<compile_context>
chip_gen: v6e
topology: v6e:2x2x1
jax: 0.10.0
libtpu: 0.0.40
codegen_flags: <defaults>
</compile_context>

<pallas_src>
import math
import functools

import jax
import jax.numpy as jnp
from jax.experimental import pallas as pl
from jax.experimental.pallas import tpu as pltpu


# --------------------------------- kernel -----------------------------------

def _vae_decoder_kernel(
    # activations / masks
    x_ref, mem_ref, smask_ref, tmask_ref,
    # packed parameters
    evec_ref,   # (5, Wp)  f32: encoder LN g/b, shared-norm g/b, encoder biases
    ew_ref,     # (D, 4D+F) bf16: [enc_qkv_w | enc_o_w | enc_w1]
    ew2_ref,    # (F, D)   bf16: enc_w2
    dvec_ref,   # (N, 7, Wp) f32: per-layer LN g/b + biases
    dw_ref,     # (N, D, 8D+F) bf16: [qkv_w | so_w | cq_w | ckv_w | co_w | w1]
    dw2_ref,    # (N, F, D) bf16: w2
    # output
    out_ref,
    *, n_layers, n_heads, d_k, B, T, S, D, F):
  f32 = jnp.float32
  bf16 = jnp.bfloat16
  eps = 1e-6
  scale = 1.0 / math.sqrt(d_k)
  D2, D3, D4, D5, D7, D8 = 2 * D, 3 * D, 4 * D, 5 * D, 7 * D, 8 * D

  # ---- hoisted additive mask biases, pre-broadcast exactly once -------------
  sb = jnp.where(smask_ref[...] == 0, -1e9, 0.0).astype(f32)        # (B, 1, S)
  src_bias_enc = jnp.broadcast_to(sb, (B, S, S))
  src_bias_dec = jnp.broadcast_to(sb, (B, T, S))
  tgt_bias = jnp.where(tmask_ref[...] == 0, -1e9, 0.0).astype(f32)  # (B, T, T)

  def layernorm(z, gamma, beta):
    # Annotated-Transformer LayerNorm: unbiased (ddof=1) std, eps added to std.
    mean = jnp.mean(z, axis=-1, keepdims=True)
    var = jnp.sum((z - mean) ** 2, axis=-1, keepdims=True) * (1.0 / (D - 1))
    # Reciprocal only on the narrow (rows, 1) column (single EUP slot), then
    # multiply the wide tensor -- never divide the (rows, D) activation.
    inv = pl.reciprocal(jnp.sqrt(var) + eps, approx=True)
    return gamma * ((z - mean) * inv) + beta

  def mm(a, w, b=None):
    # bf16 operands on the MXU, f32 accumulation; bias added once on f32 result.
    r = jnp.dot(a.astype(bf16), w, preferred_element_type=f32)
    if b is not None:
      r = r + b
    return r

  def mha(q, k, v, bias, wo, bo, rows_q, rows_k):
    """Multi-head attention with per-head output-projection accumulation.

    q: (B*rows_q, D); k, v: (B*rows_k, D); bias: (B, rows_q, rows_k) f32
    (already broadcast); wo: (D, D) bf16; bo: (1, D) f32.  Each head's context
    goes through its own d_k-row slice of Wo and is accumulated in f32, so no
    cross-lane head concatenation (XLU relayout) is ever materialized.
    """
    q3 = q.reshape(B, rows_q, D)
    k3 = k.reshape(B, rows_k, D)
    v3 = v.reshape(B, rows_k, D)
    acc = None
    for h in range(n_heads):             # short static loop of lane slices
      lo = h * d_k
      qh = q3[:, :, lo:lo + d_k].astype(bf16)
      kh = k3[:, :, lo:lo + d_k].astype(bf16)
      vh = v3[:, :, lo:lo + d_k].astype(bf16)
      s = jnp.einsum('bqd,bkd->bqk', qh, kh,
                     preferred_element_type=f32) * scale + bias
      s = s - jnp.max(s, axis=-1, keepdims=True)
      p = jnp.exp(s)
      p = p * pl.reciprocal(jnp.sum(p, axis=-1, keepdims=True), approx=True)
      ctx = jnp.einsum('bqk,bkd->bqd', p.astype(bf16), vh,
                       preferred_element_type=f32)             # (B, rows_q, d_k)
      part = jnp.dot(ctx.reshape(B * rows_q, d_k).astype(bf16),
                     wo[lo:lo + d_k, :], preferred_element_type=f32)
      acc = part if acc is None else acc + part
    return acc + bo

  ev = evec_ref[...]                      # (5, Wp) packed small f32 vectors
  out_g = ev[0:1, D2:D3]                  # shared self.norm gamma / beta
  out_b = ev[1:2, D2:D3]

  # ---- final_encodes[0]: encoder layer applied to the memory ---------------
  m = mem_ref[...].reshape(B * S, D)
  mn = layernorm(m, ev[0:1, 0:D], ev[1:2, 0:D])
  qkv = mm(mn, ew_ref[:, 0:D3], ev[2:3, 0:D3])                 # fused QKV
  m = m + mha(qkv[:, :D], qkv[:, D:D2], qkv[:, D2:], src_bias_enc,
              ew_ref[:, D3:D4], ev[3:4, 0:D], S, S)
  mn = layernorm(m, ev[0:1, D:D2], ev[1:2, D:D2])
  hid = jnp.maximum(mm(mn, ew_ref[:, D4:D4 + F], ev[4:5, 0:F]), 0.0)
  m = m + mm(hid, ew2_ref[...], ev[3:4, D:D2])
  m = layernorm(m, out_g, out_b)          # mem = self.norm(mem)

  # ---- N decoder layers -----------------------------------------------------
  # TODO(synk): switch to lax.fori_loop over layers (dynamic dvec/dw indexing)
  # once n_layers grows beyond a handful, to bound vreg live ranges.
  x = x_ref[...].reshape(B * T, D)
  for li in range(n_layers):              # small static layer count
    dv = dvec_ref[li]                     # (7, Wp) this layer's packed vectors

    # sublayer 0: masked self-attention (fused QKV projection)
    xn = layernorm(x, dv[0:1, 0:D], dv[1:2, 0:D])
    qkv = mm(xn, dw_ref[li, :, 0:D3], dv[2:3, 0:D3])
    x = x + mha(qkv[:, :D], qkv[:, D:D2], qkv[:, D2:], tgt_bias,
                dw_ref[li, :, D3:D4], dv[3:4, 0:D], T, T)

    # sublayer 1: source attention against the (normalized) memory (fused KV)
    xn = layernorm(x, dv[0:1, D:D2], dv[1:2, D:D2])
    q = mm(xn, dw_ref[li, :, D4:D5], dv[3:4, D:D2])
    kv = mm(m, dw_ref[li, :, D5:D7], dv[4:5, 0:D2])
    x = x + mha(q, kv[:, :D], kv[:, D:], src_bias_dec,
                dw_ref[li, :, D7:D8], dv[3:4, D2:D3], T, S)

    # sublayer 2: position-wise feed-forward
    xn = layernorm(x, dv[0:1, D2:D3], dv[1:2, D2:D3])
    hid = jnp.maximum(mm(xn, dw_ref[li, :, D8:D8 + F], dv[5:6, 0:F]), 0.0)
    x = x + mm(hid, dw2_ref[li], dv[6:7, 0:D])

  # return self.norm(x)
  out_ref[...] = layernorm(x, out_g, out_b).reshape(B, T, D)


# ----------------------------- parameter packing -----------------------------

def pack_params(params, *, d_model, d_ff):
  """Packs the many small bias / LayerNorm tensors into two f32 slabs and the
  bf16 weight matrices into lane-concatenated slabs (cuts prologue DMA count
  from ~32 to 10 inputs)."""
  D, F = d_model, d_ff
  Wp = max(3 * D, F)
  f32 = jnp.float32
  bf16 = jnp.bfloat16

  def row(*pieces):
    v = jnp.concatenate([jnp.asarray(p, f32).reshape(-1) for p in pieces])
    return jnp.pad(v, (0, Wp - v.shape[0]))

  # encoder + shared-norm small vectors -> (5, Wp)
  evec = jnp.stack([
      row(params["enc_ln_g"][0], params["enc_ln_g"][1], params["out_ln_g"]),
      row(params["enc_ln_b"][0], params["enc_ln_b"][1], params["out_ln_b"]),
      row(params["enc_qkv_b"]),
      row(params["enc_o_b"], params["enc_b2"]),
      row(params["enc_b1"]),
  ])

  # encoder weights: [qkv | o | w1] along lanes, w2 separate
  ew = jnp.concatenate(
      [params["enc_qkv_w"], params["enc_o_w"], params["enc_w1"]],
      axis=-1).astype(bf16)                                   # (D, 4D+F)
  ew2 = params["enc_w2"].astype(bf16)                         # (F, D)

  N = params["dec_w1"].shape[0]
  dvec = jnp.stack([
      jnp.stack([
          row(params["dec_ln_g"][li, 0], params["dec_ln_g"][li, 1],
              params["dec_ln_g"][li, 2]),
          row(params["dec_ln_b"][li, 0], params["dec_ln_b"][li, 1],
              params["dec_ln_b"][li, 2]),
          row(params["dec_qkv_b"][li]),
          row(params["dec_so_b"][li], params["dec_cq_b"][li],
              params["dec_co_b"][li]),
          row(params["dec_ckv_b"][li]),
          row(params["dec_b1"][li]),
          row(params["dec_b2"][li]),
      ]) for li in range(N)
  ])                                                          # (N, 7, Wp)

  # decoder weights: [qkv | so | cq | ckv | co | w1] along lanes, w2 separate
  dw = jnp.concatenate(
      [params["dec_qkv_w"], params["dec_so_w"], params["dec_cq_w"],
       params["dec_ckv_w"], params["dec_co_w"], params["dec_w1"]],
      axis=-1).astype(bf16)                                   # (N, D, 8D+F)
  dw2 = params["dec_w2"].astype(bf16)                         # (N, F, D)

  return dict(evec=evec, ew=ew, ew2=ew2, dvec=dvec, dw=dw, dw2=dw2)


# -------------------------------- wrapper ------------------------------------

def vae_decoder_forward(x, mem, src_mask, tgt_mask, packed, *, n_heads):
  """Runs the full (bypass_bottleneck=True) VAEDecoder forward in one kernel."""
  B, T, D = x.shape
  S = mem.shape[1]
  N = packed["dw"].shape[0]
  F = packed["dw2"].shape[1]
  assert D % n_heads == 0, "d_model must be divisible by n_heads"
  d_k = D // n_heads

  kernel = functools.partial(
      _vae_decoder_kernel,
      n_layers=N, n_heads=n_heads, d_k=d_k, B=B, T=T, S=S, D=D, F=F)

  args = (
      x, mem, src_mask.astype(jnp.int32), tgt_mask.astype(jnp.int32),
      packed["evec"], packed["ew"], packed["ew2"],
      packed["dvec"], packed["dw"], packed["dw2"],
  )

  # Single invocation (no grid): everything is resident in VMEM (~1 MiB), no
  # per-step pipelining overhead at these sizes.  (v7x: see batch-grid TODO.)
  vmem = pl.BlockSpec(memory_space=pltpu.MemorySpace.VMEM)
  return pl.pallas_call(
      kernel,
      out_shape=jax.ShapeDtypeStruct((B, T, D), jnp.float32),
      in_specs=[vmem] * len(args),
      out_specs=vmem,
  )(*args)


# ---------------------------------- main --------------------------------------

if __name__ == "__main__":
  B, T, S = 2, 8, 8            # batch, target length, source (memory) length
  D, H, F, N = 128, 4, 256, 2  # d_model (lane-dense), heads, d_ff, decoder layers

  key = jax.random.PRNGKey(0)
  ks = iter(jax.random.split(key, 40))
  bf16 = jnp.bfloat16

  def nrm(shape, scale=0.1):
    return scale * jax.random.normal(next(ks), shape, jnp.float32)

  x = jax.random.normal(next(ks), (B, T, D), jnp.float32)
  mem = jax.random.normal(next(ks), (B, S, D), jnp.float32)

  # tgt_mask: causal (subsequent) mask; src_mask: all-ones. (mask == 0 -> -1e9)
  tgt_mask = jnp.tril(jnp.ones((T, T), jnp.int32))[None].repeat(B, axis=0)
  src_mask = jnp.ones((B, 1, S), jnp.int32)

  params = {
      # final_encodes[0] (encoder layer on the memory)
      "enc_ln_g": jnp.ones((2, D), jnp.float32),
      "enc_ln_b": jnp.zeros((2, D), jnp.float32),
      "enc_qkv_w": nrm((D, 3 * D)).astype(bf16),   # [Wq | Wk | Wv] fused
      "enc_qkv_b": nrm((1, 3 * D)),
      "enc_o_w": nrm((D, D)).astype(bf16),
      "enc_o_b": nrm((1, D)),
      "enc_w1": nrm((D, F)).astype(bf16),
      "enc_b1": nrm((1, F)),
      "enc_w2": nrm((F, D)).astype(bf16),
      "enc_b2": nrm((1, D)),
      # N stacked decoder layers
      "dec_ln_g": jnp.ones((N, 3, D), jnp.float32),
      "dec_ln_b": jnp.zeros((N, 3, D), jnp.float32),
      "dec_qkv_w": nrm((N, D, 3 * D)).astype(bf16),  # self-attn [Wq|Wk|Wv] fused
      "dec_qkv_b": nrm((N, 1, 3 * D)),
      "dec_so_w": nrm((N, D, D)).astype(bf16),       # self-attn output proj
      "dec_so_b": nrm((N, 1, D)),
      "dec_cq_w": nrm((N, D, D)).astype(bf16),       # src-attn query proj
      "dec_cq_b": nrm((N, 1, D)),
      "dec_ckv_w": nrm((N, D, 2 * D)).astype(bf16),  # src-attn [Wk|Wv] fused
      "dec_ckv_b": nrm((N, 1, 2 * D)),
      "dec_co_w": nrm((N, D, D)).astype(bf16),       # src-attn output proj
      "dec_co_b": nrm((N, 1, D)),
      "dec_w1": nrm((N, D, F)).astype(bf16),
      "dec_b1": nrm((N, 1, F)),
      "dec_w2": nrm((N, F, D)).astype(bf16),
      "dec_b2": nrm((N, 1, D)),
      # shared self.norm (applied to the memory and to the final x)
      "out_ln_g": jnp.ones((1, D), jnp.float32),
      "out_ln_b": jnp.zeros((1, D), jnp.float32),
  }

  packed = pack_params(params, d_model=D, d_ff=F)   # one-time param packing
  packed = jax.tree_util.tree_map(jax.block_until_ready, packed)

  out = vae_decoder_forward(x, mem, src_mask, tgt_mask, packed, n_heads=H)
  jax.block_until_ready(out)
  assert out.shape == (B, T, D)
  assert bool(jnp.all(jnp.isfinite(out)))
  print("KERNEL_OK")
</pallas_src>

<mosaic_0001>
module attributes {stable_mosaic.version = 11 : i64} {
  func.func @_vae_decoder_kernel(%arg0: memref<2x8x128xf32, #tpu.memory_space<vmem>>, %arg1: memref<2x8x128xf32, #tpu.memory_space<vmem>>, %arg2: memref<2x1x8xi32, #tpu.memory_space<vmem>>, %arg3: memref<2x8x8xi32, #tpu.memory_space<vmem>>, %arg4: memref<5x384xf32, #tpu.memory_space<vmem>>, %arg5: memref<128x768xbf16, #tpu.memory_space<vmem>>, %arg6: memref<256x128xbf16, #tpu.memory_space<vmem>>, %arg7: memref<2x7x384xf32, #tpu.memory_space<vmem>>, %arg8: memref<2x128x1280xbf16, #tpu.memory_space<vmem>>, %arg9: memref<2x256x128xbf16, #tpu.memory_space<vmem>>, %arg10: memref<2x8x128xf32, #tpu.memory_space<vmem>>) attributes {dimension_semantics = [], scalar_prefetch = 0 : i64, scratch_operands = 0 : i64, tpu.core_type = #tpu.core_type<tc>} {
    %c0 = arith.constant 0 : index
    %c0_0 = arith.constant 0 : index
    %c0_1 = arith.constant 0 : index
    %0 = vector.load %arg2[%c0, %c0_0, %c0_1] : memref<2x1x8xi32, #tpu.memory_space<vmem>>, vector<2x1x8xi32>
    %c0_i32 = arith.constant 0 : i32
    %1 = vector.broadcast %c0_i32 : i32 to vector<2x1x8xi32>
    %2 = arith.cmpi eq, %0, %1 : vector<2x1x8xi32>
    %cst = arith.constant -1.000000e+09 : f32
    %cst_2 = arith.constant 0.000000e+00 : f32
    %3 = vector.broadcast %cst : f32 to vector<2x1x8xf32>
    %4 = vector.broadcast %cst_2 : f32 to vector<2x1x8xf32>
    %5 = arith.select %2, %3, %4 : vector<2x1x8xi1>, vector<2x1x8xf32>
    %6 = vector.shape_cast %5 : vector<2x1x8xf32> to vector<2x1x8xf32>
    %7 = vector.broadcast %6 : vector<2x1x8xf32> to vector<2x8x8xf32>
    %8 = vector.shape_cast %5 : vector<2x1x8xf32> to vector<2x1x8xf32>
    %9 = vector.broadcast %8 : vector<2x1x8xf32> to vector<2x8x8xf32>
    %c0_3 = arith.constant 0 : index
    %c0_4 = arith.constant 0 : index
    %c0_5 = arith.constant 0 : index
    %10 = vector.load %arg3[%c0_3, %c0_4, %c0_5] : memref<2x8x8xi32, #tpu.memory_space<vmem>>, vector<2x8x8xi32>
    %c0_i32_6 = arith.constant 0 : i32
    %11 = vector.broadcast %c0_i32_6 : i32 to vector<2x8x8xi32>
    %12 = arith.cmpi eq, %10, %11 : vector<2x8x8xi32>
    %cst_7 = arith.constant -1.000000e+09 : f32
    %cst_8 = arith.constant 0.000000e+00 : f32
    %13 = vector.broadcast %cst_7 : f32 to vector<2x8x8xf32>
    %14 = vector.broadcast %cst_8 : f32 to vector<2x8x8xf32>
    %15 = arith.select %12, %13, %14 : vector<2x8x8xi1>, vector<2x8x8xf32>
    %c0_9 = arith.constant 0 : index
    %c0_10 = arith.constant 0 : index
    %16 = vector.load %arg4[%c0_9, %c0_10] : memref<5x384xf32, #tpu.memory_space<vmem>>, vector<5x384xf32>
    %17 = vector.extract_strided_slice %16 {offsets = [0, 256], sizes = [1, 128], strides = [1, 1]} : vector<5x384xf32> to vector<1x128xf32>
    %18 = vector.extract_strided_slice %16 {offsets = [1, 256], sizes = [1, 128], strides = [1, 1]} : vector<5x384xf32> to vector<1x128xf32>
    %c0_11 = arith.constant 0 : index
    %c0_12 = arith.constant 0 : index
    %c0_13 = arith.constant 0 : index
    %19 = vector.load %arg1[%c0_11, %c0_12, %c0_13] : memref<2x8x128xf32, #tpu.memory_space<vmem>>, vector<2x8x128xf32>
    %20 = vector.shape_cast %19 : vector<2x8x128xf32> to vector<16x128xf32>
    %21 = vector.extract_strided_slice %16 {offsets = [0, 0], sizes = [1, 128], strides = [1, 1]} : vector<5x384xf32> to vector<1x128xf32>
    %22 = vector.extract_strided_slice %16 {offsets = [1, 0], sizes = [1, 128], strides = [1, 1]} : vector<5x384xf32> to vector<1x128xf32>
    %cst_14 = arith.constant dense<0.000000e+00> : vector<16xf32>
    %23 = vector.multi_reduction <add>, %20, %cst_14 [1] : vector<16x128xf32> to vector<16xf32>
    %24 = vector.shape_cast %23 : vector<16xf32> to vector<16x1xf32>
    %cst_15 = arith.constant 1.280000e+02 : f32
    %25 = vector.broadcast %cst_15 : f32 to vector<16x1xf32>
    %26 = arith.divf %24, %25 : vector<16x1xf32>
    %27 = vector.broadcast %26 : vector<16x1xf32> to vector<16x128xf32>
    %28 = arith.subf %20, %27 : vector<16x128xf32>
    %29 = arith.mulf %28, %28 : vector<16x128xf32>
    %cst_16 = arith.constant dense<0.000000e+00> : vector<16xf32>
    %30 = vector.multi_reduction <add>, %29, %cst_16 [1] : vector<16x128xf32> to vector<16xf32>
    %31 = vector.shape_cast %30 : vector<16xf32> to vector<16x1xf32>
    %cst_17 = arith.constant 0.00787401571 : f32
    %32 = vector.broadcast %cst_17 : f32 to vector<16x1xf32>
    %33 = arith.mulf %31, %32 : vector<16x1xf32>
    %34 = math.sqrt %33 : vector<16x1xf32>
    %cst_18 = arith.constant 9.99999997E-7 : f32
    %35 = vector.broadcast %cst_18 : f32 to vector<16x1xf32>
    %36 = arith.addf %34, %35 : vector<16x1xf32>
    %37 = tpu.reciprocal %36 {approx = true} : vector<16x1xf32> -> vector<16x1xf32>
    %38 = vector.broadcast %26 : vector<16x1xf32> to vector<16x128xf32>
    %39 = arith.subf %20, %38 : vector<16x128xf32>
    %40 = vector.broadcast %37 : vector<16x1xf32> to vector<16x128xf32>
    %41 = arith.mulf %39, %40 : vector<16x128xf32>
    %42 = vector.broadcast %21 : vector<1x128xf32> to vector<16x128xf32>
    %43 = arith.mulf %42, %41 : vector<16x128xf32>
    %44 = vector.broadcast %22 : vector<1x128xf32> to vector<16x128xf32>
    %45 = arith.addf %43, %44 : vector<16x128xf32>
    %c0_19 = arith.constant 0 : index
    %c0_20 = arith.constant 0 : index
    %46 = vector.load %arg5[%c0_19, %c0_20] : memref<128x768xbf16, #tpu.memory_space<vmem>>, vector<128x384xbf16>
    %47 = vector.extract_strided_slice %16 {offsets = [2, 0], sizes = [1, 384], strides = [1, 1]} : vector<5x384xf32> to vector<1x384xf32>
    %48 = arith.truncf %45 : vector<16x128xf32> to vector<16x128xbf16>
    %cst_21 = arith.constant dense<0.000000e+00> : vector<16x384xf32>
    %49 = tpu.matmul %48, %46, %cst_21 {dimension_numbers = #tpu.dot_dimension_numbers<[1], [0], [0], [1], [0, 0, 1, 1], [], []>} : vector<16x128xbf16>, vector<128x384xbf16>, vector<16x384xf32> -> vector<16x384xf32>
    %50 = vector.broadcast %47 : vector<1x384xf32> to vector<16x384xf32>
    %51 = arith.addf %49, %50 : vector<16x384xf32>
    %52 = vector.extract_strided_slice %51 {offsets = [0, 0], sizes = [16, 128], strides = [1, 1]} : vector<16x384xf32> to vector<16x128xf32>
    %53 = vector.extract_strided_slice %51 {offsets = [0, 128], sizes = [16, 128], strides = [1, 1]} : vector<16x384xf32> to vector<16x128xf32>
    %54 = vector.extract_strided_slice %51 {offsets = [0, 256], sizes = [16, 128], strides = [1, 1]} : vector<16x384xf32> to vector<16x128xf32>
    %c0_22 = arith.constant 0 : index
    %c384 = arith.constant 384 : index
    %55 = vector.load %arg5[%c0_22, %c384] : memref<128x768xbf16, #tpu.memory_space<vmem>>, vector<128x128xbf16>
    %56 = vector.extract_strided_slice %16 {offsets = [3, 0], sizes = [1, 128], strides = [1, 1]} : vector<5x384xf32> to vector<1x128xf32>
    %57 = vector.shape_cast %52 : vector<16x128xf32> to vector<2x8x128xf32>
    %58 = vector.shape_cast %53 : vector<16x128xf32> to vector<2x8x128xf32>
    %59 = vector.shape_cast %54 : vector<16x128xf32> to vector<2x8x128xf32>
    %60 = vector.extract_strided_slice %57 {offsets = [0, 0, 0], sizes = [2, 8, 32], strides = [1, 1, 1]} : vector<2x8x128xf32> to vector<2x8x32xf32>
    %61 = arith.truncf %60 : vector<2x8x32xf32> to vector<2x8x32xbf16>
    %62 = vector.extract_strided_slice %58 {offsets = [0, 0, 0], sizes = [2, 8, 32], strides = [1, 1, 1]} : vector<2x8x128xf32> to vector<2x8x32xf32>
    %63 = arith.truncf %62 : vector<2x8x32xf32> to vector<2x8x32xbf16>
    %64 = vector.extract_strided_slice %59 {offsets = [0, 0, 0], sizes = [2, 8, 32], strides = [1, 1, 1]} : vector<2x8x128xf32> to vector<2x8x32xf32>
    %65 = arith.truncf %64 : vector<2x8x32xf32> to vector<2x8x32xbf16>
    "tpu.trace_start"() <{level = 10 : i32, message = "bqd,bkd->bqk"}> : () -> ()
    %cst_23 = arith.constant dense<0.000000e+00> : vector<2x8x8xf32>
    %66 = tpu.matmul %61, %63, %cst_23 {dimension_numbers = #tpu.dot_dimension_numbers<[2], [2], [1], [1], [0, 0, 0, 1, 1, 1], [0], [0]>} : vector<2x8x32xbf16>, vector<2x8x32xbf16>, vector<2x8x8xf32> -> vector<2x8x8xf32>
    "tpu.trace_stop"() : () -> ()
    %cst_24 = arith.constant 0.176776692 : f32
    %67 = vector.broadcast %cst_24 : f32 to vector<2x8x8xf32>
    %68 = arith.mulf %66, %67 : vector<2x8x8xf32>
    %69 = arith.addf %68, %7 : vector<2x8x8xf32>
    %cst_25 = arith.constant dense<0xFF800000> : vector<2x8xf32>
    %70 = vector.multi_reduction <maximumf>, %69, %cst_25 [2] : vector<2x8x8xf32> to vector<2x8xf32>
    %71 = vector.shape_cast %70 : vector<2x8xf32> to vector<2x8x1xf32>
    %72 = vector.broadcast %71 : vector<2x8x1xf32> to vector<2x8x8xf32>
    %73 = arith.subf %69, %72 : vector<2x8x8xf32>
    %74 = math.exp %73 : vector<2x8x8xf32>
    %cst_26 = arith.constant dense<0.000000e+00> : vector<2x8xf32>
    %75 = vector.multi_reduction <add>, %74, %cst_26 [2] : vector<2x8x8xf32> to vector<2x8xf32>
    %76 = vector.shape_cast %75 : vector<2x8xf32> to vector<2x8x1xf32>
    %77 = tpu.reciprocal %76 {approx = true} : vector<2x8x1xf32> -> vector<2x8x1xf32>
    %78 = vector.broadcast %77 : vector<2x8x1xf32> to vector<2x8x8xf32>
    %79 = arith.mulf %74, %78 : vector<2x8x8xf32>
    %80 = arith.truncf %79 : vector<2x8x8xf32> to vector<2x8x8xbf16>
    "tpu.trace_start"() <{level = 10 : i32, message = "bqk,bkd->bqd"}> : () -> ()
    %cst_27 = arith.constant dense<0.000000e+00> : vector<2x8x32xf32>
    %81 = tpu.matmul %80, %65, %cst_27 {dimension_numbers = #tpu.dot_dimension_numbers<[2], [1], [1], [2], [0, 0, 0, 1, 1, 2], [0], [0]>} : vector<2x8x8xbf16>, vector<2x8x32xbf16>, vector<2x8x32xf32> -> vector<2x8x32xf32>
    "tpu.trace_stop"() : () -> ()
    %82 = vector.shape_cast %81 : vector<2x8x32xf32> to vector<16x32xf32>
    %83 = arith.truncf %82 : vector<16x32xf32> to vector<16x32xbf16>
    %84 = vector.extract_strided_slice %55 {offsets = [0, 0], sizes = [32, 128], strides = [1, 1]} : vector<128x128xbf16> to vector<32x128xbf16>
    %cst_28 = arith.constant dense<0.000000e+00> : vector<16x128xf32>
    %85 = tpu.matmul %83, %84, %cst_28 {dimension_numbers = #tpu.dot_dimension_numbers<[1], [0], [0], [1], [0, 0, 1, 1], [], []>} : vector<16x32xbf16>, vector<32x128xbf16>, vector<16x128xf32> -> vector<16x128xf32>
    %86 = vector.extract_strided_slice %57 {offsets = [0, 0, 32], sizes = [2, 8, 32], strides = [1, 1, 1]} : vector<2x8x128xf32> to vector<2x8x32xf32>
    %87 = arith.truncf %86 : vector<2x8x32xf32> to vector<2x8x32xbf16>
    %88 = vector.extract_strided_slice %58 {offsets = [0, 0, 32], sizes = [2, 8, 32], strides = [1, 1, 1]} : vector<2x8x128xf32> to vector<2x8x32xf32>
    %89 = arith.truncf %88 : vector<2x8x32xf32> to vector<2x8x32xbf16>
    %90 = vector.extract_strided_slice %59 {offsets = [0, 0, 32], sizes = [2, 8, 32], strides = [1, 1, 1]} : vector<2x8x128xf32> to vector<2x8x32xf32>
    %91 = arith.truncf %90 : vector<2x8x32xf32> to vector<2x8x32xbf16>
    "tpu.trace_start"() <{level = 10 : i32, message = "bqd,bkd->bqk"}> : () -> ()
    %cst_29 = arith.constant dense<0.000000e+00> : vector<2x8x8xf32>
    %92 = tpu.matmul %87, %89, %cst_29 {dimension_numbers = #tpu.dot_dimension_numbers<[2], [2], [1], [1], [0, 0, 0, 1, 1, 1], [0], [0]>} : vector<2x8x32xbf16>, vector<2x8x32xbf16>, vector<2x8x8xf32> -> vector<2x8x8xf32>
    "tpu.trace_stop"() : () -> ()
    %cst_30 = arith.constant 0.176776692 : f32
    %93 = vector.broadcast %cst_30 : f32 to vector<2x8x8xf32>
    %94 = arith.mulf %92, %93 : vector<2x8x8xf32>
    %95 = arith.addf %94, %7 : vector<2x8x8xf32>
    %cst_31 = arith.constant dense<0xFF800000> : vector<2x8xf32>
    %96 = vector.multi_reduction <maximumf>, %95, %cst_31 [2] : vector<2x8x8xf32> to vector<2x8xf32>
    %97 = vector.shape_cast %96 : vector<2x8xf32> to vector<2x8x1xf32>
    %98 = vector.broadcast %97 : vector<2x8x1xf32> to vector<2x8x8xf32>
    %99 = arith.subf %95, %98 : vector<2x8x8xf32>
    %100 = math.exp %99 : vector<2x8x8xf32>
    %cst_32 = arith.constant dense<0.000000e+00> : vector<2x8xf32>
    %101 = vector.multi_reduction <add>, %100, %cst_32 [2] : vector<2x8x8xf32> to vector<2x8xf32>
    %102 = vector.shape_cast %101 : vector<2x8xf32> to vector<2x8x1xf32>
    %103 = tpu.reciprocal %102 {approx = true} : vector<2x8x1xf32> -> vector<2x8x1xf32>
    %104 = vector.broadcast %103 : vector<2x8x1xf32> to vector<2x8x8xf32>
    %105 = arith.mulf %100, %104 : vector<2x8x8xf32>
    %106 = arith.truncf %105 : vector<2x8x8xf32> to vector<2x8x8xbf16>
    "tpu.trace_start"() <{level = 10 : i32, message = "bqk,bkd->bqd"}> : () -> ()
    %cst_33 = arith.constant dense<0.000000e+00> : vector<2x8x32xf32>
    %107 = tpu.matmul %106, %91, %cst_33 {dimension_numbers = #tpu.dot_dimension_numbers<[2], [1], [1], [2], [0, 0, 0, 1, 1, 2], [0], [0]>} : vector<2x8x8xbf16>, vector<2x8x32xbf16>, vector<2x8x32xf32> -> vector<2x8x32xf32>
    "tpu.trace_stop"() : () -> ()
    %108 = vector.shape_cast %107 : vector<2x8x32xf32> to vector<16x32xf32>
    %109 = arith.truncf %108 : vector<16x32xf32> to vector<16x32xbf16>
    %110 = vector.extract_strided_slice %55 {offsets = [32, 0], sizes = [32, 128], strides = [1, 1]} : vector<128x128xbf16> to vector<32x128xbf16>
    %cst_34 = arith.constant dense<0.000000e+00> : vector<16x128xf32>
    %111 = tpu.matmul %109, %110, %cst_34 {dimension_numbers = #tpu.dot_dimension_numbers<[1], [0], [0], [1], [0, 0, 1, 1], [], []>} : vector<16x32xbf16>, vector<32x128xbf16>, vector<16x128xf32> -> vector<16x128xf32>
    %112 = arith.addf %85, %111 : vector<16x128xf32>
    %113 = vector.extract_strided_slice %57 {offsets = [0, 0, 64], sizes = [2, 8, 32], strides = [1, 1, 1]} : vector<2x8x128xf32> to vector<2x8x32xf32>
    %114 = arith.truncf %113 : vector<2x8x32xf32> to vector<2x8x32xbf16>
    %115 = vector.extract_strided_slice %58 {offsets = [0, 0, 64], sizes = [2, 8, 32], strides = [1, 1, 1]} : vector<2x8x128xf32> to vector<2x8x32xf32>
    %116 = arith.truncf %115 : vector<2x8x32xf32> to vector<2x8x32xbf16>
    %117 = vector.extract_strided_slice %59 {offsets = [0, 0, 64], sizes = [2, 8, 32], strides = [1, 1, 1]} : vector<2x8x128xf32> to vector<2x8x32xf32>
    %118 = arith.truncf %117 : vector<2x8x32xf32> to vector<2x8x32xbf16>
    "tpu.trace_start"() <{level = 10 : i32, message = "bqd,bkd->bqk"}> : () -> ()
    %cst_35 = arith.constant dense<0.000000e+00> : vector<2x8x8xf32>
    %119 = tpu.matmul %114, %116, %cst_35 {dimension_numbers = #tpu.dot_dimension_numbers<[2], [2], [1], [1], [0, 0, 0, 1, 1, 1], [0], [0]>} : vector<2x8x32xbf16>, vector<2x8x32xbf16>, vector<2x8x8xf32> -> vector<2x8x8xf32>
    "tpu.trace_stop"() : () -> ()
    %cst_36 = arith.constant 0.176776692 : f32
    %120 = vector.broadcast %cst_36 : f32 to vector<2x8x8xf32>
    %121 = arith.mulf %119, %120 : vector<2x8x8xf32>
    %122 = arith.addf %121, %7 : vector<2x8x8xf32>
    %cst_37 = arith.constant dense<0xFF800000> : vector<2x8xf32>
    %123 = vector.multi_reduction <maximumf>, %122, %cst_37 [2] : vector<2x8x8xf32> to vector<2x8xf32>
    %124 = vector.shape_cast %123 : vector<2x8xf32> to vector<2x8x1xf32>
    %125 = vector.broadcast %124 : vector<2x8x1xf32> to vector<2x8x8xf32>
    %126 = arith.subf %122, %125 : vector<2x8x8xf32>
    %127 = math.exp %126 : vector<2x8x8xf32>
    %cst_38 = arith.constant dense<0.000000e+00> : vector<2x8xf32>
    %128 = vector.multi_reduction <add>, %127, %cst_38 [2] : vector<2x8x8xf32> to vector<2x8xf32>
    %129 = vector.shape_cast %128 : vector<2x8xf32> to vector<2x8x1xf32>
    %130 = tpu.reciprocal %129 {approx = true} : vector<2x8x1xf32> -> vector<2x8x1xf32>
    %131 = vector.broadcast %130 : vector<2x8x1xf32> to vector<2x8x8xf32>
    %132 = arith.mulf %127, %131 : vector<2x8x8xf32>
    %133 = arith.truncf %132 : vector<2x8x8xf32> to vector<2x8x8xbf16>
    "tpu.trace_start"() <{level = 10 : i32, message = "bqk,bkd->bqd"}> : () -> ()
    %cst_39 = arith.constant dense<0.000000e+00> : vector<2x8x32xf32>
    %134 = tpu.matmul %133, %118, %cst_39 {dimension_numbers = #tpu.dot_dimension_numbers<[2], [1], [1], [2], [0, 0, 0, 1, 1, 2], [0], [0]>} : vector<2x8x8xbf16>, vector<2x8x32xbf16>, vector<2x8x32xf32> -> vector<2x8x32xf32>
    "tpu.trace_stop"() : () -> ()
    %135 = vector.shape_cast %134 : vector<2x8x32xf32> to vector<16x32xf32>
    %136 = arith.truncf %135 : vector<16x32xf32> to vector<16x32xbf16>
    %137 = vector.extract_strided_slice %55 {offsets = [64, 0], sizes = [32, 128], strides = [1, 1]} : vector<128x128xbf16> to vector<32x128xbf16>
    %cst_40 = arith.constant dense<0.000000e+00> : vector<16x128xf32>
    %138 = tpu.matmul %136, %137, %cst_40 {dimension_numbers = #tpu.dot_dimension_numbers<[1], [0], [0], [1], [0, 0, 1, 1], [], []>} : vector<16x32xbf16>, vector<32x128xbf16>, vector<16x128xf32> -> vector<16x128xf32>
    %139 = arith.addf %112, %138 : vector<16x128xf32>
    %140 = vector.extract_strided_slice %57 {offsets = [0, 0, 96], sizes = [2, 8, 32], strides = [1, 1, 1]} : vector<2x8x128xf32> to vector<2x8x32xf32>
    %141 = arith.truncf %140 : vector<2x8x32xf32> to vector<2x8x32xbf16>
    %142 = vector.extract_strided_slice %58 {offsets = [0, 0, 96], sizes = [2, 8, 32], strides = [1, 1, 1]} : vector<2x8x128xf32> to vector<2x8x32xf32>
    %143 = arith.truncf %142 : vector<2x8x32xf32> to vector<2x8x32xbf16>
    %144 = vector.extract_strided_slice %59 {offsets = [0, 0, 96], sizes = [2, 8, 32], strides = [1, 1, 1]} : vector<2x8x128xf32> to vector<2x8x32xf32>
    %145 = arith.truncf %144 : vector<2x8x32xf32> to vector<2x8x32xbf16>
    "tpu.trace_start"() <{level = 10 : i32, message = "bqd,bkd->bqk"}> : () -> ()
    %cst_41 = arith.constant dense<0.000000e+00> : vector<2x8x8xf32>
    %146 = tpu.matmul %141, %143, %cst_41 {dimension_numbers = #tpu.dot_dimension_numbers<[2], [2], [1], [1], [0, 0, 0, 1, 1, 1], [0], [0]>} : vector<2x8x32xbf16>, vector<2x8x32xbf16>, vector<2x8x8xf32> -> vector<2x8x8xf32>
    "tpu.trace_stop"() : () -> ()
    %cst_42 = arith.constant 0.176776692 : f32
    %147 = vector.broadcast %cst_42 : f32 to vector<2x8x8xf32>
    %148 = arith.mulf %146, %147 : vector<2x8x8xf32>
    %149 = arith.addf %148, %7 : vector<2x8x8xf32>
    %cst_43 = arith.constant dense<0xFF800000> : vector<2x8xf32>
    %150 = vector.multi_reduction <maximumf>, %149, %cst_43 [2] : vector<2x8x8xf32> to vector<2x8xf32>
    %151 = vector.shape_cast %150 : vector<2x8xf32> to vector<2x8x1xf32>
    %152 = vector.broadcast %151 : vector<2x8x1xf32> to vector<2x8x8xf32>
    %153 = arith.subf %149, %152 : vector<2x8x8xf32>
    %154 = math.exp %153 : vector<2x8x8xf32>
    %cst_44 = arith.constant dense<0.000000e+00> : vector<2x8xf32>
    %155 = vector.multi_reduction <add>, %154, %cst_44 [2] : vector<2x8x8xf32> to vector<2x8xf32>
    %156 = vector.shape_cast %155 : vector<2x8xf32> to vector<2x8x1xf32>
    %157 = tpu.reciprocal %156 {approx = true} : vector<2x8x1xf32> -> vector<2x8x1xf32>
    %158 = vector.broadcast %157 : vector<2x8x1xf32> to vector<2x8x8xf32>
    %159 = arith.mulf %154, %158 : vector<2x8x8xf32>
    %160 = arith.truncf %159 : vector<2x8x8xf32> to vector<2x8x8xbf16>
    "tpu.trace_start"() <{level = 10 : i32, message = "bqk,bkd->bqd"}> : () -> ()
    %cst_45 = arith.constant dense<0.000000e+00> : vector<2x8x32xf32>
    %161 = tpu.matmul %160, %145, %cst_45 {dimension_numbers = #tpu.dot_dimension_numbers<[2], [1], [1], [2], [0, 0, 0, 1, 1, 2], [0], [0]>} : vector<2x8x8xbf16>, vector<2x8x32xbf16>, vector<2x8x32xf32> -> vector<2x8x32xf32>
    "tpu.trace_stop"() : () -> ()
    %162 = vector.shape_cast %161 : vector<2x8x32xf32> to vector<16x32xf32>
    %163 = arith.truncf %162 : vector<16x32xf32> to vector<16x32xbf16>
    %164 = vector.extract_strided_slice %55 {offsets = [96, 0], sizes = [32, 128], strides = [1, 1]} : vector<128x128xbf16> to vector<32x128xbf16>
    %cst_46 = arith.constant dense<0.000000e+00> : vector<16x128xf32>
    %165 = tpu.matmul %163, %164, %cst_46 {dimension_numbers = #tpu.dot_dimension_numbers<[1], [0], [0], [1], [0, 0, 1, 1], [], []>} : vector<16x32xbf16>, vector<32x128xbf16>, vector<16x128xf32> -> vector<16x128xf32>
    %166 = arith.addf %139, %165 : vector<16x128xf32>
    %167 = vector.broadcast %56 : vector<1x128xf32> to vector<16x128xf32>
    %168 = arith.addf %166, %167 : vector<16x128xf32>
    %169 = arith.addf %20, %168 : vector<16x128xf32>
    %170 = vector.extract_strided_slice %16 {offsets = [0, 128], sizes = [1, 128], strides = [1, 1]} : vector<5x384xf32> to vector<1x128xf32>
    %171 = vector.extract_strided_slice %16 {offsets = [1, 128], sizes = [1, 128], strides = [1, 1]} : vector<5x384xf32> to vector<1x128xf32>
    %cst_47 = arith.constant dense<0.000000e+00> : vector<16xf32>
    %172 = vector.multi_reduction <add>, %169, %cst_47 [1] : vector<16x128xf32> to vector<16xf32>
    %173 = vector.shape_cast %172 : vector<16xf32> to vector<16x1xf32>
    %cst_48 = arith.constant 1.280000e+02 : f32
    %174 = vector.broadcast %cst_48 : f32 to vector<16x1xf32>
    %175 = arith.divf %173, %174 : vector<16x1xf32>
    %176 = vector.broadcast %175 : vector<16x1xf32> to vector<16x128xf32>
    %177 = arith.subf %169, %176 : vector<16x128xf32>
    %178 = arith.mulf %177, %177 : vector<16x128xf32>
    %cst_49 = arith.constant dense<0.000000e+00> : vector<16xf32>
    %179 = vector.multi_reduction <add>, %178, %cst_49 [1] : vector<16x128xf32> to vector<16xf32>
    %180 = vector.shape_cast %179 : vector<16xf32> to vector<16x1xf32>
    %cst_50 = arith.constant 0.00787401571 : f32
    %181 = vector.broadcast %cst_50 : f32 to vector<16x1xf32>
    %182 = arith.mulf %180, %181 : vector<16x1xf32>
    %183 = math.sqrt %182 : vector<16x1xf32>
    %cst_51 = arith.constant 9.99999997E-7 : f32
    %184 = vector.broadcast %cst_51 : f32 to vector<16x1xf32>
    %185 = arith.addf %183, %184 : vector<16x1xf32>
    %186 = tpu.reciprocal %185 {approx = true} : vector<16x1xf32> -> vector<16x1xf32>
    %187 = vector.broadcast %175 : vector<16x1xf32> to vector<16x128xf32>
    %188 = arith.subf %169, %187 : vector<16x128xf32>
    %189 = vector.broadcast %186 : vector<16x1xf32> to vector<16x128xf32>
    %190 = arith.mulf %188, %189 : vector<16x128xf32>
    %191 = vector.broadcast %170 : vector<1x128xf32> to vector<16x128xf32>
    %192 = arith.mulf %191, %190 : vector<16x128xf32>
    %193 = vector.broadcast %171 : vector<1x128xf32> to vector<16x128xf32>
    %194 = arith.addf %192, %193 : vector<16x128xf32>
    %c0_52 = arith.constant 0 : index
    %c512 = arith.constant 512 : index
    %195 = vector.load %arg5[%c0_52, %c512] : memref<128x768xbf16, #tpu.memory_space<vmem>>, vector<128x256xbf16>
    %196 = vector.extract_strided_slice %16 {offsets = [4, 0], sizes = [1, 256], strides = [1, 1]} : vector<5x384xf32> to vector<1x256xf32>
    %197 = arith.truncf %194 : vector<16x128xf32> to vector<16x128xbf16>
    %cst_53 = arith.constant dense<0.000000e+00> : vector<16x256xf32>
    %198 = tpu.matmul %197, %195, %cst_53 {dimension_numbers = #tpu.dot_dimension_numbers<[1], [0], [0], [1], [0, 0, 1, 1], [], []>} : vector<16x128xbf16>, vector<128x256xbf16>, vector<16x256xf32> -> vector<16x256xf32>
    %199 = vector.broadcast %196 : vector<1x256xf32> to vector<16x256xf32>
    %200 = arith.addf %198, %199 : vector<16x256xf32>
    %cst_54 = arith.constant 0.000000e+00 : f32
    %201 = vector.broadcast %cst_54 : f32 to vector<16x256xf32>
    %202 = arith.maximumf %200, %201 : vector<16x256xf32>
    %c0_55 = arith.constant 0 : index
    %c0_56 = arith.constant 0 : index
    %203 = vector.load %arg6[%c0_55, %c0_56] : memref<256x128xbf16, #tpu.memory_space<vmem>>, vector<256x128xbf16>
    %204 = vector.extract_strided_slice %16 {offsets = [3, 128], sizes = [1, 128], strides = [1, 1]} : vector<5x384xf32> to vector<1x128xf32>
    %205 = arith.truncf %202 : vector<16x256xf32> to vector<16x256xbf16>
    %cst_57 = arith.constant dense<0.000000e+00> : vector<16x128xf32>
    %206 = tpu.matmul %205, %203, %cst_57 {dimension_numbers = #tpu.dot_dimension_numbers<[1], [0], [0], [1], [0, 0, 1, 1], [], []>} : vector<16x256xbf16>, vector<256x128xbf16>, vector<16x128xf32> -> vector<16x128xf32>
    %207 = vector.broadcast %204 : vector<1x128xf32> to vector<16x128xf32>
    %208 = arith.addf %206, %207 : vector<16x128xf32>
    %209 = arith.addf %169, %208 : vector<16x128xf32>
    %cst_58 = arith.constant dense<0.000000e+00> : vector<16xf32>
    %210 = vector.multi_reduction <add>, %209, %cst_58 [1] : vector<16x128xf32> to vector<16xf32>
    %211 = vector.shape_cast %210 : vector<16xf32> to vector<16x1xf32>
    %cst_59 = arith.constant 1.280000e+02 : f32
    %212 = vector.broadcast %cst_59 : f32 to vector<16x1xf32>
    %213 = arith.divf %211, %212 : vector<16x1xf32>
    %214 = vector.broadcast %213 : vector<16x1xf32> to vector<16x128xf32>
    %215 = arith.subf %209, %214 : vector<16x128xf32>
    %216 = arith.mulf %215, %215 : vector<16x128xf32>
    %cst_60 = arith.constant dense<0.000000e+00> : vector<16xf32>
    %217 = vector.multi_reduction <add>, %216, %cst_60 [1] : vector<16x128xf32> to vector<16xf32>
    %218 = vector.shape_cast %217 : vector<16xf32> to vector<16x1xf32>
    %cst_61 = arith.constant 0.00787401571 : f32
    %219 = vector.broadcast %cst_61 : f32 to vector<16x1xf32>
    %220 = arith.mulf %218, %219 : vector<16x1xf32>
    %221 = math.sqrt %220 : vector<16x1xf32>
    %cst_62 = arith.constant 9.99999997E-7 : f32
    %222 = vector.broadcast %cst_62 : f32 to vector<16x1xf32>
    %223 = arith.addf %221, %222 : vector<16x1xf32>
    %224 = tpu.reciprocal %223 {approx = true} : vector<16x1xf32> -> vector<16x1xf32>
    %225 = vector.broadcast %213 : vector<16x1xf32> to vector<16x128xf32>
    %226 = arith.subf %209, %225 : vector<16x128xf32>
    %227 = vector.broadcast %224 : vector<16x1xf32> to vector<16x128xf32>
    %228 = arith.mulf %226, %227 : vector<16x128xf32>
    %229 = vector.broadcast %17 : vector<1x128xf32> to vector<16x128xf32>
    %230 = arith.mulf %229, %228 : vector<16x128xf32>
    %231 = vector.broadcast %18 : vector<1x128xf32> to vector<16x128xf32>
    %232 = arith.addf %230, %231 : vector<16x128xf32>
    %c0_63 = arith.constant 0 : index
    %c0_64 = arith.constant 0 : index
    %c0_65 = arith.constant 0 : index
    %233 = vector.load %arg0[%c0_63, %c0_64, %c0_65] : memref<2x8x128xf32, #tpu.memory_space<vmem>>, vector<2x8x128xf32>
    %234 = vector.shape_cast %233 : vector<2x8x128xf32> to vector<16x128xf32>
    %c0_66 = arith.constant 0 : index
    %c0_67 = arith.constant 0 : index
    %c0_68 = arith.constant 0 : index
    %235 = vector.load %arg7[%c0_66, %c0_67, %c0_68] : memref<2x7x384xf32, #tpu.memory_space<vmem>>, vector<1x7x384xf32>
    %236 = vector.shape_cast %235 : vector<1x7x384xf32> to vector<7x384xf32>
    %237 = vector.extract_strided_slice %236 {offsets = [0, 0], sizes = [1, 128], strides = [1, 1]} : vector<7x384xf32> to vector<1x128xf32>
    %238 = vector.extract_strided_slice %236 {offsets = [1, 0], sizes = [1, 128], strides = [1, 1]} : vector<7x384xf32> to vector<1x128xf32>
    %cst_69 = arith.constant dense<0.000000e+00> : vector<16xf32>
    %239 = vector.multi_reduction <add>, %234, %cst_69 [1] : vector<16x128xf32> to vector<16xf32>
    %240 = vector.shape_cast %239 : vector<16xf32> to vector<16x1xf32>
    %cst_70 = arith.constant 1.280000e+02 : f32
    %241 = vector.broadcast %cst_70 : f32 to vector<16x1xf32>
    %242 = arith.divf %240, %241 : vector<16x1xf32>
    %243 = vector.broadcast %242 : vector<16x1xf32> to vector<16x128xf32>
    %244 = arith.subf %234, %243 : vector<16x128xf32>
    %245 = arith.mulf %244, %244 : vector<16x128xf32>
    %cst_71 = arith.constant dense<0.000000e+00> : vector<16xf32>
    %246 = vector.multi_reduction <add>, %245, %cst_71 [1] : vector<16x128xf32> to vector<16xf32>
    %247 = vector.shape_cast %246 : vector<16xf32> to vector<16x1xf32>
    %cst_72 = arith.constant 0.00787401571 : f32
    %248 = vector.broadcast %cst_72 : f32 to vector<16x1xf32>
    %249 = arith.mulf %247, %248 : vector<16x1xf32>
    %250 = math.sqrt %249 : vector<16x1xf32>
    %cst_73 = arith.constant 9.99999997E-7 : f32
    %251 = vector.broadcast %cst_73 : f32 to vector<16x1xf32>
    %252 = arith.addf %250, %251 : vector<16x1xf32>
    %253 = tpu.reciprocal %252 {approx = true} : vector<16x1xf32> -> vector<16x1xf32>
    %254 = vector.broadcast %242 : vector<16x1xf32> to vector<16x128xf32>
    %255 = arith.subf %234, %254 : vector<16x128xf32>
    %256 = vector.broadcast %253 : vector<16x1xf32> to vector<16x128xf32>
    %257 = arith.mulf %255, %256 : vector<16x128xf32>
    %258 = vector.broadcast %237 : vector<1x128xf32> to vector<16x128xf32>
    %259 = arith.mulf %258, %257 : vector<16x128xf32>
    %260 = vector.broadcast %238 : vector<1x128xf32> to vector<16x128xf32>
    %261 = arith.addf %259, %260 : vector<16x128xf32>
    %c0_74 = arith.constant 0 : index
    %c0_75 = arith.constant 0 : index
    %c0_76 = arith.constant 0 : index
    %262 = vector.load %arg8[%c0_74, %c0_75, %c0_76] : memref<2x128x1280xbf16, #tpu.memory_space<vmem>>, vector<1x128x384xbf16>
    %263 = vector.shape_cast %262 : vector<1x128x384xbf16> to vector<128x384xbf16>
    %264 = vector.extract_strided_slice %236 {offsets = [2, 0], sizes = [1, 384], strides = [1, 1]} : vector<7x384xf32> to vector<1x384xf32>
    %265 = arith.truncf %261 : vector<16x128xf32> to vector<16x128xbf16>
    %cst_77 = arith.constant dense<0.000000e+00> : vector<16x384xf32>
    %266 = tpu.matmul %265, %263, %cst_77 {dimension_numbers = #tpu.dot_dimension_numbers<[1], [0], [0], [1], [0, 0, 1, 1], [], []>} : vector<16x128xbf16>, vector<128x384xbf16>, vector<16x384xf32> -> vector<16x384xf32>
    %267 = vector.broadcast %264 : vector<1x384xf32> to vector<16x384xf32>
    %268 = arith.addf %266, %267 : vector<16x384xf32>
    %269 = vector.extract_strided_slice %268 {offsets = [0, 0], sizes = [16, 128], strides = [1, 1]} : vector<16x384xf32> to vector<16x128xf32>
    %270 = vector.extract_strided_slice %268 {offsets = [0, 128], sizes = [16, 128], strides = [1, 1]} : vector<16x384xf32> to vector<16x128xf32>
    %271 = vector.extract_strided_slice %268 {offsets = [0, 256], sizes = [16, 128], strides = [1, 1]} : vector<16x384xf32> to vector<16x128xf32>
    %c0_78 = arith.constant 0 : index
    %c0_79 = arith.constant 0 : index
    %c384_80 = arith.constant 384 : index
    %272 = vector.load %arg8[%c0_78, %c0_79, %c384_80] : memref<2x128x1280xbf16, #tpu.memory_space<vmem>>, vector<1x128x128xbf16>
    %273 = vector.shape_cast %272 : vector<1x128x128xbf16> to vector<128x128xbf16>
    %274 = vector.extract_strided_slice %236 {offsets = [3, 0], sizes = [1, 128], strides = [1, 1]} : vector<7x384xf32> to vector<1x128xf32>
    %275 = vector.shape_cast %269 : vector<16x128xf32> to vector<2x8x128xf32>
    %276 = vector.shape_cast %270 : vector<16x128xf32> to vector<2x8x128xf32>
    %277 = vector.shape_cast %271 : vector<16x128xf32> to vector<2x8x128xf32>
    %278 = vector.extract_strided_slice %275 {offsets = [0, 0, 0], sizes = [2, 8, 32], strides = [1, 1, 1]} : vector<2x8x128xf32> to vector<2x8x32xf32>
    %279 = arith.truncf %278 : vector<2x8x32xf32> to vector<2x8x32xbf16>
    %280 = vector.extract_strided_slice %276 {offsets = [0, 0, 0], sizes = [2, 8, 32], strides = [1, 1, 1]} : vector<2x8x128xf32> to vector<2x8x32xf32>
    %281 = arith.truncf %280 : vector<2x8x32xf32> to vector<2x8x32xbf16>
    %282 = vector.extract_strided_slice %277 {offsets = [0, 0, 0], sizes = [2, 8, 32], strides = [1, 1, 1]} : vector<2x8x128xf32> to vector<2x8x32xf32>
    %283 = arith.truncf %282 : vector<2x8x32xf32> to vector<2x8x32xbf16>
    "tpu.trace_start"() <{level = 10 : i32, message = "bqd,bkd->bqk"}> : () -> ()
    %cst_81 = arith.constant dense<0.000000e+00> : vector<2x8x8xf32>
    %284 = tpu.matmul %279, %281, %cst_81 {dimension_numbers = #tpu.dot_dimension_numbers<[2], [2], [1], [1], [0, 0, 0, 1, 1, 1], [0], [0]>} : vector<2x8x32xbf16>, vector<2x8x32xbf16>, vector<2x8x8xf32> -> vector<2x8x8xf32>
    "tpu.trace_stop"() : () -> ()
    %cst_82 = arith.constant 0.176776692 : f32
    %285 = vector.broadcast %cst_82 : f32 to vector<2x8x8xf32>
    %286 = arith.mulf %284, %285 : vector<2x8x8xf32>
    %287 = arith.addf %286, %15 : vector<2x8x8xf32>
    %cst_83 = arith.constant dense<0xFF800000> : vector<2x8xf32>
    %288 = vector.multi_reduction <maximumf>, %287, %cst_83 [2] : vector<2x8x8xf32> to vector<2x8xf32>
    %289 = vector.shape_cast %288 : vector<2x8xf32> to vector<2x8x1xf32>
    %290 = vector.broadcast %289 : vector<2x8x1xf32> to vector<2x8x8xf32>
    %291 = arith.subf %287, %290 : vector<2x8x8xf32>
    %292 = math.exp %291 : vector<2x8x8xf32>
    %cst_84 = arith.constant dense<0.000000e+00> : vector<2x8xf32>
    %293 = vector.multi_reduction <add>, %292, %cst_84 [2] : vector<2x8x8xf32> to vector<2x8xf32>
    %294 = vector.shape_cast %293 : vector<2x8xf32> to vector<2x8x1xf32>
    %295 = tpu.reciprocal %294 {approx = true} : vector<2x8x1xf32> -> vector<2x8x1xf32>
    %296 = vector.broadcast %295 : vector<2x8x1xf32> to vector<2x8x8xf32>
    %297 = arith.mulf %292, %296 : vector<2x8x8xf32>
    %298 = arith.truncf %297 : vector<2x8x8xf32> to vector<2x8x8xbf16>
    "tpu.trace_start"() <{level = 10 : i32, message = "bqk,bkd->bqd"}> : () -> ()
    %cst_85 = arith.constant dense<0.000000e+00> : vector<2x8x32xf32>
    %299 = tpu.matmul %298, %283, %cst_85 {dimension_numbers = #tpu.dot_dimension_numbers<[2], [1], [1], [2], [0, 0, 0, 1, 1, 2], [0], [0]>} : vector<2x8x8xbf16>, vector<2x8x32xbf16>, vector<2x8x32xf32> -> vector<2x8x32xf32>
    "tpu.trace_stop"() : () -> ()
    %300 = vector.shape_cast %299 : vector<2x8x32xf32> to vector<16x32xf32>
    %301 = arith.truncf %300 : vector<16x32xf32> to vector<16x32xbf16>
    %302 = vector.extract_strided_slice %273 {offsets = [0, 0], sizes = [32, 128], strides = [1, 1]} : vector<128x128xbf16> to vector<32x128xbf16>
    %cst_86 = arith.constant dense<0.000000e+00> : vector<16x128xf32>
    %303 = tpu.matmul %301, %302, %cst_86 {dimension_numbers = #tpu.dot_dimension_numbers<[1], [0], [0], [1], [0, 0, 1, 1], [], []>} : vector<16x32xbf16>, vector<32x128xbf16>, vector<16x128xf32> -> vector<16x128xf32>
    %304 = vector.extract_strided_slice %275 {offsets = [0, 0, 32], sizes = [2, 8, 32], strides = [1, 1, 1]} : vector<2x8x128xf32> to vector<2x8x32xf32>
    %305 = arith.truncf %304 : vector<2x8x32xf32> to vector<2x8x32xbf16>
    %306 = vector.extract_strided_slice %276 {offsets = [0, 0, 32], sizes = [2, 8, 32], strides = [1, 1, 1]} : vector<2x8x128xf32> to vector<2x8x32xf32>
    %307 = arith.truncf %306 : vector<2x8x32xf32> to vector<2x8x32xbf16>
    %308 = vector.extract_strided_slice %277 {offsets = [0, 0, 32], sizes = [2, 8, 32], strides = [1, 1, 1]} : vector<2x8x128xf32> to vector<2x8x32xf32>
    %309 = arith.truncf %308 : vector<2x8x32xf32> to vector<2x8x32xbf16>
    "tpu.trace_start"() <{level = 10 : i32, message = "bqd,bkd->bqk"}> : () -> ()
    %cst_87 = arith.constant dense<0.000000e+00> : vector<2x8x8xf32>
    %310 = tpu.matmul %305, %307, %cst_87 {dimension_numbers = #tpu.dot_dimension_numbers<[2], [2], [1], [1], [0, 0, 0, 1, 1, 1], [0], [0]>} : vector<2x8x32xbf16>, vector<2x8x32xbf16>, vector<2x8x8xf32> -> vector<2x8x8xf32>
    "tpu.trace_stop"() : () -> ()
    %cst_88 = arith.constant 0.176776692 : f32
    %311 = vector.broadcast %cst_88 : f32 to vector<2x8x8xf32>
    %312 = arith.mulf %310, %311 : vector<2x8x8xf32>
    %313 = arith.addf %312, %15 : vector<2x8x8xf32>
    %cst_89 = arith.constant dense<0xFF800000> : vector<2x8xf32>
    %314 = vector.multi_reduction <maximumf>, %313, %cst_89 [2] : vector<2x8x8xf32> to vector<2x8xf32>
    %315 = vector.shape_cast %314 : vector<2x8xf32> to vector<2x8x1xf32>
    %316 = vector.broadcast %315 : vector<2x8x1xf32> to vector<2x8x8xf32>
    %317 = arith.subf %313, %316 : vector<2x8x8xf32>
    %318 = math.exp %317 : vector<2x8x8xf32>
    %cst_90 = arith.constant dense<0.000000e+00> : vector<2x8xf32>
    %319 = vector.multi_reduction <add>, %318, %cst_90 [2] : vector<2x8x8xf32> to vector<2x8xf32>
    %320 = vector.shape_cast %319 : vector<2x8xf32> to vector<2x8x1xf32>
    %321 = tpu.reciprocal %320 {approx = true} : vector<2x8x1xf32> -> vector<2x8x1xf32>
    %322 = vector.broadcast %321 : vector<2x8x1xf32> to vector<2x8x8xf32>
    %323 = arith.mulf %318, %322 : vector<2x8x8xf32>
    %324 = arith.truncf %323 : vector<2x8x8xf32> to vector<2x8x8xbf16>
    "tpu.trace_start"() <{level = 10 : i32, message = "bqk,bkd->bqd"}> : () -> ()
    %cst_91 = arith.constant dense<0.000000e+00> : vector<2x8x32xf32>
    %325 = tpu.matmul %324, %309, %cst_91 {dimension_numbers = #tpu.dot_dimension_numbers<[2], [1], [1], [2], [0, 0, 0, 1, 1, 2], [0], [0]>} : vector<2x8x8xbf16>, vector<2x8x32xbf16>, vector<2x8x32xf32> -> vector<2x8x32xf32>
    "tpu.trace_stop"() : () -> ()
    %326 = vector.shape_cast %325 : vector<2x8x32xf32> to vector<16x32xf32>
    %327 = arith.truncf %326 : vector<16x32xf32> to vector<16x32xbf16>
    %328 = vector.extract_strided_slice %273 {offsets = [32, 0], sizes = [32, 128], strides = [1, 1]} : vector<128x128xbf16> to vector<32x128xbf16>
    %cst_92 = arith.constant dense<0.000000e+00> : vector<16x128xf32>
    %329 = tpu.matmul %327, %328, %cst_92 {dimension_numbers = #tpu.dot_dimension_numbers<[1], [0], [0], [1], [0, 0, 1, 1], [], []>} : vector<16x32xbf16>, vector<32x128xbf16>, vector<16x128xf32> -> vector<16x128xf32>
    %330 = arith.addf %303, %329 : vector<16x128xf32>
    %331 = vector.extract_strided_slice %275 {offsets = [0, 0, 64], sizes = [2, 8, 32], strides = [1, 1, 1]} : vector<2x8x128xf32> to vector<2x8x32xf32>
    %332 = arith.truncf %331 : vector<2x8x32xf32> to vector<2x8x32xbf16>
    %333 = vector.extract_strided_slice %276 {offsets = [0, 0, 64], sizes = [2, 8, 32], strides = [1, 1, 1]} : vector<2x8x128xf32> to vector<2x8x32xf32>
    %334 = arith.truncf %333 : vector<2x8x32xf32> to vector<2x8x32xbf16>
    %335 = vector.extract_strided_slice %277 {offsets = [0, 0, 64], sizes = [2, 8, 32], strides = [1, 1, 1]} : vector<2x8x128xf32> to vector<2x8x32xf32>
    %336 = arith.truncf %335 : vector<2x8x32xf32> to vector<2x8x32xbf16>
    "tpu.trace_start"() <{level = 10 : i32, message = "bqd,bkd->bqk"}> : () -> ()
    %cst_93 = arith.constant dense<0.000000e+00> : vector<2x8x8xf32>
    %337 = tpu.matmul %332, %334, %cst_93 {dimension_numbers = #tpu.dot_dimension_numbers<[2], [2], [1], [1], [0, 0, 0, 1, 1, 1], [0], [0]>} : vector<2x8x32xbf16>, vector<2x8x32xbf16>, vector<2x8x8xf32> -> vector<2x8x8xf32>
    "tpu.trace_stop"() : () -> ()
    %cst_94 = arith.constant 0.176776692 : f32
    %338 = vector.broadcast %cst_94 : f32 to vector<2x8x8xf32>
    %339 = arith.mulf %337, %338 : vector<2x8x8xf32>
    %340 = arith.addf %339, %15 : vector<2x8x8xf32>
    %cst_95 = arith.constant dense<0xFF800000> : vector<2x8xf32>
    %341 = vector.multi_reduction <maximumf>, %340, %cst_95 [2] : vector<2x8x8xf32> to vector<2x8xf32>
    %342 = vector.shape_cast %341 : vector<2x8xf32> to vector<2x8x1xf32>
    %343 = vector.broadcast %342 : vector<2x8x1xf32> to vector<2x8x8xf32>
    %344 = arith.subf %340, %343 : vector<2x8x8xf32>
    %345 = math.exp %344 : vector<2x8x8xf32>
    %cst_96 = arith.constant dense<0.000000e+00> : vector<2x8xf32>
    %346 = vector.multi_reduction <add>, %345, %cst_96 [2] : vector<2x8x8xf32> to vector<2x8xf32>
    %347 = vector.shape_cast %346 : vector<2x8xf32> to vector<2x8x1xf32>
    %348 = tpu.reciprocal %347 {approx = true} : vector<2x8x1xf32> -> vector<2x8x1xf32>
    %349 = vector.broadcast %348 : vector<2x8x1xf32> to vector<2x8x8xf32>
    %350 = arith.mulf %345, %349 : vector<2x8x8xf32>
    %351 = arith.truncf %350 : vector<2x8x8xf32> to vector<2x8x8xbf16>
    "tpu.trace_start"() <{level = 10 : i32, message = "bqk,bkd->bqd"}> : () -> ()
    %cst_97 = arith.constant dense<0.000000e+00> : vector<2x8x32xf32>
    %352 = tpu.matmul %351, %336, %cst_97 {dimension_numbers = #tpu.dot_dimension_numbers<[2], [1], [1], [2], [0, 0, 0, 1, 1, 2], [0], [0]>} : vector<2x8x8xbf16>, vector<2x8x32xbf16>, vector<2x8x32xf32> -> vector<2x8x32xf32>
    "tpu.trace_stop"() : () -> ()
    %353 = vector.shape_cast %352 : vector<2x8x32xf32> to vector<16x32xf32>
    %354 = arith.truncf %353 : vector<16x32xf32> to vector<16x32xbf16>
    %355 = vector.extract_strided_slice %273 {offsets = [64, 0], sizes = [32, 128], strides = [1, 1]} : vector<128x128xbf16> to vector<32x128xbf16>
    %cst_98 = arith.constant dense<0.000000e+00> : vector<16x128xf32>
    %356 = tpu.matmul %354, %355, %cst_98 {dimension_numbers = #tpu.dot_dimension_numbers<[1], [0], [0], [1], [0, 0, 1, 1], [], []>} : vector<16x32xbf16>, vector<32x128xbf16>, vector<16x128xf32> -> vector<16x128xf32>
    %357 = arith.addf %330, %356 : vector<16x128xf32>
    %358 = vector.extract_strided_slice %275 {offsets = [0, 0, 96], sizes = [2, 8, 32], strides = [1, 1, 1]} : vector<2x8x128xf32> to vector<2x8x32xf32>
    %359 = arith.truncf %358 : vector<2x8x32xf32> to vector<2x8x32xbf16>
    %360 = vector.extract_strided_slice %276 {offsets = [0, 0, 96], sizes = [2, 8, 32], strides = [1, 1, 1]} : vector<2x8x128xf32> to vector<2x8x32xf32>
    %361 = arith.truncf %360 : vector<2x8x32xf32> to vector<2x8x32xbf16>
    %362 = vector.extract_strided_slice %277 {offsets = [0, 0, 96], sizes = [2, 8, 32], strides = [1, 1, 1]} : vector<2x8x128xf32> to vector<2x8x32xf32>
    %363 = arith.truncf %362 : vector<2x8x32xf32> to vector<2x8x32xbf16>
    "tpu.trace_start"() <{level = 10 : i32, message = "bqd,bkd->bqk"}> : () -> ()
    %cst_99 = arith.constant dense<0.000000e+00> : vector<2x8x8xf32>
    %364 = tpu.matmul %359, %361, %cst_99 {dimension_numbers = #tpu.dot_dimension_numbers<[2], [2], [1], [1], [0, 0, 0, 1, 1, 1], [0], [0]>} : vector<2x8x32xbf16>, vector<2x8x32xbf16>, vector<2x8x8xf32> -> vector<2x8x8xf32>
    "tpu.trace_stop"() : () -> ()
    %cst_100 = arith.constant 0.176776692 : f32
    %365 = vector.broadcast %cst_100 : f32 to vector<2x8x8xf32>
    %366 = arith.mulf %364, %365 : vector<2x8x8xf32>
    %367 = arith.addf %366, %15 : vector<2x8x8xf32>
    %cst_101 = arith.constant dense<0xFF800000> : vector<2x8xf32>
    %368 = vector.multi_reduction <maximumf>, %367, %cst_101 [2] : vector<2x8x8xf32> to vector<2x8xf32>
    %369 = vector.shape_cast %368 : vector<2x8xf32> to vector<2x8x1xf32>
    %370 = vector.broadcast %369 : vector<2x8x1xf32> to vector<2x8x8xf32>
    %371 = arith.subf %367, %370 : vector<2x8x8xf32>
    %372 = math.exp %371 : vector<2x8x8xf32>
    %cst_102 = arith.constant dense<0.000000e+00> : vector<2x8xf32>
    %373 = vector.multi_reduction <add>, %372, %cst_102 [2] : vector<2x8x8xf32> to vector<2x8xf32>
    %374 = vector.shape_cast %373 : vector<2x8xf32> to vector<2x8x1xf32>
    %375 = tpu.reciprocal %374 {approx = true} : vector<2x8x1xf32> -> vector<2x8x1xf32>
    %376 = vector.broadcast %375 : vector<2x8x1xf32> to vector<2x8x8xf32>
    %377 = arith.mulf %372, %376 : vector<2x8x8xf32>
    %378 = arith.truncf %377 : vector<2x8x8xf32> to vector<2x8x8xbf16>
    "tpu.trace_start"() <{level = 10 : i32, message = "bqk,bkd->bqd"}> : () -> ()
    %cst_103 = arith.constant dense<0.000000e+00> : vector<2x8x32xf32>
    %379 = tpu.matmul %378, %363, %cst_103 {dimension_numbers = #tpu.dot_dimension_numbers<[2], [1], [1], [2], [0, 0, 0, 1, 1, 2], [0], [0]>} : vector<2x8x8xbf16>, vector<2x8x32xbf16>, vector<2x8x32xf32> -> vector<2x8x32xf32>
    "tpu.trace_stop"() : () -> ()
    %380 = vector.shape_cast %379 : vector<2x8x32xf32> to vector<16x32xf32>
    %381 = arith.truncf %380 : vector<16x32xf32> to vector<16x32xbf16>
    %382 = vector.extract_strided_slice %273 {offsets = [96, 0], sizes = [32, 128], strides = [1, 1]} : vector<128x128xbf16> to vector<32x128xbf16>
    %cst_104 = arith.constant dense<0.000000e+00> : vector<16x128xf32>
    %383 = tpu.matmul %381, %382, %cst_104 {dimension_numbers = #tpu.dot_dimension_numbers<[1], [0], [0], [1], [0, 0, 1, 1], [], []>} : vector<16x32xbf16>, vector<32x128xbf16>, vector<16x128xf32> -> vector<16x128xf32>
    %384 = arith.addf %357, %383 : vector<16x128xf32>
    %385 = vector.broadcast %274 : vector<1x128xf32> to vector<16x128xf32>
    %386 = arith.addf %384, %385 : vector<16x128xf32>
    %387 = arith.addf %234, %386 : vector<16x128xf32>
    %388 = vector.extract_strided_slice %236 {offsets = [0, 128], sizes = [1, 128], strides = [1, 1]} : vector<7x384xf32> to vector<1x128xf32>
    %389 = vector.extract_strided_slice %236 {offsets = [1, 128], sizes = [1, 128], strides = [1, 1]} : vector<7x384xf32> to vector<1x128xf32>
    %cst_105 = arith.constant dense<0.000000e+00> : vector<16xf32>
    %390 = vector.multi_reduction <add>, %387, %cst_105 [1] : vector<16x128xf32> to vector<16xf32>
    %391 = vector.shape_cast %390 : vector<16xf32> to vector<16x1xf32>
    %cst_106 = arith.constant 1.280000e+02 : f32
    %392 = vector.broadcast %cst_106 : f32 to vector<16x1xf32>
    %393 = arith.divf %391, %392 : vector<16x1xf32>
    %394 = vector.broadcast %393 : vector<16x1xf32> to vector<16x128xf32>
    %395 = arith.subf %387, %394 : vector<16x128xf32>
    %396 = arith.mulf %395, %395 : vector<16x128xf32>
    %cst_107 = arith.constant dense<0.000000e+00> : vector<16xf32>
    %397 = vector.multi_reduction <add>, %396, %cst_107 [1] : vector<16x128xf32> to vector<16xf32>
    %398 = vector.shape_cast %397 : vector<16xf32> to vector<16x1xf32>
    %cst_108 = arith.constant 0.00787401571 : f32
    %399 = vector.broadcast %cst_108 : f32 to vector<16x1xf32>
    %400 = arith.mulf %398, %399 : vector<16x1xf32>
    %401 = math.sqrt %400 : vector<16x1xf32>
    %cst_109 = arith.constant 9.99999997E-7 : f32
    %402 = vector.broadcast %cst_109 : f32 to vector<16x1xf32>
    %403 = arith.addf %401, %402 : vector<16x1xf32>
    %404 = tpu.reciprocal %403 {approx = true} : vector<16x1xf32> -> vector<16x1xf32>
    %405 = vector.broadcast %393 : vector<16x1xf32> to vector<16x128xf32>
    %406 = arith.subf %387, %405 : vector<16x128xf32>
    %407 = vector.broadcast %404 : vector<16x1xf32> to vector<16x128xf32>
    %408 = arith.mulf %406, %407 : vector<16x128xf32>
    %409 = vector.broadcast %388 : vector<1x128xf32> to vector<16x128xf32>
    %410 = arith.mulf %409, %408 : vector<16x128xf32>
    %411 = vector.broadcast %389 : vector<1x128xf32> to vector<16x128xf32>
    %412 = arith.addf %410, %411 : vector<16x128xf32>
    %c0_110 = arith.constant 0 : index
    %c0_111 = arith.constant 0 : index
    %c512_112 = arith.constant 512 : index
    %413 = vector.load %arg8[%c0_110, %c0_111, %c512_112] : memref<2x128x1280xbf16, #tpu.memory_space<vmem>>, vector<1x128x128xbf16>
    %414 = vector.shape_cast %413 : vector<1x128x128xbf16> to vector<128x128xbf16>
    %415 = vector.extract_strided_slice %236 {offsets = [3, 128], sizes = [1, 128], strides = [1, 1]} : vector<7x384xf32> to vector<1x128xf32>
    %416 = arith.truncf %412 : vector<16x128xf32> to vector<16x128xbf16>
    %cst_113 = arith.constant dense<0.000000e+00> : vector<16x128xf32>
    %417 = tpu.matmul %416, %414, %cst_113 {dimension_numbers = #tpu.dot_dimension_numbers<[1], [0], [0], [1], [0, 0, 1, 1], [], []>} : vector<16x128xbf16>, vector<128x128xbf16>, vector<16x128xf32> -> vector<16x128xf32>
    %418 = vector.broadcast %415 : vector<1x128xf32> to vector<16x128xf32>
    %419 = arith.addf %417, %418 : vector<16x128xf32>
    %c0_114 = arith.constant 0 : index
    %c0_115 = arith.constant 0 : index
    %c640 = arith.constant 640 : index
    %420 = vector.load %arg8[%c0_114, %c0_115, %c640] : memref<2x128x1280xbf16, #tpu.memory_space<vmem>>, vector<1x128x256xbf16>
    %421 = vector.shape_cast %420 : vector<1x128x256xbf16> to vector<128x256xbf16>
    %422 = vector.extract_strided_slice %236 {offsets = [4, 0], sizes = [1, 256], strides = [1, 1]} : vector<7x384xf32> to vector<1x256xf32>
    %423 = arith.truncf %232 : vector<16x128xf32> to vector<16x128xbf16>
    %cst_116 = arith.constant dense<0.000000e+00> : vector<16x256xf32>
    %424 = tpu.matmul %423, %421, %cst_116 {dimension_numbers = #tpu.dot_dimension_numbers<[1], [0], [0], [1], [0, 0, 1, 1], [], []>} : vector<16x128xbf16>, vector<128x256xbf16>, vector<16x256xf32> -> vector<16x256xf32>
    %425 = vector.broadcast %422 : vector<1x256xf32> to vector<16x256xf32>
    %426 = arith.addf %424, %425 : vector<16x256xf32>
    %427 = vector.extract_strided_slice %426 {offsets = [0, 0], sizes = [16, 128], strides = [1, 1]} : vector<16x256xf32> to vector<16x128xf32>
    %428 = vector.extract_strided_slice %426 {offsets = [0, 128], sizes = [16, 128], strides = [1, 1]} : vector<16x256xf32> to vector<16x128xf32>
    %c0_117 = arith.constant 0 : index
    %c0_118 = arith.constant 0 : index
    %c896 = arith.constant 896 : index
    %429 = vector.load %arg8[%c0_117, %c0_118, %c896] : memref<2x128x1280xbf16, #tpu.memory_space<vmem>>, vector<1x128x128xbf16>
    %430 = vector.shape_cast %429 : vector<1x128x128xbf16> to vector<128x128xbf16>
    %431 = vector.extract_strided_slice %236 {offsets = [3, 256], sizes = [1, 128], strides = [1, 1]} : vector<7x384xf32> to vector<1x128xf32>
    %432 = vector.shape_cast %419 : vector<16x128xf32> to vector<2x8x128xf32>
    %433 = vector.shape_cast %427 : vector<16x128xf32> to vector<2x8x128xf32>
    %434 = vector.shape_cast %428 : vector<16x128xf32> to vector<2x8x128xf32>
    %435 = vector.extract_strided_slice %432 {offsets = [0, 0, 0], sizes = [2, 8, 32], strides = [1, 1, 1]} : vector<2x8x128xf32> to vector<2x8x32xf32>
    %436 = arith.truncf %435 : vector<2x8x32xf32> to vector<2x8x32xbf16>
    %437 = vector.extract_strided_slice %433 {offsets = [0, 0, 0], sizes = [2, 8, 32], strides = [1, 1, 1]} : vector<2x8x128xf32> to vector<2x8x32xf32>
    %438 = arith.truncf %437 : vector<2x8x32xf32> to vector<2x8x32xbf16>
    %439 = vector.extract_strided_slice %434 {offsets = [0, 0, 0], sizes = [2, 8, 32], strides = [1, 1, 1]} : vector<2x8x128xf32> to vector<2x8x32xf32>
    %440 = arith.truncf %439 : vector<2x8x32xf32> to vector<2x8x32xbf16>
    "tpu.trace_start"() <{level = 10 : i32, message = "bqd,bkd->bqk"}> : () -> ()
    %cst_119 = arith.constant dense<0.000000e+00> : vector<2x8x8xf32>
    %441 = tpu.matmul %436, %438, %cst_119 {dimension_numbers = #tpu.dot_dimension_numbers<[2], [2], [1], [1], [0, 0, 0, 1, 1, 1], [0], [0]>} : vector<2x8x32xbf16>, vector<2x8x32xbf16>, vector<2x8x8xf32> -> vector<2x8x8xf32>
    "tpu.trace_stop"() : () -> ()
    %cst_120 = arith.constant 0.176776692 : f32
    %442 = vector.broadcast %cst_120 : f32 to vector<2x8x8xf32>
    %443 = arith.mulf %441, %442 : vector<2x8x8xf32>
    %444 = arith.addf %443, %9 : vector<2x8x8xf32>
    %cst_121 = arith.constant dense<0xFF800000> : vector<2x8xf32>
    %445 = vector.multi_reduction <maximumf>, %444, %cst_121 [2] : vector<2x8x8xf32> to vector<2x8xf32>
    %446 = vector.shape_cast %445 : vector<2x8xf32> to vector<2x8x1xf32>
    %447 = vector.broadcast %446 : vector<2x8x1xf32> to vector<2x8x8xf32>
    %448 = arith.subf %444, %447 : vector<2x8x8xf32>
    %449 = math.exp %448 : vector<2x8x8xf32>
    %cst_122 = arith.constant dense<0.000000e+00> : vector<2x8xf32>
    %450 = vector.multi_reduction <add>, %449, %cst_122 [2] : vector<2x8x8xf32> to vector<2x8xf32>
    %451 = vector.shape_cast %450 : vector<2x8xf32> to vector<2x8x1xf32>
    %452 = tpu.reciprocal %451 {approx = true} : vector<2x8x1xf32> -> vector<2x8x1xf32>
    %453 = vector.broadcast %452 : vector<2x8x1xf32> to vector<2x8x8xf32>
    %454 = arith.mulf %449, %453 : vector<2x8x8xf32>
    %455 = arith.truncf %454 : vector<2x8x8xf32> to vector<2x8x8xbf16>
    "tpu.trace_start"() <{level = 10 : i32, message = "bqk,bkd->bqd"}> : () -> ()
    %cst_123 = arith.constant dense<0.000000e+00> : vector<2x8x32xf32>
    %456 = tpu.matmul %455, %440, %cst_123 {dimension_numbers = #tpu.dot_dimension_numbers<[2], [1], [1], [2], [0, 0, 0, 1, 1, 2], [0], [0]>} : vector<2x8x8xbf16>, vector<2x8x32xbf16>, vector<2x8x32xf32> -> vector<2x8x32xf32>
    "tpu.trace_stop"() : () -> ()
    %457 = vector.shape_cast %456 : vector<2x8x32xf32> to vector<16x32xf32>
    %458 = arith.truncf %457 : vector<16x32xf32> to vector<16x32xbf16>
    %459 = vector.extract_strided_slice %430 {offsets = [0, 0], sizes = [32, 128], strides = [1, 1]} : vector<128x128xbf16> to vector<32x128xbf16>
    %cst_124 = arith.constant dense<0.000000e+00> : vector<16x128xf32>
    %460 = tpu.matmul %458, %459, %cst_124 {dimension_numbers = #tpu.dot_dimension_numbers<[1], [0], [0], [1], [0, 0, 1, 1], [], []>} : vector<16x32xbf16>, vector<32x128xbf16>, vector<16x128xf32> -> vector<16x128xf32>
    %461 = vector.extract_strided_slice %432 {offsets = [0, 0, 32], sizes = [2, 8, 32], strides = [1, 1, 1]} : vector<2x8x128xf32> to vector<2x8x32xf32>
    %462 = arith.truncf %461 : vector<2x8x32xf32> to vector<2x8x32xbf16>
    %463 = vector.extract_strided_slice %433 {offsets = [0, 0, 32], sizes = [2, 8, 32], strides = [1, 1, 1]} : vector<2x8x128xf32> to vector<2x8x32xf32>
    %464 = arith.truncf %463 : vector<2x8x32xf32> to vector<2x8x32xbf16>
    %465 = vector.extract_strided_slice %434 {offsets = [0, 0, 32], sizes = [2, 8, 32], strides = [1, 1, 1]} : vector<2x8x128xf32> to vector<2x8x32xf32>
    %466 = arith.truncf %465 : vector<2x8x32xf32> to vector<2x8x32xbf16>
    "tpu.trace_start"() <{level = 10 : i32, message = "bqd,bkd->bqk"}> : () -> ()
    %cst_125 = arith.constant dense<0.000000e+00> : vector<2x8x8xf32>
    %467 = tpu.matmul %462, %464, %cst_125 {dimension_numbers = #tpu.dot_dimension_numbers<[2], [2], [1], [1], [0, 0, 0, 1, 1, 1], [0], [0]>} : vector<2x8x32xbf16>, vector<2x8x32xbf16>, vector<2x8x8xf32> -> vector<2x8x8xf32>
    "tpu.trace_stop"() : () -> ()
    %cst_126 = arith.constant 0.176776692 : f32
    %468 = vector.broadcast %cst_126 : f32 to vector<2x8x8xf32>
    %469 = arith.mulf %467, %468 : vector<2x8x8xf32>
    %470 = arith.addf %469, %9 : vector<2x8x8xf32>
    %cst_127 = arith.constant dense<0xFF800000> : vector<2x8xf32>
    %471 = vector.multi_reduction <maximumf>, %470, %cst_127 [2] : vector<2x8x8xf32> to vector<2x8xf32>
    %472 = vector.shape_cast %471 : vector<2x8xf32> to vector<2x8x1xf32>
    %473 = vector.broadcast %472 : vector<2x8x1xf32> to vector<2x8x8xf32>
    %474 = arith.subf %470, %473 : vector<2x8x8xf32>
    %475 = math.exp %474 : vector<2x8x8xf32>
    %cst_128 = arith.constant dense<0.000000e+00> : vector<2x8xf32>
    %476 = vector.multi_reduction <add>, %475, %cst_128 [2] : vector<2x8x8xf32> to vector<2x8xf32>
    %477 = vector.shape_cast %476 : vector<2x8xf32> to vector<2x8x1xf32>
    %478 = tpu.reciprocal %477 {approx = true} : vector<2x8x1xf32> -> vector<2x8x1xf32>
    %479 = vector.broadcast %478 : vector<2x8x1xf32> to vector<2x8x8xf32>
    %480 = arith.mulf %475, %479 : vector<2x8x8xf32>
    %481 = arith.truncf %480 : vector<2x8x8xf32> to vector<2x8x8xbf16>
    "tpu.trace_start"() <{level = 10 : i32, message = "bqk,bkd->bqd"}> : () -> ()
    %cst_129 = arith.constant dense<0.000000e+00> : vector<2x8x32xf32>
    %482 = tpu.matmul %481, %466, %cst_129 {dimension_numbers = #tpu.dot_dimension_numbers<[2], [1], [1], [2], [0, 0, 0, 1, 1, 2], [0], [0]>} : vector<2x8x8xbf16>, vector<2x8x32xbf16>, vector<2x8x32xf32> -> vector<2x8x32xf32>
    "tpu.trace_stop"() : () -> ()
    %483 = vector.shape_cast %482 : vector<2x8x32xf32> to vector<16x32xf32>
    %484 = arith.truncf %483 : vector<16x32xf32> to vector<16x32xbf16>
    %485 = vector.extract_strided_slice %430 {offsets = [32, 0], sizes = [32, 128], strides = [1, 1]} : vector<128x128xbf16> to vector<32x128xbf16>
    %cst_130 = arith.constant dense<0.000000e+00> : vector<16x128xf32>
    %486 = tpu.matmul %484, %485, %cst_130 {dimension_numbers = #tpu.dot_dimension_numbers<[1], [0], [0], [1], [0, 0, 1, 1], [], []>} : vector<16x32xbf16>, vector<32x128xbf16>, vector<16x128xf32> -> vector<16x128xf32>
    %487 = arith.addf %460, %486 : vector<16x128xf32>
    %488 = vector.extract_strided_slice %432 {offsets = [0, 0, 64], sizes = [2, 8, 32], strides = [1, 1, 1]} : vector<2x8x128xf32> to vector<2x8x32xf32>
    %489 = arith.truncf %488 : vector<2x8x32xf32> to vector<2x8x32xbf16>
    %490 = vector.extract_strided_slice %433 {offsets = [0, 0, 64], sizes = [2, 8, 32], strides = [1, 1, 1]} : vector<2x8x128xf32> to vector<2x8x32xf32>
    %491 = arith.truncf %490 : vector<2x8x32xf32> to vector<2x8x32xbf16>
    %492 = vector.extract_strided_slice %434 {offsets = [0, 0, 64], sizes = [2, 8, 32], strides = [1, 1, 1]} : vector<2x8x128xf32> to vector<2x8x32xf32>
    %493 = arith.truncf %492 : vector<2x8x32xf32> to vector<2x8x32xbf16>
    "tpu.trace_start"() <{level = 10 : i32, message = "bqd,bkd->bqk"}> : () -> ()
    %cst_131 = arith.constant dense<0.000000e+00> : vector<2x8x8xf32>
    %494 = tpu.matmul %489, %491, %cst_131 {dimension_numbers = #tpu.dot_dimension_numbers<[2], [2], [1], [1], [0, 0, 0, 1, 1, 1], [0], [0]>} : vector<2x8x32xbf16>, vector<2x8x32xbf16>, vector<2x8x8xf32> -> vector<2x8x8xf32>
    "tpu.trace_stop"() : () -> ()
    %cst_132 = arith.constant 0.176776692 : f32
    %495 = vector.broadcast %cst_132 : f32 to vector<2x8x8xf32>
    %496 = arith.mulf %494, %495 : vector<2x8x8xf32>
    %497 = arith.addf %496, %9 : vector<2x8x8xf32>
    %cst_133 = arith.constant dense<0xFF800000> : vector<2x8xf32>
    %498 = vector.multi_reduction <maximumf>, %497, %cst_133 [2] : vector<2x8x8xf32> to vector<2x8xf32>
    %499 = vector.shape_cast %498 : vector<2x8xf32> to vector<2x8x1xf32>
    %500 = vector.broadcast %499 : vector<2x8x1xf32> to vector<2x8x8xf32>
    %501 = arith.subf %497, %500 : vector<2x8x8xf32>
    %502 = math.exp %501 : vector<2x8x8xf32>
    %cst_134 = arith.constant dense<0.000000e+00> : vector<2x8xf32>
    %503 = vector.multi_reduction <add>, %502, %cst_134 [2] : vector<2x8x8xf32> to vector<2x8xf32>
    %504 = vector.shape_cast %503 : vector<2x8xf32> to vector<2x8x1xf32>
    %505 = tpu.reciprocal %504 {approx = true} : vector<2x8x1xf32> -> vector<2x8x1xf32>
    %506 = vector.broadcast %505 : vector<2x8x1xf32> to vector<2x8x8xf32>
    %507 = arith.mulf %502, %506 : vector<2x8x8xf32>
    %508 = arith.truncf %507 : vector<2x8x8xf32> to vector<2x8x8xbf16>
    "tpu.trace_start"() <{level = 10 : i32, message = "bqk,bkd->bqd"}> : () -> ()
    %cst_135 = arith.constant dense<0.000000e+00> : vector<2x8x32xf32>
    %509 = tpu.matmul %508, %493, %cst_135 {dimension_numbers = #tpu.dot_dimension_numbers<[2], [1], [1], [2], [0, 0, 0, 1, 1, 2], [0], [0]>} : vector<2x8x8xbf16>, vector<2x8x32xbf16>, vector<2x8x32xf32> -> vector<2x8x32xf32>
    "tpu.trace_stop"() : () -> ()
    %510 = vector.shape_cast %509 : vector<2x8x32xf32> to vector<16x32xf32>
    %511 = arith.truncf %510 : vector<16x32xf32> to vector<16x32xbf16>
    %512 = vector.extract_strided_slice %430 {offsets = [64, 0], sizes = [32, 128], strides = [1, 1]} : vector<128x128xbf16> to vector<32x128xbf16>
    %cst_136 = arith.constant dense<0.000000e+00> : vector<16x128xf32>
    %513 = tpu.matmul %511, %512, %cst_136 {dimension_numbers = #tpu.dot_dimension_numbers<[1], [0], [0], [1], [0, 0, 1, 1], [], []>} : vector<16x32xbf16>, vector<32x128xbf16>, vector<16x128xf32> -> vector<16x128xf32>
    %514 = arith.addf %487, %513 : vector<16x128xf32>
    %515 = vector.extract_strided_slice %432 {offsets = [0, 0, 96], sizes = [2, 8, 32], strides = [1, 1, 1]} : vector<2x8x128xf32> to vector<2x8x32xf32>
    %516 = arith.truncf %515 : vector<2x8x32xf32> to vector<2x8x32xbf16>
    %517 = vector.extract_strided_slice %433 {offsets = [0, 0, 96], sizes = [2, 8, 32], strides = [1, 1, 1]} : vector<2x8x128xf32> to vector<2x8x32xf32>
    %518 = arith.truncf %517 : vector<2x8x32xf32> to vector<2x8x32xbf16>
    %519 = vector.extract_strided_slice %434 {offsets = [0, 0, 96], sizes = [2, 8, 32], strides = [1, 1, 1]} : vector<2x8x128xf32> to vector<2x8x32xf32>
    %520 = arith.truncf %519 : vector<2x8x32xf32> to vector<2x8x32xbf16>
    "tpu.trace_start"() <{level = 10 : i32, message = "bqd,bkd->bqk"}> : () -> ()
    %cst_137 = arith.constant dense<0.000000e+00> : vector<2x8x8xf32>
    %521 = tpu.matmul %516, %518, %cst_137 {dimension_numbers = #tpu.dot_dimension_numbers<[2], [2], [1], [1], [0, 0, 0, 1, 1, 1], [0], [0]>} : vector<2x8x32xbf16>, vector<2x8x32xbf16>, vector<2x8x8xf32> -> vector<2x8x8xf32>
    "tpu.trace_stop"() : () -> ()
    %cst_138 = arith.constant 0.176776692 : f32
    %522 = vector.broadcast %cst_138 : f32 to vector<2x8x8xf32>
    %523 = arith.mulf %521, %522 : vector<2x8x8xf32>
    %524 = arith.addf %523, %9 : vector<2x8x8xf32>
    %cst_139 = arith.constant dense<0xFF800000> : vector<2x8xf32>
    %525 = vector.multi_reduction <maximumf>, %524, %cst_139 [2] : vector<2x8x8xf32> to vector<2x8xf32>
    %526 = vector.shape_cast %525 : vector<2x8xf32> to vector<2x8x1xf32>
    %527 = vector.broadcast %526 : vector<2x8x1xf32> to vector<2x8x8xf32>
    %528 = arith.subf %524, %527 : vector<2x8x8xf32>
    %529 = math.exp %528 : vector<2x8x8xf32>
    %cst_140 = arith.constant dense<0.000000e+00> : vector<2x8xf32>
    %530 = vector.multi_reduction <add>, %529, %cst_140 [2] : vector<2x8x8xf32> to vector<2x8xf32>
    %531 = vector.shape_cast %530 : vector<2x8xf32> to vector<2x8x1xf32>
    %532 = tpu.reciprocal %531 {approx = true} : vector<2x8x1xf32> -> vector<2x8x1xf32>
    %533 = vector.broadcast %532 : vector<2x8x1xf32> to vector<2x8x8xf32>
    %534 = arith.mulf %529, %533 : vector<2x8x8xf32>
    %535 = arith.truncf %534 : vector<2x8x8xf32> to vector<2x8x8xbf16>
    "tpu.trace_start"() <{level = 10 : i32, message = "bqk,bkd->bqd"}> : () -> ()
    %cst_141 = arith.constant dense<0.000000e+00> : vector<2x8x32xf32>
    %536 = tpu.matmul %535, %520, %cst_141 {dimension_numbers = #tpu.dot_dimension_numbers<[2], [1], [1], [2], [0, 0, 0, 1, 1, 2], [0], [0]>} : vector<2x8x8xbf16>, vector<2x8x32xbf16>, vector<2x8x32xf32> -> vector<2x8x32xf32>
    "tpu.trace_stop"() : () -> ()
    %537 = vector.shape_cast %536 : vector<2x8x32xf32> to vector<16x32xf32>
    %538 = arith.truncf %537 : vector<16x32xf32> to vector<16x32xbf16>
    %539 = vector.extract_strided_slice %430 {offsets = [96, 0], sizes = [32, 128], strides = [1, 1]} : vector<128x128xbf16> to vector<32x128xbf16>
    %cst_142 = arith.constant dense<0.000000e+00> : vector<16x128xf32>
    %540 = tpu.matmul %538, %539, %cst_142 {dimension_numbers = #tpu.dot_dimension_numbers<[1], [0], [0], [1], [0, 0, 1, 1], [], []>} : vector<16x32xbf16>, vector<32x128xbf16>, vector<16x128xf32> -> vector<16x128xf32>
    %541 = arith.addf %514, %540 : vector<16x128xf32>
    %542 = vector.broadcast %431 : vector<1x128xf32> to vector<16x128xf32>
    %543 = arith.addf %541, %542 : vector<16x128xf32>
    %544 = arith.addf %387, %543 : vector<16x128xf32>
    %545 = vector.extract_strided_slice %236 {offsets = [0, 256], sizes = [1, 128], strides = [1, 1]} : vector<7x384xf32> to vector<1x128xf32>
    %546 = vector.extract_strided_slice %236 {offsets = [1, 256], sizes = [1, 128], strides = [1, 1]} : vector<7x384xf32> to vector<1x128xf32>
    %cst_143 = arith.constant dense<0.000000e+00> : vector<16xf32>
    %547 = vector.multi_reduction <add>, %544, %cst_143 [1] : vector<16x128xf32> to vector<16xf32>
    %548 = vector.shape_cast %547 : vector<16xf32> to vector<16x1xf32>
    %cst_144 = arith.constant 1.280000e+02 : f32
    %549 = vector.broadcast %cst_144 : f32 to vector<16x1xf32>
    %550 = arith.divf %548, %549 : vector<16x1xf32>
    %551 = vector.broadcast %550 : vector<16x1xf32> to vector<16x128xf32>
    %552 = arith.subf %544, %551 : vector<16x128xf32>
    %553 = arith.mulf %552, %552 : vector<16x128xf32>
    %cst_145 = arith.constant dense<0.000000e+00> : vector<16xf32>
    %554 = vector.multi_reduction <add>, %553, %cst_145 [1] : vector<16x128xf32> to vector<16xf32>
    %555 = vector.shape_cast %554 : vector<16xf32> to vector<16x1xf32>
    %cst_146 = arith.constant 0.00787401571 : f32
    %556 = vector.broadcast %cst_146 : f32 to vector<16x1xf32>
    %557 = arith.mulf %555, %556 : vector<16x1xf32>
    %558 = math.sqrt %557 : vector<16x1xf32>
    %cst_147 = arith.constant 9.99999997E-7 : f32
    %559 = vector.broadcast %cst_147 : f32 to vector<16x1xf32>
    %560 = arith.addf %558, %559 : vector<16x1xf32>
    %561 = tpu.reciprocal %560 {approx = true} : vector<16x1xf32> -> vector<16x1xf32>
    %562 = vector.broadcast %550 : vector<16x1xf32> to vector<16x128xf32>
    %563 = arith.subf %544, %562 : vector<16x128xf32>
    %564 = vector.broadcast %561 : vector<16x1xf32> to vector<16x128xf32>
    %565 = arith.mulf %563, %564 : vector<16x128xf32>
    %566 = vector.broadcast %545 : vector<1x128xf32> to vector<16x128xf32>
    %567 = arith.mulf %566, %565 : vector<16x128xf32>
    %568 = vector.broadcast %546 : vector<1x128xf32> to vector<16x128xf32>
    %569 = arith.addf %567, %568 : vector<16x128xf32>
    %c0_148 = arith.constant 0 : index
    %c0_149 = arith.constant 0 : index
    %c1024 = arith.constant 1024 : index
    %570 = vector.load %arg8[%c0_148, %c0_149, %c1024] : memref<2x128x1280xbf16, #tpu.memory_space<vmem>>, vector<1x128x256xbf16>
    %571 = vector.shape_cast %570 : vector<1x128x256xbf16> to vector<128x256xbf16>
    %572 = vector.extract_strided_slice %236 {offsets = [5, 0], sizes = [1, 256], strides = [1, 1]} : vector<7x384xf32> to vector<1x256xf32>
    %573 = arith.truncf %569 : vector<16x128xf32> to vector<16x128xbf16>
    %cst_150 = arith.constant dense<0.000000e+00> : vector<16x256xf32>
    %574 = tpu.matmul %573, %571, %cst_150 {dimension_numbers = #tpu.dot_dimension_numbers<[1], [0], [0], [1], [0, 0, 1, 1], [], []>} : vector<16x128xbf16>, vector<128x256xbf16>, vector<16x256xf32> -> vector<16x256xf32>
    %575 = vector.broadcast %572 : vector<1x256xf32> to vector<16x256xf32>
    %576 = arith.addf %574, %575 : vector<16x256xf32>
    %cst_151 = arith.constant 0.000000e+00 : f32
    %577 = vector.broadcast %cst_151 : f32 to vector<16x256xf32>
    %578 = arith.maximumf %576, %577 : vector<16x256xf32>
    %c0_152 = arith.constant 0 : index
    %c0_153 = arith.constant 0 : index
    %c0_154 = arith.constant 0 : index
    %579 = vector.load %arg9[%c0_152, %c0_153, %c0_154] : memref<2x256x128xbf16, #tpu.memory_space<vmem>>, vector<1x256x128xbf16>
    %580 = vector.shape_cast %579 : vector<1x256x128xbf16> to vector<256x128xbf16>
    %581 = vector.extract_strided_slice %236 {offsets = [6, 0], sizes = [1, 128], strides = [1, 1]} : vector<7x384xf32> to vector<1x128xf32>
    %582 = arith.truncf %578 : vector<16x256xf32> to vector<16x256xbf16>
    %cst_155 = arith.constant dense<0.000000e+00> : vector<16x128xf32>
    %583 = tpu.matmul %582, %580, %cst_155 {dimension_numbers = #tpu.dot_dimension_numbers<[1], [0], [0], [1], [0, 0, 1, 1], [], []>} : vector<16x256xbf16>, vector<256x128xbf16>, vector<16x128xf32> -> vector<16x128xf32>
    %584 = vector.broadcast %581 : vector<1x128xf32> to vector<16x128xf32>
    %585 = arith.addf %583, %584 : vector<16x128xf32>
    %586 = arith.addf %544, %585 : vector<16x128xf32>
    %c1 = arith.constant 1 : index
    %c0_156 = arith.constant 0 : index
    %c0_157 = arith.constant 0 : index
    %587 = vector.load %arg7[%c1, %c0_156, %c0_157] : memref<2x7x384xf32, #tpu.memory_space<vmem>>, vector<1x7x384xf32>
    %588 = vector.shape_cast %587 : vector<1x7x384xf32> to vector<7x384xf32>
    %589 = vector.extract_strided_slice %588 {offsets = [0, 0], sizes = [1, 128], strides = [1, 1]} : vector<7x384xf32> to vector<1x128xf32>
    %590 = vector.extract_strided_slice %588 {offsets = [1, 0], sizes = [1, 128], strides = [1, 1]} : vector<7x384xf32> to vector<1x128xf32>
    %cst_158 = arith.constant dense<0.000000e+00> : vector<16xf32>
    %591 = vector.multi_reduction <add>, %586, %cst_158 [1] : vector<16x128xf32> to vector<16xf32>
    %592 = vector.shape_cast %591 : vector<16xf32> to vector<16x1xf32>
    %cst_159 = arith.constant 1.280000e+02 : f32
    %593 = vector.broadcast %cst_159 : f32 to vector<16x1xf32>
    %594 = arith.divf %592, %593 : vector<16x1xf32>
    %595 = vector.broadcast %594 : vector<16x1xf32> to vector<16x128xf32>
    %596 = arith.subf %586, %595 : vector<16x128xf32>
    %597 = arith.mulf %596, %596 : vector<16x128xf32>
    %cst_160 = arith.constant dense<0.000000e+00> : vector<16xf32>
    %598 = vector.multi_reduction <add>, %597, %cst_160 [1] : vector<16x128xf32> to vector<16xf32>
    %599 = vector.shape_cast %598 : vector<16xf32> to vector<16x1xf32>
    %cst_161 = arith.constant 0.00787401571 : f32
    %600 = vector.broadcast %cst_161 : f32 to vector<16x1xf32>
    %601 = arith.mulf %599, %600 : vector<16x1xf32>
    %602 = math.sqrt %601 : vector<16x1xf32>
    %cst_162 = arith.constant 9.99999997E-7 : f32
    %603 = vector.broadcast %cst_162 : f32 to vector<16x1xf32>
    %604 = arith.addf %602, %603 : vector<16x1xf32>
    %605 = tpu.reciprocal %604 {approx = true} : vector<16x1xf32> -> vector<16x1xf32>
    %606 = vector.broadcast %594 : vector<16x1xf32> to vector<16x128xf32>
    %607 = arith.subf %586, %606 : vector<16x128xf32>
    %608 = vector.broadcast %605 : vector<16x1xf32> to vector<16x128xf32>
    %609 = arith.mulf %607, %608 : vector<16x128xf32>
    %610 = vector.broadcast %589 : vector<1x128xf32> to vector<16x128xf32>
    %611 = arith.mulf %610, %609 : vector<16x128xf32>
    %612 = vector.broadcast %590 : vector<1x128xf32> to vector<16x128xf32>
    %613 = arith.addf %611, %612 : vector<16x128xf32>
    %c1_163 = arith.constant 1 : index
    %c0_164 = arith.constant 0 : index
    %c0_165 = arith.constant 0 : index
    %614 = vector.load %arg8[%c1_163, %c0_164, %c0_165] : memref<2x128x1280xbf16, #tpu.memory_space<vmem>>, vector<1x128x384xbf16>
    %615 = vector.shape_cast %614 : vector<1x128x384xbf16> to vector<128x384xbf16>
    %616 = vector.extract_strided_slice %588 {offsets = [2, 0], sizes = [1, 384], strides = [1, 1]} : vector<7x384xf32> to vector<1x384xf32>
    %617 = arith.truncf %613 : vector<16x128xf32> to vector<16x128xbf16>
    %cst_166 = arith.constant dense<0.000000e+00> : vector<16x384xf32>
    %618 = tpu.matmul %617, %615, %cst_166 {dimension_numbers = #tpu.dot_dimension_numbers<[1], [0], [0], [1], [0, 0, 1, 1], [], []>} : vector<16x128xbf16>, vector<128x384xbf16>, vector<16x384xf32> -> vector<16x384xf32>
    %619 = vector.broadcast %616 : vector<1x384xf32> to vector<16x384xf32>
    %620 = arith.addf %618, %619 : vector<16x384xf32>
    %621 = vector.extract_strided_slice %620 {offsets = [0, 0], sizes = [16, 128], strides = [1, 1]} : vector<16x384xf32> to vector<16x128xf32>
    %622 = vector.extract_strided_slice %620 {offsets = [0, 128], sizes = [16, 128], strides = [1, 1]} : vector<16x384xf32> to vector<16x128xf32>
    %623 = vector.extract_strided_slice %620 {offsets = [0, 256], sizes = [16, 128], strides = [1, 1]} : vector<16x384xf32> to vector<16x128xf32>
    %c1_167 = arith.constant 1 : index
    %c0_168 = arith.constant 0 : index
    %c384_169 = arith.constant 384 : index
    %624 = vector.load %arg8[%c1_167, %c0_168, %c384_169] : memref<2x128x1280xbf16, #tpu.memory_space<vmem>>, vector<1x128x128xbf16>
    %625 = vector.shape_cast %624 : vector<1x128x128xbf16> to vector<128x128xbf16>
    %626 = vector.extract_strided_slice %588 {offsets = [3, 0], sizes = [1, 128], strides = [1, 1]} : vector<7x384xf32> to vector<1x128xf32>
    %627 = vector.shape_cast %621 : vector<16x128xf32> to vector<2x8x128xf32>
    %628 = vector.shape_cast %622 : vector<16x128xf32> to vector<2x8x128xf32>
    %629 = vector.shape_cast %623 : vector<16x128xf32> to vector<2x8x128xf32>
    %630 = vector.extract_strided_slice %627 {offsets = [0, 0, 0], sizes = [2, 8, 32], strides = [1, 1, 1]} : vector<2x8x128xf32> to vector<2x8x32xf32>
    %631 = arith.truncf %630 : vector<2x8x32xf32> to vector<2x8x32xbf16>
    %632 = vector.extract_strided_slice %628 {offsets = [0, 0, 0], sizes = [2, 8, 32], strides = [1, 1, 1]} : vector<2x8x128xf32> to vector<2x8x32xf32>
    %633 = arith.truncf %632 : vector<2x8x32xf32> to vector<2x8x32xbf16>
    %634 = vector.extract_strided_slice %629 {offsets = [0, 0, 0], sizes = [2, 8, 32], strides = [1, 1, 1]} : vector<2x8x128xf32> to vector<2x8x32xf32>
    %635 = arith.truncf %634 : vector<2x8x32xf32> to vector<2x8x32xbf16>
    "tpu.trace_start"() <{level = 10 : i32, message = "bqd,bkd->bqk"}> : () -> ()
    %cst_170 = arith.constant dense<0.000000e+00> : vector<2x8x8xf32>
    %636 = tpu.matmul %631, %633, %cst_170 {dimension_numbers = #tpu.dot_dimension_numbers<[2], [2], [1], [1], [0, 0, 0, 1, 1, 1], [0], [0]>} : vector<2x8x32xbf16>, vector<2x8x32xbf16>, vector<2x8x8xf32> -> vector<2x8x8xf32>
    "tpu.trace_stop"() : () -> ()
    %cst_171 = arith.constant 0.176776692 : f32
    %637 = vector.broadcast %cst_171 : f32 to vector<2x8x8xf32>
    %638 = arith.mulf %636, %637 : vector<2x8x8xf32>
    %639 = arith.addf %638, %15 : vector<2x8x8xf32>
    %cst_172 = arith.constant dense<0xFF800000> : vector<2x8xf32>
    %640 = vector.multi_reduction <maximumf>, %639, %cst_172 [2] : vector<2x8x8xf32> to vector<2x8xf32>
    %641 = vector.shape_cast %640 : vector<2x8xf32> to vector<2x8x1xf32>
    %642 = vector.broadcast %641 : vector<2x8x1xf32> to vector<2x8x8xf32>
    %643 = arith.subf %639, %642 : vector<2x8x8xf32>
    %644 = math.exp %643 : vector<2x8x8xf32>
    %cst_173 = arith.constant dense<0.000000e+00> : vector<2x8xf32>
    %645 = vector.multi_reduction <add>, %644, %cst_173 [2] : vector<2x8x8xf32> to vector<2x8xf32>
    %646 = vector.shape_cast %645 : vector<2x8xf32> to vector<2x8x1xf32>
    %647 = tpu.reciprocal %646 {approx = true} : vector<2x8x1xf32> -> vector<2x8x1xf32>
    %648 = vector.broadcast %647 : vector<2x8x1xf32> to vector<2x8x8xf32>
    %649 = arith.mulf %644, %648 : vector<2x8x8xf32>
    %650 = arith.truncf %649 : vector<2x8x8xf32> to vector<2x8x8xbf16>
    "tpu.trace_start"() <{level = 10 : i32, message = "bqk,bkd->bqd"}> : () -> ()
    %cst_174 = arith.constant dense<0.000000e+00> : vector<2x8x32xf32>
    %651 = tpu.matmul %650, %635, %cst_174 {dimension_numbers = #tpu.dot_dimension_numbers<[2], [1], [1], [2], [0, 0, 0, 1, 1, 2], [0], [0]>} : vector<2x8x8xbf16>, vector<2x8x32xbf16>, vector<2x8x32xf32> -> vector<2x8x32xf32>
    "tpu.trace_stop"() : () -> ()
    %652 = vector.shape_cast %651 : vector<2x8x32xf32> to vector<16x32xf32>
    %653 = arith.truncf %652 : vector<16x32xf32> to vector<16x32xbf16>
    %654 = vector.extract_strided_slice %625 {offsets = [0, 0], sizes = [32, 128], strides = [1, 1]} : vector<128x128xbf16> to vector<32x128xbf16>
    %cst_175 = arith.constant dense<0.000000e+00> : vector<16x128xf32>
    %655 = tpu.matmul %653, %654, %cst_175 {dimension_numbers = #tpu.dot_dimension_numbers<[1], [0], [0], [1], [0, 0, 1, 1], [], []>} : vector<16x32xbf16>, vector<32x128xbf16>, vector<16x128xf32> -> vector<16x128xf32>
    %656 = vector.extract_strided_slice %627 {offsets = [0, 0, 32], sizes = [2, 8, 32], strides = [1, 1, 1]} : vector<2x8x128xf32> to vector<2x8x32xf32>
    %657 = arith.truncf %656 : vector<2x8x32xf32> to vector<2x8x32xbf16>
    %658 = vector.extract_strided_slice %628 {offsets = [0, 0, 32], sizes = [2, 8, 32], strides = [1, 1, 1]} : vector<2x8x128xf32> to vector<2x8x32xf32>
    %659 = arith.truncf %658 : vector<2x8x32xf32> to vector<2x8x32xbf16>
    %660 = vector.extract_strided_slice %629 {offsets = [0, 0, 32], sizes = [2, 8, 32], strides = [1, 1, 1]} : vector<2x8x128xf32> to vector<2x8x32xf32>
    %661 = arith.truncf %660 : vector<2x8x32xf32> to vector<2x8x32xbf16>
    "tpu.trace_start"() <{level = 10 : i32, message = "bqd,bkd->bqk"}> : () -> ()
    %cst_176 = arith.constant dense<0.000000e+00> : vector<2x8x8xf32>
    %662 = tpu.matmul %657, %659, %cst_176 {dimension_numbers = #tpu.dot_dimension_numbers<[2], [2], [1], [1], [0, 0, 0, 1, 1, 1], [0], [0]>} : vector<2x8x32xbf16>, vector<2x8x32xbf16>, vector<2x8x8xf32> -> vector<2x8x8xf32>
    "tpu.trace_stop"() : () -> ()
    %cst_177 = arith.constant 0.176776692 : f32
    %663 = vector.broadcast %cst_177 : f32 to vector<2x8x8xf32>
    %664 = arith.mulf %662, %663 : vector<2x8x8xf32>
    %665 = arith.addf %664, %15 : vector<2x8x8xf32>
    %cst_178 = arith.constant dense<0xFF800000> : vector<2x8xf32>
    %666 = vector.multi_reduction <maximumf>, %665, %cst_178 [2] : vector<2x8x8xf32> to vector<2x8xf32>
    %667 = vector.shape_cast %666 : vector<2x8xf32> to vector<2x8x1xf32>
    %668 = vector.broadcast %667 : vector<2x8x1xf32> to vector<2x8x8xf32>
    %669 = arith.subf %665, %668 : vector<2x8x8xf32>
    %670 = math.exp %669 : vector<2x8x8xf32>
    %cst_179 = arith.constant dense<0.000000e+00> : vector<2x8xf32>
    %671 = vector.multi_reduction <add>, %670, %cst_179 [2] : vector<2x8x8xf32> to vector<2x8xf32>
    %672 = vector.shape_cast %671 : vector<2x8xf32> to vector<2x8x1xf32>
    %673 = tpu.reciprocal %672 {approx = true} : vector<2x8x1xf32> -> vector<2x8x1xf32>
    %674 = vector.broadcast %673 : vector<2x8x1xf32> to vector<2x8x8xf32>
    %675 = arith.mulf %670, %674 : vector<2x8x8xf32>
    %676 = arith.truncf %675 : vector<2x8x8xf32> to vector<2x8x8xbf16>
    "tpu.trace_start"() <{level = 10 : i32, message = "bqk,bkd->bqd"}> : () -> ()
    %cst_180 = arith.constant dense<0.000000e+00> : vector<2x8x32xf32>
    %677 = tpu.matmul %676, %661, %cst_180 {dimension_numbers = #tpu.dot_dimension_numbers<[2], [1], [1], [2], [0, 0, 0, 1, 1, 2], [0], [0]>} : vector<2x8x8xbf16>, vector<2x8x32xbf16>, vector<2x8x32xf32> -> vector<2x8x32xf32>
    "tpu.trace_stop"() : () -> ()
    %678 = vector.shape_cast %677 : vector<2x8x32xf32> to vector<16x32xf32>
    %679 = arith.truncf %678 : vector<16x32xf32> to vector<16x32xbf16>
    %680 = vector.extract_strided_slice %625 {offsets = [32, 0], sizes = [32, 128], strides = [1, 1]} : vector<128x128xbf16> to vector<32x128xbf16>
    %cst_181 = arith.constant dense<0.000000e+00> : vector<16x128xf32>
    %681 = tpu.matmul %679, %680, %cst_181 {dimension_numbers = #tpu.dot_dimension_numbers<[1], [0], [0], [1], [0, 0, 1, 1], [], []>} : vector<16x32xbf16>, vector<32x128xbf16>, vector<16x128xf32> -> vector<16x128xf32>
    %682 = arith.addf %655, %681 : vector<16x128xf32>
    %683 = vector.extract_strided_slice %627 {offsets = [0, 0, 64], sizes = [2, 8, 32], strides = [1, 1, 1]} : vector<2x8x128xf32> to vector<2x8x32xf32>
    %684 = arith.truncf %683 : vector<2x8x32xf32> to vector<2x8x32xbf16>
    %685 = vector.extract_strided_slice %628 {offsets = [0, 0, 64], sizes = [2, 8, 32], strides = [1, 1, 1]} : vector<2x8x128xf32> to vector<2x8x32xf32>
    %686 = arith.truncf %685 : vector<2x8x32xf32> to vector<2x8x32xbf16>
    %687 = vector.extract_strided_slice %629 {offsets = [0, 0, 64], sizes = [2, 8, 32], strides = [1, 1, 1]} : vector<2x8x128xf32> to vector<2x8x32xf32>
    %688 = arith.truncf %687 : vector<2x8x32xf32> to vector<2x8x32xbf16>
    "tpu.trace_start"() <{level = 10 : i32, message = "bqd,bkd->bqk"}> : () -> ()
    %cst_182 = arith.constant dense<0.000000e+00> : vector<2x8x8xf32>
    %689 = tpu.matmul %684, %686, %cst_182 {dimension_numbers = #tpu.dot_dimension_numbers<[2], [2], [1], [1], [0, 0, 0, 1, 1, 1], [0], [0]>} : vector<2x8x32xbf16>, vector<2x8x32xbf16>, vector<2x8x8xf32> -> vector<2x8x8xf32>
    "tpu.trace_stop"() : () -> ()
    %cst_183 = arith.constant 0.176776692 : f32
    %690 = vector.broadcast %cst_183 : f32 to vector<2x8x8xf32>
    %691 = arith.mulf %689, %690 : vector<2x8x8xf32>
    %692 = arith.addf %691, %15 : vector<2x8x8xf32>
    %cst_184 = arith.constant dense<0xFF800000> : vector<2x8xf32>
    %693 = vector.multi_reduction <maximumf>, %692, %cst_184 [2] : vector<2x8x8xf32> to vector<2x8xf32>
    %694 = vector.shape_cast %693 : vector<2x8xf32> to vector<2x8x1xf32>
    %695 = vector.broadcast %694 : vector<2x8x1xf32> to vector<2x8x8xf32>
    %696 = arith.subf %692, %695 : vector<2x8x8xf32>
    %697 = math.exp %696 : vector<2x8x8xf32>
    %cst_185 = arith.constant dense<0.000000e+00> : vector<2x8xf32>
    %698 = vector.multi_reduction <add>, %697, %cst_185 [2] : vector<2x8x8xf32> to vector<2x8xf32>
    %699 = vector.shape_cast %698 : vector<2x8xf32> to vector<2x8x1xf32>
    %700 = tpu.reciprocal %699 {approx = true} : vector<2x8x1xf32> -> vector<2x8x1xf32>
    %701 = vector.broadcast %700 : vector<2x8x1xf32> to vector<2x8x8xf32>
    %702 = arith.mulf %697, %701 : vector<2x8x8xf32>
    %703 = arith.truncf %702 : vector<2x8x8xf32> to vector<2x8x8xbf16>
    "tpu.trace_start"() <{level = 10 : i32, message = "bqk,bkd->bqd"}> : () -> ()
    %cst_186 = arith.constant dense<0.000000e+00> : vector<2x8x32xf32>
    %704 = tpu.matmul %703, %688, %cst_186 {dimension_numbers = #tpu.dot_dimension_numbers<[2], [1], [1], [2], [0, 0, 0, 1, 1, 2], [0], [0]>} : vector<2x8x8xbf16>, vector<2x8x32xbf16>, vector<2x8x32xf32> -> vector<2x8x32xf32>
    "tpu.trace_stop"() : () -> ()
    %705 = vector.shape_cast %704 : vector<2x8x32xf32> to vector<16x32xf32>
    %706 = arith.truncf %705 : vector<16x32xf32> to vector<16x32xbf16>
    %707 = vector.extract_strided_slice %625 {offsets = [64, 0], sizes = [32, 128], strides = [1, 1]} : vector<128x128xbf16> to vector<32x128xbf16>
    %cst_187 = arith.constant dense<0.000000e+00> : vector<16x128xf32>
    %708 = tpu.matmul %706, %707, %cst_187 {dimension_numbers = #tpu.dot_dimension_numbers<[1], [0], [0], [1], [0, 0, 1, 1], [], []>} : vector<16x32xbf16>, vector<32x128xbf16>, vector<16x128xf32> -> vector<16x128xf32>
    %709 = arith.addf %682, %708 : vector<16x128xf32>
    %710 = vector.extract_strided_slice %627 {offsets = [0, 0, 96], sizes = [2, 8, 32], strides = [1, 1, 1]} : vector<2x8x128xf32> to vector<2x8x32xf32>
    %711 = arith.truncf %710 : vector<2x8x32xf32> to vector<2x8x32xbf16>
    %712 = vector.extract_strided_slice %628 {offsets = [0, 0, 96], sizes = [2, 8, 32], strides = [1, 1, 1]} : vector<2x8x128xf32> to vector<2x8x32xf32>
    %713 = arith.truncf %712 : vector<2x8x32xf32> to vector<2x8x32xbf16>
    %714 = vector.extract_strided_slice %629 {offsets = [0, 0, 96], sizes = [2, 8, 32], strides = [1, 1, 1]} : vector<2x8x128xf32> to vector<2x8x32xf32>
    %715 = arith.truncf %714 : vector<2x8x32xf32> to vector<2x8x32xbf16>
    "tpu.trace_start"() <{level = 10 : i32, message = "bqd,bkd->bqk"}> : () -> ()
    %cst_188 = arith.constant dense<0.000000e+00> : vector<2x8x8xf32>
    %716 = tpu.matmul %711, %713, %cst_188 {dimension_numbers = #tpu.dot_dimension_numbers<[2], [2], [1], [1], [0, 0, 0, 1, 1, 1], [0], [0]>} : vector<2x8x32xbf16>, vector<2x8x32xbf16>, vector<2x8x8xf32> -> vector<2x8x8xf32>
    "tpu.trace_stop"() : () -> ()
    %cst_189 = arith.constant 0.176776692 : f32
    %717 = vector.broadcast %cst_189 : f32 to vector<2x8x8xf32>
    %718 = arith.mulf %716, %717 : vector<2x8x8xf32>
    %719 = arith.addf %718, %15 : vector<2x8x8xf32>
    %cst_190 = arith.constant dense<0xFF800000> : vector<2x8xf32>
    %720 = vector.multi_reduction <maximumf>, %719, %cst_190 [2] : vector<2x8x8xf32> to vector<2x8xf32>
    %721 = vector.shape_cast %720 : vector<2x8xf32> to vector<2x8x1xf32>
    %722 = vector.broadcast %721 : vector<2x8x1xf32> to vector<2x8x8xf32>
    %723 = arith.subf %719, %722 : vector<2x8x8xf32>
    %724 = math.exp %723 : vector<2x8x8xf32>
    %cst_191 = arith.constant dense<0.000000e+00> : vector<2x8xf32>
    %725 = vector.multi_reduction <add>, %724, %cst_191 [2] : vector<2x8x8xf32> to vector<2x8xf32>
    %726 = vector.shape_cast %725 : vector<2x8xf32> to vector<2x8x1xf32>
    %727 = tpu.reciprocal %726 {approx = true} : vector<2x8x1xf32> -> vector<2x8x1xf32>
    %728 = vector.broadcast %727 : vector<2x8x1xf32> to vector<2x8x8xf32>
    %729 = arith.mulf %724, %728 : vector<2x8x8xf32>
    %730 = arith.truncf %729 : vector<2x8x8xf32> to vector<2x8x8xbf16>
    "tpu.trace_start"() <{level = 10 : i32, message = "bqk,bkd->bqd"}> : () -> ()
    %cst_192 = arith.constant dense<0.000000e+00> : vector<2x8x32xf32>
    %731 = tpu.matmul %730, %715, %cst_192 {dimension_numbers = #tpu.dot_dimension_numbers<[2], [1], [1], [2], [0, 0, 0, 1, 1, 2], [0], [0]>} : vector<2x8x8xbf16>, vector<2x8x32xbf16>, vector<2x8x32xf32> -> vector<2x8x32xf32>
    "tpu.trace_stop"() : () -> ()
    %732 = vector.shape_cast %731 : vector<2x8x32xf32> to vector<16x32xf32>
    %733 = arith.truncf %732 : vector<16x32xf32> to vector<16x32xbf16>
    %734 = vector.extract_strided_slice %625 {offsets = [96, 0], sizes = [32, 128], strides = [1, 1]} : vector<128x128xbf16> to vector<32x128xbf16>
    %cst_193 = arith.constant dense<0.000000e+00> : vector<16x128xf32>
    %735 = tpu.matmul %733, %734, %cst_193 {dimension_numbers = #tpu.dot_dimension_numbers<[1], [0], [0], [1], [0, 0, 1, 1], [], []>} : vector<16x32xbf16>, vector<32x128xbf16>, vector<16x128xf32> -> vector<16x128xf32>
    %736 = arith.addf %709, %735 : vector<16x128xf32>
    %737 = vector.broadcast %626 : vector<1x128xf32> to vector<16x128xf32>
    %738 = arith.addf %736, %737 : vector<16x128xf32>
    %739 = arith.addf %586, %738 : vector<16x128xf32>
    %740 = vector.extract_strided_slice %588 {offsets = [0, 128], sizes = [1, 128], strides = [1, 1]} : vector<7x384xf32> to vector<1x128xf32>
    %741 = vector.extract_strided_slice %588 {offsets = [1, 128], sizes = [1, 128], strides = [1, 1]} : vector<7x384xf32> to vector<1x128xf32>
    %cst_194 = arith.constant dense<0.000000e+00> : vector<16xf32>
    %742 = vector.multi_reduction <add>, %739, %cst_194 [1] : vector<16x128xf32> to vector<16xf32>
    %743 = vector.shape_cast %742 : vector<16xf32> to vector<16x1xf32>
    %cst_195 = arith.constant 1.280000e+02 : f32
    %744 = vector.broadcast %cst_195 : f32 to vector<16x1xf32>
    %745 = arith.divf %743, %744 : vector<16x1xf32>
    %746 = vector.broadcast %745 : vector<16x1xf32> to vector<16x128xf32>
    %747 = arith.subf %739, %746 : vector<16x128xf32>
    %748 = arith.mulf %747, %747 : vector<16x128xf32>
    %cst_196 = arith.constant dense<0.000000e+00> : vector<16xf32>
    %749 = vector.multi_reduction <add>, %748, %cst_196 [1] : vector<16x128xf32> to vector<16xf32>
    %750 = vector.shape_cast %749 : vector<16xf32> to vector<16x1xf32>
    %cst_197 = arith.constant 0.00787401571 : f32
    %751 = vector.broadcast %cst_197 : f32 to vector<16x1xf32>
    %752 = arith.mulf %750, %751 : vector<16x1xf32>
    %753 = math.sqrt %752 : vector<16x1xf32>
    %cst_198 = arith.constant 9.99999997E-7 : f32
    %754 = vector.broadcast %cst_198 : f32 to vector<16x1xf32>
    %755 = arith.addf %753, %754 : vector<16x1xf32>
    %756 = tpu.reciprocal %755 {approx = true} : vector<16x1xf32> -> vector<16x1xf32>
    %757 = vector.broadcast %745 : vector<16x1xf32> to vector<16x128xf32>
    %758 = arith.subf %739, %757 : vector<16x128xf32>
    %759 = vector.broadcast %756 : vector<16x1xf32> to vector<16x128xf32>
    %760 = arith.mulf %758, %759 : vector<16x128xf32>
    %761 = vector.broadcast %740 : vector<1x128xf32> to vector<16x128xf32>
    %762 = arith.mulf %761, %760 : vector<16x128xf32>
    %763 = vector.broadcast %741 : vector<1x128xf32> to vector<16x128xf32>
    %764 = arith.addf %762, %763 : vector<16x128xf32>
    %c1_199 = arith.constant 1 : index
    %c0_200 = arith.constant 0 : index
    %c512_201 = arith.constant 512 : index
    %765 = vector.load %arg8[%c1_199, %c0_200, %c512_201] : memref<2x128x1280xbf16, #tpu.memory_space<vmem>>, vector<1x128x128xbf16>
    %766 = vector.shape_cast %765 : vector<1x128x128xbf16> to vector<128x128xbf16>
    %767 = vector.extract_strided_slice %588 {offsets = [3, 128], sizes = [1, 128], strides = [1, 1]} : vector<7x384xf32> to vector<1x128xf32>
    %768 = arith.truncf %764 : vector<16x128xf32> to vector<16x128xbf16>
    %cst_202 = arith.constant dense<0.000000e+00> : vector<16x128xf32>
    %769 = tpu.matmul %768, %766, %cst_202 {dimension_numbers = #tpu.dot_dimension_numbers<[1], [0], [0], [1], [0, 0, 1, 1], [], []>} : vector<16x128xbf16>, vector<128x128xbf16>, vector<16x128xf32> -> vector<16x128xf32>
    %770 = vector.broadcast %767 : vector<1x128xf32> to vector<16x128xf32>
    %771 = arith.addf %769, %770 : vector<16x128xf32>
    %c1_203 = arith.constant 1 : index
    %c0_204 = arith.constant 0 : index
    %c640_205 = arith.constant 640 : index
    %772 = vector.load %arg8[%c1_203, %c0_204, %c640_205] : memref<2x128x1280xbf16, #tpu.memory_space<vmem>>, vector<1x128x256xbf16>
    %773 = vector.shape_cast %772 : vector<1x128x256xbf16> to vector<128x256xbf16>
    %774 = vector.extract_strided_slice %588 {offsets = [4, 0], sizes = [1, 256], strides = [1, 1]} : vector<7x384xf32> to vector<1x256xf32>
    %775 = arith.truncf %232 : vector<16x128xf32> to vector<16x128xbf16>
    %cst_206 = arith.constant dense<0.000000e+00> : vector<16x256xf32>
    %776 = tpu.matmul %775, %773, %cst_206 {dimension_numbers = #tpu.dot_dimension_numbers<[1], [0], [0], [1], [0, 0, 1, 1], [], []>} : vector<16x128xbf16>, vector<128x256xbf16>, vector<16x256xf32> -> vector<16x256xf32>
    %777 = vector.broadcast %774 : vector<1x256xf32> to vector<16x256xf32>
    %778 = arith.addf %776, %777 : vector<16x256xf32>
    %779 = vector.extract_strided_slice %778 {offsets = [0, 0], sizes = [16, 128], strides = [1, 1]} : vector<16x256xf32> to vector<16x128xf32>
    %780 = vector.extract_strided_slice %778 {offsets = [0, 128], sizes = [16, 128], strides = [1, 1]} : vector<16x256xf32> to vector<16x128xf32>
    %c1_207 = arith.constant 1 : index
    %c0_208 = arith.constant 0 : index
    %c896_209 = arith.constant 896 : index
    %781 = vector.load %arg8[%c1_207, %c0_208, %c896_209] : memref<2x128x1280xbf16, #tpu.memory_space<vmem>>, vector<1x128x128xbf16>
    %782 = vector.shape_cast %781 : vector<1x128x128xbf16> to vector<128x128xbf16>
    %783 = vector.extract_strided_slice %588 {offsets = [3, 256], sizes = [1, 128], strides = [1, 1]} : vector<7x384xf32> to vector<1x128xf32>
    %784 = vector.shape_cast %771 : vector<16x128xf32> to vector<2x8x128xf32>
    %785 = vector.shape_cast %779 : vector<16x128xf32> to vector<2x8x128xf32>
    %786 = vector.shape_cast %780 : vector<16x128xf32> to vector<2x8x128xf32>
    %787 = vector.extract_strided_slice %784 {offsets = [0, 0, 0], sizes = [2, 8, 32], strides = [1, 1, 1]} : vector<2x8x128xf32> to vector<2x8x32xf32>
    %788 = arith.truncf %787 : vector<2x8x32xf32> to vector<2x8x32xbf16>
    %789 = vector.extract_strided_slice %785 {offsets = [0, 0, 0], sizes = [2, 8, 32], strides = [1, 1, 1]} : vector<2x8x128xf32> to vector<2x8x32xf32>
    %790 = arith.truncf %789 : vector<2x8x32xf32> to vector<2x8x32xbf16>
    %791 = vector.extract_strided_slice %786 {offsets = [0, 0, 0], sizes = [2, 8, 32], strides = [1, 1, 1]} : vector<2x8x128xf32> to vector<2x8x32xf32>
    %792 = arith.truncf %791 : vector<2x8x32xf32> to vector<2x8x32xbf16>
    "tpu.trace_start"() <{level = 10 : i32, message = "bqd,bkd->bqk"}> : () -> ()
    %cst_210 = arith.constant dense<0.000000e+00> : vector<2x8x8xf32>
    %793 = tpu.matmul %788, %790, %cst_210 {dimension_numbers = #tpu.dot_dimension_numbers<[2], [2], [1], [1], [0, 0, 0, 1, 1, 1], [0], [0]>} : vector<2x8x32xbf16>, vector<2x8x32xbf16>, vector<2x8x8xf32> -> vector<2x8x8xf32>
    "tpu.trace_stop"() : () -> ()
    %cst_211 = arith.constant 0.176776692 : f32
    %794 = vector.broadcast %cst_211 : f32 to vector<2x8x8xf32>
    %795 = arith.mulf %793, %794 : vector<2x8x8xf32>
    %796 = arith.addf %795, %9 : vector<2x8x8xf32>
    %cst_212 = arith.constant dense<0xFF800000> : vector<2x8xf32>
    %797 = vector.multi_reduction <maximumf>, %796, %cst_212 [2] : vector<2x8x8xf32> to vector<2x8xf32>
    %798 = vector.shape_cast %797 : vector<2x8xf32> to vector<2x8x1xf32>
    %799 = vector.broadcast %798 : vector<2x8x1xf32> to vector<2x8x8xf32>
    %800 = arith.subf %796, %799 : vector<2x8x8xf32>
    %801 = math.exp %800 : vector<2x8x8xf32>
    %cst_213 = arith.constant dense<0.000000e+00> : vector<2x8xf32>
    %802 = vector.multi_reduction <add>, %801, %cst_213 [2] : vector<2x8x8xf32> to vector<2x8xf32>
    %803 = vector.shape_cast %802 : vector<2x8xf32> to vector<2x8x1xf32>
    %804 = tpu.reciprocal %803 {approx = true} : vector<2x8x1xf32> -> vector<2x8x1xf32>
    %805 = vector.broadcast %804 : vector<2x8x1xf32> to vector<2x8x8xf32>
    %806 = arith.mulf %801, %805 : vector<2x8x8xf32>
    %807 = arith.truncf %806 : vector<2x8x8xf32> to vector<2x8x8xbf16>
    "tpu.trace_start"() <{level = 10 : i32, message = "bqk,bkd->bqd"}> : () -> ()
    %cst_214 = arith.constant dense<0.000000e+00> : vector<2x8x32xf32>
    %808 = tpu.matmul %807, %792, %cst_214 {dimension_numbers = #tpu.dot_dimension_numbers<[2], [1], [1], [2], [0, 0, 0, 1, 1, 2], [0], [0]>} : vector<2x8x8xbf16>, vector<2x8x32xbf16>, vector<2x8x32xf32> -> vector<2x8x32xf32>
    "tpu.trace_stop"() : () -> ()
    %809 = vector.shape_cast %808 : vector<2x8x32xf32> to vector<16x32xf32>
    %810 = arith.truncf %809 : vector<16x32xf32> to vector<16x32xbf16>
    %811 = vector.extract_strided_slice %782 {offsets = [0, 0], sizes = [32, 128], strides = [1, 1]} : vector<128x128xbf16> to vector<32x128xbf16>
    %cst_215 = arith.constant dense<0.000000e+00> : vector<16x128xf32>
    %812 = tpu.matmul %810, %811, %cst_215 {dimension_numbers = #tpu.dot_dimension_numbers<[1], [0], [0], [1], [0, 0, 1, 1], [], []>} : vector<16x32xbf16>, vector<32x128xbf16>, vector<16x128xf32> -> vector<16x128xf32>
    %813 = vector.extract_strided_slice %784 {offsets = [0, 0, 32], sizes = [2, 8, 32], strides = [1, 1, 1]} : vector<2x8x128xf32> to vector<2x8x32xf32>
    %814 = arith.truncf %813 : vector<2x8x32xf32> to vector<2x8x32xbf16>
    %815 = vector.extract_strided_slice %785 {offsets = [0, 0, 32], sizes = [2, 8, 32], strides = [1, 1, 1]} : vector<2x8x128xf32> to vector<2x8x32xf32>
    %816 = arith.truncf %815 : vector<2x8x32xf32> to vector<2x8x32xbf16>
    %817 = vector.extract_strided_slice %786 {offsets = [0, 0, 32], sizes = [2, 8, 32], strides = [1, 1, 1]} : vector<2x8x128xf32> to vector<2x8x32xf32>
    %818 = arith.truncf %817 : vector<2x8x32xf32> to vector<2x8x32xbf16>
    "tpu.trace_start"() <{level = 10 : i32, message = "bqd,bkd->bqk"}> : () -> ()
    %cst_216 = arith.constant dense<0.000000e+00> : vector<2x8x8xf32>
    %819 = tpu.matmul %814, %816, %cst_216 {dimension_numbers = #tpu.dot_dimension_numbers<[2], [2], [1], [1], [0, 0, 0, 1, 1, 1], [0], [0]>} : vector<2x8x32xbf16>, vector<2x8x32xbf16>, vector<2x8x8xf32> -> vector<2x8x8xf32>
    "tpu.trace_stop"() : () -> ()
    %cst_217 = arith.constant 0.176776692 : f32
    %820 = vector.broadcast %cst_217 : f32 to vector<2x8x8xf32>
    %821 = arith.mulf %819, %820 : vector<2x8x8xf32>
    %822 = arith.addf %821, %9 : vector<2x8x8xf32>
    %cst_218 = arith.constant dense<0xFF800000> : vector<2x8xf32>
    %823 = vector.multi_reduction <maximumf>, %822, %cst_218 [2] : vector<2x8x8xf32> to vector<2x8xf32>
    %824 = vector.shape_cast %823 : vector<2x8xf32> to vector<2x8x1xf32>
    %825 = vector.broadcast %824 : vector<2x8x1xf32> to vector<2x8x8xf32>
    %826 = arith.subf %822, %825 : vector<2x8x8xf32>
    %827 = math.exp %826 : vector<2x8x8xf32>
    %cst_219 = arith.constant dense<0.000000e+00> : vector<2x8xf32>
    %828 = vector.multi_reduction <add>, %827, %cst_219 [2] : vector<2x8x8xf32> to vector<2x8xf32>
    %829 = vector.shape_cast %828 : vector<2x8xf32> to vector<2x8x1xf32>
    %830 = tpu.reciprocal %829 {approx = true} : vector<2x8x1xf32> -> vector<2x8x1xf32>
    %831 = vector.broadcast %830 : vector<2x8x1xf32> to vector<2x8x8xf32>
    %832 = arith.mulf %827, %831 : vector<2x8x8xf32>
    %833 = arith.truncf %832 : vector<2x8x8xf32> to vector<2x8x8xbf16>
    "tpu.trace_start"() <{level = 10 : i32, message = "bqk,bkd->bqd"}> : () -> ()
    %cst_220 = arith.constant dense<0.000000e+00> : vector<2x8x32xf32>
    %834 = tpu.matmul %833, %818, %cst_220 {dimension_numbers = #tpu.dot_dimension_numbers<[2], [1], [1], [2], [0, 0, 0, 1, 1, 2], [0], [0]>} : vector<2x8x8xbf16>, vector<2x8x32xbf16>, vector<2x8x32xf32> -> vector<2x8x32xf32>
    "tpu.trace_stop"() : () -> ()
    %835 = vector.shape_cast %834 : vector<2x8x32xf32> to vector<16x32xf32>
    %836 = arith.truncf %835 : vector<16x32xf32> to vector<16x32xbf16>
    %837 = vector.extract_strided_slice %782 {offsets = [32, 0], sizes = [32, 128], strides = [1, 1]} : vector<128x128xbf16> to vector<32x128xbf16>
    %cst_221 = arith.constant dense<0.000000e+00> : vector<16x128xf32>
    %838 = tpu.matmul %836, %837, %cst_221 {dimension_numbers = #tpu.dot_dimension_numbers<[1], [0], [0], [1], [0, 0, 1, 1], [], []>} : vector<16x32xbf16>, vector<32x128xbf16>, vector<16x128xf32> -> vector<16x128xf32>
    %839 = arith.addf %812, %838 : vector<16x128xf32>
    %840 = vector.extract_strided_slice %784 {offsets = [0, 0, 64], sizes = [2, 8, 32], strides = [1, 1, 1]} : vector<2x8x128xf32> to vector<2x8x32xf32>
    %841 = arith.truncf %840 : vector<2x8x32xf32> to vector<2x8x32xbf16>
    %842 = vector.extract_strided_slice %785 {offsets = [0, 0, 64], sizes = [2, 8, 32], strides = [1, 1, 1]} : vector<2x8x128xf32> to vector<2x8x32xf32>
    %843 = arith.truncf %842 : vector<2x8x32xf32> to vector<2x8x32xbf16>
    %844 = vector.extract_strided_slice %786 {offsets = [0, 0, 64], sizes = [2, 8, 32], strides = [1, 1, 1]} : vector<2x8x128xf32> to vector<2x8x32xf32>
    %845 = arith.truncf %844 : vector<2x8x32xf32> to vector<2x8x32xbf16>
    "tpu.trace_start"() <{level = 10 : i32, message = "bqd,bkd->bqk"}> : () -> ()
    %cst_222 = arith.constant dense<0.000000e+00> : vector<2x8x8xf32>
    %846 = tpu.matmul %841, %843, %cst_222 {dimension_numbers = #tpu.dot_dimension_numbers<[2], [2], [1], [1], [0, 0, 0, 1, 1, 1], [0], [0]>} : vector<2x8x32xbf16>, vector<2x8x32xbf16>, vector<2x8x8xf32> -> vector<2x8x8xf32>
    "tpu.trace_stop"() : () -> ()
    %cst_223 = arith.constant 0.176776692 : f32
    %847 = vector.broadcast %cst_223 : f32 to vector<2x8x8xf32>
    %848 = arith.mulf %846, %847 : vector<2x8x8xf32>
    %849 = arith.addf %848, %9 : vector<2x8x8xf32>
    %cst_224 = arith.constant dense<0xFF800000> : vector<2x8xf32>
    %850 = vector.multi_reduction <maximumf>, %849, %cst_224 [2] : vector<2x8x8xf32> to vector<2x8xf32>
    %851 = vector.shape_cast %850 : vector<2x8xf32> to vector<2x8x1xf32>
    %852 = vector.broadcast %851 : vector<2x8x1xf32> to vector<2x8x8xf32>
    %853 = arith.subf %849, %852 : vector<2x8x8xf32>
    %854 = math.exp %853 : vector<2x8x8xf32>
    %cst_225 = arith.constant dense<0.000000e+00> : vector<2x8xf32>
    %855 = vector.multi_reduction <add>, %854, %cst_225 [2] : vector<2x8x8xf32> to vector<2x8xf32>
    %856 = vector.shape_cast %855 : vector<2x8xf32> to vector<2x8x1xf32>
    %857 = tpu.reciprocal %856 {approx = true} : vector<2x8x1xf32> -> vector<2x8x1xf32>
    %858 = vector.broadcast %857 : vector<2x8x1xf32> to vector<2x8x8xf32>
    %859 = arith.mulf %854, %858 : vector<2x8x8xf32>
    %860 = arith.truncf %859 : vector<2x8x8xf32> to vector<2x8x8xbf16>
    "tpu.trace_start"() <{level = 10 : i32, message = "bqk,bkd->bqd"}> : () -> ()
    %cst_226 = arith.constant dense<0.000000e+00> : vector<2x8x32xf32>
    %861 = tpu.matmul %860, %845, %cst_226 {dimension_numbers = #tpu.dot_dimension_numbers<[2], [1], [1], [2], [0, 0, 0, 1, 1, 2], [0], [0]>} : vector<2x8x8xbf16>, vector<2x8x32xbf16>, vector<2x8x32xf32> -> vector<2x8x32xf32>
    "tpu.trace_stop"() : () -> ()
    %862 = vector.shape_cast %861 : vector<2x8x32xf32> to vector<16x32xf32>
    %863 = arith.truncf %862 : vector<16x32xf32> to vector<16x32xbf16>
    %864 = vector.extract_strided_slice %782 {offsets = [64, 0], sizes = [32, 128], strides = [1, 1]} : vector<128x128xbf16> to vector<32x128xbf16>
    %cst_227 = arith.constant dense<0.000000e+00> : vector<16x128xf32>
    %865 = tpu.matmul %863, %864, %cst_227 {dimension_numbers = #tpu.dot_dimension_numbers<[1], [0], [0], [1], [0, 0, 1, 1], [], []>} : vector<16x32xbf16>, vector<32x128xbf16>, vector<16x128xf32> -> vector<16x128xf32>
    %866 = arith.addf %839, %865 : vector<16x128xf32>
    %867 = vector.extract_strided_slice %784 {offsets = [0, 0, 96], sizes = [2, 8, 32], strides = [1, 1, 1]} : vector<2x8x128xf32> to vector<2x8x32xf32>
    %868 = arith.truncf %867 : vector<2x8x32xf32> to vector<2x8x32xbf16>
    %869 = vector.extract_strided_slice %785 {offsets = [0, 0, 96], sizes = [2, 8, 32], strides = [1, 1, 1]} : vector<2x8x128xf32> to vector<2x8x32xf32>
    %870 = arith.truncf %869 : vector<2x8x32xf32> to vector<2x8x32xbf16>
    %871 = vector.extract_strided_slice %786 {offsets = [0, 0, 96], sizes = [2, 8, 32], strides = [1, 1, 1]} : vector<2x8x128xf32> to vector<2x8x32xf32>
    %872 = arith.truncf %871 : vector<2x8x32xf32> to vector<2x8x32xbf16>
    "tpu.trace_start"() <{level = 10 : i32, message = "bqd,bkd->bqk"}> : () -> ()
    %cst_228 = arith.constant dense<0.000000e+00> : vector<2x8x8xf32>
    %873 = tpu.matmul %868, %870, %cst_228 {dimension_numbers = #tpu.dot_dimension_numbers<[2], [2], [1], [1], [0, 0, 0, 1, 1, 1], [0], [0]>} : vector<2x8x32xbf16>, vector<2x8x32xbf16>, vector<2x8x8xf32> -> vector<2x8x8xf32>
    "tpu.trace_stop"() : () -> ()
    %cst_229 = arith.constant 0.176776692 : f32
    %874 = vector.broadcast %cst_229 : f32 to vector<2x8x8xf32>
    %875 = arith.mulf %873, %874 : vector<2x8x8xf32>
    %876 = arith.addf %875, %9 : vector<2x8x8xf32>
    %cst_230 = arith.constant dense<0xFF800000> : vector<2x8xf32>
    %877 = vector.multi_reduction <maximumf>, %876, %cst_230 [2] : vector<2x8x8xf32> to vector<2x8xf32>
    %878 = vector.shape_cast %877 : vector<2x8xf32> to vector<2x8x1xf32>
    %879 = vector.broadcast %878 : vector<2x8x1xf32> to vector<2x8x8xf32>
    %880 = arith.subf %876, %879 : vector<2x8x8xf32>
    %881 = math.exp %880 : vector<2x8x8xf32>
    %cst_231 = arith.constant dense<0.000000e+00> : vector<2x8xf32>
    %882 = vector.multi_reduction <add>, %881, %cst_231 [2] : vector<2x8x8xf32> to vector<2x8xf32>
    %883 = vector.shape_cast %882 : vector<2x8xf32> to vector<2x8x1xf32>
    %884 = tpu.reciprocal %883 {approx = true} : vector<2x8x1xf32> -> vector<2x8x1xf32>
    %885 = vector.broadcast %884 : vector<2x8x1xf32> to vector<2x8x8xf32>
    %886 = arith.mulf %881, %885 : vector<2x8x8xf32>
    %887 = arith.truncf %886 : vector<2x8x8xf32> to vector<2x8x8xbf16>
    "tpu.trace_start"() <{level = 10 : i32, message = "bqk,bkd->bqd"}> : () -> ()
    %cst_232 = arith.constant dense<0.000000e+00> : vector<2x8x32xf32>
    %888 = tpu.matmul %887, %872, %cst_232 {dimension_numbers = #tpu.dot_dimension_numbers<[2], [1], [1], [2], [0, 0, 0, 1, 1, 2], [0], [0]>} : vector<2x8x8xbf16>, vector<2x8x32xbf16>, vector<2x8x32xf32> -> vector<2x8x32xf32>
    "tpu.trace_stop"() : () -> ()
    %889 = vector.shape_cast %888 : vector<2x8x32xf32> to vector<16x32xf32>
    %890 = arith.truncf %889 : vector<16x32xf32> to vector<16x32xbf16>
    %891 = vector.extract_strided_slice %782 {offsets = [96, 0], sizes = [32, 128], strides = [1, 1]} : vector<128x128xbf16> to vector<32x128xbf16>
    %cst_233 = arith.constant dense<0.000000e+00> : vector<16x128xf32>
    %892 = tpu.matmul %890, %891, %cst_233 {dimension_numbers = #tpu.dot_dimension_numbers<[1], [0], [0], [1], [0, 0, 1, 1], [], []>} : vector<16x32xbf16>, vector<32x128xbf16>, vector<16x128xf32> -> vector<16x128xf32>
    %893 = arith.addf %866, %892 : vector<16x128xf32>
    %894 = vector.broadcast %783 : vector<1x128xf32> to vector<16x128xf32>
    %895 = arith.addf %893, %894 : vector<16x128xf32>
    %896 = arith.addf %739, %895 : vector<16x128xf32>
    %897 = vector.extract_strided_slice %588 {offsets = [0, 256], sizes = [1, 128], strides = [1, 1]} : vector<7x384xf32> to vector<1x128xf32>
    %898 = vector.extract_strided_slice %588 {offsets = [1, 256], sizes = [1, 128], strides = [1, 1]} : vector<7x384xf32> to vector<1x128xf32>
    %cst_234 = arith.constant dense<0.000000e+00> : vector<16xf32>
    %899 = vector.multi_reduction <add>, %896, %cst_234 [1] : vector<16x128xf32> to vector<16xf32>
    %900 = vector.shape_cast %899 : vector<16xf32> to vector<16x1xf32>
    %cst_235 = arith.constant 1.280000e+02 : f32
    %901 = vector.broadcast %cst_235 : f32 to vector<16x1xf32>
    %902 = arith.divf %900, %901 : vector<16x1xf32>
    %903 = vector.broadcast %902 : vector<16x1xf32> to vector<16x128xf32>
    %904 = arith.subf %896, %903 : vector<16x128xf32>
    %905 = arith.mulf %904, %904 : vector<16x128xf32>
    %cst_236 = arith.constant dense<0.000000e+00> : vector<16xf32>
    %906 = vector.multi_reduction <add>, %905, %cst_236 [1] : vector<16x128xf32> to vector<16xf32>
    %907 = vector.shape_cast %906 : vector<16xf32> to vector<16x1xf32>
    %cst_237 = arith.constant 0.00787401571 : f32
    %908 = vector.broadcast %cst_237 : f32 to vector<16x1xf32>
    %909 = arith.mulf %907, %908 : vector<16x1xf32>
    %910 = math.sqrt %909 : vector<16x1xf32>
    %cst_238 = arith.constant 9.99999997E-7 : f32
    %911 = vector.broadcast %cst_238 : f32 to vector<16x1xf32>
    %912 = arith.addf %910, %911 : vector<16x1xf32>
    %913 = tpu.reciprocal %912 {approx = true} : vector<16x1xf32> -> vector<16x1xf32>
    %914 = vector.broadcast %902 : vector<16x1xf32> to vector<16x128xf32>
    %915 = arith.subf %896, %914 : vector<16x128xf32>
    %916 = vector.broadcast %913 : vector<16x1xf32> to vector<16x128xf32>
    %917 = arith.mulf %915, %916 : vector<16x128xf32>
    %918 = vector.broadcast %897 : vector<1x128xf32> to vector<16x128xf32>
    %919 = arith.mulf %918, %917 : vector<16x128xf32>
    %920 = vector.broadcast %898 : vector<1x128xf32> to vector<16x128xf32>
    %921 = arith.addf %919, %920 : vector<16x128xf32>
    %c1_239 = arith.constant 1 : index
    %c0_240 = arith.constant 0 : index
    %c1024_241 = arith.constant 1024 : index
    %922 = vector.load %arg8[%c1_239, %c0_240, %c1024_241] : memref<2x128x1280xbf16, #tpu.memory_space<vmem>>, vector<1x128x256xbf16>
    %923 = vector.shape_cast %922 : vector<1x128x256xbf16> to vector<128x256xbf16>
    %924 = vector.extract_strided_slice %588 {offsets = [5, 0], sizes = [1, 256], strides = [1, 1]} : vector<7x384xf32> to vector<1x256xf32>
    %925 = arith.truncf %921 : vector<16x128xf32> to vector<16x128xbf16>
    %cst_242 = arith.constant dense<0.000000e+00> : vector<16x256xf32>
    %926 = tpu.matmul %925, %923, %cst_242 {dimension_numbers = #tpu.dot_dimension_numbers<[1], [0], [0], [1], [0, 0, 1, 1], [], []>} : vector<16x128xbf16>, vector<128x256xbf16>, vector<16x256xf32> -> vector<16x256xf32>
    %927 = vector.broadcast %924 : vector<1x256xf32> to vector<16x256xf32>
    %928 = arith.addf %926, %927 : vector<16x256xf32>
    %cst_243 = arith.constant 0.000000e+00 : f32
    %929 = vector.broadcast %cst_243 : f32 to vector<16x256xf32>
    %930 = arith.maximumf %928, %929 : vector<16x256xf32>
    %c1_244 = arith.constant 1 : index
    %c0_245 = arith.constant 0 : index
    %c0_246 = arith.constant 0 : index
    %931 = vector.load %arg9[%c1_244, %c0_245, %c0_246] : memref<2x256x128xbf16, #tpu.memory_space<vmem>>, vector<1x256x128xbf16>
    %932 = vector.shape_cast %931 : vector<1x256x128xbf16> to vector<256x128xbf16>
    %933 = vector.extract_strided_slice %588 {offsets = [6, 0], sizes = [1, 128], strides = [1, 1]} : vector<7x384xf32> to vector<1x128xf32>
    %934 = arith.truncf %930 : vector<16x256xf32> to vector<16x256xbf16>
    %cst_247 = arith.constant dense<0.000000e+00> : vector<16x128xf32>
    %935 = tpu.matmul %934, %932, %cst_247 {dimension_numbers = #tpu.dot_dimension_numbers<[1], [0], [0], [1], [0, 0, 1, 1], [], []>} : vector<16x256xbf16>, vector<256x128xbf16>, vector<16x128xf32> -> vector<16x128xf32>
    %936 = vector.broadcast %933 : vector<1x128xf32> to vector<16x128xf32>
    %937 = arith.addf %935, %936 : vector<16x128xf32>
    %938 = arith.addf %896, %937 : vector<16x128xf32>
    %cst_248 = arith.constant dense<0.000000e+00> : vector<16xf32>
    %939 = vector.multi_reduction <add>, %938, %cst_248 [1] : vector<16x128xf32> to vector<16xf32>
    %940 = vector.shape_cast %939 : vector<16xf32> to vector<16x1xf32>
    %cst_249 = arith.constant 1.280000e+02 : f32
    %941 = vector.broadcast %cst_249 : f32 to vector<16x1xf32>
    %942 = arith.divf %940, %941 : vector<16x1xf32>
    %943 = vector.broadcast %942 : vector<16x1xf32> to vector<16x128xf32>
    %944 = arith.subf %938, %943 : vector<16x128xf32>
    %945 = arith.mulf %944, %944 : vector<16x128xf32>
    %cst_250 = arith.constant dense<0.000000e+00> : vector<16xf32>
    %946 = vector.multi_reduction <add>, %945, %cst_250 [1] : vector<16x128xf32> to vector<16xf32>
    %947 = vector.shape_cast %946 : vector<16xf32> to vector<16x1xf32>
    %cst_251 = arith.constant 0.00787401571 : f32
    %948 = vector.broadcast %cst_251 : f32 to vector<16x1xf32>
    %949 = arith.mulf %947, %948 : vector<16x1xf32>
    %950 = math.sqrt %949 : vector<16x1xf32>
    %cst_252 = arith.constant 9.99999997E-7 : f32
    %951 = vector.broadcast %cst_252 : f32 to vector<16x1xf32>
    %952 = arith.addf %950, %951 : vector<16x1xf32>
    %953 = tpu.reciprocal %952 {approx = true} : vector<16x1xf32> -> vector<16x1xf32>
    %954 = vector.broadcast %942 : vector<16x1xf32> to vector<16x128xf32>
    %955 = arith.subf %938, %954 : vector<16x128xf32>
    %956 = vector.broadcast %953 : vector<16x1xf32> to vector<16x128xf32>
    %957 = arith.mulf %955, %956 : vector<16x128xf32>
    %958 = vector.broadcast %17 : vector<1x128xf32> to vector<16x128xf32>
    %959 = arith.mulf %958, %957 : vector<16x128xf32>
    %960 = vector.broadcast %18 : vector<1x128xf32> to vector<16x128xf32>
    %961 = arith.addf %959, %960 : vector<16x128xf32>
    %962 = vector.shape_cast %961 : vector<16x128xf32> to vector<2x8x128xf32>
    %c0_253 = arith.constant 0 : index
    %c0_254 = arith.constant 0 : index
    %c0_255 = arith.constant 0 : index
    %963 = vector.load %arg10[%c0_253, %c0_254, %c0_255] : memref<2x8x128xf32, #tpu.memory_space<vmem>>, vector<2x8x128xf32>
    tpu.vector_store %arg10[%c0_253, %c0_254, %c0_255], %962 {strides = array<i32>} : memref<2x8x128xf32, #tpu.memory_space<vmem>>, vector<2x8x128xf32>,
    return
  }
}

</mosaic_0001>

<bundles_post_ra>
// kernel: tpu_custom_call.1
= control target key start
LH: loop header
LB: loop body
LE: loop exit
PB: predicated region body
PF: predicated region fallthrough
CT: control target
= control target key end

     0   :  { %15 = vsyncpa [#allocation3], 0  ;;  %s12362_s0 = inlined_call_operand.vmem [shape: f32[2,8,128], index: 0, kind: input, shape index: {}]   ;;  %s12363_s1 = inlined_call_operand.vmem [shape: f32[2,8,128], index: 1, kind: input, shape index: {}]   ;;  %s12364_s2 = inlined_call_operand.vmem [shape: s32[2,1,8], index: 2, kind: input, shape index: {}]   ;;  %s12365_s3 = inlined_call_operand.vmem [shape: s32[2,8,8], index: 3, kind: input, shape index: {}]   ;;  %s12366_s4 = inlined_call_operand.vmem [shape: f32[5,384], index: 4, kind: input, shape index: {}]   ;;  %s12367_s5 = inlined_call_operand.hbm [shape: bf16[128,768], index: 5, kind: input, shape index: {}]   ;;  %s12368_s6 = inlined_call_operand.hbm [shape: bf16[256,128], index: 6, kind: input, shape index: {}]   ;;  %s12369_s7 = inlined_call_operand.vmem [shape: f32[2,7,384], index: 7, kind: input, shape index: {}]   ;;  %s12370_s8 = inlined_call_operand.hbm [shape: bf16[2,128,1280], index: 8, kind: input, shape index: {}]   ;;  %s12371_s9 = inlined_call_operand.hbm [shape: bf16[2,256,128], index: 9, kind: input, shape index: {}]   ;;  %s12372_s10 = inlined_call_operand.hbm [shape: f32[2,8,128], index: 10, kind: output, shape index: {}]  }
   0x1   :  { %16 = vsyncpa [#allocation6], 0 }
   0x2   :  { %17 = vsyncpa [#allocation9], 0 }
   0x3   :  { %18 = vsyncpa [#allocation4], 0  ;;  %s10793_s13 = smov [#allocation5]  }
   0x4   :  { %s46_s14 = sshll.u32 %s10793_s13, 4  ;;  %s47_s14 = int_to_ptr.vmem [resolvable:$true] %s46_s14 }
   0x5   :  { %s10693_s15 = scalar_lea.vmem %s47_s14, 2048  ;;  %p10698_p1 = scmp.lt.s32.totalorder %s47_s14, %s47_s14 }
   0x6   :  { %p10694_p0 = scmp.ne.s32.totalorder %s47_s14, %s10693_s15  ;;  %p10699_p2 = scmp.lt.s32.totalorder %s10693_s15, %s10693_s15 }
   0x8   :  { %p10700_p3 = por %p10699_p2, %p10698_p1 }
   0xa   :  { %p10701_p4 = pnand %p10700_p3, %p10694_p0 }
   0xc   :  { %10704 = shalt.err (!%p10701_p4)
}
   0xd   :  { %s10794_s16 = smov 64   ;;  %s10795_s17 = smov 4  }
   0xe   :  { %52 = dma.hbm_to_vmem [thread:$0]  %s12368_s6, 2048, %s47_s14, [#allocation6], %s10794_s16, %s10794_s16, %s10795_s17  }
   0xf   :  { %s10796_s20 = smov [#allocation2]  }
  0x10   :  { %s34_s21 = sshll.u32 %s10796_s20, 4  ;;  %s35_s21 = int_to_ptr.vmem [resolvable:$true] %s34_s21 }
  0x11   :  { %s10713_s22 = scalar_lea.vmem %s35_s21, 6144  ;;  %p10718_p6 = scmp.lt.s32.totalorder %s35_s21, %s35_s21 }
  0x12   :  { %p10714_p5 = scmp.ne.s32.totalorder %s35_s21, %s10713_s22  ;;  %p10719_p7 = scmp.lt.s32.totalorder %s10713_s22, %s10713_s22 }
  0x14   :  { %p10720_p8 = por %p10719_p7, %p10718_p6 }
  0x16   :  { %p10721_p9 = pnand %p10720_p8, %p10714_p5 }
  0x18   :  { %10724 = shalt.err (!%p10721_p9)
}
  0x19   :  { %s10797_s23 = smov 384   ;;  %s10798_s24 = smov 24  }
  0x1a   :  { %40 = dma.hbm_to_vmem [thread:$0]  %s12367_s5, 6144, %s35_s21, [#allocation3], %s10797_s23, %s10797_s23, %s10798_s24  }
  0x1b   :  { %s10799_s27 = smov [#allocation7]  }
  0x1c   :  { %s60_s28 = sshll.u32 %s10799_s27, 4  ;;  %s61_s28 = int_to_ptr.vmem [resolvable:$true] %s60_s28 }
  0x1d   :  { %s10733_s6 = scalar_lea.vmem %s61_s28, 20480  ;;  %p10738_p11 = scmp.lt.s32.totalorder %s61_s28, %s61_s28 }
  0x1e   :  { %p10734_p10 = scmp.ne.s32.totalorder %s61_s28, %s10733_s6  ;;  %p10739_p12 = scmp.lt.s32.totalorder %s10733_s6, %s10733_s6 }
  0x20   :  { %p10740_p13 = por %p10739_p12, %p10738_p11 }
  0x22   :  { %p10741_p0 = pnand %p10740_p13, %p10734_p10 }
  0x24   :  { %10744 = shalt.err (!%p10741_p0)
}
  0x25   :  { %s10800_s29 = smov 640   ;;  %s10801_s30 = smov 40  }
  0x26   :  { %66 = dma.hbm_to_vmem [thread:$0]  %s12370_s8, 20480, %s61_s28, [#allocation6], %s10800_s29, %s10800_s29, %s10801_s30  }
  0x27   :  { %s10802_s13 = smov [#allocation8]  }
  0x28   :  { %s72_s14 = sshll.u32 %s10802_s13, 4  ;;  %s73_s14 = int_to_ptr.vmem [resolvable:$true] %s72_s14 }
  0x29   :  { %s10753_s5 = scalar_lea.vmem %s73_s14, 4096  ;;  %p10758_p2 = scmp.lt.s32.totalorder %s73_s14, %s73_s14 }
  0x2a   :  { %p10754_p1 = scmp.ne.s32.totalorder %s73_s14, %s10753_s5  ;;  %p10759_p3 = scmp.lt.s32.totalorder %s10753_s5, %s10753_s5 }
  0x2c   :  { %p10760_p4 = por %p10759_p3, %p10758_p2 }
  0x2e   :  { %p10761_p5 = pnand %p10760_p4, %p10754_p1 }
  0x30   :  { %10764 = shalt.err (!%p10761_p5)
}
  0x31   :  { %78 = dma.hbm_to_vmem [thread:$0]  %s12371_s9, 4096, %s73_s14, [#allocation9], %s10794_s16, %s10794_s16, %s10795_s17  }
  0x32   :  { %10785 = dma.done.wait [#allocation3], 6144  }
  0x33   :  { %10786 = vsyncadd [#allocation3], 4294961152 }
  0x34   :  { %10787 = dma.done.wait [#allocation6], 22528  }
  0x35   :  { %10788 = vsyncadd [#allocation6], 4294944768 }
  0x36   :  { %10789 = dma.done.wait [#allocation9], 4096  }
  0x37   :  { %10790 = vsyncadd [#allocation9], 4294963200  ;;  %v119_v0 = vld [vmem:[%s12363_s1] sm:$0xff]  ;;  %v120_v1 = vld [vmem:[%s12363_s1 + $0x8] sm:$0xff]  ;;  %v10803_v13 = vmov 0.0   ;;  %v10804_v27 = vmov 0   ;;  %v100_v52 = vlaneseq }
  0x38   :  { %121 = vadd.xlane.f32.xlu0 %v119_v0  ;;  %v10110_v10 = vld [vmem:[#allocation2 + $0x154] ss:$24 sps:$4 sm:$0xff]   ;;  %v10112_v11 = vld [vmem:[#allocation2 + $0x150] ss:$24 sps:$4 sm:$0xff]   ;;  %9352 = vmatprep.subr.bf16.mxu1 %v10803_v13  ;;  %v10114_v14 = vld [vmem:[#allocation2 + $0x124] ss:$24 sps:$4 sm:$0xff]  }
  0x39   :  { %v10113_v12 = vld [vmem:[#allocation2 + $0x158] ss:$24 sps:$4 sm:$0xff]   ;;  %343 = vmatprep.subr.bf16.mxu0 %v10110_v10  ;;  %v10117_v16 = vld [vmem:[#allocation2 + $0x128] ss:$24 sps:$4 sm:$0xff]   ;;  %v10118_v17 = vld [vmem:[#allocation2 + $0xf4] ss:$24 sps:$4 sm:$0xff]   ;;  %375 = vmatprep.mubr.bf16.mxu0 %v10804_v27 }
  0x3a   :  { %344 = vmatpush1.bf16.msra.mxu0 %v10112_v11  ;;  %9353 = vmatpush3.bf16.msra.mxu1 %v10113_v12  ;;  %v10116_v15 = vld [vmem:[#allocation2 + $0x120] ss:$24 sps:$4 sm:$0xff]   ;;  %v10120_v18 = vld [vmem:[#allocation2 + $0xf0] ss:$24 sps:$4 sm:$0xff]   ;;  %v10122_v20 = vld [vmem:[#allocation2 + $0xc4] ss:$24 sps:$4 sm:$0xff]  }
  0x3b   :  { %9354 = vmatprep.subr.bf16.mxu1 %v10803_v13  ;;  %345 = vmatprep.subr.bf16.mxu0 %v10114_v14  ;;  %v10121_v19 = vld [vmem:[#allocation2 + $0xf8] ss:$24 sps:$4 sm:$0xff]   ;;  %v10125_v22 = vld [vmem:[#allocation2 + $0xc8] ss:$24 sps:$4 sm:$0xff]   ;;  %v10126_v23 = vld [vmem:[#allocation2 + $0x94] ss:$24 sps:$4 sm:$0xff]  }
  0x3c   :  { %123 = vadd.xlane.f32.xlu0 %v120_v1  ;;  %v10124_v21 = vld [vmem:[#allocation2 + $0xc0] ss:$24 sps:$4 sm:$0xff]   ;;  %v10128_v24 = vld [vmem:[#allocation2 + $0x90] ss:$24 sps:$4 sm:$0xff]   ;;  %v10130_v26 = vld [vmem:[#allocation2 + $0x64] ss:$24 sps:$4 sm:$0xff]  }
  0x3d   :  { %v10129_v25 = vld [vmem:[#allocation2 + $0x98] ss:$24 sps:$4 sm:$0xff]   ;;  %vm10805_vm0 = vmmov 0   ;;  %v10133_v29 = vld [vmem:[#allocation2 + $0x68] ss:$24 sps:$4 sm:$0xff]   ;;  %v10911_v53 = vshrl.u32 %v100_v52, 7 }
  0x3e   :  { %346 = vmatpush1.bf16.msra.mxu0 %v10116_v15  ;;  %9355 = vmatpush3.bf16.msra.mxu1 %v10117_v16  ;;  %v10132_v28 = vld [vmem:[#allocation2 + $0x60] ss:$24 sps:$4 sm:$0xff]   ;;  %v10134_v30 = vld [vmem:[#allocation2 + $0x34] ss:$24 sps:$4 sm:$0xff]   ;;  %v10136_v31 = vld [vmem:[#allocation2 + $0x30] ss:$24 sps:$4 sm:$0xff]  }
  0x3f   :  { %9356 = vmatprep.subr.bf16.mxu1 %v10803_v13  ;;  %347 = vmatprep.subr.bf16.mxu0 %v10118_v17  ;;  %v10137_v32 = vld [vmem:[#allocation2 + $0x38] ss:$24 sps:$4 sm:$0xff]   ;;  %v10138_v33 = vld [vmem:[#allocation2 + $0x4] ss:$24 sps:$4 sm:$0xff]   ;;  %v10141_v35 = vld [vmem:[#allocation2 + $0x8] ss:$24 sps:$4 sm:$0xff]  }
  0x40   :  { %9368 = vmatprep.mubr.msk.bf16.mxu1 %vm10805_vm0, %v10803_v13  ;;  %v10140_v34 = vld [vmem:[#allocation2] ss:$24 sps:$4 sm:$0xff]   ;;  %v10914_v54 = vsub.s32 0, %v10911_v53  ;;  %v10925_v59 = vsub.s32 1, %v10911_v53  ;;  %vm449_vm5 = vcmask 261120   ;;  %vm574_vm6 = vcmask 1043456  }
  0x41   :  { %v10919_v55 = vld [vmem:[%s12366_s4] sm:$0x1f]  ;;  %vm546_vm9 = vcmask 64512   ;;  %s10807_s29 = smov 32  }
  0x42   :  { %348 = vmatpush1.bf16.msra.mxu0 %v10120_v18  ;;  %9357 = vmatpush3.bf16.msra.mxu1 %v10121_v19  ;;  %v161_v58 = vrot.slane %v10919_v55, %v10914_v54  ;;  %v167_v63 = vrot.slane %v10919_v55, %v10925_v59 }
  0x43   :  { %9358 = vmatprep.subr.bf16.mxu1 %v10803_v13  ;;  %349 = vmatprep.subr.bf16.mxu0 %v10122_v20 }
  0x46   :  { %350 = vmatpush1.bf16.msra.mxu0 %v10124_v21  ;;  %9359 = vmatpush3.bf16.msra.mxu1 %v10125_v22 }
  0x47   :  { %351 = vmatprep.subr.bf16.mxu0 %v10126_v23  ;;  %9360 = vmatprep.subr.bf16.mxu1 %v10803_v13 }
  0x4a   :  { %352 = vmatpush1.bf16.msra.mxu0 %v10128_v24  ;;  %9361 = vmatpush3.bf16.msra.mxu1 %v10129_v25 }
  0x4b   :  { %353 = vmatprep.subr.bf16.mxu0 %v10130_v26  ;;  %9362 = vmatprep.subr.bf16.mxu1 %v10803_v13 }
  0x4e   :  { %354 = vmatpush1.bf16.msra.mxu0 %v10132_v28  ;;  %9363 = vmatpush3.bf16.msra.mxu1 %v10133_v29 }
  0x4f   :  { %355 = vmatprep.subr.bf16.mxu0 %v10134_v30  ;;  %9364 = vmatprep.subr.bf16.mxu1 %v10803_v13 }
  0x52   :  { %356 = vmatpush1.bf16.msra.mxu0 %v10136_v31  ;;  %9365 = vmatpush3.bf16.msra.mxu1 %v10137_v32 }
  0x53   :  { %357 = vmatprep.subr.bf16.mxu0 %v10138_v33  ;;  %9366 = vmatprep.subr.bf16.mxu1 %v10803_v13 }
  0x56   :  { %358 = vmatpush1.bf16.msra.mxu0 %v10140_v34  ;;  %9367 = vmatpush3.bf16.msra.mxu1 %v10141_v35 }
  0x57   :  { %9372 = vmatprep.subr.bf16.mxu0 %v10803_v13  ;;  %9378 = vmatprep.subr.bf16.mxu1 %v10803_v13 }
  0xc1   :  { %v122_v2 = vpop.xlane.xlu0 %121 }
  0xc2   :  { %v126_v3 = vmul.f32 0.0078125, %v122_v2 }
  0xc4   :  { %v10890_v4 = vsub.f32 %v119_v0, %v126_v3 }
  0xc5   :  { %v124_v5 = vpop.xlane.xlu0 %123 }
  0xc6   :  { %v127_v6 = vmul.f32 0.0078125, %v124_v5  ;;  %v130_v7 = vmul.f32 %v10890_v4, %v10890_v4  ;;  %v10938_v5 = vsub.s32 2, %v10911_v53 }
  0xc8   :  { %132 = vadd.xlane.f32.xlu1 %v130_v7  ;;  %v10894_v8 = vsub.f32 %v120_v1, %v127_v6  ;;  %v206_v17 = vrot.slane %v10919_v55, %v10938_v5 }
  0xca   :  { %v131_v9 = vmul.f32 %v10894_v8, %v10894_v8 }
  0xcc   :  { %134 = vadd.xlane.f32.xlu1 %v131_v9 }
 0x151   :  { %v133_v36 = vpop.xlane.xlu1 %132 }
 0x152   :  { %v136_v37 = vmul.f32 0.007874016, %v133_v36  ;;  %v92_v36 = vld [vmem:[%s12364_s2] sm:$0x1] }
 0x153   :  { %vm94_vm7 = vcmp.eq.s32.totalorder %v92_v36, 0 }
 0x154   :  { %10430 = vrsqrt.f32 %v136_v37  ;;  %vm140_vm1 = vcmp.eq.f32.partialorder %v136_v37, inf  ;;  %v143_v42 = vand.u32 2147483648, %v136_v37  ;;  %vm142_vm2 = vcmp.eq.f32.partialorder %v136_v37, 0.0 }
 0x155   :  { %v135_v38 = vpop.xlane.xlu1 %134 }
 0x156   :  { %v137_v39 = vmul.f32 0.007874016, %v135_v38  ;;  %v96_v38 = vsel %vm94_vm7, -1e+09, %v10803_v13 }
 0x158   :  { %10432 = vrsqrt.f32 %v137_v39  ;;  %vm147_vm3 = vcmp.eq.f32.partialorder %v137_v39, inf  ;;  %v150_v48 = vand.u32 2147483648, %v137_v39  ;;  %vm149_vm4 = vcmp.eq.f32.partialorder %v137_v39, 0.0 }
 0x161   :  { %v10431_v40 = vpop.eup %10430 }
 0x162   :  { %v139_v41 = vmul.f32 %v10431_v40, %v136_v37 }
 0x164   :  { %v141_v43 = vsel %vm140_vm1, %v136_v37, %v139_v41  ;;  %v93_v37 = vld [vmem:[%s12364_s2 + $0x1] sm:$0x1]  ;;  %s10806_s2 = smov 96  }
 0x165   :  { %v10433_v44 = vpop.eup %10432  ;;  %v144_v45 = vsel %vm142_vm2, %v143_v42, %v141_v43  ;;  %vm95_vm8 = vcmp.eq.s32.totalorder %v93_v37, 0 }
 0x166   :  { %v152_v46 = vadd.f32 1e-06, %v144_v45  ;;  %v146_v47 = vmul.f32 %v10433_v44, %v137_v39  ;;  %v97_v41 = vsel %vm95_vm8, -1e+09, %v10803_v13 }
 0x167   :  { %v10992_v45 = vrot.slane %v97_v41, %v10914_v54 }
 0x168   :  { %10434 = vrcp.f32 %v152_v46  ;;  %v148_v49 = vsel %vm147_vm3, %v137_v39, %v146_v47  ;;  %v10987_v39 = vrot.slane %v96_v38, %v10914_v54 }
 0x169   :  { %v151_v50 = vsel %vm149_vm4, %v150_v48, %v148_v49 }
 0x16a   :  { %v153_v51 = vadd.f32 1e-06, %v151_v50 }
 0x16c   :  { %10436 = vrcp.f32 %v153_v51 }
 0x175   :  { %v10435_v56 = vpop.eup %10434 }
 0x176   :  { %v156_v57 = vmul.f32 %v10435_v56, %v10890_v4  ;;  %v117_v4 = vld [vmem:[%s12366_s4 + $0x8] sm:$0x1f] }
 0x177   :  { %v210_v6 = vrot.slane %v117_v4, %v10938_v5 }
 0x178   :  { %v162_v62 = vmul.f32 %v161_v58, %v156_v57 }
 0x179   :  { %v10437_v60 = vpop.eup %10436 }
 0x17a   :  { %v157_v61 = vmul.f32 %v10437_v60, %v10894_v8  ;;  %v168_v1 = vadd.f32 %v167_v63, %v162_v62  ;;  %v118_v8 = vld [vmem:[%s12366_s4 + $0x10] sm:$0x1f] }
 0x17b   :  { %v214_v12 = vrot.slane %v118_v8, %v10938_v5 }
 0x17c   :  { %v163_v0 = vmul.f32 %v161_v58, %v157_v61 }
 0x17e   :  { %v169_v2 = vadd.f32 %v167_v63, %v163_v0 }
 0x180   :  { %v202_v3 = vpack.c.bf16 %v169_v2, %v168_v1 }
 0x182   :  { %376 = vmatmul.mubr.bf16.vlgmr.msra.gmra.mxu0 %v202_v3  ;;  %9369 = vmatmul.mubr.bf16.vlgmr.msra.gmra.mxu1 %v202_v3 }
 0x183   :  { %9374 = vmatprep.mubr.msk.bf16.mxu0 %vm10805_vm0, %v10803_v13  ;;  %9380 = vmatprep.mubr.msk.bf16.mxu1 %vm10805_vm0, %v10803_v13 }
 0x242   :  { %v377_v7 = vpop.f32.mrf.mxu0  ;;  %v420_v9 = vpop.f32.mrf.mxu1 }
 0x243   :  { %v421_v21 = vadd.f32 %v420_v9, %v214_v12  ;;  %v378_v24 = vadd.f32 %v377_v7, %v206_v17 }
 0x244   :  { %v379_v10 = vpop.f32.mrf.mxu0  ;;  %v9370_v11 = vpop.f32.mrf.mxu1 }
 0x245   :  { %v380_v14 = vadd.f32 %v379_v10, %v210_v6  ;;  %v10954_v26 = vpack.c.bf16 %v421_v21, %v421_v21  ;;  %v10958_v30 = vpack.c.bf16 %v378_v24, %v378_v24 }
 0x246   :  { %v381_v15 = vpop.f32.mrf.mxu0  ;;  %v423_v16 = vpop.f32.mrf.mxu1 }
 0x247   :  { %v10947_v18 = vpack.c.bf16 %v380_v14, %v380_v14  ;;  %v424_v28 = vadd.f32 %v423_v16, %v214_v12  ;;  %v382_v31 = vadd.f32 %v381_v15, %v206_v17  ;;  %v576_v33 = vsel %vm574_vm6, %v10954_v26, 0 }
 0x248   :  { %v383_v19 = vpop.f32.mrf.mxu0  ;;  %v9371_v20 = vpop.f32.mrf.mxu1 }
 0x249   :  { %v384_v22 = vadd.f32 %v383_v19, %v210_v6  ;;  %v454_v23 = vsel %vm449_vm5, %v10947_v18, 0  ;;  %v10961_v32 = vpack.c.bf16 %v424_v28, %v424_v28  ;;  %v10969_v34 = vpack.c.bf16 %v382_v31, %v382_v31 }
 0x24a   :  { %9373 = vmatpush3.bf16.xpose.msra.mxu0 %v454_v23 }
 0x24b   :  { %v10951_v25 = vpack.c.bf16 %v384_v22, %v384_v22  ;;  %9384 = vmatprep.subr.bf16.mxu0 %v10803_v13  ;;  %v622_v35 = vsel %vm574_vm6, %v10961_v32, 0 }
 0x24d   :  { %v500_v29 = vsel %vm449_vm5, %v10951_v25, 0 }
 0x24e   :  { %9379 = vmatpush3.bf16.xpose.msra.mxu1 %v500_v29 }
 0x24f   :  { %9390 = vmatprep.subr.bf16.mxu1 %v10803_v13 }
 0x251   :  { %9375 = vmatmul.mubr.msk.bf16.vlgmr.msra.gmra.mxu0 %vm449_vm5, %v10958_v30 }
 0x252   :  { %9385 = vmatpush3.bf16.msra.mxu0 %v576_v33  ;;  %9386 = vmatprep.mubr.msk.bf16.mxu0 %vm10805_vm0, %v10803_v13 }
 0x253   :  { %9396 = vmatprep.subr.bf16.mxu0 %v10803_v13 }
 0x255   :  { %9381 = vmatmul.mubr.msk.bf16.vlgmr.msra.gmra.mxu1 %vm449_vm5, %v10969_v34 }
 0x256   :  { %9391 = vmatpush3.bf16.msra.mxu1 %v622_v35  ;;  %9392 = vmatprep.mubr.msk.bf16.mxu1 %vm10805_vm0, %v10803_v13 }
 0x257   :  { %9402 = vmatprep.subr.bf16.mxu1 %v10803_v13 }
 0x311   :  { %v490_v40 = vpop.f32.mrf.mxu0 }
 0x312   :  { %v542_v42 = vmul.f32 0.17677669, %v490_v40 }
 0x313   :  { %v9376_v43 = vpop.f32.mrf.mxu0 }
 0x314   :  { %v544_v44 = vadd.f32 %v542_v42, %v10987_v39 }
 0x315   :  { %v493_v46 = vpop.f32.mrf.mxu0  ;;  %v536_v47 = vpop.f32.mrf.mxu1 }
 0x316   :  { %v543_v48 = vmul.f32 0.17677669, %v536_v47  ;;  %v547_v49 = vsel %vm546_vm9, %v544_v44, -inf }
 0x317   :  { %v9377_v50 = vpop.f32.mrf.mxu0  ;;  %v9382_v51 = vpop.f32.mrf.mxu1  ;;  %548 = vmax.xlane.f32.xlu0 %v547_v49 }
 0x318   :  { %v545_v52 = vadd.f32 %v543_v48, %v10992_v45 }
 0x319   :  { %v539_v56 = vpop.f32.mrf.mxu1 }
 0x31a   :  { %v550_v57 = vsel %vm546_vm9, %v545_v52, -inf }
 0x31b   :  { %v9383_v58 = vpop.f32.mrf.mxu1  ;;  %551 = vmax.xlane.f32.xlu1 %v550_v57 }
 0x32c   :  { %721 = vrot.lane.b32.xlu1 %v10951_v25, %s10806_s2 }
 0x3a0   :  { %v549_v60 = vpop.xlane.xlu0 %548 }
 0x3a1   :  { %v553_v61 = vsub.f32 %v544_v44, %v549_v60 }
 0x3a3   :  { %v555_v62 = vmul.f32 1.442695, %v553_v61 }
 0x3a4   :  { %v552_v63 = vpop.xlane.xlu1 %551 }
 0x3a5   :  { %10438 = vpow2.f32 %v555_v62  ;;  %v554_v0 = vsub.f32 %v545_v52, %v552_v63 }
 0x3a7   :  { %v557_v1 = vmul.f32 1.442695, %v554_v0 }
 0x3a8   :  { %v722_v7 = vpop.permute.xlu1 %721 }
 0x3a9   :  { %10440 = vpow2.f32 %v557_v1  ;;  %v727_v20 = vsel %vm449_vm5, %v722_v7, 0 }
 0x3b2   :  { %v10439_v2 = vpop.eup %10438 }
 0x3b3   :  { %v559_v3 = vsel %vm546_vm9, %v10439_v2, 0.0 }
 0x3b4   :  { %560 = vadd.xlane.f32.xlu0 %v559_v3 }
 0x3b6   :  { %v10441_v4 = vpop.eup %10440 }
 0x3b7   :  { %v562_v6 = vsel %vm546_vm9, %v10441_v4, 0.0 }
 0x3b8   :  { %563 = vadd.xlane.f32.xlu1 %v562_v6 }
 0x3c9   :  { %666 = vrot.lane.b32.xlu1 %v10958_v30, %s10806_s2 }
 0x3ca   :  { %669 = vrot.lane.b32.xlu0 %v10947_v18, %s10806_s2 }
 0x3cd   :  { %718 = vrot.lane.b32.xlu1 %v10969_v34, %s10806_s2 }
 0x43d   :  { %v561_v8 = vpop.xlane.xlu0 %560 }
 0x43e   :  { %10442 = vrcp.f32 %v561_v8 }
 0x441   :  { %v564_v9 = vpop.xlane.xlu1 %563  ;;  %v670_v12 = vpop.permute.xlu0 %669 }
 0x442   :  { %10444 = vrcp.f32 %v564_v9  ;;  %v675_v16 = vsel %vm449_vm5, %v670_v12, 0 }
 0x445   :  { %v667_v21 = vpop.permute.xlu1 %666 }
 0x449   :  { %v719_v22 = vpop.permute.xlu1 %718 }
 0x44b   :  { %v10443_v10 = vpop.eup %10442 }
 0x44c   :  { %v567_v11 = vmul.f32 %v10443_v10, %v10439_v2 }
 0x44e   :  { %v569_v14 = vpack.c.bf16 %v567_v11, %v567_v11 }
 0x44f   :  { %v10445_v15 = vpop.eup %10444 }
 0x450   :  { %9387 = vmatmul.mubr.msk.bf16.vlgmr.msra.gmra.mxu0 %vm546_vm9, %v569_v14  ;;  %v568_v17 = vmul.f32 %v10445_v15, %v10441_v4  ;;  %v10144_v14 = vld [vmem:[#allocation2 + $0x9c] ss:$24 sps:$4 sm:$0xff]  }
 0x451   :  { %9397 = vmatpush3.bf16.xpose.msra.mxu0 %v675_v16  ;;  %9398 = vmatprep.mubr.msk.bf16.mxu0 %vm10805_vm0, %v10803_v13 }
 0x452   :  { %v570_v19 = vpack.c.bf16 %v568_v17, %v568_v17  ;;  %9408 = vmatprep.subr.bf16.mxu0 %v10803_v13 }
 0x454   :  { %9393 = vmatmul.mubr.msk.bf16.vlgmr.msra.gmra.mxu1 %vm546_vm9, %v570_v19  ;;  %v10142_v19 = vld [vmem:[#allocation2 + $0x3c] ss:$24 sps:$4 sm:$0xff]  }
 0x455   :  { %9403 = vmatpush3.bf16.xpose.msra.mxu1 %v727_v20  ;;  %9404 = vmatprep.mubr.msk.bf16.mxu1 %vm10805_vm0, %v10803_v13 }
 0x456   :  { %9414 = vmatprep.subr.bf16.mxu1 %v10803_v13 }
 0x458   :  { %9399 = vmatmul.mubr.msk.bf16.vlgmr.msra.gmra.mxu0 %vm449_vm5, %v667_v21 }
 0x459   :  { %9410 = vmatprep.mubr.msk.bf16.mxu0 %vm10805_vm0, %v10803_v13 }
 0x45c   :  { %9405 = vmatmul.mubr.msk.bf16.vlgmr.msra.gmra.mxu1 %vm449_vm5, %v719_v22  ;;  %v10143_v22 = vld [vmem:[#allocation2 + $0xc] ss:$24 sps:$4 sm:$0xff]  }
 0x45d   :  { %9416 = vmatprep.mubr.msk.bf16.mxu1 %vm10805_vm0, %v10803_v13 }
 0x510   :  { %v11023_v23 = vpop.f32.mrf.mxu0 }
 0x512   :  { %v9388_v24 = vpop.f32.mrf.mxu0 }
 0x514   :  { %v615_v28 = vpop.f32.mrf.mxu0  ;;  %v11025_v29 = vpop.f32.mrf.mxu1 }
 0x515   :  { %v664_v31 = vpack.c.bf16 %v11025_v29, %v11023_v23 }
 0x516   :  { %v9389_v33 = vpop.f32.mrf.mxu0  ;;  %v9394_v35 = vpop.f32.mrf.mxu1 }
 0x517   :  { %v10145_v35 = vld [vmem:[#allocation2 + $0x6c] ss:$24 sps:$4 sm:$0xff]  }
 0x518   :  { %v661_v36 = vpop.f32.mrf.mxu1  ;;  %v711_v37 = vpop.f32.mrf.mxu0 }
 0x519   :  { %v769_v38 = vmul.f32 0.17677669, %v711_v37 }
 0x51a   :  { %v9395_v40 = vpop.f32.mrf.mxu1  ;;  %v9400_v41 = vpop.f32.mrf.mxu0 }
 0x51b   :  { %v771_v42 = vadd.f32 %v769_v38, %v10987_v39 }
 0x51c   :  { %v714_v43 = vpop.f32.mrf.mxu0  ;;  %v763_v44 = vpop.f32.mrf.mxu1 }
 0x51d   :  { %v770_v46 = vmul.f32 0.17677669, %v763_v44  ;;  %v773_v47 = vsel %vm546_vm9, %v771_v42, -inf }
 0x51e   :  { %v9406_v48 = vpop.f32.mrf.mxu1  ;;  %774 = vmax.xlane.f32.xlu0 %v773_v47  ;;  %v9401_v49 = vpop.f32.mrf.mxu0 }
 0x51f   :  { %v772_v50 = vadd.f32 %v770_v46, %v10992_v45 }
 0x520   :  { %v766_v51 = vpop.f32.mrf.mxu1 }
 0x521   :  { %v776_v52 = vsel %vm546_vm9, %v772_v50, -inf }
 0x522   :  { %777 = vmax.xlane.f32.xlu1 %v776_v52  ;;  %v9407_v56 = vpop.f32.mrf.mxu1 }
 0x533   :  { %847 = vrot.lane.b32.xlu1 %v10961_v32, %s10806_s2 }
 0x537   :  { %1010 = vrot.lane.b32.xlu1 %v10947_v18, %s10794_s16 }
 0x53b   :  { %1060 = vrot.lane.b32.xlu1 %v10951_v25, %s10794_s16 }
 0x53f   :  { %1058 = vrot.lane.b32.xlu1 %v10969_v34, %s10794_s16 }
 0x5a7   :  { %v775_v57 = vpop.xlane.xlu0 %774 }
 0x5a8   :  { %v779_v58 = vsub.f32 %v771_v42, %v775_v57 }
 0x5aa   :  { %v781_v60 = vmul.f32 1.442695, %v779_v58 }
 0x5ab   :  { %v778_v61 = vpop.xlane.xlu1 %777 }
 0x5ac   :  { %10446 = vpow2.f32 %v781_v60  ;;  %v780_v62 = vsub.f32 %v772_v50, %v778_v61 }
 0x5ae   :  { %v783_v63 = vmul.f32 1.442695, %v780_v62 }
 0x5af   :  { %v848_v0 = vpop.permute.xlu1 %847 }
 0x5b0   :  { %10448 = vpow2.f32 %v783_v63  ;;  %v853_v1 = vsel %vm574_vm6, %v848_v0, 0 }
 0x5b1   :  { %9415 = vmatpush3.bf16.msra.mxu1 %v853_v1 }
 0x5b2   :  { %9428 = vmatprep.subr.bf16.mxu1 %v10803_v13 }
 0x5b3   :  { %v1011_v21 = vpop.permute.xlu1 %1010 }
 0x5b4   :  { %v1016_v41 = vsel %vm449_vm5, %v1011_v21, 0 }
 0x5b7   :  { %v1061_v24 = vpop.permute.xlu1 %1060 }
 0x5b8   :  { %v1066_v28 = vsel %vm449_vm5, %v1061_v24, 0 }
 0x5b9   :  { %v10447_v2 = vpop.eup %10446 }
 0x5ba   :  { %v785_v3 = vsel %vm546_vm9, %v10447_v2, 0.0 }
 0x5bb   :  { %786 = vadd.xlane.f32.xlu0 %v785_v3  ;;  %v1059_v33 = vpop.permute.xlu1 %1058 }
 0x5bd   :  { %v10449_v4 = vpop.eup %10448 }
 0x5be   :  { %v788_v6 = vsel %vm546_vm9, %v10449_v4, 0.0 }
 0x5bf   :  { %789 = vadd.xlane.f32.xlu0 %v788_v6 }
 0x5d5   :  { %798 = vrot.lane.b32.xlu0 %v10954_v26, %s10806_s2 }
 0x5d9   :  { %1008 = vrot.lane.b32.xlu0 %v10958_v30, %s10794_s16 }
 0x644   :  { %v787_v7 = vpop.xlane.xlu0 %786 }
 0x645   :  { %10450 = vrcp.f32 %v787_v7 }
 0x648   :  { %v790_v8 = vpop.xlane.xlu0 %789 }
 0x649   :  { %10452 = vrcp.f32 %v790_v8 }
 0x64c   :  { %v799_v9 = vpop.permute.xlu0 %798 }
 0x64d   :  { %v804_v10 = vsel %vm574_vm6, %v799_v9, 0 }
 0x64e   :  { %9409 = vmatpush3.bf16.msra.mxu0 %v804_v10 }
 0x64f   :  { %9420 = vmatprep.subr.bf16.mxu0 %v10803_v13 }
 0x650   :  { %v1009_v46 = vpop.permute.xlu0 %1008 }
 0x652   :  { %v10451_v11 = vpop.eup %10450 }
 0x653   :  { %v793_v12 = vmul.f32 %v10451_v11, %v10447_v2 }
 0x655   :  { %v795_v15 = vpack.c.bf16 %v793_v12, %v793_v12 }
 0x656   :  { %v10453_v16 = vpop.eup %10452 }
 0x657   :  { %9411 = vmatmul.mubr.msk.bf16.vlgmr.msra.gmra.mxu0 %vm546_vm9, %v795_v15  ;;  %v794_v17 = vmul.f32 %v10453_v16, %v10449_v4 }
 0x658   :  { %9421 = vmatpush3.bf16.msra.mxu0 %v10144_v14  ;;  %9424 = vmatprep.mubr.msk.bf16.mxu0 %vm10805_vm0, %v10803_v13 }
 0x659   :  { %v796_v20 = vpack.c.bf16 %v794_v17, %v794_v17  ;;  %9422 = vmatprep.subr.bf16.mxu0 %v10803_v13 }
 0x65b   :  { %9417 = vmatmul.mubr.msk.bf16.vlgmr.msra.gmra.mxu1 %vm546_vm9, %v796_v20 }
 0x65c   :  { %9429 = vmatpush3.bf16.msra.mxu1 %v10142_v19  ;;  %9432 = vmatprep.mubr.msk.bf16.mxu1 %vm10805_vm0, %v10803_v13 }
 0x65d   :  { %9430 = vmatprep.subr.bf16.mxu1 %v10803_v13  ;;  %9423 = vmatpush3.bf16.msra.mxu0 %v10145_v35 }
 0x65e   :  { %9436 = vmatprep.subr.bf16.mxu0 %v10803_v13 }
 0x660   :  { %9431 = vmatpush3.bf16.msra.mxu1 %v10143_v22 }
 0x661   :  { %9442 = vmatprep.subr.bf16.mxu1 %v10803_v13 }
 0x663   :  { %9433 = vmatmul.mubr.msk.bf16.vlgmr.msra.gmra.mxu1 %vm449_vm5, %v664_v31 }
 0x664   :  { %9443 = vmatpush3.bf16.xpose.msra.mxu1 %v1066_v28  ;;  %9444 = vmatprep.mubr.msk.bf16.mxu1 %vm10805_vm0, %v10803_v13 }
 0x665   :  { %9454 = vmatprep.subr.bf16.mxu1 %v10803_v13 }
 0x66b   :  { %9445 = vmatmul.mubr.msk.bf16.vlgmr.msra.gmra.mxu1 %vm449_vm5, %v1059_v33 }
 0x66c   :  { %9456 = vmatprep.mubr.msk.bf16.mxu1 %vm10805_vm0, %v10803_v13 }
 0x717   :  { %v840_v36 = vpop.f32.mrf.mxu0 }
 0x719   :  { %v9412_v23 = vpop.f32.mrf.mxu0 }
 0x71b   :  { %v843_v29 = vpop.f32.mrf.mxu0  ;;  %v889_v31 = vpop.f32.mrf.mxu1 }
 0x71c   :  { %v895_v37 = vpack.c.bf16 %v889_v31, %v840_v36 }
 0x71d   :  { %v9413_v38 = vpop.f32.mrf.mxu0  ;;  %v9418_v40 = vpop.f32.mrf.mxu1 }
 0x71e   :  { %9425 = vmatmul.mubr.msk.bf16.vlgmr.msra.gmra.mxu0 %vm449_vm5, %v895_v37 }
 0x71f   :  { %9437 = vmatpush3.bf16.xpose.msra.mxu0 %v1016_v41  ;;  %v892_v42 = vpop.f32.mrf.mxu1  ;;  %9438 = vmatprep.mubr.msk.bf16.mxu0 %vm10805_vm0, %v10803_v13 }
 0x720   :  { %9448 = vmatprep.subr.bf16.mxu0 %v10803_v13 }
 0x721   :  { %v9419_v43 = vpop.f32.mrf.mxu1 }
 0x722   :  { %v10146_v43 = vld [vmem:[#allocation2 + $0xfc] ss:$24 sps:$4 sm:$0xff]  }
 0x723   :  { %v11077_v44 = vpop.f32.mrf.mxu1 }
 0x725   :  { %v9434_v47 = vpop.f32.mrf.mxu1 }
 0x726   :  { %9439 = vmatmul.mubr.msk.bf16.vlgmr.msra.gmra.mxu0 %vm449_vm5, %v1009_v46  ;;  %v10147_v46 = vld [vmem:[#allocation2 + $0xcc] ss:$24 sps:$4 sm:$0xff]  }
 0x727   :  { %v11080_v48 = vpop.f32.mrf.mxu1  ;;  %9450 = vmatprep.mubr.msk.bf16.mxu0 %vm10805_vm0, %v10803_v13 }
 0x729   :  { %v9435_v49 = vpop.f32.mrf.mxu1 }
 0x72b   :  { %v1102_v50 = vpop.f32.mrf.mxu1 }
 0x72c   :  { %v1109_v51 = vmul.f32 0.17677669, %v1102_v50 }
 0x72d   :  { %v9446_v52 = vpop.f32.mrf.mxu1 }
 0x72e   :  { %v1111_v56 = vadd.f32 %v1109_v51, %v10992_v45 }
 0x72f   :  { %v1105_v57 = vpop.f32.mrf.mxu1 }
 0x730   :  { %v1115_v58 = vsel %vm546_vm9, %v1111_v56, -inf }
 0x731   :  { %1116 = vmax.xlane.f32.xlu1 %v1115_v58  ;;  %v9447_v60 = vpop.f32.mrf.mxu1 }
 0x742   :  { %1184 = vrot.lane.b32.xlu1 %v10961_v32, %s10794_s16 }
 0x746   :  { %1293 = vrot.lane.b32.xlu1 %v10947_v18, %s10807_s29 }
 0x74a   :  { %1343 = vrot.lane.b32.xlu1 %v10951_v25, %s10807_s29 }
 0x74e   :  { %1341 = vrot.lane.b32.xlu1 %v10969_v34, %s10807_s29 }
 0x7ba   :  { %v1117_v61 = vpop.xlane.xlu1 %1116 }
 0x7bb   :  { %v1119_v0 = vsub.f32 %v1111_v56, %v1117_v61 }
 0x7bd   :  { %v1122_v1 = vmul.f32 1.442695, %v1119_v0 }
 0x7be   :  { %v1185_v62 = vpop.permute.xlu1 %1184 }
 0x7bf   :  { %v1190_v63 = vsel %vm574_vm6, %v1185_v62, 0  ;;  %10454 = vpow2.f32 %v1122_v1 }
 0x7c0   :  { %9455 = vmatpush3.bf16.msra.mxu1 %v1190_v63 }
 0x7c1   :  { %9468 = vmatprep.subr.bf16.mxu1 %v10803_v13 }
 0x7c2   :  { %v1294_v24 = vpop.permute.xlu1 %1293 }
 0x7c3   :  { %v1299_v33 = vsel %vm449_vm5, %v1294_v24, 0 }
 0x7c6   :  { %v1344_v58 = vpop.permute.xlu1 %1343 }
 0x7c7   :  { %v1349_v63 = vsel %vm449_vm5, %v1344_v58, 0 }
 0x7cc   :  { %v10455_v10 = vpop.eup %10454 }
 0x7cd   :  { %v1127_v12 = vsel %vm546_vm9, %v10455_v10, 0.0 }
 0x7de   :  { %v11096_v2 = vpop.f32.mrf.mxu0 }
 0x7e0   :  { %v9426_v3 = vpop.f32.mrf.mxu0 }
 0x7e1   :  { %v1342_v3 = vpop.permute.xlu1 %1341 }
 0x7e2   :  { %v11098_v18 = vpop.f32.mrf.mxu0 }
 0x7e4   :  { %v9427_v4 = vpop.f32.mrf.mxu0 }
 0x7e6   :  { %v1052_v25 = vpop.f32.mrf.mxu0 }
 0x7e7   :  { %v1108_v6 = vmul.f32 0.17677669, %v1052_v25 }
 0x7e8   :  { %v9440_v7 = vpop.f32.mrf.mxu0 }
 0x7e9   :  { %v1110_v34 = vadd.f32 %v1108_v6, %v10987_v39 }
 0x7ea   :  { %v1055_v8 = vpop.f32.mrf.mxu0 }
 0x7eb   :  { %v1112_v9 = vsel %vm546_vm9, %v1110_v34, -inf  ;;  %v1002_v8 = vadd.f32 %v11077_v44, %v11096_v2 }
 0x7ec   :  { %1113 = vmax.xlane.f32.xlu0 %v1112_v9  ;;  %v9441_v11 = vpop.f32.mrf.mxu0 }
 0x7f0   :  { %1128 = vadd.xlane.f32.xlu0 %v1127_v12  ;;  %v1005_v12 = vadd.f32 %v11080_v48, %v11098_v18 }
 0x875   :  { %v1114_v14 = vpop.xlane.xlu0 %1113 }
 0x876   :  { %v1118_v15 = vsub.f32 %v1110_v34, %v1114_v14 }
 0x878   :  { %v1120_v16 = vmul.f32 1.442695, %v1118_v15 }
 0x879   :  { %v1129_v17 = vpop.xlane.xlu0 %1128 }
 0x87a   :  { %10456 = vpow2.f32 %v1120_v16 }
 0x87b   :  { %10458 = vrcp.f32 %v1129_v17 }
 0x887   :  { %v10457_v19 = vpop.eup %10456 }
 0x888   :  { %v10459_v20 = vpop.eup %10458  ;;  %v1124_v21 = vsel %vm546_vm9, %v10457_v19, 0.0 }
 0x889   :  { %1125 = vadd.xlane.f32.xlu0 %v1124_v21  ;;  %v1133_v22 = vmul.f32 %v10459_v20, %v10455_v10 }
 0x88b   :  { %v1135_v28 = vpack.c.bf16 %v1133_v22, %v1133_v22 }
 0x88d   :  { %9457 = vmatmul.mubr.msk.bf16.vlgmr.msra.gmra.mxu1 %vm546_vm9, %v1135_v28 }
 0x88e   :  { %9469 = vmatpush3.bf16.xpose.msra.mxu1 %v1299_v33  ;;  %9470 = vmatprep.mubr.msk.bf16.mxu1 %vm10805_vm0, %v10803_v13 }
 0x88f   :  { %9480 = vmatprep.subr.bf16.mxu1 %v10803_v13 }
 0x89f   :  { %1136 = vrot.lane.b32.xlu0 %v10954_v26, %s10794_s16 }
 0x8a3   :  { %1291 = vrot.lane.b32.xlu0 %v10958_v30, %s10807_s29 }
 0x912   :  { %v1126_v35 = vpop.xlane.xlu0 %1125 }
 0x913   :  { %10460 = vrcp.f32 %v1126_v35 }
 0x916   :  { %v1137_v36 = vpop.permute.xlu0 %1136 }
 0x917   :  { %v1142_v23 = vsel %vm574_vm6, %v1137_v36, 0 }
 0x918   :  { %9449 = vmatpush3.bf16.msra.mxu0 %v1142_v23 }
 0x919   :  { %9460 = vmatprep.subr.bf16.mxu0 %v10803_v13 }
 0x91a   :  { %v1292_v29 = vpop.permute.xlu0 %1291 }
 0x91b   :  { %9471 = vmatmul.mubr.msk.bf16.vlgmr.msra.gmra.mxu1 %vm449_vm5, %v1292_v29 }
 0x91c   :  { %9482 = vmatprep.mubr.msk.bf16.mxu1 %vm10805_vm0, %v10803_v13 }
 0x920   :  { %v10461_v31 = vpop.eup %10460 }
 0x921   :  { %v1132_v37 = vmul.f32 %v10461_v31, %v10457_v19 }
 0x923   :  { %v1134_v38 = vpack.c.bf16 %v1132_v37, %v1132_v37 }
 0x925   :  { %9451 = vmatmul.mubr.msk.bf16.vlgmr.msra.gmra.mxu0 %vm546_vm9, %v1134_v38 }
 0x926   :  { %9464 = vmatprep.mubr.msk.bf16.mxu0 %vm10805_vm0, %v10803_v13  ;;  %9461 = vmatpush3.bf16.msra.mxu0 %v10146_v43  ;;  %v10149_v43 = vld [vmem:[#allocation2 + $0x12c] ss:$24 sps:$4 sm:$0xff]  }
 0x927   :  { %9462 = vmatprep.subr.bf16.mxu0 %v10803_v13 }
 0x92a   :  { %9463 = vmatpush3.bf16.msra.mxu0 %v10147_v46 }
 0x92b   :  { %9474 = vmatprep.subr.bf16.mxu0 %v10803_v13 }
 0x94d   :  { %v1226_v30 = vpop.f32.mrf.mxu1 }
 0x94f   :  { %v9458_v40 = vpop.f32.mrf.mxu1 }
 0x951   :  { %v1229_v41 = vpop.f32.mrf.mxu1 }
 0x953   :  { %v9459_v42 = vpop.f32.mrf.mxu1 }
 0x954   :  { %v10148_v42 = vld [vmem:[#allocation2 + $0x15c] ss:$24 sps:$4 sm:$0xff]  }
 0x9db   :  { %v1335_v47 = vpop.f32.mrf.mxu1 }
 0x9dc   :  { %v1391_v49 = vmul.f32 0.17677669, %v1335_v47 }
 0x9dd   :  { %v9472_v50 = vpop.f32.mrf.mxu1 }
 0x9de   :  { %v1393_v51 = vadd.f32 %v1391_v49, %v10987_v39 }
 0x9df   :  { %v1338_v52 = vpop.f32.mrf.mxu1 }
 0x9e0   :  { %v1395_v56 = vsel %vm546_vm9, %v1393_v51, -inf }
 0x9e1   :  { %1396 = vmax.xlane.f32.xlu0 %v1395_v56  ;;  %v9473_v57 = vpop.f32.mrf.mxu1 }
 0x9e5   :  { %v1178_v60 = vpop.f32.mrf.mxu0 }
 0x9e6   :  { %v1232_v61 = vpack.c.bf16 %v1226_v30, %v1178_v60  ;;  %v11156_v60 = vsub.s32 3, %v10911_v53 }
 0x9e7   :  { %v9452_v62 = vpop.f32.mrf.mxu0 }
 0x9e8   :  { %9465 = vmatmul.mubr.msk.bf16.vlgmr.msra.gmra.mxu0 %vm449_vm5, %v1232_v61  ;;  %v1577_v61 = vrot.slane %v10919_v55, %v11156_v60  ;;  %v2008_v55 = vld [vmem:[%s12362_s0 + $0x8] sm:$0xff] }
 0x9e9   :  { %9475 = vmatpush3.bf16.xpose.msra.mxu0 %v1349_v63  ;;  %v1181_v0 = vpop.f32.mrf.mxu0  ;;  %9476 = vmatprep.mubr.msk.bf16.mxu0 %vm10805_vm0, %v10803_v13 }
 0x9ea   :  { %9486 = vmatprep.subr.bf16.mxu0 %v10803_v13 }
 0x9eb   :  { %v9453_v1 = vpop.f32.mrf.mxu0 }
 0x9f0   :  { %9477 = vmatmul.mubr.msk.bf16.vlgmr.msra.gmra.mxu0 %vm449_vm5, %v1342_v3 }
 0x9f1   :  { %9488 = vmatprep.mubr.msk.bf16.mxu0 %vm10805_vm0, %v10803_v13 }
 0xa6a   :  { %v1397_v4 = vpop.xlane.xlu0 %1396 }
 0xa6b   :  { %v1401_v25 = vsub.f32 %v1393_v51, %v1397_v4 }
 0xa6d   :  { %v1403_v6 = vmul.f32 1.442695, %v1401_v25  ;;  %v10670_v25 = vld [vmem:[%s12363_s1] sm:$0xff] }
 0xa6f   :  { %10462 = vpow2.f32 %v1403_v6 }
 0xa7c   :  { %v10463_v7 = vpop.eup %10462 }
 0xa7d   :  { %v1407_v34 = vsel %vm546_vm9, %v10463_v7, 0.0 }
 0xa7e   :  { %1408 = vadd.xlane.f32.xlu0 %v1407_v34 }
 0xaa8   :  { %v1282_v9 = vpop.f32.mrf.mxu0 }
 0xaa9   :  { %v1289_v10 = vadd.f32 %v1282_v9, %v1002_v8  ;;  %v10671_v8 = vld [vmem:[%s12363_s1 + $0x8] sm:$0xff] }
 0xaaa   :  { %v9466_v11 = vpop.f32.mrf.mxu0 }
 0xaac   :  { %v1285_v14 = vpop.f32.mrf.mxu0 }
 0xaad   :  { %v1290_v15 = vadd.f32 %v1285_v14, %v1005_v12 }
 0xaae   :  { %v9467_v16 = vpop.f32.mrf.mxu0 }
 0xab0   :  { %v1385_v17 = vpop.f32.mrf.mxu0 }
 0xab1   :  { %v1392_v19 = vmul.f32 0.17677669, %v1385_v17 }
 0xab2   :  { %v9478_v20 = vpop.f32.mrf.mxu0 }
 0xab3   :  { %v1394_v21 = vadd.f32 %v1392_v19, %v10992_v45 }
 0xab4   :  { %v1388_v22 = vpop.f32.mrf.mxu0 }
 0xab5   :  { %v1398_v24 = vsel %vm546_vm9, %v1394_v21, -inf }
 0xab6   :  { %1399 = vmax.xlane.f32.xlu1 %v1398_v24  ;;  %v9479_v28 = vpop.f32.mrf.mxu0 }
 0xac7   :  { %1467 = vrot.lane.b32.xlu1 %v10961_v32, %s10807_s29 }
 0xb07   :  { %v1409_v23 = vpop.xlane.xlu0 %1408 }
 0xb3f   :  { %v1400_v44 = vpop.xlane.xlu1 %1399 }
 0xb40   :  { %v1402_v2 = vsub.f32 %v1394_v21, %v1400_v44 }
 0xb42   :  { %v1405_v33 = vmul.f32 1.442695, %v1402_v2 }
 0xb43   :  { %v1468_v48 = vpop.permute.xlu1 %1467 }
 0xb44   :  { %10464 = vpow2.f32 %v1405_v33  ;;  %v1473_v18 = vsel %vm574_vm6, %v1468_v48, 0 }
 0xb45   :  { %9487 = vmatpush3.bf16.msra.mxu0 %v1473_v18  ;;  %10466 = vrcp.f32 %v1409_v23  ;;  %v10152_v18 = vld [vmem:[#allocation2 + $0x164] ss:$24 sps:$4 sm:$0xff]   ;;  %v10153_v23 = vld [vmem:[#allocation2 + $0x130] ss:$24 sps:$4 sm:$0xff]  }
 0xb46   :  { %1735 = vmatprep.subr.bf16.mxu0 %v10152_v18 }
 0xb51   :  { %v10465_v35 = vpop.eup %10464 }
 0xb52   :  { %v1410_v36 = vsel %vm546_vm9, %v10465_v35, 0.0  ;;  %v10467_v29 = vpop.eup %10466 }
 0xb53   :  { %1411 = vadd.xlane.f32.xlu0 %v1410_v36  ;;  %v1415_v32 = vmul.f32 %v10467_v29, %v10463_v7  ;;  %v10155_v36 = vld [vmem:[#allocation2 + $0x134] ss:$24 sps:$4 sm:$0xff]   ;;  %v10158_v29 = vld [vmem:[#allocation2 + $0x104] ss:$24 sps:$4 sm:$0xff]  }
 0xb55   :  { %v1417_v30 = vpack.c.bf16 %v1415_v32, %v1415_v32  ;;  %v10161_v32 = vld [vmem:[#allocation2 + $0xd4] ss:$24 sps:$4 sm:$0xff]  }
 0xb69   :  { %1419 = vrot.lane.b32.xlu0 %v10954_v26, %s10807_s29 }
 0xbdc   :  { %v1412_v31 = vpop.xlane.xlu0 %1411 }
 0xbdd   :  { %10468 = vrcp.f32 %v1412_v31  ;;  %v10156_v31 = vld [vmem:[#allocation2 + $0x100] ss:$24 sps:$4 sm:$0xff]  }
 0xbe0   :  { %v1420_v37 = vpop.permute.xlu0 %1419 }
 0xbe1   :  { %v1425_v38 = vsel %vm574_vm6, %v1420_v37, 0  ;;  %v10159_v37 = vld [vmem:[#allocation2 + $0xd0] ss:$24 sps:$4 sm:$0xff]  }
 0xbe2   :  { %9481 = vmatpush3.bf16.msra.mxu1 %v1425_v38  ;;  %v10162_v38 = vld [vmem:[#allocation2 + $0xa0] ss:$24 sps:$4 sm:$0xff]  }
 0xbe3   :  { %9492 = vmatprep.subr.bf16.mxu1 %v10803_v13 }
 0xbe5   :  { %9483 = vmatmul.mubr.msk.bf16.vlgmr.msra.gmra.mxu1 %vm546_vm9, %v1417_v30  ;;  %v10164_v30 = vld [vmem:[#allocation2 + $0xa4] ss:$24 sps:$4 sm:$0xff]  }
 0xbe6   :  { %9496 = vmatprep.mubr.msk.bf16.mxu1 %vm10805_vm0, %v10803_v13  ;;  %9493 = vmatpush3.bf16.msra.mxu1 %v10148_v42  ;;  %v10168_v42 = vld [vmem:[#allocation2 + $0x40] ss:$24 sps:$4 sm:$0xff]  }
 0xbe7   :  { %9494 = vmatprep.subr.bf16.mxu1 %v10803_v13 }
 0xbea   :  { %v10469_v40 = vpop.eup %10468  ;;  %9495 = vmatpush3.bf16.msra.mxu1 %v10149_v43  ;;  %v10173_v43 = vld [vmem:[#allocation2 + $0x14] ss:$24 sps:$4 sm:$0xff]  }
 0xbeb   :  { %v1416_v26 = vmul.f32 %v10469_v40, %v10465_v35  ;;  %v10150_v35 = vld [vmem:[#allocation2 + $0x160] ss:$24 sps:$4 sm:$0xff]   ;;  %v10167_v40 = vld [vmem:[#allocation2 + $0x74] ss:$24 sps:$4 sm:$0xff]  }
 0xbed   :  { %v1418_v41 = vpack.c.bf16 %v1416_v26, %v1416_v26  ;;  %v10165_v26 = vld [vmem:[#allocation2 + $0x70] ss:$24 sps:$4 sm:$0xff]  }
 0xbef   :  { %9489 = vmatmul.mubr.msk.bf16.vlgmr.msra.gmra.mxu0 %vm546_vm9, %v1418_v41  ;;  %v10170_v41 = vld [vmem:[#allocation2 + $0x44] ss:$24 sps:$4 sm:$0xff]  }
 0xbf0   :  { %1767 = vmatprep.mubr.bf16.mxu0 %v10804_v27  ;;  %1736 = vmatpush1.bf16.msra.mxu0 %v10150_v35 }
 0xbf1   :  { %1737 = vmatprep.subr.bf16.mxu0 %v10155_v36 }
 0xbf4   :  { %1738 = vmatpush1.bf16.msra.mxu0 %v10153_v23 }
 0xbf5   :  { %1739 = vmatprep.subr.bf16.mxu0 %v10158_v29  ;;  %v11200_v29 = vld [vmem:[%s12366_s4 + $0x8] sm:$0x1f] }
 0xbf8   :  { %1740 = vmatpush1.bf16.msra.mxu0 %v10156_v31  ;;  %v1621_v31 = vrot.slane %v11200_v29, %v10914_v54 }
 0xbf9   :  { %1741 = vmatprep.subr.bf16.mxu0 %v10161_v32 }
 0xbfc   :  { %1742 = vmatpush1.bf16.msra.mxu0 %v10159_v37 }
 0xbfd   :  { %1743 = vmatprep.subr.bf16.mxu0 %v10164_v30 }
 0xc00   :  { %1744 = vmatpush1.bf16.msra.mxu0 %v10162_v38 }
 0xc01   :  { %1745 = vmatprep.subr.bf16.mxu0 %v10167_v40  ;;  %v1627_v40 = vrot.slane %v11200_v29, %v10925_v59 }
 0xc04   :  { %1746 = vmatpush1.bf16.msra.mxu0 %v10165_v26 }
 0xc05   :  { %1747 = vmatprep.subr.bf16.mxu0 %v10170_v41 }
 0xc08   :  { %1748 = vmatpush1.bf16.msra.mxu0 %v10168_v42 }
 0xc09   :  { %1749 = vmatprep.subr.bf16.mxu0 %v10173_v43 }
 0xca5   :  { %v1461_v46 = vpop.f32.mrf.mxu1 }
 0xca7   :  { %v9484_v47 = vpop.f32.mrf.mxu1 }
 0xca8   :  { %v10176_v47 = vld [vmem:[#allocation7 + $0x234] ss:$40 sps:$4 sm:$0xff]  }
 0xca9   :  { %v1464_v49 = vpop.f32.mrf.mxu1 }
 0xcaa   :  { %v10198_v49 = vld [vmem:[#allocation5 + $0x78] sm:$0xff]  }
 0xcab   :  { %v9485_v50 = vpop.f32.mrf.mxu1  ;;  %9074 = vmatprep.subr.bf16.mxu1 %v10198_v49 }
 0xcac   :  { %v10199_v50 = vld [vmem:[#allocation5 + $0x38] sm:$0xff]  }
 0xcaf   :  { %v1509_v51 = vpop.f32.mrf.mxu0 }
 0xcb0   :  { %v1515_v52 = vpack.c.bf16 %v1509_v51, %v1461_v46  ;;  %v10171_v46 = vld [vmem:[#allocation2 + $0x10] ss:$24 sps:$4 sm:$0xff]  }
 0xcb1   :  { %v9490_v56 = vpop.f32.mrf.mxu0  ;;  %1750 = vmatpush1.bf16.msra.mxu0 %v10171_v46  ;;  %v10200_v51 = vld [vmem:[#allocation5 + $0x70] sm:$0xff]  }
 0xcb2   :  { %9497 = vmatmul.mubr.msk.bf16.vlgmr.msra.gmra.mxu1 %vm449_vm5, %v1515_v52  ;;  %2233 = vmatprep.subr.bf16.mxu0 %v10176_v47  ;;  %v10201_v52 = vld [vmem:[#allocation5 + $0x30] sm:$0xff]   ;;  %v10202_v56 = vld [vmem:[#allocation5 + $0x68] sm:$0xff]  }
 0xcb3   :  { %v1512_v57 = vpop.f32.mrf.mxu0  ;;  %9075 = vmatpush3.bf16.msra.mxu1 %v10199_v50 }
 0xcb4   :  { %9076 = vmatprep.subr.bf16.mxu1 %v10200_v51  ;;  %v10203_v57 = vld [vmem:[#allocation5 + $0x28] sm:$0xff]   ;;  %v10174_v51 = vld [vmem:[#allocation7 + $0x230] ss:$40 sps:$4 sm:$0xff]  }
 0xcb5   :  { %v9491_v58 = vpop.f32.mrf.mxu0 }
 0xcb6   :  { %v10204_v58 = vld [vmem:[#allocation5 + $0x60] sm:$0xff]  }
 0xcb7   :  { %9077 = vmatpush3.bf16.msra.mxu1 %v10201_v52 }
 0xcb8   :  { %9078 = vmatprep.subr.bf16.mxu1 %v10202_v56 }
 0xcbb   :  { %9079 = vmatpush3.bf16.msra.mxu1 %v10203_v57  ;;  %v10179_v57 = vld [vmem:[#allocation7 + $0x1e4] ss:$40 sps:$4 sm:$0xff]  }
 0xcbc   :  { %9080 = vmatprep.subr.bf16.mxu1 %v10204_v58  ;;  %v10177_v58 = vld [vmem:[#allocation7 + $0x1e0] ss:$40 sps:$4 sm:$0xff]  }
 0xd72   :  { %v1565_v62 = vpop.f32.mrf.mxu1 }
 0xd73   :  { %v1572_v63 = vadd.f32 %v1565_v62, %v1289_v10  ;;  %v2007_v10 = vld [vmem:[%s12362_s0] sm:$0xff]  ;;  %v10206_v62 = vld [vmem:[#allocation5 + $0x58] sm:$0xff]  }
 0xd74   :  { %v9498_v0 = vpop.f32.mrf.mxu1 }
 0xd75   :  { %v1578_v1 = vadd.f32 %v1577_v61, %v1572_v63  ;;  %v10207_v63 = vld [vmem:[#allocation5 + $0x18] sm:$0xff]  }
 0xd76   :  { %v1568_v3 = vpop.f32.mrf.mxu1 }
 0xd77   :  { %v1573_v4 = vadd.f32 %v1568_v3, %v1290_v15  ;;  %v11163_v6 = vadd.f32 %v10670_v25, %v1578_v1 }
 0xd78   :  { %v9499_v7 = vpop.f32.mrf.mxu1 }
 0xd79   :  { %v1579_v34 = vadd.f32 %v1577_v61, %v1573_v4  ;;  %1582 = vadd.xlane.f32.xlu1 %v11163_v6  ;;  %v10205_v61 = vld [vmem:[#allocation5 + $0x20] sm:$0xff]  }
 0xd7a   :  { %9081 = vmatpush3.bf16.msra.mxu1 %v10205_v61  ;;  %v10180_v61 = vld [vmem:[#allocation7 + $0x190] ss:$40 sps:$4 sm:$0xff]  }
 0xd7b   :  { %v11172_v9 = vadd.f32 %v10671_v8, %v1579_v34  ;;  %9082 = vmatprep.subr.bf16.mxu1 %v10206_v62  ;;  %v10185_v62 = vld [vmem:[#allocation7 + $0x144] ss:$40 sps:$4 sm:$0xff]  }
 0xd7d   :  { %1584 = vadd.xlane.f32.xlu0 %v11172_v9  ;;  %2014 = vadd.xlane.f32.xlu1 %v2008_v55 }
 0xd7e   :  { %9083 = vmatpush3.bf16.msra.mxu1 %v10207_v63  ;;  %v10183_v63 = vld [vmem:[#allocation7 + $0x140] ss:$40 sps:$4 sm:$0xff]  }
 0xd81   :  { %2012 = vadd.xlane.f32.xlu0 %v2007_v10 }
 0xe02   :  { %v1583_v11 = vpop.xlane.xlu1 %1582 }
 0xe03   :  { %v1586_v12 = vmul.f32 0.0078125, %v1583_v11 }
 0xe05   :  { %v11179_v14 = vsub.f32 %v11163_v6, %v1586_v12 }
 0xe06   :  { %v1585_v15 = vpop.xlane.xlu0 %1584  ;;  %v2015_v16 = vpop.xlane.xlu1 %2014 }
 0xe07   :  { %v1587_v17 = vmul.f32 0.0078125, %v1585_v15  ;;  %v1590_v19 = vmul.f32 %v11179_v14, %v11179_v14  ;;  %v2017_v20 = vmul.f32 0.0078125, %v2015_v16 }
 0xe09   :  { %1592 = vadd.xlane.f32.xlu0 %v1590_v19  ;;  %v11184_v21 = vsub.f32 %v11172_v9, %v1587_v17  ;;  %v11186_v22 = vsub.f32 %v2008_v55, %v2017_v20 }
 0xe0a   :  { %v2013_v24 = vpop.xlane.xlu0 %2012 }
 0xe0b   :  { %v2016_v28 = vmul.f32 0.0078125, %v2013_v24  ;;  %v1591_v44 = vmul.f32 %v11184_v21, %v11184_v21  ;;  %v2021_v2 = vmul.f32 %v11186_v22, %v11186_v22 }
 0xe0d   :  { %1594 = vadd.xlane.f32.xlu1 %v1591_v44  ;;  %v11192_v33 = vsub.f32 %v2007_v10, %v2016_v28 }
 0xe0f   :  { %v2020_v48 = vmul.f32 %v11192_v33, %v11192_v33 }
 0xe11   :  { %2024 = vadd.xlane.f32.xlu1 %v2021_v2  ;;  %2022 = vadd.xlane.f32.xlu0 %v2020_v48 }
 0xe92   :  { %v1593_v0 = vpop.xlane.xlu0 %1592 }
 0xe93   :  { %v1596_v1 = vmul.f32 0.007874016, %v1593_v0  ;;  %v10188_v0 = vld [vmem:[#allocation7 + $0xf4] ss:$40 sps:$4 sm:$0xff]  }
 0xe95   :  { %10470 = vrsqrt.f32 %v1596_v1  ;;  %vm1600_vm10 = vcmp.eq.f32.partialorder %v1596_v1, inf  ;;  %v1603_v11 = vand.u32 2147483648, %v1596_v1  ;;  %vm1602_vm11 = vcmp.eq.f32.partialorder %v1596_v1, 0.0 }
 0xe96   :  { %v1595_v3 = vpop.xlane.xlu1 %1594 }
 0xe97   :  { %v1597_v4 = vmul.f32 0.007874016, %v1595_v3 }
 0xe99   :  { %10472 = vrsqrt.f32 %v1597_v4  ;;  %vm1607_vm12 = vcmp.eq.f32.partialorder %v1597_v4, inf  ;;  %v1610_v20 = vand.u32 2147483648, %v1597_v4  ;;  %vm1609_vm13 = vcmp.eq.f32.partialorder %v1597_v4, 0.0 }
 0xe9a   :  { %v2025_v25 = vpop.xlane.xlu1 %2024  ;;  %v2023_v7 = vpop.xlane.xlu0 %2022 }
 0xe9b   :  { %v2027_v55 = vmul.f32 0.007874016, %v2025_v25  ;;  %v2026_v10 = vmul.f32 0.007874016, %v2023_v7  ;;  %v11211_v7 = vld [vmem:[%s12369_s7] sm:$0x7f] }
 0xe9d   :  { %10474 = vrsqrt.f32 %v2027_v55  ;;  %vm2037_vm14 = vcmp.eq.f32.partialorder %v2027_v55, inf  ;;  %vm2030_vm15 = vcmp.eq.f32.partialorder %v2026_v10, inf  ;;  %v2040_v32 = vand.u32 2147483648, %v2027_v55 }
 0xe9e   :  { %10476 = vrsqrt.f32 %v2026_v10  ;;  %vm2039_vm1 = vcmp.eq.f32.partialorder %v2027_v55, 0.0  ;;  %v2033_v30 = vand.u32 2147483648, %v2026_v10  ;;  %vm2032_vm2 = vcmp.eq.f32.partialorder %v2026_v10, 0.0 }
 0xea2   :  { %v10471_v34 = vpop.eup %10470 }
 0xea3   :  { %v1599_v8 = vmul.f32 %v10471_v34, %v1596_v1  ;;  %v10189_v34 = vld [vmem:[#allocation7 + $0xa0] ss:$40 sps:$4 sm:$0xff]  }
 0xea5   :  { %v1601_v12 = vsel %vm1600_vm10, %v1596_v1, %v1599_v8  ;;  %v10186_v1 = vld [vmem:[#allocation7 + $0xf0] ss:$40 sps:$4 sm:$0xff]  }
 0xea6   :  { %v10473_v15 = vpop.eup %10472  ;;  %v1604_v16 = vsel %vm1602_vm11, %v1603_v11, %v1601_v12  ;;  %v2051_v11 = vrot.slane %v11211_v7, %v10914_v54  ;;  %v10192_v12 = vld [vmem:[#allocation7 + $0x50] ss:$40 sps:$4 sm:$0xff]  }
 0xea7   :  { %v1612_v17 = vadd.f32 1e-06, %v1604_v16  ;;  %v1606_v19 = vmul.f32 %v10473_v15, %v1597_v4  ;;  %v10197_v15 = vld [vmem:[#allocation7 + $0x4] ss:$40 sps:$4 sm:$0xff]  }
 0xea9   :  { %10478 = vrcp.f32 %v1612_v17  ;;  %v1608_v24 = vsel %vm1607_vm12, %v1597_v4, %v1606_v19  ;;  %v10191_v4 = vld [vmem:[#allocation7 + $0xa4] ss:$40 sps:$4 sm:$0xff]   ;;  %v2057_v19 = vrot.slane %v11211_v7, %v10925_v59 }
 0xeaa   :  { %v1611_v28 = vsel %vm1609_vm13, %v1610_v20, %v1608_v24  ;;  %v10475_v2 = vpop.eup %10474  ;;  %v10195_v20 = vld [vmem:[#allocation7] ss:$40 sps:$4 sm:$0xff]  }
 0xeab   :  { %v1613_v44 = vadd.f32 1e-06, %v1611_v28  ;;  %v10477_v48 = vpop.eup %10476  ;;  %v2036_v35 = vmul.f32 %v10475_v2, %v2027_v55  ;;  %v10210_v2 = vld [vmem:[#allocation5 + $0x48] sm:$0xff]  }
 0xeac   :  { %v2029_v36 = vmul.f32 %v10477_v48, %v2026_v10  ;;  %v10211_v48 = vld [vmem:[#allocation5 + $0x8] sm:$0xff]  }
 0xead   :  { %10480 = vrcp.f32 %v1613_v44  ;;  %v2038_v38 = vsel %vm2037_vm14, %v2027_v55, %v2036_v35  ;;  %v10194_v55 = vld [vmem:[#allocation7 + $0x54] ss:$40 sps:$4 sm:$0xff]   ;;  %v10213_v35 = vld [vmem:[#allocation5] sm:$0xff]  }
 0xeae   :  { %v2031_v26 = vsel %vm2030_vm15, %v2026_v10, %v2029_v36  ;;  %v2041_v42 = vsel %vm2039_vm1, %v2040_v32, %v2038_v38  ;;  %v10209_v44 = vld [vmem:[#allocation5 + $0x10] sm:$0xff]   ;;  %v11227_v36 = vsub.s32 4, %v10911_v53  ;;  %v10673_v32 = vld [vmem:[%s12366_s4] sm:$0x1f] }
 0xeaf   :  { %v2034_v46 = vsel %vm2032_vm2, %v2033_v30, %v2031_v26  ;;  %v2043_v50 = vadd.f32 1e-06, %v2041_v42 }
 0xeb0   :  { %v2042_v52 = vadd.f32 1e-06, %v2034_v46 }
 0xeb1   :  { %10482 = vrcp.f32 %v2043_v50 }
 0xeb2   :  { %10484 = vrcp.f32 %v2042_v52 }
 0xeb6   :  { %v10479_v18 = vpop.eup %10478 }
 0xeb7   :  { %v1616_v23 = vmul.f32 %v10479_v18, %v11179_v14  ;;  %v10212_v18 = vld [vmem:[#allocation5 + $0x40] sm:$0xff]  }
 0xeb9   :  { %v1622_v41 = vmul.f32 %v1621_v31, %v1616_v23 }
 0xeba   :  { %v10481_v37 = vpop.eup %10480 }
 0xebb   :  { %v1617_v14 = vmul.f32 %v10481_v37, %v11184_v21  ;;  %v1628_v47 = vadd.f32 %v1627_v40, %v1622_v41  ;;  %v10182_v21 = vld [vmem:[#allocation7 + $0x194] ss:$40 sps:$4 sm:$0xff]   ;;  %v1650_v37 = vrot.slane %v10673_v32, %v11227_v36 }
 0xebd   :  { %v1623_v43 = vmul.f32 %v1621_v31, %v1617_v14  ;;  %v1654_v31 = vrot.slane %v11200_v29, %v11227_v36 }
 0xebe   :  { %v10483_v3 = vpop.eup %10482 }
 0xebf   :  { %v1629_v49 = vadd.f32 %v1627_v40, %v1623_v43  ;;  %v10485_v25 = vpop.eup %10484  ;;  %v2047_v10 = vmul.f32 %v10483_v3, %v11186_v22  ;;  %v10208_v22 = vld [vmem:[#allocation5 + $0x50] sm:$0xff]  }
 0xec0   :  { %v2046_v8 = vmul.f32 %v10485_v25, %v11192_v33  ;;  %9084 = vmatprep.subr.bf16.mxu1 %v10208_v22 }
 0xec1   :  { %v1646_v56 = vpack.c.bf16 %v1629_v49, %v1628_v47  ;;  %v2053_v17 = vmul.f32 %v2051_v11, %v2047_v10  ;;  %9085 = vmatpush3.bf16.msra.mxu1 %v10209_v44 }
 0xec2   :  { %v2052_v16 = vmul.f32 %v2051_v11, %v2046_v8  ;;  %9086 = vmatprep.subr.bf16.mxu1 %v10210_v2 }
 0xec3   :  { %1768 = vmatmul.mubr.bf16.vlgmr.msra.gmra.mxu0 %v1646_v56  ;;  %v2059_v28 = vadd.f32 %v2057_v19, %v2053_v17  ;;  %v10215_v56 = vld [vmem:[#allocation7 + $0x1e8] ss:$40 sps:$4 sm:$0xff]  }
 0xec4   :  { %2234 = vmatpush1.bf16.msra.mxu0 %v10174_v51  ;;  %2265 = vmatprep.mubr.bf16.mxu0 %v10804_v27  ;;  %v2058_v24 = vadd.f32 %v2057_v19, %v2052_v16  ;;  %v10214_v51 = vld [vmem:[#allocation7 + $0x238] ss:$40 sps:$4 sm:$0xff]  }
 0xec5   :  { %2235 = vmatprep.subr.bf16.mxu0 %v10179_v57  ;;  %9087 = vmatpush3.bf16.msra.mxu1 %v10211_v48  ;;  %v10216_v57 = vld [vmem:[#allocation7 + $0x198] ss:$40 sps:$4 sm:$0xff]   ;;  %v11280_v48 = vrot.slane %v11200_v29, %v11156_v60 }
 0xec6   :  { %v11219_v33 = vpack.c.bf16 %v2059_v28, %v2058_v24  ;;  %9088 = vmatprep.subr.bf16.mxu1 %v10212_v18 }
 0xec8   :  { %2236 = vmatpush1.bf16.msra.mxu0 %v10177_v58  ;;  %v10217_v58 = vld [vmem:[#allocation7 + $0x148] ss:$40 sps:$4 sm:$0xff]  }
 0xec9   :  { %2237 = vmatprep.subr.bf16.mxu0 %v10182_v21  ;;  %9089 = vmatpush3.bf16.msra.mxu1 %v10213_v35  ;;  %v10218_v21 = vld [vmem:[#allocation7 + $0xf8] ss:$40 sps:$4 sm:$0xff]  }
 0xeca   :  { %9500 = vmatprep.subr.bf16.mxu1 %v10803_v13 }
 0xecc   :  { %2238 = vmatpush1.bf16.msra.mxu0 %v10180_v61  ;;  %v2010_v61 = vld [vmem:[%s12369_s7 + $0x8] sm:$0x7f] }
 0xecd   :  { %2239 = vmatprep.subr.bf16.mxu0 %v10185_v62  ;;  %v2100_v62 = vrot.slane %v2010_v61, %v10938_v5 }
 0xed0   :  { %2240 = vmatpush1.bf16.msra.mxu0 %v10183_v63  ;;  %v10219_v63 = vld [vmem:[#allocation7 + $0xa8] ss:$40 sps:$4 sm:$0xff]  }
 0xed1   :  { %2241 = vmatprep.subr.bf16.mxu0 %v10188_v0 }
 0xed4   :  { %2242 = vmatpush1.bf16.msra.mxu0 %v10186_v1 }
 0xed5   :  { %2243 = vmatprep.subr.bf16.mxu0 %v10191_v4  ;;  %v10220_v4 = vld [vmem:[#allocation7 + $0x58] ss:$40 sps:$4 sm:$0xff]  }
 0xed8   :  { %2244 = vmatpush1.bf16.msra.mxu0 %v10189_v34  ;;  %v2096_v34 = vrot.slane %v11211_v7, %v10938_v5 }
 0xed9   :  { %2245 = vmatprep.subr.bf16.mxu0 %v10194_v55 }
 0xedc   :  { %2246 = vmatpush1.bf16.msra.mxu0 %v10192_v12  ;;  %v10221_v12 = vld [vmem:[#allocation7 + $0x8] ss:$40 sps:$4 sm:$0xff]  }
 0xedd   :  { %2247 = vmatprep.subr.bf16.mxu0 %v10197_v15 }
 0xee0   :  { %2248 = vmatpush1.bf16.msra.mxu0 %v10195_v20 }
 0xee1   :  { %9520 = vmatprep.subr.bf16.mxu0 %v10803_v13 }
 0xee3   :  { %2266 = vmatmul.mubr.bf16.vlgmr.msra.gmra.mxu0 %v11219_v33 }
 0xee4   :  { %9522 = vmatprep.mubr.msk.bf16.mxu0 %vm10805_vm0, %v10803_v13 }
 0xf83   :  { %v1769_v23 = vpop.f32.mrf.mxu0 }
 0xf84   :  { %v1770_v14 = vadd.f32 %v1769_v23, %v1650_v37  ;;  %v2011_v23 = vld [vmem:[%s12369_s7 + $0x10] sm:$0x7f] }
 0xf85   :  { %v1771_v38 = vpop.f32.mrf.mxu0  ;;  %v2104_v32 = vrot.slane %v2011_v23, %v10938_v5 }
 0xf86   :  { %v1772_v40 = vadd.f32 %v1771_v38, %v1654_v31  ;;  %v1778_v49 = vmax.f32 %v1770_v14, 0.0  ;;  %v111_v14 = vld [vmem:[%s12365_s3 + $0x8] sm:$0xff] }
 0xf87   :  { %v1773_v30 = vpop.f32.mrf.mxu0  ;;  %vm113_vm4 = vcmp.eq.s32.totalorder %v111_v14, 0 }
 0xf88   :  { %v1774_v26 = vadd.f32 %v1773_v30, %v1650_v37  ;;  %v1779_v46 = vmax.f32 %v1772_v40, 0.0 }
 0xf89   :  { %v1775_v41 = vpop.f32.mrf.mxu0 }
 0xf8a   :  { %v1776_v42 = vadd.f32 %v1775_v41, %v1654_v31  ;;  %v1780_v43 = vmax.f32 %v1774_v26, 0.0  ;;  %v110_v31 = vld [vmem:[%s12365_s3] sm:$0xff] }
 0xf8b   :  { %vm112_vm3 = vcmp.eq.s32.totalorder %v110_v31, 0 }
 0xf8c   :  { %v1781_v47 = vmax.f32 %v1776_v42, 0.0  ;;  %v1814_v52 = vpack.c.bf16 %v1780_v43, %v1778_v49  ;;  %v11293_v29 = vsel %vm112_vm3, -1e+09, %v10803_v13 }
 0xf8e   :  { %v1815_v50 = vpack.c.bf16 %v1781_v47, %v1779_v46 }
 0xf90   :  { %1948 = vmatprep.mubr.bf16.mxu1 %v1815_v50 }
 0xf91   :  { %1949 = vmatmul.mubr.bf16.vlgmr.msra.gmra.mxu1 %v1814_v52 }
 0xf92   :  { %9501 = vmatpush3.bf16.msra.mxu1 %v10214_v51  ;;  %9516 = vmatprep.mubr.msk.bf16.mxu1 %vm10805_vm0, %v10803_v13 }
 0xf93   :  { %9502 = vmatprep.subr.bf16.mxu1 %v10803_v13 }
 0xf96   :  { %9503 = vmatpush3.bf16.msra.mxu1 %v10215_v56 }
 0xf97   :  { %9504 = vmatprep.subr.bf16.mxu1 %v10803_v13 }
 0xf9a   :  { %9505 = vmatpush3.bf16.msra.mxu1 %v10216_v57 }
 0xf9b   :  { %9506 = vmatprep.subr.bf16.mxu1 %v10803_v13 }
 0xf9e   :  { %9507 = vmatpush3.bf16.msra.mxu1 %v10217_v58 }
 0xf9f   :  { %9508 = vmatprep.subr.bf16.mxu1 %v10803_v13 }
 0xfa2   :  { %9509 = vmatpush3.bf16.msra.mxu1 %v10218_v21  ;;  %v11308_v21 = vsel %vm113_vm4, -1e+09, %v10803_v13 }
 0xfa3   :  { %v2267_v0 = vpop.f32.mrf.mxu0  ;;  %9510 = vmatprep.subr.bf16.mxu1 %v10803_v13 }
 0xfa4   :  { %v2268_v15 = vadd.f32 %v2267_v0, %v2096_v34 }
 0xfa5   :  { %v2269_v1 = vpop.f32.mrf.mxu0 }
 0xfa6   :  { %v2270_v3 = vadd.f32 %v2269_v1, %v2100_v62  ;;  %9511 = vmatpush3.bf16.msra.mxu1 %v10219_v63  ;;  %v11258_v17 = vpack.c.bf16 %v2268_v15, %v2268_v15 }
 0xfa7   :  { %v2271_v25 = vpop.f32.mrf.mxu0  ;;  %9512 = vmatprep.subr.bf16.mxu1 %v10803_v13 }
 0xfa8   :  { %v11249_v55 = vpack.c.bf16 %v2270_v3, %v2270_v3  ;;  %v2272_v20 = vadd.f32 %v2271_v25, %v2096_v34 }
 0xfa9   :  { %v2273_v8 = vpop.f32.mrf.mxu0 }
 0xfaa   :  { %v2274_v10 = vadd.f32 %v2273_v8, %v2100_v62  ;;  %9513 = vmatpush3.bf16.msra.mxu1 %v10220_v4  ;;  %v2343_v11 = vsel %vm449_vm5, %v11249_v55, 0  ;;  %v11270_v24 = vpack.c.bf16 %v2272_v20, %v2272_v20 }
 0xfab   :  { %9521 = vmatpush3.bf16.xpose.msra.mxu0 %v2343_v11  ;;  %9514 = vmatprep.subr.bf16.mxu1 %v10803_v13 }
 0xfac   :  { %9532 = vmatprep.subr.bf16.mxu0 %v10803_v13  ;;  %v11255_v16 = vpack.c.bf16 %v2274_v10, %v2274_v10 }
 0xfae   :  { %9515 = vmatpush3.bf16.msra.mxu1 %v10221_v12  ;;  %v2389_v19 = vsel %vm449_vm5, %v11255_v16, 0 }
 0xfaf   :  { %9526 = vmatprep.subr.bf16.mxu1 %v10803_v13 }
 0xfb1   :  { %9517 = vmatmul.mubr.bf16.vlgmr.msra.gmra.mxu1 %v11219_v33 }
 0xfb2   :  { %9523 = vmatmul.mubr.msk.bf16.vlgmr.msra.gmra.mxu0 %vm449_vm5, %v11258_v17  ;;  %9527 = vmatpush3.bf16.xpose.msra.mxu1 %v2389_v19 }
 0xfb3   :  { %9528 = vmatprep.mubr.msk.bf16.mxu1 %vm10805_vm0, %v10803_v13  ;;  %9538 = vmatprep.subr.bf16.mxu1 %v10803_v13 }
 0xfb4   :  { %9534 = vmatprep.mubr.msk.bf16.mxu0 %vm10805_vm0, %v10803_v13 }
 0xfb9   :  { %9529 = vmatmul.mubr.msk.bf16.vlgmr.msra.gmra.mxu1 %vm449_vm5, %v11270_v24 }
 0xfba   :  { %9540 = vmatprep.mubr.msk.bf16.mxu1 %vm10805_vm0, %v10803_v13 }
0x1051   :  { %v9090_v28 = vpop.f32.mrf.mxu1 }
0x1053   :  { %v9091_v33 = vpop.f32.mrf.mxu1 }
0x1054   :  { %v11276_v22 = vadd.f32 %v9091_v33, %v9090_v28 }
0x1055   :  { %v9093_v44 = vpop.f32.mrf.mxu1 }
0x1057   :  { %v9094_v2 = vpop.f32.mrf.mxu1 }
0x1058   :  { %v9095_v18 = vadd.f32 %v9094_v2, %v9093_v44 }
0x105a   :  { %v11283_v35 = vadd.f32 %v9095_v18, %v11280_v48 }
0x1071   :  { %v2310_v37 = vpop.f32.mrf.mxu1 }
0x1072   :  { %v2311_v38 = vadd.f32 %v2310_v37, %v2104_v32  ;;  %v2379_v30 = vpop.f32.mrf.mxu0 }
0x1073   :  { %v2431_v40 = vmul.f32 0.17677669, %v2379_v30  ;;  %v9518_v26 = vpop.f32.mrf.mxu1 }
0x1074   :  { %v11298_v41 = vpack.c.bf16 %v2311_v38, %v2311_v38  ;;  %v9524_v42 = vpop.f32.mrf.mxu0 }
0x1075   :  { %v2313_v43 = vpop.f32.mrf.mxu1  ;;  %v2433_v46 = vadd.f32 %v2431_v40, %v11293_v29 }
0x1076   :  { %v2314_v47 = vadd.f32 %v2313_v43, %v2104_v32  ;;  %v2382_v49 = vpop.f32.mrf.mxu0  ;;  %v2463_v50 = vsel %vm574_vm6, %v11298_v41, 0 }
0x1077   :  { %v9519_v51 = vpop.f32.mrf.mxu1  ;;  %9533 = vmatpush3.bf16.msra.mxu0 %v2463_v50  ;;  %v2435_v52 = vsel %vm546_vm9, %v2433_v46, -inf }
0x1078   :  { %v11304_v56 = vpack.c.bf16 %v2314_v47, %v2314_v47  ;;  %2436 = vmax.xlane.f32.xlu0 %v2435_v52  ;;  %v9525_v57 = vpop.f32.mrf.mxu0  ;;  %9544 = vmatprep.subr.bf16.mxu0 %v10803_v13 }
0x1079   :  { %v2425_v58 = vpop.f32.mrf.mxu1 }
0x107a   :  { %v2432_v61 = vmul.f32 0.17677669, %v2425_v58  ;;  %v2509_v62 = vsel %vm574_vm6, %v11304_v56, 0 }
0x107b   :  { %v9530_v63 = vpop.f32.mrf.mxu1  ;;  %9539 = vmatpush3.bf16.msra.mxu1 %v2509_v62 }
0x107c   :  { %v2434_v0 = vadd.f32 %v2432_v61, %v11308_v21  ;;  %9550 = vmatprep.subr.bf16.mxu1 %v10803_v13 }
0x107d   :  { %v2428_v1 = vpop.f32.mrf.mxu1 }
0x107e   :  { %v2438_v3 = vsel %vm546_vm9, %v2434_v0, -inf }
0x107f   :  { %2439 = vmax.xlane.f32.xlu1 %v2438_v3  ;;  %v9531_v4 = vpop.f32.mrf.mxu1 }
0x1090   :  { %2608 = vrot.lane.b32.xlu1 %v11255_v16, %s10806_s2 }
0x1101   :  { %v2437_v25 = vpop.xlane.xlu0 %2436 }
0x1102   :  { %v2441_v34 = vsub.f32 %v2433_v46, %v2437_v25 }
0x1104   :  { %v2443_v8 = vmul.f32 1.442695, %v2441_v34 }
0x1106   :  { %10486 = vpow2.f32 %v2443_v8 }
0x1108   :  { %v2440_v10 = vpop.xlane.xlu1 %2439 }
0x1109   :  { %v2442_v11 = vsub.f32 %v2434_v0, %v2440_v10 }
0x110b   :  { %v2445_v12 = vmul.f32 1.442695, %v2442_v11 }
0x110c   :  { %v2609_v44 = vpop.permute.xlu1 %2608 }
0x110d   :  { %10488 = vpow2.f32 %v2445_v12  ;;  %v2614_v26 = vsel %vm449_vm5, %v2609_v44, 0 }
0x1113   :  { %v10487_v15 = vpop.eup %10486 }
0x1114   :  { %v2447_v19 = vsel %vm546_vm9, %v10487_v15, 0.0 }
0x1115   :  { %2448 = vadd.xlane.f32.xlu0 %v2447_v19 }
0x111a   :  { %v10489_v20 = vpop.eup %10488 }
0x111b   :  { %v2450_v28 = vsel %vm546_vm9, %v10489_v20, 0.0 }
0x111c   :  { %2451 = vadd.xlane.f32.xlu1 %v2450_v28 }
0x112b   :  { %2556 = vrot.lane.b32.xlu0 %v11249_v55, %s10806_s2 }
0x112d   :  { %2553 = vrot.lane.b32.xlu1 %v11258_v17, %s10806_s2 }
0x1131   :  { %2605 = vrot.lane.b32.xlu1 %v11270_v24, %s10806_s2 }
0x119e   :  { %v2449_v33 = vpop.xlane.xlu0 %2448 }
0x119f   :  { %10490 = vrcp.f32 %v2449_v33 }
0x11a2   :  { %v2557_v31 = vpop.permute.xlu0 %2556 }
0x11a3   :  { %v2562_v37 = vsel %vm449_vm5, %v2557_v31, 0 }
0x11a5   :  { %v2452_v2 = vpop.xlane.xlu1 %2451 }
0x11a6   :  { %10492 = vrcp.f32 %v2452_v2 }
0x11a9   :  { %v2554_v14 = vpop.permute.xlu1 %2553 }
0x11ac   :  { %v10491_v18 = vpop.eup %10490 }
0x11ad   :  { %v2455_v23 = vmul.f32 %v10491_v18, %v10487_v15  ;;  %v2606_v42 = vpop.permute.xlu1 %2605 }
0x11af   :  { %v2457_v32 = vpack.c.bf16 %v2455_v23, %v2455_v23 }
0x11b1   :  { %9535 = vmatmul.mubr.msk.bf16.vlgmr.msra.gmra.mxu0 %vm546_vm9, %v2457_v32 }
0x11b2   :  { %9545 = vmatpush3.bf16.xpose.msra.mxu0 %v2562_v37  ;;  %9546 = vmatprep.mubr.msk.bf16.mxu0 %vm10805_vm0, %v10803_v13 }
0x11b3   :  { %v10493_v38 = vpop.eup %10492  ;;  %9556 = vmatprep.subr.bf16.mxu0 %v10803_v13 }
0x11b4   :  { %v2456_v30 = vmul.f32 %v10493_v38, %v10489_v20 }
0x11b6   :  { %v2458_v40 = vpack.c.bf16 %v2456_v30, %v2456_v30 }
0x11b8   :  { %9541 = vmatmul.mubr.msk.bf16.vlgmr.msra.gmra.mxu1 %vm546_vm9, %v2458_v40 }
0x11b9   :  { %9551 = vmatpush3.bf16.xpose.msra.mxu1 %v2614_v26  ;;  %9547 = vmatmul.mubr.msk.bf16.vlgmr.msra.gmra.mxu0 %vm449_vm5, %v2554_v14 }
0x11ba   :  { %9552 = vmatprep.mubr.msk.bf16.mxu1 %vm10805_vm0, %v10803_v13  ;;  %9562 = vmatprep.subr.bf16.mxu1 %v10803_v13 }
0x11bb   :  { %9558 = vmatprep.mubr.msk.bf16.mxu0 %vm10805_vm0, %v10803_v13 }
0x11c0   :  { %9553 = vmatmul.mubr.msk.bf16.vlgmr.msra.gmra.mxu1 %vm449_vm5, %v2606_v42 }
0x11c1   :  { %9564 = vmatprep.mubr.msk.bf16.mxu1 %vm10805_vm0, %v10803_v13 }
0x1271   :  { %v11341_v43 = vpop.f32.mrf.mxu0 }
0x1273   :  { %v9536_v46 = vpop.f32.mrf.mxu0 }
0x1275   :  { %v2502_v47 = vpop.f32.mrf.mxu0 }
0x1277   :  { %v9537_v49 = vpop.f32.mrf.mxu0 }
0x1278   :  { %v11343_v50 = vpop.f32.mrf.mxu1 }
0x1279   :  { %v2551_v51 = vpack.c.bf16 %v11343_v50, %v11341_v43  ;;  %v2598_v52 = vpop.f32.mrf.mxu0 }
0x127a   :  { %v2656_v57 = vmul.f32 0.17677669, %v2598_v52  ;;  %v9542_v58 = vpop.f32.mrf.mxu1 }
0x127b   :  { %v9548_v61 = vpop.f32.mrf.mxu0 }
0x127c   :  { %v2548_v62 = vpop.f32.mrf.mxu1  ;;  %v2658_v63 = vadd.f32 %v2656_v57, %v11293_v29  ;;  %v10222_v57 = vld [vmem:[#allocation7 + $0x5c] ss:$40 sps:$4 sm:$0xff]  }
0x127d   :  { %v2601_v0 = vpop.f32.mrf.mxu0  ;;  %v10223_v62 = vld [vmem:[#allocation7 + $0xc] ss:$40 sps:$4 sm:$0xff]  }
0x127e   :  { %v9543_v1 = vpop.f32.mrf.mxu1  ;;  %v2660_v3 = vsel %vm546_vm9, %v2658_v63, -inf }
0x127f   :  { %2661 = vmax.xlane.f32.xlu0 %v2660_v3  ;;  %v9549_v4 = vpop.f32.mrf.mxu0  ;;  %v10224_v3 = vld [vmem:[#allocation7 + $0xfc] ss:$40 sps:$4 sm:$0xff]  }
0x1280   :  { %v2650_v25 = vpop.f32.mrf.mxu1  ;;  %v10225_v4 = vld [vmem:[#allocation7 + $0xac] ss:$40 sps:$4 sm:$0xff]  }
0x1281   :  { %v2657_v34 = vmul.f32 0.17677669, %v2650_v25 }
0x1282   :  { %v9554_v8 = vpop.f32.mrf.mxu1 }
0x1283   :  { %v2659_v10 = vadd.f32 %v2657_v34, %v11308_v21 }
0x1284   :  { %v2653_v11 = vpop.f32.mrf.mxu1 }
0x1285   :  { %v2663_v12 = vsel %vm546_vm9, %v2659_v10, -inf }
0x1286   :  { %2664 = vmax.xlane.f32.xlu1 %v2663_v12  ;;  %v9555_v15 = vpop.f32.mrf.mxu1 }
0x1297   :  { %2734 = vrot.lane.b32.xlu1 %v11304_v56, %s10806_s2 }
0x129b   :  { %2897 = vrot.lane.b32.xlu1 %v11249_v55, %s10794_s16 }
0x129f   :  { %2947 = vrot.lane.b32.xlu1 %v11255_v16, %s10794_s16 }
0x12a3   :  { %2945 = vrot.lane.b32.xlu1 %v11270_v24, %s10794_s16 }
0x1308   :  { %v2662_v19 = vpop.xlane.xlu0 %2661 }
0x1309   :  { %v2666_v20 = vsub.f32 %v2658_v63, %v2662_v19 }
0x130b   :  { %v2668_v28 = vmul.f32 1.442695, %v2666_v20 }
0x130d   :  { %10494 = vpow2.f32 %v2668_v28 }
0x130f   :  { %v2665_v33 = vpop.xlane.xlu1 %2664 }
0x1310   :  { %v2667_v44 = vsub.f32 %v2659_v10, %v2665_v33 }
0x1312   :  { %v2670_v2 = vmul.f32 1.442695, %v2667_v44 }
0x1313   :  { %v2735_v18 = vpop.permute.xlu1 %2734 }
0x1314   :  { %10496 = vpow2.f32 %v2670_v2  ;;  %v2740_v23 = vsel %vm574_vm6, %v2735_v18, 0 }
0x1315   :  { %9563 = vmatpush3.bf16.msra.mxu1 %v2740_v23 }
0x1316   :  { %9576 = vmatprep.subr.bf16.mxu1 %v10803_v13 }
0x1317   :  { %v2898_v61 = vpop.permute.xlu1 %2897 }
0x1318   :  { %v2903_v11 = vsel %vm449_vm5, %v2898_v61, 0 }
0x131a   :  { %v10495_v31 = vpop.eup %10494 }
0x131b   :  { %v2672_v32 = vsel %vm546_vm9, %v10495_v31, 0.0  ;;  %v2948_v63 = vpop.permute.xlu1 %2947 }
0x131c   :  { %2673 = vadd.xlane.f32.xlu0 %v2672_v32  ;;  %v2953_v0 = vsel %vm449_vm5, %v2948_v63, 0 }
0x131f   :  { %v2946_v1 = vpop.permute.xlu1 %2945 }
0x1321   :  { %v10497_v37 = vpop.eup %10496 }
0x1322   :  { %v2675_v38 = vsel %vm546_vm9, %v10497_v37, 0.0 }
0x1323   :  { %2676 = vadd.xlane.f32.xlu0 %v2675_v38 }
0x1339   :  { %2685 = vrot.lane.b32.xlu0 %v11298_v41, %s10806_s2 }
0x133d   :  { %2895 = vrot.lane.b32.xlu0 %v11258_v17, %s10794_s16 }
0x13a5   :  { %v2674_v30 = vpop.xlane.xlu0 %2673 }
0x13a6   :  { %10498 = vrcp.f32 %v2674_v30 }
0x13ac   :  { %v2677_v40 = vpop.xlane.xlu0 %2676 }
0x13ad   :  { %10500 = vrcp.f32 %v2677_v40 }
0x13b0   :  { %v2686_v26 = vpop.permute.xlu0 %2685 }
0x13b1   :  { %v2691_v14 = vsel %vm574_vm6, %v2686_v26, 0 }
0x13b2   :  { %9557 = vmatpush3.bf16.msra.mxu0 %v2691_v14 }
0x13b3   :  { %v10499_v42 = vpop.eup %10498  ;;  %9568 = vmatprep.subr.bf16.mxu0 %v10803_v13 }
0x13b4   :  { %v2680_v46 = vmul.f32 %v10499_v42, %v10495_v31  ;;  %v2896_v20 = vpop.permute.xlu0 %2895 }
0x13b6   :  { %v2682_v47 = vpack.c.bf16 %v2680_v46, %v2680_v46 }
0x13b8   :  { %9559 = vmatmul.mubr.msk.bf16.vlgmr.msra.gmra.mxu0 %vm546_vm9, %v2682_v47 }
0x13b9   :  { %9572 = vmatprep.mubr.msk.bf16.mxu0 %vm10805_vm0, %v10803_v13  ;;  %9569 = vmatpush3.bf16.msra.mxu0 %v10224_v3 }
0x13ba   :  { %v10501_v49 = vpop.eup %10500  ;;  %9570 = vmatprep.subr.bf16.mxu0 %v10803_v13 }
0x13bb   :  { %v2681_v52 = vmul.f32 %v10501_v49, %v10497_v37 }
0x13bd   :  { %v2683_v58 = vpack.c.bf16 %v2681_v52, %v2681_v52  ;;  %9571 = vmatpush3.bf16.msra.mxu0 %v10225_v4 }
0x13be   :  { %9584 = vmatprep.subr.bf16.mxu0 %v10803_v13 }
0x13bf   :  { %9565 = vmatmul.mubr.msk.bf16.vlgmr.msra.gmra.mxu1 %vm546_vm9, %v2683_v58 }
0x13c0   :  { %9577 = vmatpush3.bf16.msra.mxu1 %v10222_v57  ;;  %9580 = vmatprep.mubr.msk.bf16.mxu1 %vm10805_vm0, %v10803_v13 }
0x13c1   :  { %9578 = vmatprep.subr.bf16.mxu1 %v10803_v13 }
0x13c4   :  { %9579 = vmatpush3.bf16.msra.mxu1 %v10223_v62 }
0x13c5   :  { %9590 = vmatprep.subr.bf16.mxu1 %v10803_v13 }
0x13c7   :  { %9581 = vmatmul.mubr.msk.bf16.vlgmr.msra.gmra.mxu1 %vm449_vm5, %v2551_v51 }
0x13c8   :  { %9591 = vmatpush3.bf16.xpose.msra.mxu1 %v2953_v0  ;;  %9592 = vmatprep.mubr.msk.bf16.mxu1 %vm10805_vm0, %v10803_v13 }
0x13c9   :  { %9602 = vmatprep.subr.bf16.mxu1 %v10803_v13 }
0x13cf   :  { %9593 = vmatmul.mubr.msk.bf16.vlgmr.msra.gmra.mxu1 %vm449_vm5, %v2946_v1 }
0x13d0   :  { %9604 = vmatprep.mubr.msk.bf16.mxu1 %vm10805_vm0, %v10803_v13 }
0x1478   :  { %v2727_v43 = vpop.f32.mrf.mxu0 }
0x147a   :  { %v9560_v50 = vpop.f32.mrf.mxu0 }
0x147c   :  { %v2730_v51 = vpop.f32.mrf.mxu0 }
0x147e   :  { %v9561_v25 = vpop.f32.mrf.mxu0 }
0x147f   :  { %v2776_v34 = vpop.f32.mrf.mxu1 }
0x1480   :  { %v2782_v8 = vpack.c.bf16 %v2776_v34, %v2727_v43 }
0x1481   :  { %v9566_v10 = vpop.f32.mrf.mxu1 }
0x1482   :  { %9573 = vmatmul.mubr.msk.bf16.vlgmr.msra.gmra.mxu0 %vm449_vm5, %v2782_v8 }
0x1483   :  { %9585 = vmatpush3.bf16.xpose.msra.mxu0 %v2903_v11  ;;  %v2779_v12 = vpop.f32.mrf.mxu1  ;;  %9586 = vmatprep.mubr.msk.bf16.mxu0 %vm10805_vm0, %v10803_v13 }
0x1484   :  { %9596 = vmatprep.subr.bf16.mxu0 %v10803_v13 }
0x1485   :  { %v9567_v15 = vpop.f32.mrf.mxu1 }
0x1487   :  { %v11395_v19 = vpop.f32.mrf.mxu1 }
0x1489   :  { %v9582_v28 = vpop.f32.mrf.mxu1 }
0x148a   :  { %9587 = vmatmul.mubr.msk.bf16.vlgmr.msra.gmra.mxu0 %vm449_vm5, %v2896_v20 }
0x148b   :  { %v11398_v33 = vpop.f32.mrf.mxu1  ;;  %9598 = vmatprep.mubr.msk.bf16.mxu0 %vm10805_vm0, %v10803_v13 }
0x148d   :  { %v9583_v44 = vpop.f32.mrf.mxu1 }
0x148f   :  { %v2989_v2 = vpop.f32.mrf.mxu1 }
0x1490   :  { %v2996_v18 = vmul.f32 0.17677669, %v2989_v2 }
0x1491   :  { %v9594_v23 = vpop.f32.mrf.mxu1 }
0x1492   :  { %v2998_v31 = vadd.f32 %v2996_v18, %v11308_v21 }
0x1493   :  { %v2992_v32 = vpop.f32.mrf.mxu1 }
0x1494   :  { %v3002_v37 = vsel %vm546_vm9, %v2998_v31, -inf }
0x1495   :  { %3003 = vmax.xlane.f32.xlu1 %v3002_v37  ;;  %v9595_v38 = vpop.f32.mrf.mxu1  ;;  %v10226_v37 = vld [vmem:[#allocation7 + $0x19c] ss:$40 sps:$4 sm:$0xff]  }
0x1496   :  { %v10227_v38 = vld [vmem:[#allocation7 + $0x14c] ss:$40 sps:$4 sm:$0xff]  }
0x14a6   :  { %3071 = vrot.lane.b32.xlu1 %v11304_v56, %s10794_s16 }
0x14aa   :  { %3180 = vrot.lane.b32.xlu1 %v11249_v55, %s10807_s29 }
0x14ae   :  { %3230 = vrot.lane.b32.xlu1 %v11255_v16, %s10807_s29 }
0x14b2   :  { %3228 = vrot.lane.b32.xlu1 %v11270_v24, %s10807_s29 }
0x151e   :  { %v3004_v30 = vpop.xlane.xlu1 %3003 }
0x151f   :  { %v3006_v14 = vsub.f32 %v2998_v31, %v3004_v30 }
0x1521   :  { %v3009_v42 = vmul.f32 1.442695, %v3006_v14 }
0x1522   :  { %v3072_v40 = vpop.permute.xlu1 %3071 }
0x1523   :  { %v3077_v26 = vsel %vm574_vm6, %v3072_v40, 0  ;;  %10502 = vpow2.f32 %v3009_v42 }
0x1524   :  { %9603 = vmatpush3.bf16.msra.mxu1 %v3077_v26 }
0x1525   :  { %9616 = vmatprep.subr.bf16.mxu1 %v10803_v13 }
0x1526   :  { %v3181_v8 = vpop.permute.xlu1 %3180 }
0x1527   :  { %v3186_v11 = vsel %vm449_vm5, %v3181_v8, 0 }
0x1530   :  { %v10503_v62 = vpop.eup %10502 }
0x1531   :  { %v3014_v0 = vsel %vm546_vm9, %v10503_v62, 0.0 }
0x1542   :  { %v11414_v46 = vpop.f32.mrf.mxu0 }
0x1544   :  { %v9574_v47 = vpop.f32.mrf.mxu0 }
0x1546   :  { %v11416_v55 = vpop.f32.mrf.mxu0 }
0x1547   :  { %v2892_v8 = vadd.f32 %v11398_v33, %v11416_v55  ;;  %v1951_v33 = vadd.f32 %v11276_v22, %v11280_v48 }
0x1548   :  { %v9575_v49 = vpop.f32.mrf.mxu0 }
0x154a   :  { %v2939_v16 = vpop.f32.mrf.mxu0 }
0x154b   :  { %v2995_v52 = vmul.f32 0.17677669, %v2939_v16  ;;  %v3231_v16 = vpop.permute.xlu1 %3230 }
0x154c   :  { %v9588_v57 = vpop.f32.mrf.mxu0 }
0x154d   :  { %v2997_v24 = vadd.f32 %v2995_v52, %v11293_v29 }
0x154e   :  { %v2942_v58 = vpop.f32.mrf.mxu0 }
0x154f   :  { %v2999_v61 = vsel %vm546_vm9, %v2997_v24, -inf  ;;  %v3236_v58 = vsel %vm449_vm5, %v3231_v16, 0 }
0x1550   :  { %3000 = vmax.xlane.f32.xlu0 %v2999_v61  ;;  %v9589_v63 = vpop.f32.mrf.mxu0 }
0x1551   :  { %v3229_v63 = vpop.permute.xlu1 %3228 }
0x1554   :  { %3015 = vadd.xlane.f32.xlu0 %v3014_v0 }
0x15d9   :  { %v3001_v1 = vpop.xlane.xlu0 %3000 }
0x15da   :  { %v3005_v3 = vsub.f32 %v2997_v24, %v3001_v1 }
0x15dc   :  { %v3007_v4 = vmul.f32 1.442695, %v3005_v3 }
0x15dd   :  { %v3016_v43 = vpop.xlane.xlu0 %3015 }
0x15de   :  { %10504 = vpow2.f32 %v3007_v4 }
0x15df   :  { %10506 = vrcp.f32 %v3016_v43 }
0x15eb   :  { %v10505_v50 = vpop.eup %10504 }
0x15ec   :  { %v10507_v51 = vpop.eup %10506  ;;  %v3011_v25 = vsel %vm546_vm9, %v10505_v50, 0.0 }
0x15ed   :  { %3012 = vadd.xlane.f32.xlu0 %v3011_v25  ;;  %v3020_v34 = vmul.f32 %v10507_v51, %v10503_v62 }
0x15ef   :  { %v3022_v10 = vpack.c.bf16 %v3020_v34, %v3020_v34 }
0x15f1   :  { %9605 = vmatmul.mubr.msk.bf16.vlgmr.msra.gmra.mxu1 %vm546_vm9, %v3022_v10 }
0x15f2   :  { %9617 = vmatpush3.bf16.xpose.msra.mxu1 %v3186_v11  ;;  %9618 = vmatprep.mubr.msk.bf16.mxu1 %vm10805_vm0, %v10803_v13 }
0x15f3   :  { %9628 = vmatprep.subr.bf16.mxu1 %v10803_v13 }
0x1603   :  { %3023 = vrot.lane.b32.xlu0 %v11298_v41, %s10794_s16 }
0x1607   :  { %3178 = vrot.lane.b32.xlu0 %v11258_v17, %s10807_s29 }
0x1676   :  { %v3013_v12 = vpop.xlane.xlu0 %3012 }
0x1677   :  { %10508 = vrcp.f32 %v3013_v12 }
0x167a   :  { %v3024_v15 = vpop.permute.xlu0 %3023 }
0x167b   :  { %v3029_v20 = vsel %vm574_vm6, %v3024_v15, 0 }
0x167c   :  { %9597 = vmatpush3.bf16.msra.mxu0 %v3029_v20 }
0x167d   :  { %9608 = vmatprep.subr.bf16.mxu0 %v10803_v13 }
0x167e   :  { %v3179_v28 = vpop.permute.xlu0 %3178 }
0x167f   :  { %9619 = vmatmul.mubr.msk.bf16.vlgmr.msra.gmra.mxu1 %vm449_vm5, %v3179_v28 }
0x1680   :  { %9630 = vmatprep.mubr.msk.bf16.mxu1 %vm10805_vm0, %v10803_v13 }
0x1684   :  { %v10509_v44 = vpop.eup %10508 }
0x1685   :  { %v3019_v2 = vmul.f32 %v10509_v44, %v10505_v50  ;;  %v2889_v50 = vadd.f32 %v11395_v19, %v11414_v46  ;;  %v11467_v46 = vadd.f32 %v1951_v33, %v11163_v6  ;;  %v1958_v6 = vadd.f32 %v11283_v35, %v11172_v9  ;;  %v10232_v33 = vld [vmem:[#allocation7 + $0x248] ss:$40 sps:$4 sm:$0xff]  }
0x1687   :  { %v3021_v18 = vpack.c.bf16 %v3019_v2, %v3019_v2 }
0x1689   :  { %9599 = vmatmul.mubr.msk.bf16.vlgmr.msra.gmra.mxu0 %vm546_vm9, %v3021_v18 }
0x168a   :  { %9612 = vmatprep.mubr.msk.bf16.mxu0 %vm10805_vm0, %v10803_v13  ;;  %9609 = vmatpush3.bf16.msra.mxu0 %v10226_v37 }
0x168b   :  { %9610 = vmatprep.subr.bf16.mxu0 %v10803_v13 }
0x168e   :  { %9611 = vmatpush3.bf16.msra.mxu0 %v10227_v38 }
0x168f   :  { %9622 = vmatprep.subr.bf16.mxu0 %v10803_v13 }
0x16b1   :  { %v3113_v17 = vpop.f32.mrf.mxu1 }
0x16b3   :  { %v9606_v23 = vpop.f32.mrf.mxu1 }
0x16b5   :  { %v3116_v31 = vpop.f32.mrf.mxu1 }
0x16b7   :  { %v9607_v32 = vpop.f32.mrf.mxu1 }
0x173f   :  { %v3222_v30 = vpop.f32.mrf.mxu1 }
0x1740   :  { %v3278_v40 = vmul.f32 0.17677669, %v3222_v30 }
0x1741   :  { %v9620_v26 = vpop.f32.mrf.mxu1 }
0x1742   :  { %v3280_v14 = vadd.f32 %v3278_v40, %v11293_v29 }
0x1743   :  { %v3225_v42 = vpop.f32.mrf.mxu1 }
0x1744   :  { %v3282_v47 = vsel %vm546_vm9, %v3280_v14, -inf  ;;  %v10228_v42 = vld [vmem:[#allocation7 + $0x23c] ss:$40 sps:$4 sm:$0xff]  }
0x1745   :  { %3283 = vmax.xlane.f32.xlu0 %v3282_v47  ;;  %v9621_v49 = vpop.f32.mrf.mxu1  ;;  %v10229_v47 = vld [vmem:[#allocation7 + $0x1ec] ss:$40 sps:$4 sm:$0xff]  }
0x1749   :  { %v3065_v52 = vpop.f32.mrf.mxu0 }
0x174a   :  { %v3119_v57 = vpack.c.bf16 %v3113_v17, %v3065_v52 }
0x174b   :  { %v9600_v24 = vpop.f32.mrf.mxu0 }
0x174c   :  { %9613 = vmatmul.mubr.msk.bf16.vlgmr.msra.gmra.mxu0 %vm449_vm5, %v3119_v57 }
0x174d   :  { %9623 = vmatpush3.bf16.xpose.msra.mxu0 %v3236_v58  ;;  %v3068_v61 = vpop.f32.mrf.mxu0  ;;  %9624 = vmatprep.mubr.msk.bf16.mxu0 %vm10805_vm0, %v10803_v13 }
0x174e   :  { %9634 = vmatprep.subr.bf16.mxu0 %v10803_v13 }
0x174f   :  { %v9601_v62 = vpop.f32.mrf.mxu0 }
0x1754   :  { %9625 = vmatmul.mubr.msk.bf16.vlgmr.msra.gmra.mxu0 %vm449_vm5, %v3229_v63 }
0x1755   :  { %9636 = vmatprep.mubr.msk.bf16.mxu0 %vm10805_vm0, %v10803_v13 }
0x17ce   :  { %v3284_v0 = vpop.xlane.xlu0 %3283 }
0x17cf   :  { %v3288_v1 = vsub.f32 %v3280_v14, %v3284_v0 }
0x17d1   :  { %v3290_v3 = vmul.f32 1.442695, %v3288_v1  ;;  %v3464_v1 = vrot.slane %v11211_v7, %v11156_v60 }
0x17d3   :  { %10510 = vpow2.f32 %v3290_v3 }
0x17e0   :  { %v10511_v4 = vpop.eup %10510 }
0x17e1   :  { %v3294_v43 = vsel %vm546_vm9, %v10511_v4, 0.0 }
0x17e2   :  { %3295 = vadd.xlane.f32.xlu0 %v3294_v43 }
0x180c   :  { %v3169_v51 = vpop.f32.mrf.mxu0 }
0x180d   :  { %v11454_v25 = vadd.f32 %v3169_v51, %v2889_v50 }
0x180e   :  { %v9614_v34 = vpop.f32.mrf.mxu0 }
0x1810   :  { %v3172_v10 = vpop.f32.mrf.mxu0 }
0x1811   :  { %v11458_v11 = vadd.f32 %v3172_v10, %v2892_v8 }
0x1812   :  { %v9615_v12 = vpop.f32.mrf.mxu0 }
0x1814   :  { %v3272_v15 = vpop.f32.mrf.mxu0 }
0x1815   :  { %v3279_v20 = vmul.f32 0.17677669, %v3272_v15  ;;  %v10674_v15 = vld [vmem:[%s12362_s0] sm:$0xff] }
0x1816   :  { %v9626_v28 = vpop.f32.mrf.mxu0 }
0x1817   :  { %v3281_v44 = vadd.f32 %v3279_v20, %v11308_v21 }
0x1818   :  { %v3275_v2 = vpop.f32.mrf.mxu0 }
0x1819   :  { %v3285_v18 = vsel %vm546_vm9, %v3281_v44, -inf }
0x181a   :  { %3286 = vmax.xlane.f32.xlu1 %v3285_v18  ;;  %v9627_v19 = vpop.f32.mrf.mxu0 }
0x182b   :  { %3354 = vrot.lane.b32.xlu1 %v11304_v56, %s10807_s29 }
0x184f   :  { %1959 = vadd.xlane.f32.xlu1 %v11467_v46 }
0x186b   :  { %v3296_v22 = vpop.xlane.xlu0 %3295 }
0x18a3   :  { %v3287_v55 = vpop.xlane.xlu1 %3286 }
0x18a4   :  { %v3289_v17 = vsub.f32 %v3281_v44, %v3287_v55  ;;  %v10235_v55 = vld [vmem:[#allocation7 + $0x1f8] ss:$40 sps:$4 sm:$0xff]  }
0x18a6   :  { %v3292_v23 = vmul.f32 1.442695, %v3289_v17  ;;  %v10233_v17 = vld [vmem:[#allocation7 + $0x1f4] ss:$40 sps:$4 sm:$0xff]  }
0x18a7   :  { %v3355_v31 = vpop.permute.xlu1 %3354 }
0x18a8   :  { %10512 = vpow2.f32 %v3292_v23  ;;  %v3360_v32 = vsel %vm574_vm6, %v3355_v31, 0  ;;  %v10238_v23 = vld [vmem:[#allocation7 + $0x1a8] ss:$40 sps:$4 sm:$0xff]   ;;  %v10236_v31 = vld [vmem:[#allocation7 + $0x1a4] ss:$40 sps:$4 sm:$0xff]  }
0x18a9   :  { %9635 = vmatpush3.bf16.msra.mxu0 %v3360_v32  ;;  %10514 = vrcp.f32 %v3296_v22  ;;  %v10241_v32 = vld [vmem:[#allocation7 + $0x158] ss:$40 sps:$4 sm:$0xff]  }
0x18aa   :  { %9648 = vmatprep.subr.bf16.mxu0 %v10803_v13  ;;  %v10247_v22 = vld [vmem:[#allocation7 + $0xb8] ss:$40 sps:$4 sm:$0xff]  }
0x18b5   :  { %v10513_v37 = vpop.eup %10512 }
0x18b6   :  { %v3297_v56 = vsel %vm546_vm9, %v10513_v37, 0.0  ;;  %v10515_v48 = vpop.eup %10514 }
0x18b7   :  { %3298 = vadd.xlane.f32.xlu0 %v3297_v56  ;;  %v3302_v30 = vmul.f32 %v10515_v48, %v10511_v4  ;;  %v10244_v56 = vld [vmem:[#allocation7 + $0x108] ss:$40 sps:$4 sm:$0xff]   ;;  %v10245_v48 = vld [vmem:[#allocation7 + $0xb4] ss:$40 sps:$4 sm:$0xff]  }
0x18b9   :  { %v3304_v14 = vpack.c.bf16 %v3302_v30, %v3302_v30  ;;  %v10248_v30 = vld [vmem:[#allocation7 + $0x64] ss:$40 sps:$4 sm:$0xff]  }
0x18cd   :  { %3306 = vrot.lane.b32.xlu0 %v11298_v41, %s10807_s29 }
0x18d8   :  { %v1960_v0 = vpop.xlane.xlu1 %1959 }
0x18d9   :  { %v1963_v4 = vmul.f32 0.0078125, %v1960_v0 }
0x18db   :  { %v11498_v28 = vsub.f32 %v11467_v46, %v1963_v4  ;;  %v10230_v46 = vld [vmem:[#allocation7 + $0x244] ss:$40 sps:$4 sm:$0xff]  }
0x18ec   :  { %1961 = vadd.xlane.f32.xlu0 %v1958_v6 }
0x1940   :  { %v3299_v38 = vpop.xlane.xlu0 %3298 }
0x1941   :  { %10516 = vrcp.f32 %v3299_v38  ;;  %v10250_v38 = vld [vmem:[#allocation7 + $0x68] ss:$40 sps:$4 sm:$0xff]  }
0x1944   :  { %v3307_v40 = vpop.permute.xlu0 %3306 }
0x1945   :  { %v3312_v26 = vsel %vm574_vm6, %v3307_v40, 0  ;;  %v10253_v40 = vld [vmem:[#allocation7 + $0x18] ss:$40 sps:$4 sm:$0xff]  }
0x1946   :  { %9629 = vmatpush3.bf16.msra.mxu1 %v3312_v26  ;;  %v10251_v26 = vld [vmem:[#allocation7 + $0x14] ss:$40 sps:$4 sm:$0xff]  }
0x1947   :  { %9640 = vmatprep.subr.bf16.mxu1 %v10803_v13 }
0x1949   :  { %9631 = vmatmul.mubr.msk.bf16.vlgmr.msra.gmra.mxu1 %vm546_vm9, %v3304_v14 }
0x194a   :  { %9644 = vmatprep.mubr.msk.bf16.mxu1 %vm10805_vm0, %v10803_v13  ;;  %9641 = vmatpush3.bf16.msra.mxu1 %v10228_v42 }
0x194b   :  { %9642 = vmatprep.subr.bf16.mxu1 %v10803_v13 }
0x194e   :  { %v10517_v9 = vpop.eup %10516  ;;  %9643 = vmatpush3.bf16.msra.mxu1 %v10229_v47 }
0x194f   :  { %v3303_v35 = vmul.f32 %v10517_v9, %v10513_v37  ;;  %3732 = vmatprep.subr.bf16.mxu1 %v10232_v33  ;;  %v10239_v37 = vld [vmem:[#allocation7 + $0x154] ss:$40 sps:$4 sm:$0xff]   ;;  %v10257_v33 = vld [vmem:[#allocation7 + $0x150] ss:$40 sps:$4 sm:$0xff]  }
0x1951   :  { %v3305_v41 = vpack.c.bf16 %v3303_v35, %v3303_v35 }
0x1953   :  { %9637 = vmatmul.mubr.msk.bf16.vlgmr.msra.gmra.mxu0 %vm546_vm9, %v3305_v41 }
0x1954   :  { %9664 = vmatprep.mubr.msk.bf16.mxu0 %vm10805_vm0, %v10803_v13 }
0x1975   :  { %v1962_v50 = vpop.xlane.xlu0 %1961 }
0x1976   :  { %v1964_v10 = vmul.f32 0.0078125, %v1962_v50 }
0x1978   :  { %v11508_v18 = vsub.f32 %v1958_v6, %v1964_v10  ;;  %v10242_v6 = vld [vmem:[#allocation7 + $0x104] ss:$40 sps:$4 sm:$0xff]   ;;  %v10254_v10 = vld [vmem:[#allocation7 + $0x240] ss:$40 sps:$4 sm:$0xff]  }
0x1979   :  { %9649 = vmatpush3.bf16.msra.mxu0 %v10254_v10 }
0x197a   :  { %v1968_v19 = vmul.f32 %v11508_v18, %v11508_v18  ;;  %9650 = vmatprep.subr.bf16.mxu0 %v10803_v13 }
0x1a09   :  { %v3348_v49 = vpop.f32.mrf.mxu1 }
0x1a0b   :  { %v9632_v16 = vpop.f32.mrf.mxu1 }
0x1a0d   :  { %v3351_v52 = vpop.f32.mrf.mxu1 }
0x1a0f   :  { %v9633_v57 = vpop.f32.mrf.mxu1 }
0x1a13   :  { %v3396_v24 = vpop.f32.mrf.mxu0 }
0x1a14   :  { %v3402_v58 = vpack.c.bf16 %v3396_v24, %v3348_v49 }
0x1a15   :  { %v9638_v61 = vpop.f32.mrf.mxu0 }
0x1a16   :  { %9645 = vmatmul.mubr.msk.bf16.vlgmr.msra.gmra.mxu1 %vm449_vm5, %v3402_v58 }
0x1a17   :  { %v3399_v62 = vpop.f32.mrf.mxu0  ;;  %3764 = vmatprep.mubr.bf16.mxu1 %v10804_v27  ;;  %3733 = vmatpush1.bf16.msra.mxu1 %v10230_v46 }
0x1a18   :  { %3734 = vmatprep.subr.bf16.mxu1 %v10235_v55 }
0x1a19   :  { %v9639_v63 = vpop.f32.mrf.mxu0 }
0x1a1b   :  { %3735 = vmatpush1.bf16.msra.mxu1 %v10233_v17 }
0x1a1c   :  { %3736 = vmatprep.subr.bf16.mxu1 %v10238_v23 }
0x1a1f   :  { %3737 = vmatpush1.bf16.msra.mxu1 %v10236_v31  ;;  %v10258_v31 = vld [vmem:[#allocation7 + $0x100] ss:$40 sps:$4 sm:$0xff]  }
0x1a20   :  { %3738 = vmatprep.subr.bf16.mxu1 %v10241_v32 }
0x1a23   :  { %3739 = vmatpush1.bf16.msra.mxu1 %v10239_v37 }
0x1a24   :  { %3740 = vmatprep.subr.bf16.mxu1 %v10244_v56  ;;  %v10259_v56 = vld [vmem:[#allocation7 + $0xb0] ss:$40 sps:$4 sm:$0xff]  }
0x1a27   :  { %3741 = vmatpush1.bf16.msra.mxu1 %v10242_v6  ;;  %v10261_v6 = vld [vmem:[#allocation7 + $0x10] ss:$40 sps:$4 sm:$0xff]  }
0x1a28   :  { %3742 = vmatprep.subr.bf16.mxu1 %v10247_v22 }
0x1a2b   :  { %3743 = vmatpush1.bf16.msra.mxu1 %v10245_v48 }
0x1a2c   :  { %3744 = vmatprep.subr.bf16.mxu1 %v10250_v38 }
0x1a2f   :  { %3745 = vmatpush1.bf16.msra.mxu1 %v10248_v30 }
0x1a30   :  { %3746 = vmatprep.subr.bf16.mxu1 %v10253_v40 }
0x1a33   :  { %3747 = vmatpush1.bf16.msra.mxu1 %v10251_v26 }
0x1a34   :  { %9674 = vmatprep.subr.bf16.mxu1 %v10803_v13 }
0x1ad6   :  { %v3452_v3 = vpop.f32.mrf.mxu1 }
0x1ad7   :  { %v3459_v43 = vadd.f32 %v3452_v3, %v11454_v25  ;;  %v10675_v25 = vld [vmem:[%s12362_s0 + $0x8] sm:$0xff] }
0x1ad8   :  { %v9646_v51 = vpop.f32.mrf.mxu1 }
0x1ad9   :  { %v3465_v34 = vadd.f32 %v3464_v1, %v3459_v43 }
0x1ada   :  { %v3455_v8 = vpop.f32.mrf.mxu1 }
0x1adb   :  { %v3460_v12 = vadd.f32 %v3455_v8, %v11458_v11  ;;  %v11495_v20 = vadd.f32 %v10674_v15, %v3465_v34  ;;  %v1967_v11 = vmul.f32 %v11498_v28, %v11498_v28 }
0x1adc   :  { %v9647_v7 = vpop.f32.mrf.mxu1 }
0x1add   :  { %v3466_v44 = vadd.f32 %v3464_v1, %v3460_v12  ;;  %3469 = vadd.xlane.f32.xlu0 %v11495_v20  ;;  %v10255_v12 = vld [vmem:[#allocation7 + $0x1f0] ss:$40 sps:$4 sm:$0xff]  }
0x1ade   :  { %9651 = vmatpush3.bf16.msra.mxu0 %v10255_v12  ;;  %v10676_v7 = vld [vmem:[%s12366_s4 + $0x10] sm:$0x1f] }
0x1adf   :  { %v11504_v2 = vadd.f32 %v10675_v25, %v3466_v44  ;;  %v11529_v44 = vrot.slane %v10676_v7, %v10914_v54  ;;  %9652 = vmatprep.subr.bf16.mxu0 %v10803_v13  ;;  %v11534_v46 = vrot.slane %v10676_v7, %v10925_v59 }
0x1ae1   :  { %3471 = vadd.xlane.f32.xlu1 %v11504_v2  ;;  %1969 = vadd.xlane.f32.xlu0 %v1967_v11  ;;  %v10256_v11 = vld [vmem:[#allocation7 + $0x1a0] ss:$40 sps:$4 sm:$0xff]  }
0x1ae2   :  { %9653 = vmatpush3.bf16.msra.mxu0 %v10256_v11 }
0x1ae3   :  { %9654 = vmatprep.subr.bf16.mxu0 %v10803_v13 }
0x1ae5   :  { %1971 = vadd.xlane.f32.xlu1 %v1968_v19 }
0x1ae6   :  { %9655 = vmatpush3.bf16.msra.mxu0 %v10257_v33 }
0x1ae7   :  { %9656 = vmatprep.subr.bf16.mxu0 %v10803_v13 }
0x1aea   :  { %9657 = vmatpush3.bf16.msra.mxu0 %v10258_v31 }
0x1aeb   :  { %9658 = vmatprep.subr.bf16.mxu0 %v10803_v13 }
0x1aee   :  { %9659 = vmatpush3.bf16.msra.mxu0 %v10259_v56 }
0x1aef   :  { %9660 = vmatprep.subr.bf16.mxu0 %v10803_v13 }
0x1b66   :  { %v3470_v14 = vpop.xlane.xlu0 %3469 }
0x1b67   :  { %v3473_v9 = vmul.f32 0.0078125, %v3470_v14 }
0x1b69   :  { %v11515_v35 = vsub.f32 %v11495_v20, %v3473_v9 }
0x1b6a   :  { %v1970_v41 = vpop.xlane.xlu0 %1969  ;;  %v3472_v42 = vpop.xlane.xlu1 %3471 }
0x1b6b   :  { %v1973_v47 = vmul.f32 0.007874016, %v1970_v41  ;;  %v3474_v49 = vmul.f32 0.0078125, %v3472_v42  ;;  %v3477_v16 = vmul.f32 %v11515_v35, %v11515_v35 }
0x1b6d   :  { %10518 = vrsqrt.f32 %v1973_v47  ;;  %3479 = vadd.xlane.f32.xlu0 %v3477_v16  ;;  %v11520_v57 = vsub.f32 %v11504_v2, %v3474_v49  ;;  %vm1977_vm7 = vcmp.eq.f32.partialorder %v1973_v47, inf  ;;  %v1980_v63 = vand.u32 2147483648, %v1973_v47 }
0x1b6e   :  { %v1972_v52 = vpop.xlane.xlu1 %1971  ;;  %vm1979_vm8 = vcmp.eq.f32.partialorder %v1973_v47, 0.0 }
0x1b6f   :  { %v1974_v24 = vmul.f32 0.007874016, %v1972_v52  ;;  %v3478_v58 = vmul.f32 %v11520_v57, %v11520_v57 }
0x1b71   :  { %10520 = vrsqrt.f32 %v1974_v24  ;;  %3481 = vadd.xlane.f32.xlu1 %v3478_v58  ;;  %vm1984_vm10 = vcmp.eq.f32.partialorder %v1974_v24, inf  ;;  %v1987_v50 = vand.u32 2147483648, %v1974_v24  ;;  %vm1986_vm11 = vcmp.eq.f32.partialorder %v1974_v24, 0.0 }
0x1b7a   :  { %v10519_v61 = vpop.eup %10518 }
0x1b7b   :  { %v1976_v62 = vmul.f32 %v10519_v61, %v1973_v47 }
0x1b7d   :  { %v1978_v0 = vsel %vm1977_vm7, %v1973_v47, %v1976_v62 }
0x1b7e   :  { %v10521_v1 = vpop.eup %10520  ;;  %v1981_v3 = vsel %vm1979_vm8, %v1980_v63, %v1978_v0  ;;  %v10677_v63 = vld [vmem:[%s12369_s7 + $0x8] sm:$0x7f] }
0x1b7f   :  { %v1989_v4 = vadd.f32 1e-06, %v1981_v3  ;;  %v1983_v43 = vmul.f32 %v10521_v1, %v1974_v24  ;;  %v3508_v0 = vrot.slane %v10677_v63, %v10914_v54  ;;  %v3537_v31 = vrot.slane %v10677_v63, %v11156_v60 }
0x1b81   :  { %10522 = vrcp.f32 %v1989_v4  ;;  %v1985_v51 = vsel %vm1984_vm10, %v1974_v24, %v1983_v43  ;;  %v3514_v43 = vrot.slane %v10677_v63, %v10925_v59 }
0x1b82   :  { %v1988_v34 = vsel %vm1986_vm11, %v1987_v50, %v1985_v51 }
0x1b83   :  { %v1990_v8 = vadd.f32 1e-06, %v1988_v34 }
0x1b85   :  { %10524 = vrcp.f32 %v1990_v8 }
0x1b8e   :  { %v10523_v15 = vpop.eup %10522 }
0x1b8f   :  { %v1993_v25 = vmul.f32 %v10523_v15, %v11498_v28 }
0x1b91   :  { %v1999_v17 = vmul.f32 %v11529_v44, %v1993_v25 }
0x1b92   :  { %v10525_v19 = vpop.eup %10524 }
0x1b93   :  { %v1994_v55 = vmul.f32 %v10525_v19, %v11508_v18  ;;  %v2005_v28 = vadd.f32 %v11534_v46, %v1999_v17  ;;  %v10260_v18 = vld [vmem:[#allocation7 + $0x60] ss:$40 sps:$4 sm:$0xff]   ;;  %v3651_v17 = vrot.slane %v10677_v63, %v11227_v36 }
0x1b94   :  { %9661 = vmatpush3.bf16.msra.mxu0 %v10260_v18 }
0x1b95   :  { %v2000_v23 = vmul.f32 %v11529_v44, %v1994_v55  ;;  %9662 = vmatprep.subr.bf16.mxu0 %v10803_v13 }
0x1b97   :  { %v2006_v32 = vadd.f32 %v11534_v46, %v2000_v23 }
0x1b98   :  { %9663 = vmatpush3.bf16.msra.mxu0 %v10261_v6 }
0x1b99   :  { %v11543_v37 = vpack.c.bf16 %v2006_v32, %v2005_v28  ;;  %9668 = vmatprep.subr.bf16.mxu0 %v10803_v13 }
0x1b9b   :  { %3765 = vmatmul.mubr.bf16.vlgmr.msra.gmra.mxu1 %v11543_v37 }
0x1b9c   :  { %9676 = vmatprep.mubr.msk.bf16.mxu1 %vm10805_vm0, %v10803_v13 }
0x1bf6   :  { %v3480_v22 = vpop.xlane.xlu0 %3479 }
0x1bf7   :  { %v3483_v48 = vmul.f32 0.007874016, %v3480_v22 }
0x1bf9   :  { %10526 = vrsqrt.f32 %v3483_v48  ;;  %vm3487_vm12 = vcmp.eq.f32.partialorder %v3483_v48, inf  ;;  %v3490_v14 = vand.u32 2147483648, %v3483_v48  ;;  %vm3489_vm13 = vcmp.eq.f32.partialorder %v3483_v48, 0.0 }
0x1bfa   :  { %v3482_v38 = vpop.xlane.xlu1 %3481 }
0x1bfb   :  { %v3484_v30 = vmul.f32 0.007874016, %v3482_v38 }
0x1bfd   :  { %10528 = vrsqrt.f32 %v3484_v30  ;;  %vm3494_vm14 = vcmp.eq.f32.partialorder %v3484_v30, inf  ;;  %v3497_v16 = vand.u32 2147483648, %v3484_v30  ;;  %vm3496_vm15 = vcmp.eq.f32.partialorder %v3484_v30, 0.0 }
0x1c06   :  { %v10527_v40 = vpop.eup %10526 }
0x1c07   :  { %v3486_v26 = vmul.f32 %v10527_v40, %v3483_v48 }
0x1c09   :  { %v3488_v9 = vsel %vm3487_vm12, %v3483_v48, %v3486_v26 }
0x1c0a   :  { %v3491_v41 = vsel %vm3489_vm13, %v3490_v14, %v3488_v9  ;;  %v10529_v42 = vpop.eup %10528 }
0x1c0b   :  { %v3499_v47 = vadd.f32 1e-06, %v3491_v41  ;;  %v3493_v49 = vmul.f32 %v10529_v42, %v3484_v30 }
0x1c0d   :  { %10530 = vrcp.f32 %v3499_v47  ;;  %v3495_v52 = vsel %vm3494_vm14, %v3484_v30, %v3493_v49 }
0x1c0e   :  { %v3498_v24 = vsel %vm3496_vm15, %v3497_v16, %v3495_v52 }
0x1c0f   :  { %v3500_v58 = vadd.f32 1e-06, %v3498_v24 }
0x1c11   :  { %10532 = vrcp.f32 %v3500_v58 }
0x1c1a   :  { %v10531_v61 = vpop.eup %10530 }
0x1c1b   :  { %v3503_v62 = vmul.f32 %v10531_v61, %v11515_v35  ;;  %v11564_v35 = vld [vmem:[%s12369_s7] sm:$0x7f] }
0x1c1c   :  { %v3647_v10 = vrot.slane %v11564_v35, %v11227_v36 }
0x1c1d   :  { %v3509_v4 = vmul.f32 %v3508_v0, %v3503_v62 }
0x1c1e   :  { %v10533_v1 = vpop.eup %10532 }
0x1c1f   :  { %v3504_v3 = vmul.f32 %v10533_v1, %v11520_v57  ;;  %v3515_v51 = vadd.f32 %v3514_v43, %v3509_v4 }
0x1c21   :  { %v3510_v50 = vmul.f32 %v3508_v0, %v3504_v3 }
0x1c23   :  { %v3516_v34 = vadd.f32 %v3514_v43, %v3510_v50 }
0x1c25   :  { %v3533_v8 = vpack.c.bf16 %v3516_v34, %v3515_v51 }
0x1c27   :  { %9665 = vmatmul.mubr.bf16.vlgmr.msra.gmra.mxu0 %v3533_v8 }
0x1c28   :  { %9670 = vmatprep.mubr.msk.bf16.mxu0 %vm10805_vm0, %v10803_v13 }
0x1c5b   :  { %v3766_v57 = vpop.f32.mrf.mxu1 }
0x1c5c   :  { %v3767_v12 = vadd.f32 %v3766_v57, %v3647_v10 }
0x1c5d   :  { %v3768_v15 = vpop.f32.mrf.mxu1 }
0x1c5e   :  { %v11568_v7 = vpack.c.bf16 %v3767_v12, %v3767_v12  ;;  %v3769_v23 = vadd.f32 %v3768_v15, %v3651_v17 }
0x1c5f   :  { %v3770_v25 = vpop.f32.mrf.mxu1 }
0x1c60   :  { %v3771_v11 = vadd.f32 %v3770_v25, %v3647_v10  ;;  %v3801_v19 = vsel %vm449_vm5, %v11568_v7, 0  ;;  %v11580_v56 = vpack.c.bf16 %v3769_v23, %v3769_v23 }
0x1c61   :  { %9669 = vmatpush3.bf16.xpose.msra.mxu0 %v3801_v19  ;;  %v3772_v28 = vpop.f32.mrf.mxu1 }
0x1c62   :  { %v11572_v33 = vpack.c.bf16 %v3771_v11, %v3771_v11  ;;  %9680 = vmatprep.subr.bf16.mxu0 %v10803_v13  ;;  %v3773_v18 = vadd.f32 %v3772_v28, %v3651_v17  ;;  %v3921_v26 = vsel %vm574_vm6, %v11580_v56, 0 }
0x1c64   :  { %v3847_v55 = vsel %vm449_vm5, %v11572_v33, 0  ;;  %v11584_v30 = vpack.c.bf16 %v3773_v18, %v3773_v18 }
0x1c65   :  { %9675 = vmatpush3.bf16.xpose.msra.mxu1 %v3847_v55 }
0x1c66   :  { %9686 = vmatprep.subr.bf16.mxu1 %v10803_v13  ;;  %v3967_v41 = vsel %vm574_vm6, %v11584_v30, 0 }
0x1ce7   :  { %v3620_v32 = vpop.f32.mrf.mxu0 }
0x1ce8   :  { %v3621_v6 = vadd.f32 %v3620_v32, %v3537_v31 }
0x1ce9   :  { %v9666_v22 = vpop.f32.mrf.mxu0 }
0x1cea   :  { %v11582_v48 = vpack.c.bf16 %v3621_v6, %v3621_v6 }
0x1ceb   :  { %v3623_v38 = vpop.f32.mrf.mxu0 }
0x1cec   :  { %v3624_v40 = vadd.f32 %v3623_v38, %v3537_v31  ;;  %9671 = vmatmul.mubr.msk.bf16.vlgmr.msra.gmra.mxu0 %vm449_vm5, %v11582_v48 }
0x1ced   :  { %9681 = vmatpush3.bf16.msra.mxu0 %v3921_v26  ;;  %v9667_v14 = vpop.f32.mrf.mxu0  ;;  %9682 = vmatprep.mubr.msk.bf16.mxu0 %vm10805_vm0, %v10803_v13 }
0x1cee   :  { %v11592_v9 = vpack.c.bf16 %v3624_v40, %v3624_v40  ;;  %9692 = vmatprep.subr.bf16.mxu0 %v10803_v13 }
0x1cf0   :  { %9677 = vmatmul.mubr.msk.bf16.vlgmr.msra.gmra.mxu1 %vm449_vm5, %v11592_v9 }
0x1cf1   :  { %9687 = vmatpush3.bf16.msra.mxu1 %v3967_v41  ;;  %9688 = vmatprep.mubr.msk.bf16.mxu1 %vm10805_vm0, %v10803_v13 }
0x1cf2   :  { %9698 = vmatprep.subr.bf16.mxu1 %v10803_v13 }
0x1dac   :  { %v3837_v42 = vpop.f32.mrf.mxu0 }
0x1dad   :  { %v3889_v47 = vmul.f32 0.17677669, %v3837_v42 }
0x1dae   :  { %v9672_v49 = vpop.f32.mrf.mxu0 }
0x1daf   :  { %v3891_v16 = vadd.f32 %v3889_v47, %v10987_v39 }
0x1db0   :  { %v3840_v52 = vpop.f32.mrf.mxu0  ;;  %v3883_v24 = vpop.f32.mrf.mxu1 }
0x1db1   :  { %v3890_v58 = vmul.f32 0.17677669, %v3883_v24  ;;  %v3893_v61 = vsel %vm546_vm9, %v3891_v16, -inf }
0x1db2   :  { %v9678_v62 = vpop.f32.mrf.mxu1  ;;  %3894 = vmax.xlane.f32.xlu0 %v3893_v61  ;;  %v9673_v63 = vpop.f32.mrf.mxu0 }
0x1db3   :  { %v3892_v0 = vadd.f32 %v3890_v58, %v10992_v45 }
0x1db4   :  { %v3886_v1 = vpop.f32.mrf.mxu1 }
0x1db5   :  { %v3896_v3 = vsel %vm546_vm9, %v3892_v0, -inf }
0x1db6   :  { %3897 = vmax.xlane.f32.xlu1 %v3896_v3  ;;  %v9679_v4 = vpop.f32.mrf.mxu1 }
0x1dc7   :  { %4066 = vrot.lane.b32.xlu1 %v11572_v33, %s10806_s2 }
0x1e3b   :  { %v3895_v43 = vpop.xlane.xlu0 %3894 }
0x1e3c   :  { %v3899_v50 = vsub.f32 %v3891_v16, %v3895_v43 }
0x1e3e   :  { %v3901_v51 = vmul.f32 1.442695, %v3899_v50 }
0x1e3f   :  { %v3898_v34 = vpop.xlane.xlu1 %3897 }
0x1e40   :  { %10534 = vpow2.f32 %v3901_v51  ;;  %v3900_v8 = vsub.f32 %v3892_v0, %v3898_v34 }
0x1e42   :  { %v3903_v10 = vmul.f32 1.442695, %v3900_v8 }
0x1e43   :  { %v4067_v11 = vpop.permute.xlu1 %4066 }
0x1e44   :  { %10536 = vpow2.f32 %v3903_v10  ;;  %v4072_v38 = vsel %vm449_vm5, %v4067_v11, 0 }
0x1e4d   :  { %v10535_v57 = vpop.eup %10534 }
0x1e4e   :  { %v3905_v12 = vsel %vm546_vm9, %v10535_v57, 0.0 }
0x1e4f   :  { %3906 = vadd.xlane.f32.xlu0 %v3905_v12 }
0x1e51   :  { %v10537_v15 = vpop.eup %10536 }
0x1e52   :  { %v3908_v25 = vsel %vm546_vm9, %v10537_v15, 0.0 }
0x1e53   :  { %3909 = vadd.xlane.f32.xlu1 %v3908_v25 }
0x1e64   :  { %4011 = vrot.lane.b32.xlu1 %v11582_v48, %s10806_s2 }
0x1e65   :  { %4014 = vrot.lane.b32.xlu0 %v11568_v7, %s10806_s2 }
0x1e68   :  { %4063 = vrot.lane.b32.xlu1 %v11592_v9, %s10806_s2 }
0x1ed8   :  { %v3907_v19 = vpop.xlane.xlu0 %3906 }
0x1ed9   :  { %10538 = vrcp.f32 %v3907_v19 }
0x1edc   :  { %v3910_v55 = vpop.xlane.xlu1 %3909  ;;  %v4015_v31 = vpop.permute.xlu0 %4014 }
0x1edd   :  { %10540 = vrcp.f32 %v3910_v55  ;;  %v4020_v18 = vsel %vm449_vm5, %v4015_v31, 0 }
0x1ee0   :  { %v4012_v40 = vpop.permute.xlu1 %4011 }
0x1ee4   :  { %v4064_v26 = vpop.permute.xlu1 %4063 }
0x1ee6   :  { %v10539_v17 = vpop.eup %10538 }
0x1ee7   :  { %v3913_v23 = vmul.f32 %v10539_v17, %v10535_v57 }
0x1ee9   :  { %v3915_v28 = vpack.c.bf16 %v3913_v23, %v3913_v23 }
0x1eea   :  { %v10541_v32 = vpop.eup %10540 }
0x1eeb   :  { %9683 = vmatmul.mubr.msk.bf16.vlgmr.msra.gmra.mxu0 %vm546_vm9, %v3915_v28  ;;  %v3914_v6 = vmul.f32 %v10541_v32, %v10537_v15 }
0x1eec   :  { %9693 = vmatpush3.bf16.xpose.msra.mxu0 %v4020_v18  ;;  %9694 = vmatprep.mubr.msk.bf16.mxu0 %vm10805_vm0, %v10803_v13 }
0x1eed   :  { %v3916_v22 = vpack.c.bf16 %v3914_v6, %v3914_v6  ;;  %9704 = vmatprep.subr.bf16.mxu0 %v10803_v13 }
0x1eef   :  { %9689 = vmatmul.mubr.msk.bf16.vlgmr.msra.gmra.mxu1 %vm546_vm9, %v3916_v22 }
0x1ef0   :  { %9699 = vmatpush3.bf16.xpose.msra.mxu1 %v4072_v38  ;;  %9700 = vmatprep.mubr.msk.bf16.mxu1 %vm10805_vm0, %v10803_v13 }
0x1ef1   :  { %9710 = vmatprep.subr.bf16.mxu1 %v10803_v13 }
0x1ef3   :  { %9695 = vmatmul.mubr.msk.bf16.vlgmr.msra.gmra.mxu0 %vm449_vm5, %v4012_v40 }
0x1ef4   :  { %9706 = vmatprep.mubr.msk.bf16.mxu0 %vm10805_vm0, %v10803_v13 }
0x1ef7   :  { %9701 = vmatmul.mubr.msk.bf16.vlgmr.msra.gmra.mxu1 %vm449_vm5, %v4064_v26 }
0x1ef8   :  { %9712 = vmatprep.mubr.msk.bf16.mxu1 %vm10805_vm0, %v10803_v13 }
0x1fab   :  { %v11632_v14 = vpop.f32.mrf.mxu0 }
0x1fad   :  { %v9684_v41 = vpop.f32.mrf.mxu0 }
0x1faf   :  { %v3960_v42 = vpop.f32.mrf.mxu0  ;;  %v11634_v47 = vpop.f32.mrf.mxu1 }
0x1fb0   :  { %v4009_v49 = vpack.c.bf16 %v11634_v47, %v11632_v14  ;;  %v10264_v42 = vld [vmem:[#allocation7 + $0x10c] ss:$40 sps:$4 sm:$0xff]  }
0x1fb1   :  { %v9685_v16 = vpop.f32.mrf.mxu0  ;;  %v9690_v52 = vpop.f32.mrf.mxu1 }
0x1fb3   :  { %v4006_v24 = vpop.f32.mrf.mxu1  ;;  %v4056_v58 = vpop.f32.mrf.mxu0 }
0x1fb4   :  { %v4114_v61 = vmul.f32 0.17677669, %v4056_v58  ;;  %v10262_v58 = vld [vmem:[#allocation7 + $0x6c] ss:$40 sps:$4 sm:$0xff]  }
0x1fb5   :  { %v9691_v62 = vpop.f32.mrf.mxu1  ;;  %v9696_v63 = vpop.f32.mrf.mxu0 }
0x1fb6   :  { %v4116_v0 = vadd.f32 %v4114_v61, %v10987_v39  ;;  %v10263_v63 = vld [vmem:[#allocation7 + $0x1c] ss:$40 sps:$4 sm:$0xff]  }
0x1fb7   :  { %v4059_v1 = vpop.f32.mrf.mxu0  ;;  %v4108_v3 = vpop.f32.mrf.mxu1 }
0x1fb8   :  { %v4115_v4 = vmul.f32 0.17677669, %v4108_v3  ;;  %v4118_v43 = vsel %vm546_vm9, %v4116_v0, -inf }
0x1fb9   :  { %v9702_v50 = vpop.f32.mrf.mxu1  ;;  %4119 = vmax.xlane.f32.xlu0 %v4118_v43  ;;  %v9697_v51 = vpop.f32.mrf.mxu0 }
0x1fba   :  { %v4117_v34 = vadd.f32 %v4115_v4, %v10992_v45  ;;  %v10265_v4 = vld [vmem:[#allocation7 + $0xbc] ss:$40 sps:$4 sm:$0xff]  }
0x1fbb   :  { %v4111_v8 = vpop.f32.mrf.mxu1 }
0x1fbc   :  { %v4121_v10 = vsel %vm546_vm9, %v4117_v34, -inf }
0x1fbd   :  { %4122 = vmax.xlane.f32.xlu1 %v4121_v10  ;;  %v9703_v57 = vpop.f32.mrf.mxu1 }
0x1fce   :  { %4192 = vrot.lane.b32.xlu1 %v11584_v30, %s10806_s2 }
0x1fd2   :  { %4355 = vrot.lane.b32.xlu1 %v11568_v7, %s10794_s16 }
0x1fd6   :  { %4405 = vrot.lane.b32.xlu1 %v11572_v33, %s10794_s16 }
0x1fda   :  { %4403 = vrot.lane.b32.xlu1 %v11592_v9, %s10794_s16 }
0x2042   :  { %v4120_v12 = vpop.xlane.xlu0 %4119 }
0x2043   :  { %v4124_v15 = vsub.f32 %v4116_v0, %v4120_v12 }
0x2045   :  { %v4126_v25 = vmul.f32 1.442695, %v4124_v15 }
0x2046   :  { %v4123_v11 = vpop.xlane.xlu1 %4122 }
0x2047   :  { %10542 = vpow2.f32 %v4126_v25  ;;  %v4125_v19 = vsub.f32 %v4117_v34, %v4123_v11 }
0x2049   :  { %v4128_v55 = vmul.f32 1.442695, %v4125_v19 }
0x204a   :  { %v4193_v17 = vpop.permute.xlu1 %4192 }
0x204b   :  { %10544 = vpow2.f32 %v4128_v55  ;;  %v4198_v23 = vsel %vm574_vm6, %v4193_v17, 0 }
0x204c   :  { %9711 = vmatpush3.bf16.msra.mxu1 %v4198_v23 }
0x204d   :  { %9724 = vmatprep.subr.bf16.mxu1 %v10803_v13 }
0x204e   :  { %v4356_v62 = vpop.permute.xlu1 %4355 }
0x204f   :  { %v4361_v8 = vsel %vm449_vm5, %v4356_v62, 0 }
0x2052   :  { %v4406_v0 = vpop.permute.xlu1 %4405 }
0x2053   :  { %v4411_v1 = vsel %vm449_vm5, %v4406_v0, 0 }
0x2054   :  { %v10543_v31 = vpop.eup %10542 }
0x2055   :  { %v4130_v28 = vsel %vm546_vm9, %v10543_v31, 0.0 }
0x2056   :  { %4131 = vadd.xlane.f32.xlu0 %v4130_v28  ;;  %v4404_v3 = vpop.permute.xlu1 %4403 }
0x2058   :  { %v10545_v32 = vpop.eup %10544 }
0x2059   :  { %v4133_v18 = vsel %vm546_vm9, %v10545_v32, 0.0 }
0x205a   :  { %4134 = vadd.xlane.f32.xlu0 %v4133_v18 }
0x2070   :  { %4143 = vrot.lane.b32.xlu0 %v11580_v56, %s10806_s2 }
0x2074   :  { %4353 = vrot.lane.b32.xlu0 %v11582_v48, %s10794_s16 }
0x20df   :  { %v4132_v6 = vpop.xlane.xlu0 %4131 }
0x20e0   :  { %10546 = vrcp.f32 %v4132_v6 }
0x20e3   :  { %v4135_v22 = vpop.xlane.xlu0 %4134 }
0x20e4   :  { %10548 = vrcp.f32 %v4135_v22 }
0x20e7   :  { %v4144_v38 = vpop.permute.xlu0 %4143 }
0x20e8   :  { %v4149_v40 = vsel %vm574_vm6, %v4144_v38, 0 }
0x20e9   :  { %9705 = vmatpush3.bf16.msra.mxu0 %v4149_v40 }
0x20ea   :  { %9716 = vmatprep.subr.bf16.mxu0 %v10803_v13 }
0x20eb   :  { %v4354_v15 = vpop.permute.xlu0 %4353 }
0x20ed   :  { %v10547_v26 = vpop.eup %10546 }
0x20ee   :  { %v4138_v41 = vmul.f32 %v10547_v26, %v10543_v31 }
0x20f0   :  { %v4140_v16 = vpack.c.bf16 %v4138_v41, %v4138_v41 }
0x20f1   :  { %v10549_v52 = vpop.eup %10548 }
0x20f2   :  { %9707 = vmatmul.mubr.msk.bf16.vlgmr.msra.gmra.mxu0 %vm546_vm9, %v4140_v16  ;;  %v4139_v24 = vmul.f32 %v10549_v52, %v10545_v32 }
0x20f3   :  { %9717 = vmatpush3.bf16.msra.mxu0 %v10264_v42  ;;  %9720 = vmatprep.mubr.msk.bf16.mxu0 %vm10805_vm0, %v10803_v13 }
0x20f4   :  { %v4141_v61 = vpack.c.bf16 %v4139_v24, %v4139_v24  ;;  %9718 = vmatprep.subr.bf16.mxu0 %v10803_v13 }
0x20f6   :  { %9713 = vmatmul.mubr.msk.bf16.vlgmr.msra.gmra.mxu1 %vm546_vm9, %v4141_v61 }
0x20f7   :  { %9725 = vmatpush3.bf16.msra.mxu1 %v10262_v58  ;;  %9728 = vmatprep.mubr.msk.bf16.mxu1 %vm10805_vm0, %v10803_v13 }
0x20f8   :  { %9726 = vmatprep.subr.bf16.mxu1 %v10803_v13  ;;  %9719 = vmatpush3.bf16.msra.mxu0 %v10265_v4 }
0x20f9   :  { %9732 = vmatprep.subr.bf16.mxu0 %v10803_v13 }
0x20fb   :  { %9727 = vmatpush3.bf16.msra.mxu1 %v10263_v63 }
0x20fc   :  { %9738 = vmatprep.subr.bf16.mxu1 %v10803_v13 }
0x20fe   :  { %9729 = vmatmul.mubr.msk.bf16.vlgmr.msra.gmra.mxu1 %vm449_vm5, %v4009_v49 }
0x20ff   :  { %9739 = vmatpush3.bf16.xpose.msra.mxu1 %v4411_v1  ;;  %9740 = vmatprep.mubr.msk.bf16.mxu1 %vm10805_vm0, %v10803_v13 }
0x2100   :  { %9750 = vmatprep.subr.bf16.mxu1 %v10803_v13 }
0x2106   :  { %9741 = vmatmul.mubr.msk.bf16.vlgmr.msra.gmra.mxu1 %vm449_vm5, %v4404_v3 }
0x2107   :  { %9752 = vmatprep.mubr.msk.bf16.mxu1 %vm10805_vm0, %v10803_v13 }
0x21b2   :  { %v4185_v43 = vpop.f32.mrf.mxu0 }
0x21b4   :  { %v9708_v14 = vpop.f32.mrf.mxu0 }
0x21b6   :  { %v4188_v47 = vpop.f32.mrf.mxu0  ;;  %v4234_v49 = vpop.f32.mrf.mxu1 }
0x21b7   :  { %v4240_v50 = vpack.c.bf16 %v4234_v49, %v4185_v43 }
0x21b8   :  { %v9709_v51 = vpop.f32.mrf.mxu0  ;;  %v9714_v34 = vpop.f32.mrf.mxu1 }
0x21b9   :  { %9721 = vmatmul.mubr.msk.bf16.vlgmr.msra.gmra.mxu0 %vm449_vm5, %v4240_v50 }
0x21ba   :  { %9733 = vmatpush3.bf16.xpose.msra.mxu0 %v4361_v8  ;;  %v4237_v10 = vpop.f32.mrf.mxu1  ;;  %9734 = vmatprep.mubr.msk.bf16.mxu0 %vm10805_vm0, %v10803_v13 }
0x21bb   :  { %9744 = vmatprep.subr.bf16.mxu0 %v10803_v13 }
0x21bc   :  { %v9715_v57 = vpop.f32.mrf.mxu1 }
0x21be   :  { %v11686_v12 = vpop.f32.mrf.mxu1 }
0x21c0   :  { %v9730_v25 = vpop.f32.mrf.mxu1 }
0x21c1   :  { %9735 = vmatmul.mubr.msk.bf16.vlgmr.msra.gmra.mxu0 %vm449_vm5, %v4354_v15 }
0x21c2   :  { %v11689_v11 = vpop.f32.mrf.mxu1  ;;  %9746 = vmatprep.mubr.msk.bf16.mxu0 %vm10805_vm0, %v10803_v13 }
0x21c4   :  { %v9731_v19 = vpop.f32.mrf.mxu1 }
0x21c6   :  { %v4447_v55 = vpop.f32.mrf.mxu1 }
0x21c7   :  { %v4454_v17 = vmul.f32 0.17677669, %v4447_v55 }
0x21c8   :  { %v9742_v23 = vpop.f32.mrf.mxu1 }
0x21c9   :  { %v4456_v31 = vadd.f32 %v4454_v17, %v10992_v45 }
0x21ca   :  { %v4450_v28 = vpop.f32.mrf.mxu1 }
0x21cb   :  { %v4460_v32 = vsel %vm546_vm9, %v4456_v31, -inf }
0x21cc   :  { %4461 = vmax.xlane.f32.xlu1 %v4460_v32  ;;  %v9743_v18 = vpop.f32.mrf.mxu1  ;;  %v10266_v32 = vld [vmem:[#allocation7 + $0x1ac] ss:$40 sps:$4 sm:$0xff]  }
0x21cd   :  { %v10267_v18 = vld [vmem:[#allocation7 + $0x15c] ss:$40 sps:$4 sm:$0xff]  }
0x21dd   :  { %4529 = vrot.lane.b32.xlu1 %v11584_v30, %s10794_s16 }
0x21e1   :  { %4638 = vrot.lane.b32.xlu1 %v11568_v7, %s10807_s29 }
0x21e5   :  { %4688 = vrot.lane.b32.xlu1 %v11572_v33, %s10807_s29 }
0x21e9   :  { %4686 = vrot.lane.b32.xlu1 %v11592_v9, %s10807_s29 }
0x2255   :  { %v4462_v6 = vpop.xlane.xlu1 %4461 }
0x2256   :  { %v4464_v40 = vsub.f32 %v4456_v31, %v4462_v6 }
0x2258   :  { %v4467_v26 = vmul.f32 1.442695, %v4464_v40 }
0x2259   :  { %v4530_v22 = vpop.permute.xlu1 %4529 }
0x225a   :  { %v4535_v38 = vsel %vm574_vm6, %v4530_v22, 0  ;;  %10550 = vpow2.f32 %v4467_v26 }
0x225b   :  { %9751 = vmatpush3.bf16.msra.mxu1 %v4535_v38 }
0x225c   :  { %9764 = vmatprep.subr.bf16.mxu1 %v10803_v13 }
0x225d   :  { %v4639_v51 = vpop.permute.xlu1 %4638 }
0x225e   :  { %v4644_v8 = vsel %vm449_vm5, %v4639_v51, 0 }
0x2267   :  { %v10551_v62 = vpop.eup %10550 }
0x2268   :  { %v4472_v0 = vsel %vm546_vm9, %v10551_v62, 0.0 }
0x2279   :  { %v11705_v41 = vpop.f32.mrf.mxu0 }
0x227b   :  { %v9722_v42 = vpop.f32.mrf.mxu0 }
0x227d   :  { %v11707_v7 = vpop.f32.mrf.mxu0 }
0x227e   :  { %v4350_v51 = vadd.f32 %v11689_v11, %v11707_v7 }
0x227f   :  { %v9723_v16 = vpop.f32.mrf.mxu0 }
0x2281   :  { %v4397_v33 = vpop.f32.mrf.mxu0 }
0x2282   :  { %v4453_v52 = vmul.f32 0.17677669, %v4397_v33  ;;  %v4689_v33 = vpop.permute.xlu1 %4688 }
0x2283   :  { %v9736_v24 = vpop.f32.mrf.mxu0 }
0x2284   :  { %v4455_v9 = vadd.f32 %v4453_v52, %v10987_v39 }
0x2285   :  { %v4400_v58 = vpop.f32.mrf.mxu0 }
0x2286   :  { %v4457_v61 = vsel %vm546_vm9, %v4455_v9, -inf  ;;  %v4694_v58 = vsel %vm449_vm5, %v4689_v33, 0  ;;  %v10269_v33 = vld [vmem:[#allocation7 + $0x1fc] ss:$40 sps:$4 sm:$0xff]  }
0x2287   :  { %4458 = vmax.xlane.f32.xlu0 %v4457_v61  ;;  %v9737_v63 = vpop.f32.mrf.mxu0 }
0x2288   :  { %v4687_v63 = vpop.permute.xlu1 %4686 }
0x228b   :  { %4473 = vadd.xlane.f32.xlu0 %v4472_v0 }
0x2310   :  { %v4459_v1 = vpop.xlane.xlu0 %4458 }
0x2311   :  { %v4463_v3 = vsub.f32 %v4455_v9, %v4459_v1 }
0x2313   :  { %v4465_v4 = vmul.f32 1.442695, %v4463_v3 }
0x2314   :  { %v4474_v43 = vpop.xlane.xlu0 %4473 }
0x2315   :  { %10552 = vpow2.f32 %v4465_v4 }
0x2316   :  { %10554 = vrcp.f32 %v4474_v43 }
0x2322   :  { %v10553_v14 = vpop.eup %10552 }
0x2323   :  { %v10555_v47 = vpop.eup %10554  ;;  %v4469_v49 = vsel %vm546_vm9, %v10553_v14, 0.0 }
0x2324   :  { %v4478_v50 = vmul.f32 %v10555_v47, %v10551_v62  ;;  %4470 = vadd.xlane.f32.xlu0 %v4469_v49 }
0x2326   :  { %v4480_v34 = vpack.c.bf16 %v4478_v50, %v4478_v50 }
0x2328   :  { %9753 = vmatmul.mubr.msk.bf16.vlgmr.msra.gmra.mxu1 %vm546_vm9, %v4480_v34 }
0x2329   :  { %9765 = vmatpush3.bf16.xpose.msra.mxu1 %v4644_v8  ;;  %9766 = vmatprep.mubr.msk.bf16.mxu1 %vm10805_vm0, %v10803_v13 }
0x232a   :  { %9776 = vmatprep.subr.bf16.mxu1 %v10803_v13 }
0x233a   :  { %4481 = vrot.lane.b32.xlu0 %v11580_v56, %s10794_s16 }
0x233e   :  { %4636 = vrot.lane.b32.xlu0 %v11582_v48, %s10807_s29 }
0x23ad   :  { %v4471_v10 = vpop.xlane.xlu0 %4470 }
0x23ae   :  { %10556 = vrcp.f32 %v4471_v10 }
0x23b1   :  { %v4482_v57 = vpop.permute.xlu0 %4481 }
0x23b2   :  { %v4487_v15 = vsel %vm574_vm6, %v4482_v57, 0 }
0x23b3   :  { %9745 = vmatpush3.bf16.msra.mxu0 %v4487_v15 }
0x23b4   :  { %9756 = vmatprep.subr.bf16.mxu0 %v10803_v13 }
0x23b5   :  { %v4637_v25 = vpop.permute.xlu0 %4636 }
0x23b6   :  { %9767 = vmatmul.mubr.msk.bf16.vlgmr.msra.gmra.mxu1 %vm449_vm5, %v4637_v25 }
0x23b7   :  { %9778 = vmatprep.mubr.msk.bf16.mxu1 %vm10805_vm0, %v10803_v13 }
0x23bb   :  { %v10557_v19 = vpop.eup %10556 }
0x23bc   :  { %v4477_v55 = vmul.f32 %v10557_v19, %v10553_v14  ;;  %v4347_v14 = vadd.f32 %v11686_v12, %v11705_v41 }
0x23be   :  { %v4479_v17 = vpack.c.bf16 %v4477_v55, %v4477_v55 }
0x23c0   :  { %9747 = vmatmul.mubr.msk.bf16.vlgmr.msra.gmra.mxu0 %vm546_vm9, %v4479_v17 }
0x23c1   :  { %9760 = vmatprep.mubr.msk.bf16.mxu0 %vm10805_vm0, %v10803_v13  ;;  %9757 = vmatpush3.bf16.msra.mxu0 %v10266_v32 }
0x23c2   :  { %9758 = vmatprep.subr.bf16.mxu0 %v10803_v13 }
0x23c5   :  { %9759 = vmatpush3.bf16.msra.mxu0 %v10267_v18 }
0x23c6   :  { %9770 = vmatprep.subr.bf16.mxu0 %v10803_v13 }
0x23e8   :  { %v4571_v48 = vpop.f32.mrf.mxu1 }
0x23ea   :  { %v9754_v23 = vpop.f32.mrf.mxu1 }
0x23ec   :  { %v4574_v31 = vpop.f32.mrf.mxu1 }
0x23ee   :  { %v9755_v28 = vpop.f32.mrf.mxu1 }
0x2476   :  { %v4680_v6 = vpop.f32.mrf.mxu1 }
0x2477   :  { %v4736_v22 = vmul.f32 0.17677669, %v4680_v6 }
0x2478   :  { %v9768_v38 = vpop.f32.mrf.mxu1 }
0x2479   :  { %v4738_v40 = vadd.f32 %v4736_v22, %v10987_v39 }
0x247a   :  { %v4683_v26 = vpop.f32.mrf.mxu1 }
0x247b   :  { %v4740_v42 = vsel %vm546_vm9, %v4738_v40, -inf }
0x247c   :  { %4741 = vmax.xlane.f32.xlu0 %v4740_v42  ;;  %v9769_v16 = vpop.f32.mrf.mxu1 }
0x247d   :  { %v10268_v16 = vld [vmem:[#allocation7 + $0x24c] ss:$40 sps:$4 sm:$0xff]  }
0x2480   :  { %v4523_v52 = vpop.f32.mrf.mxu0 }
0x2481   :  { %v4577_v24 = vpack.c.bf16 %v4571_v48, %v4523_v52 }
0x2482   :  { %v9748_v9 = vpop.f32.mrf.mxu0 }
0x2483   :  { %9761 = vmatmul.mubr.msk.bf16.vlgmr.msra.gmra.mxu0 %vm449_vm5, %v4577_v24 }
0x2484   :  { %9771 = vmatpush3.bf16.xpose.msra.mxu0 %v4694_v58  ;;  %v4526_v61 = vpop.f32.mrf.mxu0  ;;  %9772 = vmatprep.mubr.msk.bf16.mxu0 %vm10805_vm0, %v10803_v13 }
0x2485   :  { %9782 = vmatprep.subr.bf16.mxu0 %v10803_v13 }
0x2486   :  { %v9749_v62 = vpop.f32.mrf.mxu0 }
0x248b   :  { %9773 = vmatmul.mubr.msk.bf16.vlgmr.msra.gmra.mxu0 %vm449_vm5, %v4687_v63 }
0x248c   :  { %9784 = vmatprep.mubr.msk.bf16.mxu0 %vm10805_vm0, %v10803_v13 }
0x2505   :  { %v4742_v0 = vpop.xlane.xlu0 %4741 }
0x2506   :  { %v4746_v1 = vsub.f32 %v4738_v40, %v4742_v0 }
0x2508   :  { %v4748_v3 = vmul.f32 1.442695, %v4746_v1 }
0x250a   :  { %10558 = vpow2.f32 %v4748_v3  ;;  %v11767_v3 = vld [vmem:[%s12369_s7 + $0x10] sm:$0x7f] }
0x2517   :  { %v10559_v4 = vpop.eup %10558 }
0x2518   :  { %v4752_v43 = vsel %vm546_vm9, %v10559_v4, 0.0 }
0x2519   :  { %4753 = vadd.xlane.f32.xlu0 %v4752_v43 }
0x2543   :  { %v4627_v47 = vpop.f32.mrf.mxu0 }
0x2544   :  { %v4634_v49 = vadd.f32 %v4627_v47, %v4347_v14 }
0x2545   :  { %v9762_v50 = vpop.f32.mrf.mxu0 }
0x2547   :  { %v4630_v34 = vpop.f32.mrf.mxu0 }
0x2548   :  { %v4635_v8 = vadd.f32 %v4630_v34, %v4350_v51 }
0x2549   :  { %v9763_v10 = vpop.f32.mrf.mxu0 }
0x254b   :  { %v4730_v57 = vpop.f32.mrf.mxu0 }
0x254c   :  { %v4737_v15 = vmul.f32 0.17677669, %v4730_v57 }
0x254d   :  { %v9774_v25 = vpop.f32.mrf.mxu0 }
0x254e   :  { %v4739_v19 = vadd.f32 %v4737_v15, %v10992_v45 }
0x254f   :  { %v4733_v55 = vpop.f32.mrf.mxu0 }
0x2550   :  { %v4743_v17 = vsel %vm546_vm9, %v4739_v19, -inf }
0x2551   :  { %4744 = vmax.xlane.f32.xlu1 %v4743_v17  ;;  %v9775_v48 = vpop.f32.mrf.mxu0 }
0x2562   :  { %4812 = vrot.lane.b32.xlu1 %v11584_v30, %s10807_s29 }
0x25a2   :  { %v4754_v32 = vpop.xlane.xlu0 %4753 }
0x25da   :  { %v4745_v12 = vpop.xlane.xlu1 %4744 }
0x25db   :  { %v4747_v41 = vsub.f32 %v4739_v19, %v4745_v12  ;;  %v10272_v12 = vld [vmem:[#allocation7 + $0x254] ss:$40 sps:$4 sm:$0xff]  }
0x25dd   :  { %v4750_v23 = vmul.f32 1.442695, %v4747_v41  ;;  %v10270_v41 = vld [vmem:[#allocation7 + $0x250] ss:$40 sps:$4 sm:$0xff]  }
0x25de   :  { %v4813_v11 = vpop.permute.xlu1 %4812 }
0x25df   :  { %10560 = vpow2.f32 %v4750_v23  ;;  %v4818_v7 = vsel %vm574_vm6, %v4813_v11, 0  ;;  %v10275_v23 = vld [vmem:[#allocation7 + $0x204] ss:$40 sps:$4 sm:$0xff]   ;;  %v10273_v11 = vld [vmem:[#allocation7 + $0x200] ss:$40 sps:$4 sm:$0xff]  }
0x25e0   :  { %9783 = vmatpush3.bf16.msra.mxu0 %v4818_v7  ;;  %10562 = vrcp.f32 %v4754_v32  ;;  %v10278_v7 = vld [vmem:[#allocation7 + $0x1b4] ss:$40 sps:$4 sm:$0xff]   ;;  %v10279_v32 = vld [vmem:[#allocation7 + $0x160] ss:$40 sps:$4 sm:$0xff]  }
0x25e1   :  { %5080 = vmatprep.subr.bf16.mxu0 %v10272_v12  ;;  %v4966_v12 = vrot.slane %v11767_v3, %v10914_v54 }
0x25ec   :  { %v10561_v31 = vpop.eup %10560 }
0x25ed   :  { %v4755_v28 = vsel %vm546_vm9, %v10561_v31, 0.0  ;;  %v10563_v18 = vpop.eup %10562 }
0x25ee   :  { %4756 = vadd.xlane.f32.xlu0 %v4755_v28  ;;  %v4760_v30 = vmul.f32 %v10563_v18, %v10559_v4  ;;  %v4922_v4 = vrot.slane %v11767_v3, %v11156_v60  ;;  %v10281_v28 = vld [vmem:[#allocation7 + $0x164] ss:$40 sps:$4 sm:$0xff]   ;;  %v10284_v18 = vld [vmem:[#allocation7 + $0x114] ss:$40 sps:$4 sm:$0xff]  }
0x25f0   :  { %v4762_v40 = vpack.c.bf16 %v4760_v30, %v4760_v30  ;;  %v10287_v30 = vld [vmem:[#allocation7 + $0xc4] ss:$40 sps:$4 sm:$0xff]  }
0x2604   :  { %4764 = vrot.lane.b32.xlu0 %v11580_v56, %s10807_s29 }
0x2677   :  { %v4757_v6 = vpop.xlane.xlu0 %4756 }
0x2678   :  { %10564 = vrcp.f32 %v4757_v6  ;;  %v10282_v6 = vld [vmem:[#allocation7 + $0x110] ss:$40 sps:$4 sm:$0xff]  }
0x267b   :  { %v4765_v22 = vpop.permute.xlu0 %4764 }
0x267c   :  { %v4770_v38 = vsel %vm574_vm6, %v4765_v22, 0  ;;  %v10285_v22 = vld [vmem:[#allocation7 + $0xc0] ss:$40 sps:$4 sm:$0xff]  }
0x267d   :  { %9777 = vmatpush3.bf16.msra.mxu1 %v4770_v38  ;;  %v10290_v38 = vld [vmem:[#allocation7 + $0x74] ss:$40 sps:$4 sm:$0xff]  }
0x267e   :  { %9788 = vmatprep.subr.bf16.mxu1 %v10803_v13 }
0x2680   :  { %9779 = vmatmul.mubr.msk.bf16.vlgmr.msra.gmra.mxu1 %vm546_vm9, %v4762_v40  ;;  %v10288_v40 = vld [vmem:[#allocation7 + $0x70] ss:$40 sps:$4 sm:$0xff]  }
0x2681   :  { %9792 = vmatprep.mubr.msk.bf16.mxu1 %vm10805_vm0, %v10803_v13  ;;  %9789 = vmatpush3.bf16.msra.mxu1 %v10268_v16  ;;  %v10295_v16 = vld [vmem:[#allocation8 + $0x38] sm:$0xff]  }
0x2682   :  { %9790 = vmatprep.subr.bf16.mxu1 %v10803_v13 }
0x2685   :  { %v10565_v26 = vpop.eup %10564  ;;  %9791 = vmatpush3.bf16.msra.mxu1 %v10269_v33  ;;  %v10296_v33 = vld [vmem:[#allocation8 + $0x70] sm:$0xff]  }
0x2686   :  { %v4761_v56 = vmul.f32 %v10565_v26, %v10561_v31  ;;  %v10276_v31 = vld [vmem:[#allocation7 + $0x1b0] ss:$40 sps:$4 sm:$0xff]   ;;  %v10293_v26 = vld [vmem:[#allocation7 + $0x24] ss:$40 sps:$4 sm:$0xff]  }
0x2688   :  { %v4763_v42 = vpack.c.bf16 %v4761_v56, %v4761_v56  ;;  %v10291_v56 = vld [vmem:[#allocation7 + $0x20] ss:$40 sps:$4 sm:$0xff]  }
0x268a   :  { %9785 = vmatmul.mubr.msk.bf16.vlgmr.msra.gmra.mxu0 %vm546_vm9, %v4763_v42  ;;  %v10294_v42 = vld [vmem:[#allocation8 + $0x78] sm:$0xff]  }
0x268b   :  { %5112 = vmatprep.mubr.bf16.mxu0 %v10804_v27  ;;  %5081 = vmatpush1.bf16.msra.mxu0 %v10270_v41 }
0x268c   :  { %5082 = vmatprep.subr.bf16.mxu0 %v10275_v23  ;;  %9202 = vmatprep.subr.bf16.mxu1 %v10294_v42 }
0x268f   :  { %5083 = vmatpush1.bf16.msra.mxu0 %v10273_v11  ;;  %v4972_v11 = vrot.slane %v11767_v3, %v10925_v59  ;;  %v10309_v3 = vld [vmem:[#allocation8] sm:$0xff]  }
0x2690   :  { %5084 = vmatprep.subr.bf16.mxu0 %v10278_v7 }
0x2693   :  { %5085 = vmatpush1.bf16.msra.mxu0 %v10276_v31 }
0x2694   :  { %5086 = vmatprep.subr.bf16.mxu0 %v10281_v28 }
0x2697   :  { %5087 = vmatpush1.bf16.msra.mxu0 %v10279_v32 }
0x2698   :  { %5088 = vmatprep.subr.bf16.mxu0 %v10284_v18 }
0x269b   :  { %5089 = vmatpush1.bf16.msra.mxu0 %v10282_v6 }
0x269c   :  { %5090 = vmatprep.subr.bf16.mxu0 %v10287_v30  ;;  %v10304_v30 = vld [vmem:[#allocation8 + $0x50] sm:$0xff]  }
0x269f   :  { %5091 = vmatpush1.bf16.msra.mxu0 %v10285_v22  ;;  %v10305_v22 = vld [vmem:[#allocation8 + $0x10] sm:$0xff]  }
0x26a0   :  { %5092 = vmatprep.subr.bf16.mxu0 %v10290_v38  ;;  %v10306_v38 = vld [vmem:[#allocation8 + $0x48] sm:$0xff]  }
0x26a3   :  { %5093 = vmatpush1.bf16.msra.mxu0 %v10288_v40  ;;  %v10308_v40 = vld [vmem:[#allocation8 + $0x40] sm:$0xff]  }
0x26a4   :  { %5094 = vmatprep.subr.bf16.mxu0 %v10293_v26 }
0x26a7   :  { %5095 = vmatpush1.bf16.msra.mxu0 %v10291_v56  ;;  %v10680_v56 = vld [vmem:[%s12369_s7 + $0x8] sm:$0x7f] }
0x2740   :  { %v4806_v52 = vpop.f32.mrf.mxu1 }
0x2742   :  { %v9780_v24 = vpop.f32.mrf.mxu1 }
0x2743   :  { %v10298_v24 = vld [vmem:[#allocation8 + $0x68] sm:$0xff]  }
0x2744   :  { %v4809_v9 = vpop.f32.mrf.mxu1 }
0x2745   :  { %v10299_v9 = vld [vmem:[#allocation8 + $0x28] sm:$0xff]  }
0x2746   :  { %v9781_v58 = vpop.f32.mrf.mxu1 }
0x2747   :  { %v10300_v58 = vld [vmem:[#allocation8 + $0x60] sm:$0xff]  }
0x274a   :  { %v4854_v61 = vpop.f32.mrf.mxu0 }
0x274b   :  { %v4860_v62 = vpack.c.bf16 %v4854_v61, %v4806_v52  ;;  %v10297_v52 = vld [vmem:[#allocation8 + $0x30] sm:$0xff]   ;;  %v10301_v61 = vld [vmem:[#allocation8 + $0x20] sm:$0xff]  }
0x274c   :  { %v9786_v63 = vpop.f32.mrf.mxu0 }
0x274d   :  { %9793 = vmatmul.mubr.msk.bf16.vlgmr.msra.gmra.mxu1 %vm449_vm5, %v4860_v62  ;;  %v10302_v62 = vld [vmem:[#allocation8 + $0x58] sm:$0xff]  }
0x274e   :  { %v4857_v0 = vpop.f32.mrf.mxu0  ;;  %9203 = vmatpush3.bf16.msra.mxu1 %v10295_v16  ;;  %v10303_v63 = vld [vmem:[#allocation8 + $0x18] sm:$0xff]  }
0x274f   :  { %9204 = vmatprep.subr.bf16.mxu1 %v10296_v33 }
0x2750   :  { %v9787_v1 = vpop.f32.mrf.mxu0 }
0x2752   :  { %9205 = vmatpush3.bf16.msra.mxu1 %v10297_v52 }
0x2753   :  { %9206 = vmatprep.subr.bf16.mxu1 %v10298_v24 }
0x2756   :  { %9207 = vmatpush3.bf16.msra.mxu1 %v10299_v9 }
0x2757   :  { %9208 = vmatprep.subr.bf16.mxu1 %v10300_v58 }
0x275a   :  { %9209 = vmatpush3.bf16.msra.mxu1 %v10301_v61 }
0x275b   :  { %9210 = vmatprep.subr.bf16.mxu1 %v10302_v62 }
0x275e   :  { %9211 = vmatpush3.bf16.msra.mxu1 %v10303_v63 }
0x275f   :  { %9212 = vmatprep.subr.bf16.mxu1 %v10304_v30  ;;  %v10314_v30 = vld [vmem:[#allocation7 + $0x460] ss:$40 sps:$4 sm:$0xff]  }
0x2762   :  { %9213 = vmatpush3.bf16.msra.mxu1 %v10305_v22  ;;  %v10317_v22 = vld [vmem:[#allocation7 + $0x468] ss:$40 sps:$4 sm:$0xff]  }
0x2763   :  { %9214 = vmatprep.subr.bf16.mxu1 %v10306_v38  ;;  %v10320_v38 = vld [vmem:[#allocation7 + $0x414] ss:$40 sps:$4 sm:$0xff]  }
0x280d   :  { %v4910_v43 = vpop.f32.mrf.mxu1 }
0x280e   :  { %v4917_v14 = vadd.f32 %v4910_v43, %v4634_v49 }
0x280f   :  { %v9794_v47 = vpop.f32.mrf.mxu1 }
0x2810   :  { %v4923_v50 = vadd.f32 %v4922_v4, %v4917_v14 }
0x2811   :  { %v4913_v51 = vpop.f32.mrf.mxu1 }
0x2812   :  { %v4918_v34 = vadd.f32 %v4913_v51, %v4635_v8  ;;  %v11772_v10 = vadd.f32 %v4923_v50, %v11495_v20 }
0x2813   :  { %v9795_v57 = vpop.f32.mrf.mxu1 }
0x2814   :  { %v4924_v15 = vadd.f32 %v4922_v4, %v4918_v34  ;;  %4927 = vadd.xlane.f32.xlu1 %v11772_v10 }
0x2816   :  { %v11776_v25 = vadd.f32 %v4924_v15, %v11504_v2 }
0x2818   :  { %4929 = vadd.xlane.f32.xlu0 %v11776_v25 }
0x289d   :  { %v4928_v19 = vpop.xlane.xlu1 %4927 }
0x289e   :  { %v4931_v55 = vmul.f32 0.0078125, %v4928_v19 }
0x28a0   :  { %v11780_v49 = vsub.f32 %v11772_v10, %v4931_v55 }
0x28a1   :  { %v4930_v17 = vpop.xlane.xlu0 %4929 }
0x28a2   :  { %v4932_v48 = vmul.f32 0.0078125, %v4930_v17  ;;  %v4935_v20 = vmul.f32 %v11780_v49, %v11780_v49 }
0x28a4   :  { %v11785_v8 = vsub.f32 %v11776_v25, %v4932_v48  ;;  %4937 = vadd.xlane.f32.xlu0 %v4935_v20 }
0x28a6   :  { %v4936_v2 = vmul.f32 %v11785_v8, %v11785_v8 }
0x28a8   :  { %4939 = vadd.xlane.f32.xlu1 %v4936_v2 }
0x292d   :  { %v4938_v0 = vpop.xlane.xlu0 %4937 }
0x292e   :  { %v4941_v1 = vmul.f32 0.007874016, %v4938_v0 }
0x2930   :  { %10566 = vrsqrt.f32 %v4941_v1  ;;  %vm4945_vm1 = vcmp.eq.f32.partialorder %v4941_v1, inf  ;;  %v4948_v50 = vand.u32 2147483648, %v4941_v1  ;;  %vm4947_vm2 = vcmp.eq.f32.partialorder %v4941_v1, 0.0 }
0x2931   :  { %v4940_v4 = vpop.xlane.xlu1 %4939 }
0x2932   :  { %v4942_v43 = vmul.f32 0.007874016, %v4940_v4 }
0x2934   :  { %10568 = vrsqrt.f32 %v4942_v43  ;;  %vm4952_vm3 = vcmp.eq.f32.partialorder %v4942_v43, inf  ;;  %v4955_v55 = vand.u32 2147483648, %v4942_v43  ;;  %vm4954_vm4 = vcmp.eq.f32.partialorder %v4942_v43, 0.0 }
0x293d   :  { %v10567_v14 = vpop.eup %10566 }
0x293e   :  { %v4944_v47 = vmul.f32 %v10567_v14, %v4941_v1 }
0x2940   :  { %v4946_v51 = vsel %vm4945_vm1, %v4941_v1, %v4944_v47 }
0x2941   :  { %v10569_v34 = vpop.eup %10568  ;;  %v4949_v57 = vsel %vm4947_vm2, %v4948_v50, %v4946_v51  ;;  %v10681_v50 = vld [vmem:[%s12369_s7] sm:$0x7f] }
0x2942   :  { %v4957_v15 = vadd.f32 1e-06, %v4949_v57  ;;  %v4951_v19 = vmul.f32 %v10569_v34, %v4942_v43 }
0x2944   :  { %10570 = vrcp.f32 %v4957_v15  ;;  %v4953_v17 = vsel %vm4952_vm3, %v4942_v43, %v4951_v19 }
0x2945   :  { %v4956_v48 = vsel %vm4954_vm4, %v4955_v55, %v4953_v17 }
0x2946   :  { %v4958_v20 = vadd.f32 1e-06, %v4956_v48 }
0x2948   :  { %10572 = vrcp.f32 %v4958_v20 }
0x2951   :  { %v10571_v2 = vpop.eup %10570 }
0x2952   :  { %v4961_v41 = vmul.f32 %v10571_v2, %v11780_v49  ;;  %v10307_v49 = vld [vmem:[#allocation8 + $0x8] sm:$0xff]  }
0x2953   :  { %9215 = vmatpush3.bf16.msra.mxu1 %v10307_v49  ;;  %v10318_v49 = vld [vmem:[#allocation7 + $0x410] ss:$40 sps:$4 sm:$0xff]  }
0x2954   :  { %v4967_v31 = vmul.f32 %v4966_v12, %v4961_v41  ;;  %9216 = vmatprep.subr.bf16.mxu1 %v10308_v40  ;;  %v10321_v40 = vld [vmem:[#allocation7 + $0x418] ss:$40 sps:$4 sm:$0xff]  }
0x2955   :  { %v10573_v23 = vpop.eup %10572 }
0x2956   :  { %v4962_v7 = vmul.f32 %v10573_v23, %v11785_v8  ;;  %v4973_v32 = vadd.f32 %v4972_v11, %v4967_v31  ;;  %v11798_v8 = vsub.s32 5, %v10911_v53 }
0x2957   :  { %9217 = vmatpush3.bf16.msra.mxu1 %v10309_v3  ;;  %v10324_v3 = vld [vmem:[#allocation7 + $0x3c4] ss:$40 sps:$4 sm:$0xff]  }
0x2958   :  { %v4968_v28 = vmul.f32 %v4966_v12, %v4962_v7  ;;  %9796 = vmatprep.subr.bf16.mxu1 %v10803_v13  ;;  %v4999_v42 = vrot.slane %v10680_v56, %v11798_v8  ;;  %v4995_v16 = vrot.slane %v11564_v35, %v11798_v8  ;;  %v5163_v35 = vsub.s32 6, %v10911_v53  ;;  %v10325_v56 = vld [vmem:[#allocation7 + $0x3c8] ss:$40 sps:$4 sm:$0xff]  }
0x295a   :  { %v4974_v18 = vadd.f32 %v4972_v11, %v4968_v28  ;;  %v5164_v51 = vrot.slane %v10681_v50, %v5163_v35  ;;  %v10312_v28 = vld [vmem:[#allocation7 + $0x4b4] ss:$40 sps:$4 sm:$0xff]  }
0x295b   :  { %5530 = vmatprep.subr.bf16.mxu0 %v10312_v28 }
0x295c   :  { %v4991_v6 = vpack.c.bf16 %v4974_v18, %v4973_v32  ;;  %v10310_v32 = vld [vmem:[#allocation7 + $0x4b0] ss:$40 sps:$4 sm:$0xff]  }
0x295d   :  { %v10313_v18 = vld [vmem:[#allocation7 + $0x4b8] ss:$40 sps:$4 sm:$0xff]  }
0x295e   :  { %5113 = vmatmul.mubr.bf16.vlgmr.msra.gmra.mxu0 %v4991_v6  ;;  %v10316_v6 = vld [vmem:[#allocation7 + $0x464] ss:$40 sps:$4 sm:$0xff]  }
0x295f   :  { %5562 = vmatprep.mubr.bf16.mxu0 %v10804_v27  ;;  %5531 = vmatpush1.bf16.msra.mxu0 %v10310_v32 }
0x2960   :  { %5532 = vmatprep.subr.bf16.mxu0 %v10316_v6 }
0x2963   :  { %5533 = vmatpush1.bf16.msra.mxu0 %v10314_v30 }
0x2964   :  { %5534 = vmatprep.subr.bf16.mxu0 %v10320_v38 }
0x2967   :  { %5535 = vmatpush1.bf16.msra.mxu0 %v10318_v49 }
0x2968   :  { %5536 = vmatprep.subr.bf16.mxu0 %v10324_v3 }
0x2a1e   :  { %v5114_v26 = vpop.f32.mrf.mxu0 }
0x2a1f   :  { %v5115_v58 = vadd.f32 %v5114_v26, %v4995_v16  ;;  %v10322_v26 = vld [vmem:[#allocation7 + $0x3c0] ss:$40 sps:$4 sm:$0xff]  }
0x2a20   :  { %v5116_v33 = vpop.f32.mrf.mxu0  ;;  %5537 = vmatpush1.bf16.msra.mxu0 %v10322_v26  ;;  %v8884_v26 = vld [vmem:[%s12369_s7 + $0x28] sm:$0x7f] }
0x2a21   :  { %v5117_v24 = vadd.f32 %v5116_v33, %v4999_v42  ;;  %v5123_v4 = vmax.f32 %v5115_v58, 0.0  ;;  %v10329_v33 = vld [vmem:[#allocation7 + $0x378] ss:$40 sps:$4 sm:$0xff]   ;;  %v10336_v58 = vld [vmem:[#allocation7 + $0x2d4] ss:$40 sps:$4 sm:$0xff]  }
0x2a22   :  { %v5118_v52 = vpop.f32.mrf.mxu0 }
0x2a23   :  { %v5119_v9 = vadd.f32 %v5118_v52, %v4995_v16  ;;  %v5124_v0 = vmax.f32 %v5117_v24, 0.0  ;;  %v10326_v16 = vld [vmem:[#allocation7 + $0x370] ss:$40 sps:$4 sm:$0xff]   ;;  %v10332_v52 = vld [vmem:[#allocation7 + $0x324] ss:$40 sps:$4 sm:$0xff]  }
0x2a24   :  { %v5120_v61 = vpop.f32.mrf.mxu0  ;;  %v10330_v24 = vld [vmem:[#allocation7 + $0x320] ss:$40 sps:$4 sm:$0xff]  }
0x2a25   :  { %v5121_v62 = vadd.f32 %v5120_v61, %v4999_v42  ;;  %v5125_v63 = vmax.f32 %v5119_v9, 0.0  ;;  %v10328_v42 = vld [vmem:[#allocation7 + $0x374] ss:$40 sps:$4 sm:$0xff]   ;;  %v10333_v9 = vld [vmem:[#allocation7 + $0x328] ss:$40 sps:$4 sm:$0xff]  }
0x2a26   :  { %5538 = vmatprep.subr.bf16.mxu0 %v10328_v42  ;;  %v10334_v61 = vld [vmem:[#allocation7 + $0x2d0] ss:$40 sps:$4 sm:$0xff]  }
0x2a27   :  { %v5126_v1 = vmax.f32 %v5121_v62, 0.0  ;;  %v5159_v14 = vpack.c.bf16 %v5125_v63, %v5123_v4  ;;  %5539 = vmatpush1.bf16.msra.mxu0 %v10326_v16  ;;  %v10337_v62 = vld [vmem:[#allocation7 + $0x2d8] ss:$40 sps:$4 sm:$0xff]   ;;  %v10340_v63 = vld [vmem:[#allocation7 + $0x284] ss:$40 sps:$4 sm:$0xff]  }
0x2a28   :  { %5540 = vmatprep.subr.bf16.mxu0 %v10332_v52 }
0x2a29   :  { %v5160_v43 = vpack.c.bf16 %v5126_v1, %v5124_v0  ;;  %v10338_v0 = vld [vmem:[#allocation7 + $0x280] ss:$40 sps:$4 sm:$0xff]  }
0x2a2a   :  { %v10341_v1 = vld [vmem:[#allocation7 + $0x288] ss:$40 sps:$4 sm:$0xff]  }
0x2a2b   :  { %5293 = vmatprep.mubr.bf16.mxu1 %v5160_v43  ;;  %5541 = vmatpush1.bf16.msra.mxu0 %v10330_v24 }
0x2a2c   :  { %5294 = vmatmul.mubr.bf16.vlgmr.msra.gmra.mxu1 %v5159_v14  ;;  %5542 = vmatprep.subr.bf16.mxu0 %v10336_v58 }
0x2a2d   :  { %9812 = vmatprep.mubr.msk.bf16.mxu1 %vm10805_vm0, %v10803_v13  ;;  %9797 = vmatpush3.bf16.msra.mxu1 %v10313_v18 }
0x2a2e   :  { %9798 = vmatprep.subr.bf16.mxu1 %v10803_v13 }
0x2a2f   :  { %5543 = vmatpush1.bf16.msra.mxu0 %v10334_v61 }
0x2a30   :  { %5544 = vmatprep.subr.bf16.mxu0 %v10340_v63 }
0x2a31   :  { %9799 = vmatpush3.bf16.msra.mxu1 %v10317_v22 }
0x2a32   :  { %9800 = vmatprep.subr.bf16.mxu1 %v10803_v13 }
0x2a33   :  { %5545 = vmatpush1.bf16.msra.mxu0 %v10338_v0 }
0x2a34   :  { %9816 = vmatprep.subr.bf16.mxu0 %v10803_v13 }
0x2a35   :  { %9801 = vmatpush3.bf16.msra.mxu1 %v10321_v40 }
0x2a36   :  { %9802 = vmatprep.subr.bf16.mxu1 %v10803_v13 }
0x2a39   :  { %9803 = vmatpush3.bf16.msra.mxu1 %v10325_v56 }
0x2a3a   :  { %9804 = vmatprep.subr.bf16.mxu1 %v10803_v13 }
0x2a3d   :  { %9805 = vmatpush3.bf16.msra.mxu1 %v10329_v33  ;;  %v5401_v33 = vrot.slane %v8884_v26, %v10938_v5 }
0x2a3e   :  { %9806 = vmatprep.subr.bf16.mxu1 %v10803_v13 }
0x2a41   :  { %9807 = vmatpush3.bf16.msra.mxu1 %v10333_v9 }
0x2a42   :  { %9808 = vmatprep.subr.bf16.mxu1 %v10803_v13 }
0x2a45   :  { %9809 = vmatpush3.bf16.msra.mxu1 %v10337_v62 }
0x2a46   :  { %9810 = vmatprep.subr.bf16.mxu1 %v10803_v13 }
0x2a49   :  { %9811 = vmatpush3.bf16.msra.mxu1 %v10341_v1 }
0x2a4a   :  { %9822 = vmatprep.subr.bf16.mxu1 %v10803_v13 }
0x2aec   :  { %v9218_v47 = vpop.f32.mrf.mxu1 }
0x2aee   :  { %v9219_v34 = vpop.f32.mrf.mxu1 }
0x2aef   :  { %v9220_v57 = vadd.f32 %v9219_v34, %v9218_v47 }
0x2af0   :  { %v9221_v15 = vpop.f32.mrf.mxu1 }
0x2af1   :  { %v5296_v19 = vadd.f32 %v9220_v57, %v5164_v51 }
0x2af2   :  { %v9222_v55 = vpop.f32.mrf.mxu1 }
0x2af3   :  { %v9223_v17 = vadd.f32 %v9222_v55, %v9221_v15  ;;  %v11815_v48 = vadd.f32 %v5296_v19, %v11772_v10 }
0x2af5   :  { %v5299_v20 = vadd.f32 %v9223_v17, %v5164_v51  ;;  %5308 = vadd.xlane.f32.xlu0 %v11815_v48 }
0x2af7   :  { %v11819_v2 = vadd.f32 %v5299_v20, %v11776_v25 }
0x2af9   :  { %5310 = vadd.xlane.f32.xlu1 %v11819_v2 }
0x2b7e   :  { %v5309_v12 = vpop.xlane.xlu0 %5308 }
0x2b7f   :  { %v5312_v41 = vmul.f32 0.0078125, %v5309_v12 }
0x2b81   :  { %v11823_v23 = vsub.f32 %v11815_v48, %v5312_v41 }
0x2b82   :  { %v5311_v11 = vpop.xlane.xlu1 %5310 }
0x2b83   :  { %v5313_v7 = vmul.f32 0.0078125, %v5311_v11  ;;  %v5316_v31 = vmul.f32 %v11823_v23, %v11823_v23 }
0x2b85   :  { %v11828_v10 = vsub.f32 %v11819_v2, %v5313_v7  ;;  %5318 = vadd.xlane.f32.xlu0 %v5316_v31  ;;  %v11844_v7 = vld [vmem:[%s12369_s7 + $0x18] sm:$0x7f] }
0x2b86   :  { %v5347_v28 = vrot.slane %v11844_v7, %v10914_v54  ;;  %v5353_v30 = vrot.slane %v11844_v7, %v10925_v59  ;;  %v5393_v58 = vrot.slane %v11844_v7, %v10938_v5 }
0x2b87   :  { %v5317_v25 = vmul.f32 %v11828_v10, %v11828_v10 }
0x2b89   :  { %5320 = vadd.xlane.f32.xlu1 %v5317_v25 }
0x2c0e   :  { %v5319_v4 = vpop.xlane.xlu0 %5318 }
0x2c0f   :  { %v5322_v43 = vmul.f32 0.007874016, %v5319_v4 }
0x2c11   :  { %10574 = vrsqrt.f32 %v5322_v43  ;;  %vm5326_vm7 = vcmp.eq.f32.partialorder %v5322_v43, inf  ;;  %v5329_v34 = vand.u32 2147483648, %v5322_v43  ;;  %vm5328_vm8 = vcmp.eq.f32.partialorder %v5322_v43, 0.0 }
0x2c12   :  { %v5321_v14 = vpop.xlane.xlu1 %5320 }
0x2c13   :  { %v5323_v47 = vmul.f32 0.007874016, %v5321_v14 }
0x2c15   :  { %10576 = vrsqrt.f32 %v5323_v47  ;;  %vm5333_vm10 = vcmp.eq.f32.partialorder %v5323_v47, inf  ;;  %v5336_v20 = vand.u32 2147483648, %v5323_v47  ;;  %vm5335_vm11 = vcmp.eq.f32.partialorder %v5323_v47, 0.0 }
0x2c1e   :  { %v10575_v50 = vpop.eup %10574 }
0x2c1f   :  { %v5325_v51 = vmul.f32 %v10575_v50, %v5322_v43 }
0x2c21   :  { %v5327_v57 = vsel %vm5326_vm7, %v5322_v43, %v5325_v51 }
0x2c22   :  { %v10577_v15 = vpop.eup %10576  ;;  %v5330_v19 = vsel %vm5328_vm8, %v5329_v34, %v5327_v57 }
0x2c23   :  { %v5338_v55 = vadd.f32 1e-06, %v5330_v19  ;;  %v5332_v17 = vmul.f32 %v10577_v15, %v5323_v47 }
0x2c25   :  { %10578 = vrcp.f32 %v5338_v55  ;;  %v5334_v12 = vsel %vm5333_vm10, %v5323_v47, %v5332_v17 }
0x2c26   :  { %v5337_v41 = vsel %vm5335_vm11, %v5336_v20, %v5334_v12 }
0x2c27   :  { %v5339_v11 = vadd.f32 1e-06, %v5337_v41 }
0x2c29   :  { %10580 = vrcp.f32 %v5339_v11 }
0x2c32   :  { %v10579_v31 = vpop.eup %10578 }
0x2c33   :  { %v5342_v25 = vmul.f32 %v10579_v31, %v11823_v23  ;;  %v11859_v23 = vld [vmem:[%s12369_s7 + $0x20] sm:$0x7f] }
0x2c35   :  { %v5348_v6 = vmul.f32 %v5347_v28, %v5342_v25 }
0x2c36   :  { %v10581_v32 = vpop.eup %10580 }
0x2c37   :  { %v5343_v18 = vmul.f32 %v10581_v32, %v11828_v10  ;;  %v5354_v38 = vadd.f32 %v5353_v30, %v5348_v6  ;;  %v5397_v10 = vrot.slane %v11859_v23, %v10938_v5 }
0x2c39   :  { %v5349_v22 = vmul.f32 %v5347_v28, %v5343_v18 }
0x2c3b   :  { %v5355_v49 = vadd.f32 %v5353_v30, %v5349_v22 }
0x2c3d   :  { %v5389_v40 = vpack.c.bf16 %v5355_v49, %v5354_v38 }
0x2c3f   :  { %5563 = vmatmul.mubr.bf16.vlgmr.msra.gmra.mxu0 %v5389_v40  ;;  %9813 = vmatmul.mubr.bf16.vlgmr.msra.gmra.mxu1 %v5389_v40 }
0x2c40   :  { %9818 = vmatprep.mubr.msk.bf16.mxu0 %vm10805_vm0, %v10803_v13  ;;  %9824 = vmatprep.mubr.msk.bf16.mxu1 %vm10805_vm0, %v10803_v13 }
0x2cff   :  { %v5564_v3 = vpop.f32.mrf.mxu0  ;;  %v5607_v56 = vpop.f32.mrf.mxu1 }
0x2d00   :  { %v5608_v0 = vadd.f32 %v5607_v56, %v5401_v33  ;;  %v5565_v43 = vadd.f32 %v5564_v3, %v5393_v58 }
0x2d01   :  { %v5566_v42 = vpop.f32.mrf.mxu0  ;;  %v9814_v16 = vpop.f32.mrf.mxu1 }
0x2d02   :  { %v5567_v52 = vadd.f32 %v5566_v42, %v5397_v10  ;;  %v11876_v47 = vpack.c.bf16 %v5608_v0, %v5608_v0  ;;  %v11880_v51 = vpack.c.bf16 %v5565_v43, %v5565_v43 }
0x2d03   :  { %v5568_v24 = vpop.f32.mrf.mxu0  ;;  %v5610_v9 = vpop.f32.mrf.mxu1 }
0x2d04   :  { %v11869_v61 = vpack.c.bf16 %v5567_v52, %v5567_v52  ;;  %v5611_v50 = vadd.f32 %v5610_v9, %v5401_v33  ;;  %v5569_v34 = vadd.f32 %v5568_v24, %v5393_v58  ;;  %v5760_v15 = vsel %vm574_vm6, %v11876_v47, 0 }
0x2d05   :  { %v5570_v62 = vpop.f32.mrf.mxu0  ;;  %v9815_v63 = vpop.f32.mrf.mxu1 }
0x2d06   :  { %v5571_v1 = vadd.f32 %v5570_v62, %v5397_v10  ;;  %v5640_v4 = vsel %vm449_vm5, %v11869_v61, 0  ;;  %v11883_v57 = vpack.c.bf16 %v5611_v50, %v5611_v50  ;;  %v11891_v19 = vpack.c.bf16 %v5569_v34, %v5569_v34 }
0x2d07   :  { %9817 = vmatpush3.bf16.xpose.msra.mxu0 %v5640_v4 }
0x2d08   :  { %v11873_v14 = vpack.c.bf16 %v5571_v1, %v5571_v1  ;;  %9828 = vmatprep.subr.bf16.mxu0 %v10803_v13  ;;  %v5806_v55 = vsel %vm574_vm6, %v11883_v57, 0 }
0x2d0a   :  { %v5686_v5 = vsel %vm449_vm5, %v11873_v14, 0 }
0x2d0b   :  { %9823 = vmatpush3.bf16.xpose.msra.mxu1 %v5686_v5 }
0x2d0c   :  { %9834 = vmatprep.subr.bf16.mxu1 %v10803_v13 }
0x2d0e   :  { %9819 = vmatmul.mubr.msk.bf16.vlgmr.msra.gmra.mxu0 %vm449_vm5, %v11880_v51 }
0x2d0f   :  { %9829 = vmatpush3.bf16.msra.mxu0 %v5760_v15  ;;  %9830 = vmatprep.mubr.msk.bf16.mxu0 %vm10805_vm0, %v10803_v13 }
0x2d10   :  { %9840 = vmatprep.subr.bf16.mxu0 %v10803_v13 }
0x2d12   :  { %9825 = vmatmul.mubr.msk.bf16.vlgmr.msra.gmra.mxu1 %vm449_vm5, %v11891_v19 }
0x2d13   :  { %9835 = vmatpush3.bf16.msra.mxu1 %v5806_v55  ;;  %9836 = vmatprep.mubr.msk.bf16.mxu1 %vm10805_vm0, %v10803_v13 }
0x2d14   :  { %9846 = vmatprep.subr.bf16.mxu1 %v10803_v13 }
0x2dce   :  { %v5676_v17 = vpop.f32.mrf.mxu0 }
0x2dcf   :  { %v5728_v20 = vmul.f32 0.17677669, %v5676_v17 }
0x2dd0   :  { %v9820_v12 = vpop.f32.mrf.mxu0 }
0x2dd1   :  { %v5730_v41 = vadd.f32 %v5728_v20, %v11293_v29 }
0x2dd2   :  { %v5679_v11 = vpop.f32.mrf.mxu0  ;;  %v5722_v31 = vpop.f32.mrf.mxu1 }
0x2dd3   :  { %v5729_v25 = vmul.f32 0.17677669, %v5722_v31  ;;  %v5732_v28 = vsel %vm546_vm9, %v5730_v41, -inf }
0x2dd4   :  { %v9826_v32 = vpop.f32.mrf.mxu1  ;;  %5733 = vmax.xlane.f32.xlu0 %v5732_v28  ;;  %v9821_v18 = vpop.f32.mrf.mxu0 }
0x2dd5   :  { %v5731_v6 = vadd.f32 %v5729_v25, %v11308_v21 }
0x2dd6   :  { %v5725_v30 = vpop.f32.mrf.mxu1 }
0x2dd7   :  { %v5735_v22 = vsel %vm546_vm9, %v5731_v6, -inf }
0x2dd8   :  { %5736 = vmax.xlane.f32.xlu1 %v5735_v22  ;;  %v9827_v38 = vpop.f32.mrf.mxu1 }
0x2de9   :  { %5905 = vrot.lane.b32.xlu1 %v11873_v14, %s10806_s2 }
0x2e5d   :  { %v5734_v49 = vpop.xlane.xlu0 %5733 }
0x2e5e   :  { %v5738_v40 = vsub.f32 %v5730_v41, %v5734_v49 }
0x2e60   :  { %v5740_v10 = vmul.f32 1.442695, %v5738_v40 }
0x2e61   :  { %v5737_v3 = vpop.xlane.xlu1 %5736 }
0x2e62   :  { %10582 = vpow2.f32 %v5740_v10  ;;  %v5739_v26 = vsub.f32 %v5731_v6, %v5737_v3 }
0x2e64   :  { %v5742_v56 = vmul.f32 1.442695, %v5739_v26 }
0x2e65   :  { %v5906_v24 = vpop.permute.xlu1 %5905 }
0x2e66   :  { %10584 = vpow2.f32 %v5742_v56  ;;  %v5911_v34 = vsel %vm449_vm5, %v5906_v24, 0 }
0x2e6f   :  { %v10583_v42 = vpop.eup %10582 }
0x2e70   :  { %v5744_v16 = vsel %vm546_vm9, %v10583_v42, 0.0 }
0x2e71   :  { %5745 = vadd.xlane.f32.xlu0 %v5744_v16 }
0x2e73   :  { %v10585_v33 = vpop.eup %10584 }
0x2e74   :  { %v5747_v52 = vsel %vm546_vm9, %v10585_v33, 0.0 }
0x2e75   :  { %5748 = vadd.xlane.f32.xlu1 %v5747_v52 }
0x2e86   :  { %5850 = vrot.lane.b32.xlu1 %v11880_v51, %s10806_s2 }
0x2e87   :  { %5853 = vrot.lane.b32.xlu0 %v11869_v61, %s10806_s2 }
0x2e8a   :  { %5902 = vrot.lane.b32.xlu1 %v11891_v19, %s10806_s2 }
0x2efa   :  { %v5746_v9 = vpop.xlane.xlu0 %5745 }
0x2efb   :  { %10586 = vrcp.f32 %v5746_v9 }
0x2efe   :  { %v5749_v58 = vpop.xlane.xlu1 %5748  ;;  %v5854_v0 = vpop.permute.xlu0 %5853 }
0x2eff   :  { %10588 = vrcp.f32 %v5749_v58  ;;  %v5859_v50 = vsel %vm449_vm5, %v5854_v0, 0 }
0x2f02   :  { %v5851_v15 = vpop.permute.xlu1 %5850 }
0x2f06   :  { %v5903_v55 = vpop.permute.xlu1 %5902 }
0x2f08   :  { %v10587_v62 = vpop.eup %10586 }
0x2f09   :  { %v5752_v63 = vmul.f32 %v10587_v62, %v10583_v42 }
0x2f0b   :  { %v5754_v1 = vpack.c.bf16 %v5752_v63, %v5752_v63 }
0x2f0c   :  { %v10589_v4 = vpop.eup %10588 }
0x2f0d   :  { %v5753_v43 = vmul.f32 %v10589_v4, %v10585_v33  ;;  %9831 = vmatmul.mubr.msk.bf16.vlgmr.msra.gmra.mxu0 %vm546_vm9, %v5754_v1 }
0x2f0e   :  { %9841 = vmatpush3.bf16.xpose.msra.mxu0 %v5859_v50  ;;  %9842 = vmatprep.mubr.msk.bf16.mxu0 %vm10805_vm0, %v10803_v13 }
0x2f0f   :  { %v5755_v5 = vpack.c.bf16 %v5753_v43, %v5753_v43  ;;  %9852 = vmatprep.subr.bf16.mxu0 %v10803_v13 }
0x2f11   :  { %9837 = vmatmul.mubr.msk.bf16.vlgmr.msra.gmra.mxu1 %vm546_vm9, %v5755_v5 }
0x2f12   :  { %9847 = vmatpush3.bf16.xpose.msra.mxu1 %v5911_v34  ;;  %9848 = vmatprep.mubr.msk.bf16.mxu1 %vm10805_vm0, %v10803_v13 }
0x2f13   :  { %9858 = vmatprep.subr.bf16.mxu1 %v10803_v13 }
0x2f15   :  { %9843 = vmatmul.mubr.msk.bf16.vlgmr.msra.gmra.mxu0 %vm449_vm5, %v5851_v15 }
0x2f16   :  { %9854 = vmatprep.mubr.msk.bf16.mxu0 %vm10805_vm0, %v10803_v13 }
0x2f19   :  { %9849 = vmatmul.mubr.msk.bf16.vlgmr.msra.gmra.mxu1 %vm449_vm5, %v5903_v55 }
0x2f1a   :  { %9860 = vmatprep.mubr.msk.bf16.mxu1 %vm10805_vm0, %v10803_v13 }
0x2fcd   :  { %v11931_v17 = vpop.f32.mrf.mxu0 }
0x2fcf   :  { %v9832_v20 = vpop.f32.mrf.mxu0 }
0x2fd1   :  { %v5799_v12 = vpop.f32.mrf.mxu0  ;;  %v11933_v41 = vpop.f32.mrf.mxu1 }
0x2fd2   :  { %v5848_v11 = vpack.c.bf16 %v11933_v41, %v11931_v17 }
0x2fd3   :  { %v9833_v31 = vpop.f32.mrf.mxu0  ;;  %v9838_v25 = vpop.f32.mrf.mxu1 }
0x2fd4   :  { %v10344_v25 = vld [vmem:[#allocation7 + $0x37c] ss:$40 sps:$4 sm:$0xff]  }
0x2fd5   :  { %v5845_v28 = vpop.f32.mrf.mxu1  ;;  %v5895_v32 = vpop.f32.mrf.mxu0 }
0x2fd6   :  { %v5953_v18 = vmul.f32 0.17677669, %v5895_v32 }
0x2fd7   :  { %v9839_v6 = vpop.f32.mrf.mxu1  ;;  %v9844_v30 = vpop.f32.mrf.mxu0 }
0x2fd8   :  { %v5955_v22 = vadd.f32 %v5953_v18, %v11293_v29  ;;  %v10342_v6 = vld [vmem:[#allocation7 + $0x2dc] ss:$40 sps:$4 sm:$0xff]  }
0x2fd9   :  { %v5898_v38 = vpop.f32.mrf.mxu0  ;;  %v5947_v49 = vpop.f32.mrf.mxu1 }
0x2fda   :  { %v5954_v40 = vmul.f32 0.17677669, %v5947_v49  ;;  %v5957_v10 = vsel %vm546_vm9, %v5955_v22, -inf  ;;  %v10343_v38 = vld [vmem:[#allocation7 + $0x28c] ss:$40 sps:$4 sm:$0xff]  }
0x2fdb   :  { %v9850_v3 = vpop.f32.mrf.mxu1  ;;  %5958 = vmax.xlane.f32.xlu0 %v5957_v10  ;;  %v9845_v26 = vpop.f32.mrf.mxu0 }
0x2fdc   :  { %v5956_v56 = vadd.f32 %v5954_v40, %v11308_v21  ;;  %v10345_v3 = vld [vmem:[#allocation7 + $0x32c] ss:$40 sps:$4 sm:$0xff]  }
0x2fdd   :  { %v5950_v42 = vpop.f32.mrf.mxu1 }
0x2fde   :  { %v5960_v16 = vsel %vm546_vm9, %v5956_v56, -inf }
0x2fdf   :  { %5961 = vmax.xlane.f32.xlu1 %v5960_v16  ;;  %v9851_v33 = vpop.f32.mrf.mxu1 }
0x2ff0   :  { %6031 = vrot.lane.b32.xlu1 %v11883_v57, %s10806_s2 }
0x2ff4   :  { %6194 = vrot.lane.b32.xlu1 %v11869_v61, %s10794_s16 }
0x2ff8   :  { %6244 = vrot.lane.b32.xlu1 %v11873_v14, %s10794_s16 }
0x2ffc   :  { %6242 = vrot.lane.b32.xlu1 %v11891_v19, %s10794_s16 }
0x3064   :  { %v5959_v52 = vpop.xlane.xlu0 %5958 }
0x3065   :  { %v5963_v24 = vsub.f32 %v5955_v22, %v5959_v52 }
0x3067   :  { %v5965_v9 = vmul.f32 1.442695, %v5963_v24 }
0x3068   :  { %v5962_v58 = vpop.xlane.xlu1 %5961 }
0x3069   :  { %10590 = vpow2.f32 %v5965_v9  ;;  %v5964_v62 = vsub.f32 %v5956_v56, %v5962_v58 }
0x306b   :  { %v5967_v63 = vmul.f32 1.442695, %v5964_v62 }
0x306c   :  { %v6032_v0 = vpop.permute.xlu1 %6031 }
0x306d   :  { %10592 = vpow2.f32 %v5967_v63  ;;  %v6037_v1 = vsel %vm574_vm6, %v6032_v0, 0 }
0x306e   :  { %9859 = vmatpush3.bf16.msra.mxu1 %v6037_v1 }
0x306f   :  { %9872 = vmatprep.subr.bf16.mxu1 %v10803_v13 }
0x3070   :  { %v6195_v22 = vpop.permute.xlu1 %6194 }
0x3071   :  { %v6200_v33 = vsel %vm449_vm5, %v6195_v22, 0 }
0x3074   :  { %v6245_v49 = vpop.permute.xlu1 %6244 }
0x3075   :  { %v6250_v40 = vsel %vm449_vm5, %v6245_v49, 0 }
0x3076   :  { %v10591_v4 = vpop.eup %10590 }
0x3077   :  { %v5969_v43 = vsel %vm546_vm9, %v10591_v4, 0.0 }
0x3078   :  { %5970 = vadd.xlane.f32.xlu0 %v5969_v43  ;;  %v6243_v10 = vpop.permute.xlu1 %6242 }
0x307a   :  { %v10593_v50 = vpop.eup %10592 }
0x307b   :  { %v5972_v5 = vsel %vm546_vm9, %v10593_v50, 0.0 }
0x307c   :  { %5973 = vadd.xlane.f32.xlu0 %v5972_v5 }
0x3092   :  { %5982 = vrot.lane.b32.xlu0 %v11876_v47, %s10806_s2 }
0x3096   :  { %6192 = vrot.lane.b32.xlu0 %v11880_v51, %s10794_s16 }
0x3101   :  { %v5971_v34 = vpop.xlane.xlu0 %5970 }
0x3102   :  { %10594 = vrcp.f32 %v5971_v34 }
0x3105   :  { %v5974_v15 = vpop.xlane.xlu0 %5973 }
0x3106   :  { %10596 = vrcp.f32 %v5974_v15 }
0x3109   :  { %v5983_v55 = vpop.permute.xlu0 %5982 }
0x310a   :  { %v5988_v20 = vsel %vm574_vm6, %v5983_v55, 0 }
0x310b   :  { %9853 = vmatpush3.bf16.msra.mxu0 %v5988_v20 }
0x310c   :  { %9864 = vmatprep.subr.bf16.mxu0 %v10803_v13 }
0x310d   :  { %v6193_v58 = vpop.permute.xlu0 %6192 }
0x310f   :  { %v10595_v12 = vpop.eup %10594 }
0x3110   :  { %v5977_v31 = vmul.f32 %v10595_v12, %v10591_v4 }
0x3112   :  { %v5979_v28 = vpack.c.bf16 %v5977_v31, %v5977_v31 }
0x3113   :  { %v10597_v32 = vpop.eup %10596 }
0x3114   :  { %v5978_v18 = vmul.f32 %v10597_v32, %v10593_v50  ;;  %9855 = vmatmul.mubr.msk.bf16.vlgmr.msra.gmra.mxu0 %vm546_vm9, %v5979_v28 }
0x3115   :  { %9865 = vmatpush3.bf16.msra.mxu0 %v10344_v25  ;;  %9868 = vmatprep.mubr.msk.bf16.mxu0 %vm10805_vm0, %v10803_v13 }
0x3116   :  { %v5980_v30 = vpack.c.bf16 %v5978_v18, %v5978_v18  ;;  %9866 = vmatprep.subr.bf16.mxu0 %v10803_v13 }
0x3118   :  { %9861 = vmatmul.mubr.msk.bf16.vlgmr.msra.gmra.mxu1 %vm546_vm9, %v5980_v30 }
0x3119   :  { %9873 = vmatpush3.bf16.msra.mxu1 %v10342_v6  ;;  %9876 = vmatprep.mubr.msk.bf16.mxu1 %vm10805_vm0, %v10803_v13 }
0x311a   :  { %9874 = vmatprep.subr.bf16.mxu1 %v10803_v13  ;;  %9867 = vmatpush3.bf16.msra.mxu0 %v10345_v3 }
0x311b   :  { %9880 = vmatprep.subr.bf16.mxu0 %v10803_v13 }
0x311d   :  { %9875 = vmatpush3.bf16.msra.mxu1 %v10343_v38 }
0x311e   :  { %9886 = vmatprep.subr.bf16.mxu1 %v10803_v13 }
0x3120   :  { %9877 = vmatmul.mubr.msk.bf16.vlgmr.msra.gmra.mxu1 %vm449_vm5, %v5848_v11 }
0x3121   :  { %9887 = vmatpush3.bf16.xpose.msra.mxu1 %v6250_v40  ;;  %9888 = vmatprep.mubr.msk.bf16.mxu1 %vm10805_vm0, %v10803_v13 }
0x3122   :  { %9898 = vmatprep.subr.bf16.mxu1 %v10803_v13 }
0x3128   :  { %9889 = vmatmul.mubr.msk.bf16.vlgmr.msra.gmra.mxu1 %vm449_vm5, %v6243_v10 }
0x3129   :  { %9900 = vmatprep.mubr.msk.bf16.mxu1 %vm10805_vm0, %v10803_v13 }
0x31d4   :  { %v6024_v26 = vpop.f32.mrf.mxu0 }
0x31d6   :  { %v9856_v17 = vpop.f32.mrf.mxu0 }
0x31d8   :  { %v6027_v41 = vpop.f32.mrf.mxu0  ;;  %v6073_v11 = vpop.f32.mrf.mxu1 }
0x31d9   :  { %v6079_v56 = vpack.c.bf16 %v6073_v11, %v6024_v26 }
0x31da   :  { %v9857_v42 = vpop.f32.mrf.mxu0  ;;  %v9862_v16 = vpop.f32.mrf.mxu1 }
0x31db   :  { %9869 = vmatmul.mubr.msk.bf16.vlgmr.msra.gmra.mxu0 %vm449_vm5, %v6079_v56 }
0x31dc   :  { %9881 = vmatpush3.bf16.xpose.msra.mxu0 %v6200_v33  ;;  %v6076_v52 = vpop.f32.mrf.mxu1  ;;  %9882 = vmatprep.mubr.msk.bf16.mxu0 %vm10805_vm0, %v10803_v13 }
0x31dd   :  { %9892 = vmatprep.subr.bf16.mxu0 %v10803_v13 }
0x31de   :  { %v9863_v24 = vpop.f32.mrf.mxu1 }
0x31e0   :  { %v11985_v9 = vpop.f32.mrf.mxu1 }
0x31e2   :  { %v9878_v62 = vpop.f32.mrf.mxu1 }
0x31e3   :  { %9883 = vmatmul.mubr.msk.bf16.vlgmr.msra.gmra.mxu0 %vm449_vm5, %v6193_v58 }
0x31e4   :  { %v11988_v63 = vpop.f32.mrf.mxu1  ;;  %9894 = vmatprep.mubr.msk.bf16.mxu0 %vm10805_vm0, %v10803_v13 }
0x31e6   :  { %v9879_v0 = vpop.f32.mrf.mxu1 }
0x31e8   :  { %v6286_v1 = vpop.f32.mrf.mxu1 }
0x31e9   :  { %v6293_v4 = vmul.f32 0.17677669, %v6286_v1 }
0x31ea   :  { %v9890_v43 = vpop.f32.mrf.mxu1 }
0x31eb   :  { %v6295_v50 = vadd.f32 %v6293_v4, %v11308_v21 }
0x31ec   :  { %v6289_v5 = vpop.f32.mrf.mxu1 }
0x31ed   :  { %v6299_v34 = vsel %vm546_vm9, %v6295_v50, -inf }
0x31ee   :  { %6300 = vmax.xlane.f32.xlu1 %v6299_v34  ;;  %v9891_v15 = vpop.f32.mrf.mxu1 }
0x31ff   :  { %6368 = vrot.lane.b32.xlu1 %v11883_v57, %s10794_s16 }
0x3203   :  { %6477 = vrot.lane.b32.xlu1 %v11869_v61, %s10807_s29 }
0x3207   :  { %6527 = vrot.lane.b32.xlu1 %v11873_v14, %s10807_s29 }
0x320b   :  { %6525 = vrot.lane.b32.xlu1 %v11891_v19, %s10807_s29 }
0x3277   :  { %v6301_v55 = vpop.xlane.xlu1 %6300 }
0x3278   :  { %v6303_v31 = vsub.f32 %v6295_v50, %v6301_v55  ;;  %v10346_v55 = vld [vmem:[#allocation7 + $0x41c] ss:$40 sps:$4 sm:$0xff]  }
0x327a   :  { %v6306_v25 = vmul.f32 1.442695, %v6303_v31 }
0x327b   :  { %v6369_v20 = vpop.permute.xlu1 %6368 }
0x327c   :  { %v6374_v12 = vsel %vm574_vm6, %v6369_v20, 0  ;;  %10598 = vpow2.f32 %v6306_v25  ;;  %v10347_v20 = vld [vmem:[#allocation7 + $0x3cc] ss:$40 sps:$4 sm:$0xff]  }
0x327d   :  { %9899 = vmatpush3.bf16.msra.mxu1 %v6374_v12 }
0x327e   :  { %9912 = vmatprep.subr.bf16.mxu1 %v10803_v13 }
0x327f   :  { %v6478_v33 = vpop.permute.xlu1 %6477 }
0x3280   :  { %v6483_v24 = vsel %vm449_vm5, %v6478_v33, 0 }
0x3289   :  { %v10599_v49 = vpop.eup %10598 }
0x328a   :  { %v6311_v10 = vsel %vm546_vm9, %v10599_v49, 0.0 }
0x329b   :  { %v12004_v28 = vpop.f32.mrf.mxu0 }
0x329d   :  { %v9870_v32 = vpop.f32.mrf.mxu0 }
0x329f   :  { %v12006_v61 = vpop.f32.mrf.mxu0 }
0x32a1   :  { %v9871_v18 = vpop.f32.mrf.mxu0 }
0x32a3   :  { %v6236_v14 = vpop.f32.mrf.mxu0 }
0x32a4   :  { %v6292_v6 = vmul.f32 0.17677669, %v6236_v14 }
0x32a5   :  { %v9884_v30 = vpop.f32.mrf.mxu0 }
0x32a6   :  { %v6294_v19 = vadd.f32 %v6292_v6, %v11293_v29  ;;  %v6528_v30 = vpop.permute.xlu1 %6527 }
0x32a7   :  { %v6239_v22 = vpop.f32.mrf.mxu0 }
0x32a8   :  { %v6296_v38 = vsel %vm546_vm9, %v6294_v19, -inf }
0x32a9   :  { %6297 = vmax.xlane.f32.xlu0 %v6296_v38  ;;  %v9885_v40 = vpop.f32.mrf.mxu0 }
0x32ad   :  { %6312 = vadd.xlane.f32.xlu0 %v6311_v10  ;;  %v6526_v10 = vpop.permute.xlu1 %6525 }
0x3332   :  { %v6298_v3 = vpop.xlane.xlu0 %6297 }
0x3333   :  { %v6302_v26 = vsub.f32 %v6294_v19, %v6298_v3 }
0x3335   :  { %v6304_v17 = vmul.f32 1.442695, %v6302_v26 }
0x3336   :  { %v6313_v41 = vpop.xlane.xlu0 %6312 }
0x3337   :  { %10600 = vpow2.f32 %v6304_v17 }
0x3338   :  { %10602 = vrcp.f32 %v6313_v41 }
0x3344   :  { %v10601_v11 = vpop.eup %10600 }
0x3345   :  { %v10603_v56 = vpop.eup %10602  ;;  %v6308_v42 = vsel %vm546_vm9, %v10601_v11, 0.0 }
0x3346   :  { %v6317_v16 = vmul.f32 %v10603_v56, %v10599_v49  ;;  %6309 = vadd.xlane.f32.xlu0 %v6308_v42  ;;  %v6533_v49 = vsel %vm449_vm5, %v6528_v30, 0  ;;  %v6186_v56 = vadd.f32 %v11985_v9, %v12004_v28  ;;  %v10349_v30 = vld [vmem:[#allocation7 + $0x46c] ss:$40 sps:$4 sm:$0xff]  }
0x3348   :  { %v6319_v52 = vpack.c.bf16 %v6317_v16, %v6317_v16 }
0x334a   :  { %9901 = vmatmul.mubr.msk.bf16.vlgmr.msra.gmra.mxu1 %vm546_vm9, %v6319_v52  ;;  %v6189_v52 = vadd.f32 %v11988_v63, %v12006_v61 }
0x334b   :  { %9913 = vmatpush3.bf16.xpose.msra.mxu1 %v6483_v24  ;;  %9914 = vmatprep.mubr.msk.bf16.mxu1 %vm10805_vm0, %v10803_v13 }
0x334c   :  { %9924 = vmatprep.subr.bf16.mxu1 %v10803_v13 }
0x335c   :  { %6320 = vrot.lane.b32.xlu0 %v11876_v47, %s10794_s16 }
0x3360   :  { %6475 = vrot.lane.b32.xlu0 %v11880_v51, %s10807_s29 }
0x33cf   :  { %v6310_v58 = vpop.xlane.xlu0 %6309 }
0x33d0   :  { %10604 = vrcp.f32 %v6310_v58 }
0x33d3   :  { %v6321_v62 = vpop.permute.xlu0 %6320 }
0x33d4   :  { %v6326_v0 = vsel %vm574_vm6, %v6321_v62, 0 }
0x33d5   :  { %9893 = vmatpush3.bf16.msra.mxu0 %v6326_v0 }
0x33d6   :  { %9904 = vmatprep.subr.bf16.mxu0 %v10803_v13 }
0x33d7   :  { %v6476_v1 = vpop.permute.xlu0 %6475 }
0x33d8   :  { %9915 = vmatmul.mubr.msk.bf16.vlgmr.msra.gmra.mxu1 %vm449_vm5, %v6476_v1 }
0x33d9   :  { %9926 = vmatprep.mubr.msk.bf16.mxu1 %vm10805_vm0, %v10803_v13 }
0x33dd   :  { %v10605_v4 = vpop.eup %10604 }
0x33de   :  { %v6316_v43 = vmul.f32 %v10605_v4, %v10601_v11 }
0x33e0   :  { %v6318_v50 = vpack.c.bf16 %v6316_v43, %v6316_v43 }
0x33e2   :  { %9895 = vmatmul.mubr.msk.bf16.vlgmr.msra.gmra.mxu0 %vm546_vm9, %v6318_v50 }
0x33e3   :  { %9908 = vmatprep.mubr.msk.bf16.mxu0 %vm10805_vm0, %v10803_v13  ;;  %9905 = vmatpush3.bf16.msra.mxu0 %v10346_v55 }
0x33e4   :  { %9906 = vmatprep.subr.bf16.mxu0 %v10803_v13 }
0x33e7   :  { %9907 = vmatpush3.bf16.msra.mxu0 %v10347_v20 }
0x33e8   :  { %9918 = vmatprep.subr.bf16.mxu0 %v10803_v13 }
0x340a   :  { %v6410_v51 = vpop.f32.mrf.mxu1 }
0x340c   :  { %v9902_v5 = vpop.f32.mrf.mxu1 }
0x340e   :  { %v6413_v34 = vpop.f32.mrf.mxu1 }
0x3410   :  { %v9903_v15 = vpop.f32.mrf.mxu1 }
0x3498   :  { %v6519_v12 = vpop.f32.mrf.mxu1 }
0x3499   :  { %v6575_v31 = vmul.f32 0.17677669, %v6519_v12 }
0x349a   :  { %v9916_v25 = vpop.f32.mrf.mxu1 }
0x349b   :  { %v6577_v32 = vadd.f32 %v6575_v31, %v11293_v29 }
0x349c   :  { %v6522_v18 = vpop.f32.mrf.mxu1 }
0x349d   :  { %v6579_v14 = vsel %vm546_vm9, %v6577_v32, -inf }
0x349e   :  { %6580 = vmax.xlane.f32.xlu0 %v6579_v14  ;;  %v9917_v6 = vpop.f32.mrf.mxu1 }
0x349f   :  { %v10348_v6 = vld [vmem:[#allocation7 + $0x4bc] ss:$40 sps:$4 sm:$0xff]  }
0x34a2   :  { %v6362_v19 = vpop.f32.mrf.mxu0 }
0x34a3   :  { %v6416_v22 = vpack.c.bf16 %v6410_v51, %v6362_v19  ;;  %v10352_v19 = vld [vmem:[#allocation7 + $0x4c8] ss:$40 sps:$4 sm:$0xff]  }
0x34a4   :  { %v9896_v38 = vpop.f32.mrf.mxu0 }
0x34a5   :  { %9909 = vmatmul.mubr.msk.bf16.vlgmr.msra.gmra.mxu0 %vm449_vm5, %v6416_v22 }
0x34a6   :  { %9919 = vmatpush3.bf16.xpose.msra.mxu0 %v6533_v49  ;;  %v6365_v40 = vpop.f32.mrf.mxu0  ;;  %9920 = vmatprep.mubr.msk.bf16.mxu0 %vm10805_vm0, %v10803_v13 }
0x34a7   :  { %9930 = vmatprep.subr.bf16.mxu0 %v10803_v13 }
0x34a8   :  { %v9897_v29 = vpop.f32.mrf.mxu0 }
0x34ad   :  { %9921 = vmatmul.mubr.msk.bf16.vlgmr.msra.gmra.mxu0 %vm449_vm5, %v6526_v10  ;;  %v10350_v10 = vld [vmem:[#allocation7 + $0x4c4] ss:$40 sps:$4 sm:$0xff]  }
0x34ae   :  { %9932 = vmatprep.mubr.msk.bf16.mxu0 %vm10805_vm0, %v10803_v13 }
0x3527   :  { %v6581_v3 = vpop.xlane.xlu0 %6580 }
0x3528   :  { %v6585_v26 = vsub.f32 %v6577_v32, %v6581_v3 }
0x352a   :  { %v6587_v17 = vmul.f32 1.442695, %v6585_v26  ;;  %v10355_v26 = vld [vmem:[#allocation7 + $0x478] ss:$40 sps:$4 sm:$0xff]  }
0x352c   :  { %10606 = vpow2.f32 %v6587_v17 }
0x3539   :  { %v10607_v41 = vpop.eup %10606 }
0x353a   :  { %v6591_v11 = vsel %vm546_vm9, %v10607_v41, 0.0 }
0x353b   :  { %6592 = vadd.xlane.f32.xlu0 %v6591_v11  ;;  %v10353_v11 = vld [vmem:[#allocation7 + $0x474] ss:$40 sps:$4 sm:$0xff]  }
0x3565   :  { %v6466_v42 = vpop.f32.mrf.mxu0 }
0x3566   :  { %v12044_v16 = vadd.f32 %v6466_v42, %v6186_v56  ;;  %v10358_v56 = vld [vmem:[#allocation7 + $0x428] ss:$40 sps:$4 sm:$0xff]  }
0x3567   :  { %v9910_v33 = vpop.f32.mrf.mxu0 }
0x3568   :  { %v10356_v33 = vld [vmem:[#allocation7 + $0x424] ss:$40 sps:$4 sm:$0xff]  }
0x3569   :  { %v6469_v24 = vpop.f32.mrf.mxu0 }
0x356a   :  { %v12048_v58 = vadd.f32 %v6469_v24, %v6189_v52  ;;  %v10361_v52 = vld [vmem:[#allocation7 + $0x3d8] ss:$40 sps:$4 sm:$0xff]   ;;  %v10359_v24 = vld [vmem:[#allocation7 + $0x3d4] ss:$40 sps:$4 sm:$0xff]  }
0x356b   :  { %v9911_v62 = vpop.f32.mrf.mxu0 }
0x356c   :  { %v10364_v62 = vld [vmem:[#allocation7 + $0x388] ss:$40 sps:$4 sm:$0xff]  }
0x356d   :  { %v6569_v0 = vpop.f32.mrf.mxu0 }
0x356e   :  { %v6576_v1 = vmul.f32 0.17677669, %v6569_v0  ;;  %v10362_v0 = vld [vmem:[#allocation7 + $0x384] ss:$40 sps:$4 sm:$0xff]  }
0x356f   :  { %v9922_v4 = vpop.f32.mrf.mxu0 }
0x3570   :  { %v6578_v43 = vadd.f32 %v6576_v1, %v11308_v21  ;;  %v10367_v1 = vld [vmem:[#allocation7 + $0x338] ss:$40 sps:$4 sm:$0xff]   ;;  %v10365_v4 = vld [vmem:[#allocation7 + $0x334] ss:$40 sps:$4 sm:$0xff]  }
0x3571   :  { %v6572_v50 = vpop.f32.mrf.mxu0 }
0x3572   :  { %v6582_v51 = vsel %vm546_vm9, %v6578_v43, -inf  ;;  %v10368_v50 = vld [vmem:[#allocation7 + $0x2e4] ss:$40 sps:$4 sm:$0xff]  }
0x3573   :  { %6583 = vmax.xlane.f32.xlu1 %v6582_v51  ;;  %v9923_v9 = vpop.f32.mrf.mxu0  ;;  %v10373_v51 = vld [vmem:[#allocation7 + $0x298] ss:$40 sps:$4 sm:$0xff]  }
0x3574   :  { %v10371_v9 = vld [vmem:[#allocation7 + $0x294] ss:$40 sps:$4 sm:$0xff]  }
0x3584   :  { %6651 = vrot.lane.b32.xlu1 %v11883_v57, %s10807_s29 }
0x35c4   :  { %v6593_v55 = vpop.xlane.xlu0 %6592 }
0x35fc   :  { %v6584_v28 = vpop.xlane.xlu1 %6583 }
0x35fd   :  { %v6586_v5 = vsub.f32 %v6578_v43, %v6584_v28  ;;  %v10370_v43 = vld [vmem:[#allocation7 + $0x2e8] ss:$40 sps:$4 sm:$0xff]   ;;  %v6761_v28 = vrot.slane %v11844_v7, %v11156_v60 }
0x35ff   :  { %v6589_v63 = vmul.f32 1.442695, %v6586_v5 }
0x3600   :  { %v6652_v61 = vpop.permute.xlu1 %6651 }
0x3601   :  { %10608 = vpow2.f32 %v6589_v63  ;;  %v6657_v34 = vsel %vm574_vm6, %v6652_v61, 0 }
0x3602   :  { %9931 = vmatpush3.bf16.msra.mxu0 %v6657_v34  ;;  %10610 = vrcp.f32 %v6593_v55 }
0x3603   :  { %9944 = vmatprep.subr.bf16.mxu0 %v10803_v13 }
0x360e   :  { %v10609_v15 = vpop.eup %10608 }
0x360f   :  { %v6594_v21 = vsel %vm546_vm9, %v10609_v15, 0.0  ;;  %v10611_v57 = vpop.eup %10610 }
0x3610   :  { %6595 = vadd.xlane.f32.xlu0 %v6594_v21  ;;  %v6599_v12 = vmul.f32 %v10611_v57, %v10607_v41 }
0x3612   :  { %v6601_v32 = vpack.c.bf16 %v6599_v12, %v6599_v12 }
0x3626   :  { %6603 = vrot.lane.b32.xlu0 %v11876_v47, %s10807_s29 }
0x3699   :  { %v6596_v20 = vpop.xlane.xlu0 %6595 }
0x369a   :  { %10612 = vrcp.f32 %v6596_v20 }
0x369d   :  { %v6604_v31 = vpop.permute.xlu0 %6603 }
0x369e   :  { %v6609_v25 = vsel %vm574_vm6, %v6604_v31, 0 }
0x369f   :  { %9925 = vmatpush3.bf16.msra.mxu1 %v6609_v25 }
0x36a0   :  { %9936 = vmatprep.subr.bf16.mxu1 %v10803_v13 }
0x36a2   :  { %9927 = vmatmul.mubr.msk.bf16.vlgmr.msra.gmra.mxu1 %vm546_vm9, %v6601_v32 }
0x36a3   :  { %9940 = vmatprep.mubr.msk.bf16.mxu1 %vm10805_vm0, %v10803_v13  ;;  %9937 = vmatpush3.bf16.msra.mxu1 %v10348_v6 }
0x36a4   :  { %9938 = vmatprep.subr.bf16.mxu1 %v10803_v13 }
0x36a7   :  { %v10613_v18 = vpop.eup %10612  ;;  %9939 = vmatpush3.bf16.msra.mxu1 %v10349_v30 }
0x36a8   :  { %v6600_v47 = vmul.f32 %v10613_v18, %v10609_v15  ;;  %7028 = vmatprep.subr.bf16.mxu1 %v10352_v19 }
0x36aa   :  { %v6602_v14 = vpack.c.bf16 %v6600_v47, %v6600_v47 }
0x36ac   :  { %9933 = vmatmul.mubr.msk.bf16.vlgmr.msra.gmra.mxu0 %vm546_vm9, %v6602_v14 }
0x36ad   :  { %9960 = vmatprep.mubr.msk.bf16.mxu0 %vm10805_vm0, %v10803_v13 }
0x3762   :  { %v6645_v22 = vpop.f32.mrf.mxu1 }
0x3764   :  { %v9928_v38 = vpop.f32.mrf.mxu1 }
0x3765   :  { %v10374_v38 = vld [vmem:[#allocation7 + $0x4c0] ss:$40 sps:$4 sm:$0xff]  }
0x3766   :  { %v6648_v49 = vpop.f32.mrf.mxu1  ;;  %9945 = vmatpush3.bf16.msra.mxu0 %v10374_v38 }
0x3767   :  { %9946 = vmatprep.subr.bf16.mxu0 %v10803_v13  ;;  %v10375_v49 = vld [vmem:[#allocation7 + $0x470] ss:$40 sps:$4 sm:$0xff]  }
0x3768   :  { %v9929_v40 = vpop.f32.mrf.mxu1 }
0x3769   :  { %v10376_v40 = vld [vmem:[#allocation7 + $0x420] ss:$40 sps:$4 sm:$0xff]  }
0x376a   :  { %9947 = vmatpush3.bf16.msra.mxu0 %v10375_v49 }
0x376b   :  { %9948 = vmatprep.subr.bf16.mxu0 %v10803_v13 }
0x376c   :  { %v6693_v29 = vpop.f32.mrf.mxu0 }
0x376d   :  { %v6699_v3 = vpack.c.bf16 %v6693_v29, %v6645_v22  ;;  %v10377_v29 = vld [vmem:[#allocation7 + $0x3d0] ss:$40 sps:$4 sm:$0xff]  }
0x376e   :  { %v9934_v17 = vpop.f32.mrf.mxu0  ;;  %9949 = vmatpush3.bf16.msra.mxu0 %v10376_v40 }
0x376f   :  { %9941 = vmatmul.mubr.msk.bf16.vlgmr.msra.gmra.mxu1 %vm449_vm5, %v6699_v3  ;;  %9950 = vmatprep.subr.bf16.mxu0 %v10803_v13  ;;  %v10379_v3 = vld [vmem:[#allocation7 + $0x330] ss:$40 sps:$4 sm:$0xff]  }
0x3770   :  { %7029 = vmatpush1.bf16.msra.mxu1 %v10350_v10  ;;  %v6696_v41 = vpop.f32.mrf.mxu0  ;;  %7060 = vmatprep.mubr.bf16.mxu1 %v10804_v27  ;;  %v10378_v10 = vld [vmem:[#allocation7 + $0x380] ss:$40 sps:$4 sm:$0xff]   ;;  %v10381_v17 = vld [vmem:[#allocation7 + $0x290] ss:$40 sps:$4 sm:$0xff]  }
0x3771   :  { %7030 = vmatprep.subr.bf16.mxu1 %v10355_v26  ;;  %v10380_v26 = vld [vmem:[#allocation7 + $0x2e0] ss:$40 sps:$4 sm:$0xff]  }
0x3772   :  { %v9935_v42 = vpop.f32.mrf.mxu0  ;;  %9951 = vmatpush3.bf16.msra.mxu0 %v10377_v29 }
0x3773   :  { %9952 = vmatprep.subr.bf16.mxu0 %v10803_v13 }
0x3774   :  { %7031 = vmatpush1.bf16.msra.mxu1 %v10353_v11 }
0x3775   :  { %7032 = vmatprep.subr.bf16.mxu1 %v10358_v56 }
0x3776   :  { %9953 = vmatpush3.bf16.msra.mxu0 %v10378_v10 }
0x3777   :  { %9954 = vmatprep.subr.bf16.mxu0 %v10803_v13 }
0x3778   :  { %7033 = vmatpush1.bf16.msra.mxu1 %v10356_v33 }
0x3779   :  { %7034 = vmatprep.subr.bf16.mxu1 %v10361_v52 }
0x377a   :  { %9955 = vmatpush3.bf16.msra.mxu0 %v10379_v3 }
0x377b   :  { %9956 = vmatprep.subr.bf16.mxu0 %v10803_v13 }
0x377c   :  { %7035 = vmatpush1.bf16.msra.mxu1 %v10359_v24 }
0x377d   :  { %7036 = vmatprep.subr.bf16.mxu1 %v10364_v62 }
0x377e   :  { %9957 = vmatpush3.bf16.msra.mxu0 %v10380_v26 }
0x377f   :  { %9958 = vmatprep.subr.bf16.mxu0 %v10803_v13 }
0x3780   :  { %7037 = vmatpush1.bf16.msra.mxu1 %v10362_v0 }
0x3781   :  { %7038 = vmatprep.subr.bf16.mxu1 %v10367_v1 }
0x3782   :  { %9959 = vmatpush3.bf16.msra.mxu0 %v10381_v17 }
0x3783   :  { %9964 = vmatprep.subr.bf16.mxu0 %v10803_v13 }
0x3784   :  { %7039 = vmatpush1.bf16.msra.mxu1 %v10365_v4 }
0x3785   :  { %7040 = vmatprep.subr.bf16.mxu1 %v10370_v43 }
0x3788   :  { %7041 = vmatpush1.bf16.msra.mxu1 %v10368_v50 }
0x3789   :  { %7042 = vmatprep.subr.bf16.mxu1 %v10373_v51 }
0x378c   :  { %7043 = vmatpush1.bf16.msra.mxu1 %v10371_v9 }
0x378d   :  { %9970 = vmatprep.subr.bf16.mxu1 %v10803_v13 }
0x378f   :  { %7061 = vmatmul.mubr.bf16.vlgmr.msra.gmra.mxu1 %v11543_v37 }
0x3790   :  { %9972 = vmatprep.mubr.msk.bf16.mxu1 %vm10805_vm0, %v10803_v13 }
0x382f   :  { %v6749_v5 = vpop.f32.mrf.mxu1 }
0x3830   :  { %v6756_v63 = vadd.f32 %v6749_v5, %v12044_v16  ;;  %v6943_v16 = vrot.slane %v11844_v7, %v11227_v36 }
0x3831   :  { %v9942_v61 = vpop.f32.mrf.mxu1 }
0x3832   :  { %v6762_v34 = vadd.f32 %v6761_v28, %v6756_v63  ;;  %v6805_v61 = vrot.slane %v11859_v23, %v10914_v54 }
0x3833   :  { %v6752_v15 = vpop.f32.mrf.mxu1 }
0x3834   :  { %v6757_v21 = vadd.f32 %v6752_v15, %v12048_v58  ;;  %v12079_v55 = vadd.f32 %v6762_v34, %v11815_v48 }
0x3835   :  { %v9943_v57 = vpop.f32.mrf.mxu1 }
0x3836   :  { %v6763_v20 = vadd.f32 %v6761_v28, %v6757_v21  ;;  %6766 = vadd.xlane.f32.xlu1 %v12079_v55  ;;  %v6811_v57 = vrot.slane %v11859_v23, %v10925_v59  ;;  %v12123_v23 = vld [vmem:[%s12369_s7 + $0x20] sm:$0x7f] }
0x3838   :  { %v12083_v37 = vadd.f32 %v6763_v20, %v11819_v2 }
0x383a   :  { %6768 = vadd.xlane.f32.xlu0 %v12083_v37 }
0x384f   :  { %v7062_v12 = vpop.f32.mrf.mxu1 }
0x3850   :  { %v12088_v31 = vadd.f32 %v7062_v12, %v6943_v16 }
0x3851   :  { %v12090_v25 = vpop.f32.mrf.mxu1 }
0x3853   :  { %v7066_v58 = vpop.f32.mrf.mxu1 }
0x3854   :  { %v7067_v48 = vadd.f32 %v7066_v58, %v6943_v16  ;;  %v12113_v16 = vpack.c.bf16 %v12088_v31, %v12088_v31  ;;  %v6947_v31 = vrot.slane %v12123_v23, %v11227_v36 }
0x3856   :  { %v12092_v32 = vpack.c.bf16 %v7067_v48, %v7067_v48 }
0x3858   :  { %v7143_v18 = vsel %vm449_vm5, %v12092_v32, 0 }
0x3859   :  { %9971 = vmatpush3.bf16.xpose.msra.mxu1 %v7143_v18  ;;  %v7097_v18 = vsel %vm449_vm5, %v12113_v16, 0 }
0x385a   :  { %9982 = vmatprep.subr.bf16.mxu1 %v10803_v13 }
0x38bf   :  { %v6767_v2 = vpop.xlane.xlu1 %6766 }
0x38c0   :  { %v6770_v47 = vmul.f32 0.0078125, %v6767_v2  ;;  %v7065_v2 = vadd.f32 %v12090_v25, %v6947_v31 }
0x38c2   :  { %v6772_v14 = vsub.f32 %v12079_v55, %v6770_v47  ;;  %v6834_v47 = vrot.slane %v12123_v23, %v11156_v60 }
0x38c3   :  { %v6769_v7 = vpop.xlane.xlu0 %6768 }
0x38c4   :  { %v6771_v6 = vmul.f32 0.0078125, %v6769_v7  ;;  %v6774_v30 = vmul.f32 %v6772_v14, %v6772_v14 }
0x38c6   :  { %v6773_v19 = vsub.f32 %v12083_v37, %v6771_v6  ;;  %6776 = vadd.xlane.f32.xlu0 %v6774_v30  ;;  %v12130_v6 = vpack.c.bf16 %v7065_v2, %v7065_v2 }
0x38c8   :  { %v6775_v22 = vmul.f32 %v6773_v19, %v6773_v19  ;;  %v7217_v36 = vsel %vm574_vm6, %v12130_v6, 0 }
0x38ca   :  { %6778 = vadd.xlane.f32.xlu1 %v6775_v22 }
0x394f   :  { %v6777_v41 = vpop.xlane.xlu0 %6776 }
0x3950   :  { %v6780_v11 = vmul.f32 0.007874016, %v6777_v41 }
0x3952   :  { %10614 = vrsqrt.f32 %v6780_v11  ;;  %vm6784_vm12 = vcmp.eq.f32.partialorder %v6780_v11, inf  ;;  %v6787_v24 = vand.u32 2147483648, %v6780_v11  ;;  %vm6786_vm13 = vcmp.eq.f32.partialorder %v6780_v11, 0.0 }
0x3953   :  { %v6779_v56 = vpop.xlane.xlu1 %6778 }
0x3954   :  { %v6781_v42 = vmul.f32 0.007874016, %v6779_v56 }
0x3956   :  { %10616 = vrsqrt.f32 %v6781_v42  ;;  %vm6791_vm14 = vcmp.eq.f32.partialorder %v6781_v42, inf  ;;  %v6794_v50 = vand.u32 2147483648, %v6781_v42  ;;  %vm6793_vm15 = vcmp.eq.f32.partialorder %v6781_v42, 0.0 }
0x395f   :  { %v10615_v33 = vpop.eup %10614 }
0x3960   :  { %v6783_v52 = vmul.f32 %v10615_v33, %v6780_v11 }
0x3962   :  { %v6785_v62 = vsel %vm6784_vm12, %v6780_v11, %v6783_v52 }
0x3963   :  { %v10617_v0 = vpop.eup %10616  ;;  %v6788_v1 = vsel %vm6786_vm13, %v6787_v24, %v6785_v62 }
0x3964   :  { %v6796_v4 = vadd.f32 1e-06, %v6788_v1  ;;  %v6790_v43 = vmul.f32 %v10617_v0, %v6781_v42 }
0x3966   :  { %10618 = vrcp.f32 %v6796_v4  ;;  %v6792_v51 = vsel %vm6791_vm14, %v6781_v42, %v6790_v43 }
0x3967   :  { %v6795_v9 = vsel %vm6793_vm15, %v6794_v50, %v6792_v51 }
0x3968   :  { %v6797_v28 = vadd.f32 1e-06, %v6795_v9 }
0x396a   :  { %10620 = vrcp.f32 %v6797_v28 }
0x3973   :  { %v10619_v5 = vpop.eup %10618 }
0x3974   :  { %v6800_v63 = vmul.f32 %v10619_v5, %v6772_v14  ;;  %v7068_v14 = vpop.f32.mrf.mxu1 }
0x3975   :  { %v7069_v30 = vadd.f32 %v7068_v14, %v6947_v31 }
0x3976   :  { %v6806_v21 = vmul.f32 %v6805_v61, %v6800_v63 }
0x3977   :  { %v10621_v34 = vpop.eup %10620  ;;  %v12134_v40 = vpack.c.bf16 %v7069_v30, %v7069_v30 }
0x3978   :  { %v6801_v15 = vmul.f32 %v10621_v34, %v6773_v19  ;;  %v6812_v12 = vadd.f32 %v6811_v57, %v6806_v21 }
0x3979   :  { %v7263_v3 = vsel %vm574_vm6, %v12134_v40, 0 }
0x397a   :  { %v6807_v20 = vmul.f32 %v6805_v61, %v6801_v15 }
0x397c   :  { %v6813_v58 = vadd.f32 %v6811_v57, %v6807_v20 }
0x397e   :  { %v6830_v48 = vpack.c.bf16 %v6813_v58, %v6812_v12 }
0x3980   :  { %9961 = vmatmul.mubr.bf16.vlgmr.msra.gmra.mxu0 %v6830_v48 }
0x3981   :  { %9965 = vmatpush3.bf16.xpose.msra.mxu0 %v7097_v18  ;;  %9966 = vmatprep.mubr.msk.bf16.mxu0 %vm10805_vm0, %v10803_v13 }
0x3982   :  { %9976 = vmatprep.subr.bf16.mxu0 %v10803_v13 }
0x3a40   :  { %v6917_v7 = vpop.f32.mrf.mxu0 }
0x3a41   :  { %v6918_v19 = vadd.f32 %v6917_v7, %v6834_v47 }
0x3a42   :  { %v9962_v22 = vpop.f32.mrf.mxu0 }
0x3a43   :  { %v12132_v38 = vpack.c.bf16 %v6918_v19, %v6918_v19 }
0x3a44   :  { %v6920_v49 = vpop.f32.mrf.mxu0 }
0x3a45   :  { %v6921_v29 = vadd.f32 %v6920_v49, %v6834_v47  ;;  %9967 = vmatmul.mubr.msk.bf16.vlgmr.msra.gmra.mxu0 %vm449_vm5, %v12132_v38 }
0x3a46   :  { %9977 = vmatpush3.bf16.msra.mxu0 %v7217_v36  ;;  %v9963_v25 = vpop.f32.mrf.mxu0  ;;  %9978 = vmatprep.mubr.msk.bf16.mxu0 %vm10805_vm0, %v10803_v13 }
0x3a47   :  { %v12142_v10 = vpack.c.bf16 %v6921_v29, %v6921_v29  ;;  %9988 = vmatprep.subr.bf16.mxu0 %v10803_v13 }
0x3a49   :  { %9973 = vmatmul.mubr.msk.bf16.vlgmr.msra.gmra.mxu1 %vm449_vm5, %v12142_v10 }
0x3a4a   :  { %9983 = vmatpush3.bf16.msra.mxu1 %v7263_v3  ;;  %9984 = vmatprep.mubr.msk.bf16.mxu1 %vm10805_vm0, %v10803_v13 }
0x3a4b   :  { %9994 = vmatprep.subr.bf16.mxu1 %v10803_v13 }
0x3b05   :  { %v7133_v26 = vpop.f32.mrf.mxu0 }
0x3b06   :  { %v7185_v17 = vmul.f32 0.17677669, %v7133_v26 }
0x3b07   :  { %v9968_v41 = vpop.f32.mrf.mxu0 }
0x3b08   :  { %v7187_v11 = vadd.f32 %v7185_v17, %v10987_v39 }
0x3b09   :  { %v7136_v56 = vpop.f32.mrf.mxu0  ;;  %v7179_v42 = vpop.f32.mrf.mxu1 }
0x3b0a   :  { %v7186_v33 = vmul.f32 0.17677669, %v7179_v42  ;;  %v7189_v52 = vsel %vm546_vm9, %v7187_v11, -inf }
0x3b0b   :  { %v9974_v24 = vpop.f32.mrf.mxu1  ;;  %7190 = vmax.xlane.f32.xlu0 %v7189_v52  ;;  %v9969_v62 = vpop.f32.mrf.mxu0 }
0x3b0c   :  { %v7188_v0 = vadd.f32 %v7186_v33, %v10992_v45 }
0x3b0d   :  { %v7182_v1 = vpop.f32.mrf.mxu1 }
0x3b0e   :  { %v7192_v4 = vsel %vm546_vm9, %v7188_v0, -inf }
0x3b0f   :  { %7193 = vmax.xlane.f32.xlu1 %v7192_v4  ;;  %v9975_v43 = vpop.f32.mrf.mxu1 }
0x3b20   :  { %7362 = vrot.lane.b32.xlu1 %v12092_v32, %s10806_s2 }
0x3b94   :  { %v7191_v50 = vpop.xlane.xlu0 %7190 }
0x3b95   :  { %v7195_v51 = vsub.f32 %v7187_v11, %v7191_v50 }
0x3b97   :  { %v7197_v9 = vmul.f32 1.442695, %v7195_v51 }
0x3b98   :  { %v7194_v28 = vpop.xlane.xlu1 %7193 }
0x3b99   :  { %10622 = vpow2.f32 %v7197_v9  ;;  %v7196_v5 = vsub.f32 %v7188_v0, %v7194_v28 }
0x3b9b   :  { %v7199_v63 = vmul.f32 1.442695, %v7196_v5 }
0x3b9c   :  { %v7363_v57 = vpop.permute.xlu1 %7362 }
0x3b9d   :  { %10624 = vpow2.f32 %v7199_v63  ;;  %v7368_v30 = vsel %vm449_vm5, %v7363_v57, 0 }
0x3ba6   :  { %v10623_v61 = vpop.eup %10622 }
0x3ba7   :  { %v7201_v34 = vsel %vm546_vm9, %v10623_v61, 0.0 }
0x3ba8   :  { %7202 = vadd.xlane.f32.xlu0 %v7201_v34 }
0x3baa   :  { %v10625_v15 = vpop.eup %10624 }
0x3bab   :  { %v7204_v21 = vsel %vm546_vm9, %v10625_v15, 0.0 }
0x3bac   :  { %7205 = vadd.xlane.f32.xlu1 %v7204_v21 }
0x3bbd   :  { %7307 = vrot.lane.b32.xlu1 %v12132_v38, %s10806_s2 }
0x3bbe   :  { %7310 = vrot.lane.b32.xlu0 %v12113_v16, %s10806_s2 }
0x3bc1   :  { %7359 = vrot.lane.b32.xlu1 %v12142_v10, %s10806_s2 }
0x3c31   :  { %v7203_v20 = vpop.xlane.xlu0 %7202 }
0x3c32   :  { %10626 = vrcp.f32 %v7203_v20 }
0x3c35   :  { %v7206_v12 = vpop.xlane.xlu1 %7205  ;;  %v7311_v18 = vpop.permute.xlu0 %7310 }
0x3c36   :  { %10628 = vrcp.f32 %v7206_v12  ;;  %v7316_v14 = vsel %vm449_vm5, %v7311_v18, 0 }
0x3c39   :  { %v7308_v19 = vpop.permute.xlu1 %7307 }
0x3c3d   :  { %v7360_v22 = vpop.permute.xlu1 %7359 }
0x3c3f   :  { %v10627_v58 = vpop.eup %10626 }
0x3c40   :  { %v7209_v48 = vmul.f32 %v10627_v58, %v10623_v61 }
0x3c42   :  { %v7211_v31 = vpack.c.bf16 %v7209_v48, %v7209_v48 }
0x3c43   :  { %v10629_v2 = vpop.eup %10628 }
0x3c44   :  { %v7210_v47 = vmul.f32 %v10629_v2, %v10625_v15  ;;  %9979 = vmatmul.mubr.msk.bf16.vlgmr.msra.gmra.mxu0 %vm546_vm9, %v7211_v31 }
0x3c45   :  { %9989 = vmatpush3.bf16.xpose.msra.mxu0 %v7316_v14  ;;  %9990 = vmatprep.mubr.msk.bf16.mxu0 %vm10805_vm0, %v10803_v13 }
0x3c46   :  { %v7212_v7 = vpack.c.bf16 %v7210_v47, %v7210_v47  ;;  %10000 = vmatprep.subr.bf16.mxu0 %v10803_v13 }
0x3c48   :  { %9985 = vmatmul.mubr.msk.bf16.vlgmr.msra.gmra.mxu1 %vm546_vm9, %v7212_v7 }
0x3c49   :  { %9995 = vmatpush3.bf16.xpose.msra.mxu1 %v7368_v30  ;;  %9996 = vmatprep.mubr.msk.bf16.mxu1 %vm10805_vm0, %v10803_v13 }
0x3c4a   :  { %10006 = vmatprep.subr.bf16.mxu1 %v10803_v13 }
0x3c4c   :  { %9991 = vmatmul.mubr.msk.bf16.vlgmr.msra.gmra.mxu0 %vm449_vm5, %v7308_v19  ;;  %v10384_v19 = vld [vmem:[#allocation7 + $0x38c] ss:$40 sps:$4 sm:$0xff]  }
0x3c4d   :  { %10002 = vmatprep.mubr.msk.bf16.mxu0 %vm10805_vm0, %v10803_v13 }
0x3c50   :  { %9997 = vmatmul.mubr.msk.bf16.vlgmr.msra.gmra.mxu1 %vm449_vm5, %v7360_v22 }
0x3c51   :  { %10008 = vmatprep.mubr.msk.bf16.mxu1 %vm10805_vm0, %v10803_v13 }
0x3d04   :  { %v12182_v49 = vpop.f32.mrf.mxu0 }
0x3d06   :  { %v9980_v29 = vpop.f32.mrf.mxu0 }
0x3d08   :  { %v7256_v36 = vpop.f32.mrf.mxu0  ;;  %v12184_v25 = vpop.f32.mrf.mxu1 }
0x3d09   :  { %v7305_v3 = vpack.c.bf16 %v12184_v25, %v12182_v49 }
0x3d0a   :  { %v9981_v26 = vpop.f32.mrf.mxu0  ;;  %v9986_v17 = vpop.f32.mrf.mxu1 }
0x3d0b   :  { %v10382_v26 = vld [vmem:[#allocation7 + $0x2ec] ss:$40 sps:$4 sm:$0xff]  }
0x3d0c   :  { %v7302_v41 = vpop.f32.mrf.mxu1  ;;  %v7352_v11 = vpop.f32.mrf.mxu0 }
0x3d0d   :  { %v7410_v56 = vmul.f32 0.17677669, %v7352_v11  ;;  %v10383_v11 = vld [vmem:[#allocation7 + $0x29c] ss:$40 sps:$4 sm:$0xff]  }
0x3d0e   :  { %v9987_v42 = vpop.f32.mrf.mxu1  ;;  %v9992_v33 = vpop.f32.mrf.mxu0 }
0x3d0f   :  { %v7412_v52 = vadd.f32 %v7410_v56, %v10987_v39 }
0x3d10   :  { %v7355_v24 = vpop.f32.mrf.mxu0  ;;  %v7404_v62 = vpop.f32.mrf.mxu1 }
0x3d11   :  { %v7411_v0 = vmul.f32 0.17677669, %v7404_v62  ;;  %v7414_v1 = vsel %vm546_vm9, %v7412_v52, -inf }
0x3d12   :  { %v9998_v4 = vpop.f32.mrf.mxu1  ;;  %7415 = vmax.xlane.f32.xlu0 %v7414_v1  ;;  %v9993_v43 = vpop.f32.mrf.mxu0 }
0x3d13   :  { %v7413_v50 = vadd.f32 %v7411_v0, %v10992_v45 }
0x3d14   :  { %v7407_v51 = vpop.f32.mrf.mxu1 }
0x3d15   :  { %v7417_v9 = vsel %vm546_vm9, %v7413_v50, -inf }
0x3d16   :  { %7418 = vmax.xlane.f32.xlu1 %v7417_v9  ;;  %v9999_v28 = vpop.f32.mrf.mxu1 }
0x3d27   :  { %7488 = vrot.lane.b32.xlu1 %v12134_v40, %s10806_s2 }
0x3d2b   :  { %7651 = vrot.lane.b32.xlu1 %v12113_v16, %s10794_s16 }
0x3d2f   :  { %7701 = vrot.lane.b32.xlu1 %v12092_v32, %s10794_s16 }
0x3d33   :  { %7699 = vrot.lane.b32.xlu1 %v12142_v10, %s10794_s16 }
0x3d9b   :  { %v7416_v5 = vpop.xlane.xlu0 %7415 }
0x3d9c   :  { %v7420_v63 = vsub.f32 %v7412_v52, %v7416_v5  ;;  %v10385_v52 = vld [vmem:[#allocation7 + $0x33c] ss:$40 sps:$4 sm:$0xff]  }
0x3d9e   :  { %v7422_v61 = vmul.f32 1.442695, %v7420_v63 }
0x3d9f   :  { %v7419_v34 = vpop.xlane.xlu1 %7418 }
0x3da0   :  { %10630 = vpow2.f32 %v7422_v61  ;;  %v7421_v15 = vsub.f32 %v7413_v50, %v7419_v34 }
0x3da2   :  { %v7424_v21 = vmul.f32 1.442695, %v7421_v15 }
0x3da3   :  { %v7489_v57 = vpop.permute.xlu1 %7488 }
0x3da4   :  { %10632 = vpow2.f32 %v7424_v21  ;;  %v7494_v20 = vsel %vm574_vm6, %v7489_v57, 0 }
0x3da5   :  { %10007 = vmatpush3.bf16.msra.mxu1 %v7494_v20 }
0x3da6   :  { %10020 = vmatprep.subr.bf16.mxu1 %v10803_v13 }
0x3da7   :  { %v7652_v41 = vpop.permute.xlu1 %7651 }
0x3da8   :  { %v7657_v4 = vsel %vm449_vm5, %v7652_v41, 0 }
0x3dab   :  { %v7702_v56 = vpop.permute.xlu1 %7701 }
0x3dac   :  { %v7707_v42 = vsel %vm449_vm5, %v7702_v56, 0 }
0x3dad   :  { %v10631_v12 = vpop.eup %10630 }
0x3dae   :  { %v7426_v58 = vsel %vm546_vm9, %v10631_v12, 0.0 }
0x3daf   :  { %7427 = vadd.xlane.f32.xlu0 %v7426_v58  ;;  %v7700_v33 = vpop.permute.xlu1 %7699 }
0x3db1   :  { %v10633_v48 = vpop.eup %10632 }
0x3db2   :  { %v7429_v18 = vsel %vm546_vm9, %v10633_v48, 0.0 }
0x3db3   :  { %7430 = vadd.xlane.f32.xlu0 %v7429_v18 }
0x3dc9   :  { %7439 = vrot.lane.b32.xlu0 %v12130_v6, %s10806_s2 }
0x3dcd   :  { %7649 = vrot.lane.b32.xlu0 %v12132_v38, %s10794_s16 }
0x3e38   :  { %v7428_v31 = vpop.xlane.xlu0 %7427 }
0x3e39   :  { %10634 = vrcp.f32 %v7428_v31 }
0x3e3c   :  { %v7431_v2 = vpop.xlane.xlu0 %7430 }
0x3e3d   :  { %10636 = vrcp.f32 %v7431_v2 }
0x3e40   :  { %v7440_v47 = vpop.permute.xlu0 %7439 }
0x3e41   :  { %v7445_v14 = vsel %vm574_vm6, %v7440_v47, 0 }
0x3e42   :  { %10001 = vmatpush3.bf16.msra.mxu0 %v7445_v14 }
0x3e43   :  { %10012 = vmatprep.subr.bf16.mxu0 %v10803_v13 }
0x3e44   :  { %v7650_v9 = vpop.permute.xlu0 %7649 }
0x3e46   :  { %v10635_v7 = vpop.eup %10634 }
0x3e47   :  { %v7434_v30 = vmul.f32 %v10635_v7, %v10631_v12 }
0x3e49   :  { %v7436_v22 = vpack.c.bf16 %v7434_v30, %v7434_v30 }
0x3e4a   :  { %v10637_v29 = vpop.eup %10636 }
0x3e4b   :  { %v7435_v36 = vmul.f32 %v10637_v29, %v10633_v48  ;;  %10003 = vmatmul.mubr.msk.bf16.vlgmr.msra.gmra.mxu0 %vm546_vm9, %v7436_v22 }
0x3e4c   :  { %10013 = vmatpush3.bf16.msra.mxu0 %v10384_v19  ;;  %10016 = vmatprep.mubr.msk.bf16.mxu0 %vm10805_vm0, %v10803_v13 }
0x3e4d   :  { %v7437_v17 = vpack.c.bf16 %v7435_v36, %v7435_v36  ;;  %10014 = vmatprep.subr.bf16.mxu0 %v10803_v13 }
0x3e4f   :  { %10009 = vmatmul.mubr.msk.bf16.vlgmr.msra.gmra.mxu1 %vm546_vm9, %v7437_v17 }
0x3e50   :  { %10021 = vmatpush3.bf16.msra.mxu1 %v10382_v26  ;;  %10024 = vmatprep.mubr.msk.bf16.mxu1 %vm10805_vm0, %v10803_v13 }
0x3e51   :  { %10022 = vmatprep.subr.bf16.mxu1 %v10803_v13  ;;  %10015 = vmatpush3.bf16.msra.mxu0 %v10385_v52 }
0x3e52   :  { %10028 = vmatprep.subr.bf16.mxu0 %v10803_v13 }
0x3e54   :  { %10023 = vmatpush3.bf16.msra.mxu1 %v10383_v11 }
0x3e55   :  { %10034 = vmatprep.subr.bf16.mxu1 %v10803_v13 }
0x3e57   :  { %10025 = vmatmul.mubr.msk.bf16.vlgmr.msra.gmra.mxu1 %vm449_vm5, %v7305_v3 }
0x3e58   :  { %10035 = vmatpush3.bf16.xpose.msra.mxu1 %v7707_v42  ;;  %10036 = vmatprep.mubr.msk.bf16.mxu1 %vm10805_vm0, %v10803_v13 }
0x3e59   :  { %10046 = vmatprep.subr.bf16.mxu1 %v10803_v13 }
0x3e5f   :  { %10037 = vmatmul.mubr.msk.bf16.vlgmr.msra.gmra.mxu1 %vm449_vm5, %v7700_v33 }
0x3e60   :  { %10048 = vmatprep.mubr.msk.bf16.mxu1 %vm10805_vm0, %v10803_v13 }
0x3f0b   :  { %v7481_v24 = vpop.f32.mrf.mxu0 }
0x3f0d   :  { %v10004_v49 = vpop.f32.mrf.mxu0 }
0x3f0f   :  { %v7484_v25 = vpop.f32.mrf.mxu0  ;;  %v7530_v3 = vpop.f32.mrf.mxu1 }
0x3f10   :  { %v7536_v62 = vpack.c.bf16 %v7530_v3, %v7481_v24 }
0x3f11   :  { %v10005_v0 = vpop.f32.mrf.mxu0  ;;  %v10010_v1 = vpop.f32.mrf.mxu1 }
0x3f12   :  { %10017 = vmatmul.mubr.msk.bf16.vlgmr.msra.gmra.mxu0 %vm449_vm5, %v7536_v62 }
0x3f13   :  { %10029 = vmatpush3.bf16.xpose.msra.mxu0 %v7657_v4  ;;  %v7533_v43 = vpop.f32.mrf.mxu1  ;;  %10030 = vmatprep.mubr.msk.bf16.mxu0 %vm10805_vm0, %v10803_v13 }
0x3f14   :  { %10040 = vmatprep.subr.bf16.mxu0 %v10803_v13 }
0x3f15   :  { %v10011_v50 = vpop.f32.mrf.mxu1 }
0x3f17   :  { %v12236_v51 = vpop.f32.mrf.mxu1 }
0x3f19   :  { %v10026_v28 = vpop.f32.mrf.mxu1 }
0x3f1a   :  { %10031 = vmatmul.mubr.msk.bf16.vlgmr.msra.gmra.mxu0 %vm449_vm5, %v7650_v9 }
0x3f1b   :  { %v12239_v5 = vpop.f32.mrf.mxu1  ;;  %10042 = vmatprep.mubr.msk.bf16.mxu0 %vm10805_vm0, %v10803_v13 }
0x3f1d   :  { %v10027_v63 = vpop.f32.mrf.mxu1 }
0x3f1f   :  { %v7743_v61 = vpop.f32.mrf.mxu1 }
0x3f20   :  { %v7750_v34 = vmul.f32 0.17677669, %v7743_v61 }
0x3f21   :  { %v10038_v15 = vpop.f32.mrf.mxu1 }
0x3f22   :  { %v7752_v21 = vadd.f32 %v7750_v34, %v10992_v45  ;;  %v10386_v15 = vld [vmem:[#allocation7 + $0x42c] ss:$40 sps:$4 sm:$0xff]  }
0x3f23   :  { %v7746_v57 = vpop.f32.mrf.mxu1 }
0x3f24   :  { %v7756_v20 = vsel %vm546_vm9, %v7752_v21, -inf }
0x3f25   :  { %7757 = vmax.xlane.f32.xlu1 %v7756_v20  ;;  %v10039_v12 = vpop.f32.mrf.mxu1 }
0x3f36   :  { %7825 = vrot.lane.b32.xlu1 %v12134_v40, %s10794_s16 }
0x3f3a   :  { %7934 = vrot.lane.b32.xlu1 %v12113_v16, %s10807_s29 }
0x3f3e   :  { %7984 = vrot.lane.b32.xlu1 %v12092_v32, %s10807_s29 }
0x3f42   :  { %7982 = vrot.lane.b32.xlu1 %v12142_v10, %s10807_s29 }
0x3fae   :  { %v7758_v58 = vpop.xlane.xlu1 %7757 }
0x3faf   :  { %v7760_v31 = vsub.f32 %v7752_v21, %v7758_v58  ;;  %v10387_v21 = vld [vmem:[#allocation7 + $0x3dc] ss:$40 sps:$4 sm:$0xff]  }
0x3fb1   :  { %v7763_v2 = vmul.f32 1.442695, %v7760_v31 }
0x3fb2   :  { %v7826_v48 = vpop.permute.xlu1 %7825 }
0x3fb3   :  { %v7831_v18 = vsel %vm574_vm6, %v7826_v48, 0  ;;  %10638 = vpow2.f32 %v7763_v2 }
0x3fb4   :  { %10047 = vmatpush3.bf16.msra.mxu1 %v7831_v18 }
0x3fb5   :  { %10060 = vmatprep.subr.bf16.mxu1 %v10803_v13 }
0x3fb6   :  { %v7935_v25 = vpop.permute.xlu1 %7934 }
0x3fb7   :  { %v7940_v62 = vsel %vm449_vm5, %v7935_v25, 0 }
0x3fba   :  { %v7985_v2 = vpop.permute.xlu1 %7984 }
0x3fc0   :  { %v10639_v36 = vpop.eup %10638 }
0x3fc1   :  { %v7768_v17 = vsel %vm546_vm9, %v10639_v36, 0.0 }
0x3fd2   :  { %v12255_v47 = vpop.f32.mrf.mxu0 }
0x3fd4   :  { %v10018_v14 = vpop.f32.mrf.mxu0 }
0x3fd6   :  { %v12257_v16 = vpop.f32.mrf.mxu0 }
0x3fd8   :  { %v10019_v7 = vpop.f32.mrf.mxu0 }
0x3fda   :  { %v7693_v32 = vpop.f32.mrf.mxu0 }
0x3fdb   :  { %v7749_v30 = vmul.f32 0.17677669, %v7693_v32 }
0x3fdc   :  { %v10032_v19 = vpop.f32.mrf.mxu0 }
0x3fdd   :  { %v7751_v10 = vadd.f32 %v7749_v30, %v10987_v39  ;;  %v7990_v30 = vsel %vm449_vm5, %v7985_v2, 0 }
0x3fde   :  { %v7696_v22 = vpop.f32.mrf.mxu0 }
0x3fdf   :  { %v7753_v29 = vsel %vm546_vm9, %v7751_v10, -inf }
0x3fe0   :  { %7754 = vmax.xlane.f32.xlu0 %v7753_v29  ;;  %v10033_v26 = vpop.f32.mrf.mxu0 }
0x3fe4   :  { %7769 = vadd.xlane.f32.xlu0 %v7768_v17 }
0x4069   :  { %v7755_v41 = vpop.xlane.xlu0 %7754 }
0x406a   :  { %v7759_v11 = vsub.f32 %v7751_v10, %v7755_v41  ;;  %v7983_v10 = vpop.permute.xlu1 %7982  ;;  %v7643_v41 = vadd.f32 %v12236_v51, %v12255_v47 }
0x406c   :  { %v7761_v56 = vmul.f32 1.442695, %v7759_v11 }
0x406d   :  { %v7770_v42 = vpop.xlane.xlu0 %7769 }
0x406e   :  { %10640 = vpow2.f32 %v7761_v56 }
0x406f   :  { %10642 = vrcp.f32 %v7770_v42 }
0x407b   :  { %v10641_v33 = vpop.eup %10640 }
0x407c   :  { %v10643_v52 = vpop.eup %10642  ;;  %v7765_v24 = vsel %vm546_vm9, %v10641_v33, 0.0 }
0x407d   :  { %v7774_v49 = vmul.f32 %v10643_v52, %v10639_v36  ;;  %7766 = vadd.xlane.f32.xlu0 %v7765_v24 }
0x407f   :  { %v7776_v3 = vpack.c.bf16 %v7774_v49, %v7774_v49 }
0x4081   :  { %10049 = vmatmul.mubr.msk.bf16.vlgmr.msra.gmra.mxu1 %vm546_vm9, %v7776_v3 }
0x4082   :  { %10061 = vmatpush3.bf16.xpose.msra.mxu1 %v7940_v62  ;;  %10062 = vmatprep.mubr.msk.bf16.mxu1 %vm10805_vm0, %v10803_v13 }
0x4083   :  { %10072 = vmatprep.subr.bf16.mxu1 %v10803_v13 }
0x4093   :  { %7777 = vrot.lane.b32.xlu0 %v12130_v6, %s10794_s16 }
0x4097   :  { %7932 = vrot.lane.b32.xlu0 %v12132_v38, %s10807_s29 }
0x4106   :  { %v7767_v0 = vpop.xlane.xlu0 %7766 }
0x4107   :  { %10644 = vrcp.f32 %v7767_v0 }
0x410a   :  { %v7778_v1 = vpop.permute.xlu0 %7777 }
0x410b   :  { %v7783_v4 = vsel %vm574_vm6, %v7778_v1, 0 }
0x410c   :  { %10041 = vmatpush3.bf16.msra.mxu0 %v7783_v4 }
0x410d   :  { %10052 = vmatprep.subr.bf16.mxu0 %v10803_v13 }
0x410e   :  { %v7933_v43 = vpop.permute.xlu0 %7932 }
0x410f   :  { %10063 = vmatmul.mubr.msk.bf16.vlgmr.msra.gmra.mxu1 %vm449_vm5, %v7933_v43 }
0x4110   :  { %10074 = vmatprep.mubr.msk.bf16.mxu1 %vm10805_vm0, %v10803_v13 }
0x4114   :  { %v10645_v50 = vpop.eup %10644 }
0x4115   :  { %v7773_v9 = vmul.f32 %v10645_v50, %v10641_v33  ;;  %v7646_v33 = vadd.f32 %v12239_v5, %v12257_v16 }
0x4117   :  { %v7775_v28 = vpack.c.bf16 %v7773_v9, %v7773_v9 }
0x4119   :  { %10043 = vmatmul.mubr.msk.bf16.vlgmr.msra.gmra.mxu0 %vm546_vm9, %v7775_v28 }
0x411a   :  { %10056 = vmatprep.mubr.msk.bf16.mxu0 %vm10805_vm0, %v10803_v13  ;;  %10053 = vmatpush3.bf16.msra.mxu0 %v10386_v15 }
0x411b   :  { %10054 = vmatprep.subr.bf16.mxu0 %v10803_v13 }
0x411e   :  { %10055 = vmatpush3.bf16.msra.mxu0 %v10387_v21 }
0x411f   :  { %10066 = vmatprep.subr.bf16.mxu0 %v10803_v13 }
0x4141   :  { %v7867_v38 = vpop.f32.mrf.mxu1 }
0x4143   :  { %v10050_v63 = vpop.f32.mrf.mxu1 }
0x4145   :  { %v7870_v61 = vpop.f32.mrf.mxu1 }
0x4147   :  { %v10051_v34 = vpop.f32.mrf.mxu1 }
0x41cf   :  { %v7976_v57 = vpop.f32.mrf.mxu1 }
0x41d0   :  { %v8032_v20 = vmul.f32 0.17677669, %v7976_v57 }
0x41d1   :  { %v10064_v12 = vpop.f32.mrf.mxu1 }
0x41d2   :  { %v8034_v58 = vadd.f32 %v8032_v20, %v10987_v39  ;;  %v10388_v20 = vld [vmem:[#allocation7 + $0x4cc] ss:$40 sps:$4 sm:$0xff]   ;;  %v10389_v12 = vld [vmem:[#allocation7 + $0x47c] ss:$40 sps:$4 sm:$0xff]  }
0x41d3   :  { %v7979_v48 = vpop.f32.mrf.mxu1 }
0x41d4   :  { %v8036_v18 = vsel %vm546_vm9, %v8034_v58, -inf }
0x41d5   :  { %8037 = vmax.xlane.f32.xlu0 %v8036_v18  ;;  %v10065_v31 = vpop.f32.mrf.mxu1 }
0x41d9   :  { %v7819_v14 = vpop.f32.mrf.mxu0 }
0x41da   :  { %v7873_v7 = vpack.c.bf16 %v7867_v38, %v7819_v14 }
0x41db   :  { %v10044_v32 = vpop.f32.mrf.mxu0 }
0x41dc   :  { %10057 = vmatmul.mubr.msk.bf16.vlgmr.msra.gmra.mxu0 %vm449_vm5, %v7873_v7 }
0x41dd   :  { %10067 = vmatpush3.bf16.xpose.msra.mxu0 %v7990_v30  ;;  %v7822_v19 = vpop.f32.mrf.mxu0  ;;  %10068 = vmatprep.mubr.msk.bf16.mxu0 %vm10805_vm0, %v10803_v13 }
0x41de   :  { %10078 = vmatprep.subr.bf16.mxu0 %v10803_v13 }
0x41df   :  { %v10045_v39 = vpop.f32.mrf.mxu0 }
0x41e4   :  { %10069 = vmatmul.mubr.msk.bf16.vlgmr.msra.gmra.mxu0 %vm449_vm5, %v7983_v10 }
0x41e5   :  { %10080 = vmatprep.mubr.msk.bf16.mxu0 %vm10805_vm0, %v10803_v13 }
0x425e   :  { %v8038_v22 = vpop.xlane.xlu0 %8037 }
0x425f   :  { %v8042_v29 = vsub.f32 %v8034_v58, %v8038_v22 }
0x4261   :  { %v8044_v36 = vmul.f32 1.442695, %v8042_v29 }
0x4263   :  { %10646 = vpow2.f32 %v8044_v36 }
0x4270   :  { %v10647_v26 = vpop.eup %10646 }
0x4271   :  { %v8048_v17 = vsel %vm546_vm9, %v10647_v26, 0.0 }
0x4272   :  { %8049 = vadd.xlane.f32.xlu0 %v8048_v17 }
0x429c   :  { %v7923_v11 = vpop.f32.mrf.mxu0 }
0x429d   :  { %v7930_v56 = vadd.f32 %v7923_v11, %v7643_v41 }
0x429e   :  { %v10058_v42 = vpop.f32.mrf.mxu0 }
0x42a0   :  { %v7926_v52 = vpop.f32.mrf.mxu0 }
0x42a1   :  { %v7931_v24 = vadd.f32 %v7926_v52, %v7646_v33 }
0x42a2   :  { %v10059_v49 = vpop.f32.mrf.mxu0 }
0x42a3   :  { %v10392_v49 = vld [vmem:[#allocation7 + $0x4d4] ss:$40 sps:$4 sm:$0xff]  }
0x42a4   :  { %v8026_v25 = vpop.f32.mrf.mxu0 }
0x42a5   :  { %v8033_v3 = vmul.f32 0.17677669, %v8026_v25  ;;  %v10390_v25 = vld [vmem:[#allocation7 + $0x4d0] ss:$40 sps:$4 sm:$0xff]  }
0x42a6   :  { %v10070_v62 = vpop.f32.mrf.mxu0 }
0x42a7   :  { %v8035_v0 = vadd.f32 %v8033_v3, %v10992_v45  ;;  %v10395_v3 = vld [vmem:[#allocation7 + $0x484] ss:$40 sps:$4 sm:$0xff]   ;;  %v10393_v62 = vld [vmem:[#allocation7 + $0x480] ss:$40 sps:$4 sm:$0xff]  }
0x42a8   :  { %v8029_v1 = vpop.f32.mrf.mxu0 }
0x42a9   :  { %v8039_v4 = vsel %vm546_vm9, %v8035_v0, -inf  ;;  %v10396_v1 = vld [vmem:[#allocation7 + $0x430] ss:$40 sps:$4 sm:$0xff]  }
0x42aa   :  { %8040 = vmax.xlane.f32.xlu1 %v8039_v4  ;;  %v10071_v43 = vpop.f32.mrf.mxu0  ;;  %v10401_v4 = vld [vmem:[#allocation7 + $0x3e4] ss:$40 sps:$4 sm:$0xff]  }
0x42ab   :  { %v10399_v43 = vld [vmem:[#allocation7 + $0x3e0] ss:$40 sps:$4 sm:$0xff]  }
0x42bb   :  { %8108 = vrot.lane.b32.xlu1 %v12134_v40, %s10807_s29 }
0x42fb   :  { %v8050_v45 = vpop.xlane.xlu0 %8049 }
0x4333   :  { %v8041_v51 = vpop.xlane.xlu1 %8040 }
0x4334   :  { %v8043_v47 = vsub.f32 %v8035_v0, %v8041_v51  ;;  %v10398_v0 = vld [vmem:[#allocation7 + $0x434] ss:$40 sps:$4 sm:$0xff]  }
0x4335   :  { %v10404_v51 = vld [vmem:[#allocation7 + $0x394] ss:$40 sps:$4 sm:$0xff]  }
0x4336   :  { %v8046_v50 = vmul.f32 1.442695, %v8043_v47  ;;  %v10402_v47 = vld [vmem:[#allocation7 + $0x390] ss:$40 sps:$4 sm:$0xff]  }
0x4337   :  { %v8109_v5 = vpop.permute.xlu1 %8108 }
0x4338   :  { %10648 = vpow2.f32 %v8046_v50  ;;  %v8114_v16 = vsel %vm574_vm6, %v8109_v5, 0  ;;  %v10407_v50 = vld [vmem:[#allocation7 + $0x344] ss:$40 sps:$4 sm:$0xff]   ;;  %v10405_v5 = vld [vmem:[#allocation7 + $0x340] ss:$40 sps:$4 sm:$0xff]  }
0x4339   :  { %10079 = vmatpush3.bf16.msra.mxu0 %v8114_v16  ;;  %10650 = vrcp.f32 %v8050_v45  ;;  %v10410_v16 = vld [vmem:[#allocation7 + $0x2f4] ss:$40 sps:$4 sm:$0xff]   ;;  %v10411_v45 = vld [vmem:[#allocation7 + $0x2a0] ss:$40 sps:$4 sm:$0xff]  }
0x433a   :  { %8376 = vmatprep.subr.bf16.mxu0 %v10392_v49 }
0x4345   :  { %v10649_v9 = vpop.eup %10648 }
0x4346   :  { %v8051_v28 = vsel %vm546_vm9, %v10649_v9, 0.0  ;;  %v10651_v38 = vpop.eup %10650 }
0x4347   :  { %8052 = vadd.xlane.f32.xlu0 %v8051_v28  ;;  %v8056_v40 = vmul.f32 %v10651_v38, %v10647_v26  ;;  %v10413_v28 = vld [vmem:[#allocation7 + $0x2a4] ss:$40 sps:$4 sm:$0xff]   ;;  %v10414_v38 = vld [vmem:[#allocation8 + $0xf8] sm:$0xff]  }
0x4349   :  { %v8058_v15 = vpack.c.bf16 %v8056_v40, %v8056_v40  ;;  %v10416_v40 = vld [vmem:[#allocation8 + $0xf0] sm:$0xff]  }
0x435d   :  { %8060 = vrot.lane.b32.xlu0 %v12130_v6, %s10807_s29 }
0x43d0   :  { %v8053_v63 = vpop.xlane.xlu0 %8052 }
0x43d1   :  { %10652 = vrcp.f32 %v8053_v63  ;;  %v10415_v63 = vld [vmem:[#allocation8 + $0xb8] sm:$0xff]  }
0x43d4   :  { %v8061_v61 = vpop.permute.xlu0 %8060 }
0x43d5   :  { %v8066_v34 = vsel %vm574_vm6, %v8061_v61, 0  ;;  %v10417_v61 = vld [vmem:[#allocation8 + $0xb0] sm:$0xff]  }
0x43d6   :  { %10073 = vmatpush3.bf16.msra.mxu1 %v8066_v34  ;;  %v10418_v34 = vld [vmem:[#allocation8 + $0xe8] sm:$0xff]  }
0x43d7   :  { %10084 = vmatprep.subr.bf16.mxu1 %v10803_v13 }
0x43d9   :  { %10075 = vmatmul.mubr.msk.bf16.vlgmr.msra.gmra.mxu1 %vm546_vm9, %v8058_v15  ;;  %v10419_v15 = vld [vmem:[#allocation8 + $0xa8] sm:$0xff]  }
0x43da   :  { %10088 = vmatprep.mubr.msk.bf16.mxu1 %vm10805_vm0, %v10803_v13  ;;  %10085 = vmatpush3.bf16.msra.mxu1 %v10388_v20  ;;  %v10423_v20 = vld [vmem:[#allocation8 + $0x98] sm:$0xff]  }
0x43db   :  { %10086 = vmatprep.subr.bf16.mxu1 %v10803_v13 }
0x43de   :  { %v10653_v21 = vpop.eup %10652  ;;  %10087 = vmatpush3.bf16.msra.mxu1 %v10389_v12 }
0x43df   :  { %v8057_v6 = vmul.f32 %v10653_v21, %v10649_v9  ;;  %v10408_v9 = vld [vmem:[#allocation7 + $0x2f0] ss:$40 sps:$4 sm:$0xff]   ;;  %9330 = vmatprep.subr.bf16.mxu1 %v10414_v38  ;;  %v10420_v21 = vld [vmem:[#allocation8 + $0xe0] sm:$0xff]  }
0x43e1   :  { %v8059_v57 = vpack.c.bf16 %v8057_v6, %v8057_v6  ;;  %v10421_v6 = vld [vmem:[#allocation8 + $0xa0] sm:$0xff]  }
0x43e3   :  { %10081 = vmatmul.mubr.msk.bf16.vlgmr.msra.gmra.mxu0 %vm546_vm9, %v8059_v57  ;;  %v10422_v57 = vld [vmem:[#allocation8 + $0xd8] sm:$0xff]  }
0x43e4   :  { %8408 = vmatprep.mubr.bf16.mxu0 %v10804_v27  ;;  %v12317_v27 = vld [vmem:[%s12369_s7 + $0x28] sm:$0x7f]  ;;  %8377 = vmatpush1.bf16.msra.mxu0 %v10390_v25 }
0x43e5   :  { %v8218_v13 = vrot.slane %v12317_v27, %v11156_v60  ;;  %8378 = vmatprep.subr.bf16.mxu0 %v10395_v3  ;;  %v10424_v3 = vld [vmem:[#allocation8 + $0xd0] sm:$0xff]  }
0x43e8   :  { %8379 = vmatpush1.bf16.msra.mxu0 %v10393_v62  ;;  %v10425_v62 = vld [vmem:[#allocation8 + $0x90] sm:$0xff]  }
0x43e9   :  { %8380 = vmatprep.subr.bf16.mxu0 %v10398_v0  ;;  %v10426_v0 = vld [vmem:[#allocation8 + $0xc8] sm:$0xff]  }
0x43ec   :  { %8381 = vmatpush1.bf16.msra.mxu0 %v10396_v1  ;;  %v10429_v1 = vld [vmem:[#allocation8 + $0x80] sm:$0xff]  }
0x43ed   :  { %8382 = vmatprep.subr.bf16.mxu0 %v10401_v4 }
0x43f0   :  { %8383 = vmatpush1.bf16.msra.mxu0 %v10399_v43 }
0x43f1   :  { %8384 = vmatprep.subr.bf16.mxu0 %v10404_v51 }
0x43f4   :  { %8385 = vmatpush1.bf16.msra.mxu0 %v10402_v47 }
0x43f5   :  { %8386 = vmatprep.subr.bf16.mxu0 %v10407_v50 }
0x43f8   :  { %8387 = vmatpush1.bf16.msra.mxu0 %v10405_v5 }
0x43f9   :  { %8388 = vmatprep.subr.bf16.mxu0 %v10410_v16 }
0x43fc   :  { %8389 = vmatpush1.bf16.msra.mxu0 %v10408_v9 }
0x43fd   :  { %8390 = vmatprep.subr.bf16.mxu0 %v10413_v28 }
0x4400   :  { %8391 = vmatpush1.bf16.msra.mxu0 %v10411_v45 }
0x4499   :  { %v8102_v58 = vpop.f32.mrf.mxu1 }
0x449b   :  { %v10076_v48 = vpop.f32.mrf.mxu1 }
0x449d   :  { %v8105_v18 = vpop.f32.mrf.mxu1 }
0x449f   :  { %v10077_v31 = vpop.f32.mrf.mxu1 }
0x44a3   :  { %v8150_v2 = vpop.f32.mrf.mxu0 }
0x44a4   :  { %v8156_v14 = vpack.c.bf16 %v8150_v2, %v8102_v58 }
0x44a5   :  { %v10082_v7 = vpop.f32.mrf.mxu0 }
0x44a6   :  { %10089 = vmatmul.mubr.msk.bf16.vlgmr.msra.gmra.mxu1 %vm449_vm5, %v8156_v14 }
0x44a7   :  { %v8153_v32 = vpop.f32.mrf.mxu0  ;;  %9331 = vmatpush3.bf16.msra.mxu1 %v10415_v63 }
0x44a8   :  { %9332 = vmatprep.subr.bf16.mxu1 %v10416_v40 }
0x44a9   :  { %v10083_v30 = vpop.f32.mrf.mxu0 }
0x44ab   :  { %9333 = vmatpush3.bf16.msra.mxu1 %v10417_v61 }
0x44ac   :  { %9334 = vmatprep.subr.bf16.mxu1 %v10418_v34 }
0x44af   :  { %9335 = vmatpush3.bf16.msra.mxu1 %v10419_v15 }
0x44b0   :  { %9336 = vmatprep.subr.bf16.mxu1 %v10420_v21 }
0x44b3   :  { %9337 = vmatpush3.bf16.msra.mxu1 %v10421_v6 }
0x44b4   :  { %9338 = vmatprep.subr.bf16.mxu1 %v10422_v57 }
0x44b7   :  { %9339 = vmatpush3.bf16.msra.mxu1 %v10423_v20 }
0x44b8   :  { %9340 = vmatprep.subr.bf16.mxu1 %v10424_v3 }
0x44bb   :  { %9341 = vmatpush3.bf16.msra.mxu1 %v10425_v62 }
0x44bc   :  { %9342 = vmatprep.subr.bf16.mxu1 %v10426_v0 }
0x4566   :  { %v8206_v19 = vpop.f32.mrf.mxu1 }
0x4567   :  { %v8213_v39 = vadd.f32 %v8206_v19, %v7930_v56 }
0x4568   :  { %v10090_v10 = vpop.f32.mrf.mxu1 }
0x4569   :  { %v8219_v22 = vadd.f32 %v8218_v13, %v8213_v39 }
0x456a   :  { %v8209_v29 = vpop.f32.mrf.mxu1 }
0x456b   :  { %v8214_v36 = vadd.f32 %v8209_v29, %v7931_v24  ;;  %v12322_v26 = vadd.f32 %v8219_v22, %v12079_v55 }
0x456c   :  { %v10091_v17 = vpop.f32.mrf.mxu1 }
0x456d   :  { %v8220_v41 = vadd.f32 %v8218_v13, %v8214_v36  ;;  %8223 = vadd.xlane.f32.xlu1 %v12322_v26  ;;  %v8262_v17 = vrot.slane %v12317_v27, %v10914_v54  ;;  %v10427_v54 = vld [vmem:[#allocation8 + $0x88] sm:$0xff]  }
0x456e   :  { %9343 = vmatpush3.bf16.msra.mxu1 %v10427_v54 }
0x456f   :  { %v12326_v11 = vadd.f32 %v8220_v41, %v12083_v37 }
0x4571   :  { %8225 = vadd.xlane.f32.xlu0 %v12326_v11 }
0x45f6   :  { %v8224_v42 = vpop.xlane.xlu1 %8223 }
0x45f7   :  { %v8227_v60 = vmul.f32 0.0078125, %v8224_v42 }
0x45f9   :  { %v12330_v56 = vsub.f32 %v12322_v26, %v8227_v60  ;;  %v8268_v60 = vrot.slane %v12317_v27, %v10925_v59  ;;  %v8295_v27 = vrot.slane %v12123_v23, %v11798_v8 }
0x45fa   :  { %v8226_v33 = vpop.xlane.xlu0 %8225 }
0x45fb   :  { %v8228_v52 = vmul.f32 0.0078125, %v8226_v33  ;;  %v8231_v55 = vmul.f32 %v12330_v56, %v12330_v56 }
0x45fd   :  { %v12335_v24 = vsub.f32 %v12326_v11, %v8228_v52  ;;  %8233 = vadd.xlane.f32.xlu0 %v8231_v55 }
0x45ff   :  { %v8232_v37 = vmul.f32 %v12335_v24, %v12335_v24 }
0x4601   :  { %8235 = vadd.xlane.f32.xlu1 %v8232_v37 }
0x4686   :  { %v8234_v12 = vpop.xlane.xlu0 %8233 }
0x4687   :  { %v8237_v58 = vmul.f32 0.007874016, %v8234_v12 }
0x4689   :  { %10654 = vrsqrt.f32 %v8237_v58  ;;  %vm8241_vm0 = vcmp.eq.f32.partialorder %v8237_v58, inf  ;;  %v8244_v14 = vand.u32 2147483648, %v8237_v58  ;;  %vm8243_vm5 = vcmp.eq.f32.partialorder %v8237_v58, 0.0 }
0x468a   :  { %v8236_v48 = vpop.xlane.xlu1 %8235 }
0x468b   :  { %v8238_v18 = vmul.f32 0.007874016, %v8236_v48 }
0x468d   :  { %10656 = vrsqrt.f32 %v8238_v18  ;;  %vm8248_vm6 = vcmp.eq.f32.partialorder %v8238_v18, inf  ;;  %v8251_v39 = vand.u32 2147483648, %v8238_v18  ;;  %vm8250_vm9 = vcmp.eq.f32.partialorder %v8238_v18, 0.0 }
0x4696   :  { %v10655_v31 = vpop.eup %10654 }
0x4697   :  { %v8240_v2 = vmul.f32 %v10655_v31, %v8237_v58 }
0x4699   :  { %v8242_v7 = vsel %vm8241_vm0, %v8237_v58, %v8240_v2 }
0x469a   :  { %v10657_v32 = vpop.eup %10656  ;;  %v8245_v30 = vsel %vm8243_vm5, %v8244_v14, %v8242_v7 }
0x469b   :  { %v8253_v13 = vadd.f32 1e-06, %v8245_v30  ;;  %v8247_v19 = vmul.f32 %v10657_v32, %v8238_v18 }
0x469d   :  { %10658 = vrcp.f32 %v8253_v13  ;;  %v8249_v10 = vsel %vm8248_vm6, %v8238_v18, %v8247_v19 }
0x469e   :  { %v8252_v22 = vsel %vm8250_vm9, %v8251_v39, %v8249_v10 }
0x469f   :  { %v8254_v29 = vadd.f32 1e-06, %v8252_v22 }
0x46a1   :  { %10660 = vrcp.f32 %v8254_v29 }
0x46aa   :  { %v10659_v36 = vpop.eup %10658 }
0x46ab   :  { %v8257_v41 = vmul.f32 %v10659_v36, %v12330_v56  ;;  %v10428_v56 = vld [vmem:[#allocation8 + $0xc0] sm:$0xff]  }
0x46ac   :  { %9344 = vmatprep.subr.bf16.mxu1 %v10428_v56 }
0x46ad   :  { %v8263_v52 = vmul.f32 %v8262_v17, %v8257_v41  ;;  %9345 = vmatpush3.bf16.msra.mxu1 %v10429_v1 }
0x46ae   :  { %v10661_v42 = vpop.eup %10660 }
0x46af   :  { %v8258_v33 = vmul.f32 %v10661_v42, %v12335_v24  ;;  %v8269_v37 = vadd.f32 %v8268_v60, %v8263_v52  ;;  %v10684_v24 = vld [vmem:[%s12369_s7 + $0x18] sm:$0x7f]  ;;  %s10808_s7 = smov [#allocation10]  }
0x46b0   :  { %v8291_v4 = vrot.slane %v10684_v24, %v11798_v8  ;;  %v8461_v34 = vrot.slane %v10684_v24, %v5163_v35  ;;  %s8648_s28 = sshll.u32 %s10808_s7, 4  ;;  %s8649_s28 = int_to_ptr.vmem [resolvable:$true] %s8648_s28 }
0x46b1   :  { %v8264_v55 = vmul.f32 %v8262_v17, %v8258_v33  ;;  %s10765_s3 = scalar_lea.vmem %s8649_s28, 256  ;;  %p10770_p7 = scmp.lt.s32.totalorder %s8649_s28, %s8649_s28 }
0x46b2   :  { %p10766_p6 = scmp.ne.s32.totalorder %s8649_s28, %s10765_s3  ;;  %p10771_p8 = scmp.lt.s32.totalorder %s10765_s3, %s10765_s3 }
0x46b3   :  { %v8270_v49 = vadd.f32 %v8268_v60, %v8264_v55 }
0x46b4   :  { %p10772_p9 = por %p10771_p8, %p10770_p7 }
0x46b5   :  { %v8287_v25 = vpack.c.bf16 %v8270_v49, %v8269_v37 }
0x46b6   :  { %p10773_p10 = pnand %p10772_p9, %p10766_p6 }
0x46b7   :  { %8409 = vmatmul.mubr.bf16.vlgmr.msra.gmra.mxu0 %v8287_v25 }
0x4777   :  { %v8410_v59 = vpop.f32.mrf.mxu0 }
0x4778   :  { %v8411_v5 = vadd.f32 %v8410_v59, %v8291_v4 }
0x4779   :  { %v8412_v43 = vpop.f32.mrf.mxu0 }
0x477a   :  { %v8413_v47 = vadd.f32 %v8412_v43, %v8295_v27  ;;  %v8419_v63 = vmax.f32 %v8411_v5, 0.0 }
0x477b   :  { %v8414_v51 = vpop.f32.mrf.mxu0 }
0x477c   :  { %v8415_v50 = vadd.f32 %v8414_v51, %v8291_v4  ;;  %v8420_v45 = vmax.f32 %v8413_v47, 0.0 }
0x477d   :  { %v8416_v16 = vpop.f32.mrf.mxu0 }
0x477e   :  { %v8417_v9 = vadd.f32 %v8416_v16, %v8295_v27  ;;  %v8421_v28 = vmax.f32 %v8415_v50, 0.0 }
0x4780   :  { %v8422_v38 = vmax.f32 %v8417_v9, 0.0  ;;  %v8456_v61 = vpack.c.bf16 %v8421_v28, %v8419_v63 }
0x4782   :  { %v8457_v40 = vpack.c.bf16 %v8422_v38, %v8420_v45 }
0x4784   :  { %8590 = vmatprep.mubr.bf16.mxu1 %v8457_v40 }
0x4785   :  { %8591 = vmatmul.mubr.bf16.vlgmr.msra.gmra.mxu1 %v8456_v61 }
0x4845   :  { %v9346_v23 = vpop.f32.mrf.mxu1 }
0x4847   :  { %v9347_v8 = vpop.f32.mrf.mxu1 }
0x4848   :  { %v9348_v15 = vadd.f32 %v9347_v8, %v9346_v23 }
0x4849   :  { %v9349_v21 = vpop.f32.mrf.mxu1 }
0x484a   :  { %v8593_v6 = vadd.f32 %v9348_v15, %v8461_v34 }
0x484b   :  { %v9350_v57 = vpop.f32.mrf.mxu1 }
0x484c   :  { %v9351_v20 = vadd.f32 %v9350_v57, %v9349_v21  ;;  %v8599_v12 = vadd.f32 %v8593_v6, %v12322_v26 }
0x484e   :  { %v8596_v58 = vadd.f32 %v9351_v20, %v8461_v34  ;;  %8601 = vadd.xlane.f32.xlu0 %v8599_v12 }
0x4850   :  { %v8600_v48 = vadd.f32 %v8596_v58, %v12326_v11 }
0x4852   :  { %8603 = vadd.xlane.f32.xlu1 %v8600_v48 }
0x48d7   :  { %v8602_v18 = vpop.xlane.xlu0 %8601 }
0x48d8   :  { %v8605_v31 = vmul.f32 0.0078125, %v8602_v18 }
0x48da   :  { %v8607_v2 = vsub.f32 %v8599_v12, %v8605_v31 }
0x48db   :  { %v8604_v14 = vpop.xlane.xlu1 %8603 }
0x48dc   :  { %v8606_v7 = vmul.f32 0.0078125, %v8604_v14  ;;  %v8609_v53 = vmul.f32 %v8607_v2, %v8607_v2 }
0x48de   :  { %v8608_v35 = vsub.f32 %v8600_v48, %v8606_v7  ;;  %8611 = vadd.xlane.f32.xlu0 %v8609_v53 }
0x48e0   :  { %v8610_v32 = vmul.f32 %v8608_v35, %v8608_v35 }
0x48e2   :  { %8613 = vadd.xlane.f32.xlu1 %v8610_v32 }
0x4967   :  { %v8612_v30 = vpop.xlane.xlu0 %8611 }
0x4968   :  { %v8615_v13 = vmul.f32 0.007874016, %v8612_v30 }
0x496a   :  { %10662 = vrsqrt.f32 %v8615_v13  ;;  %vm8619_vm1 = vcmp.eq.f32.partialorder %v8615_v13, inf  ;;  %v8622_v11 = vand.u32 2147483648, %v8615_v13  ;;  %vm8621_vm2 = vcmp.eq.f32.partialorder %v8615_v13, 0.0 }
0x496b   :  { %v8614_v19 = vpop.xlane.xlu1 %8613 }
0x496c   :  { %v8616_v26 = vmul.f32 0.007874016, %v8614_v19 }
0x496e   :  { %10664 = vrsqrt.f32 %v8616_v26  ;;  %vm8626_vm3 = vcmp.eq.f32.partialorder %v8616_v26, inf  ;;  %v8629_v42 = vand.u32 2147483648, %v8616_v26  ;;  %vm8628_vm4 = vcmp.eq.f32.partialorder %v8616_v26, 0.0 }
0x4977   :  { %v10663_v39 = vpop.eup %10662 }
0x4978   :  { %v8618_v10 = vmul.f32 %v10663_v39, %v8615_v13 }
0x497a   :  { %v8620_v22 = vsel %vm8619_vm1, %v8615_v13, %v8618_v10 }
0x497b   :  { %v10665_v29 = vpop.eup %10664  ;;  %v8623_v36 = vsel %vm8621_vm2, %v8622_v11, %v8620_v22 }
0x497c   :  { %v8631_v17 = vadd.f32 1e-06, %v8623_v36  ;;  %v8625_v41 = vmul.f32 %v10665_v29, %v8616_v26 }
0x497e   :  { %10666 = vrcp.f32 %v8631_v17  ;;  %v8627_v60 = vsel %vm8626_vm3, %v8616_v26, %v8625_v41 }
0x497f   :  { %v8630_v33 = vsel %vm8628_vm4, %v8629_v42, %v8627_v60 }
0x4980   :  { %v8632_v52 = vadd.f32 1e-06, %v8630_v33 }
0x4982   :  { %10668 = vrcp.f32 %v8632_v52 }
0x498b   :  { %v10667_v55 = vpop.eup %10666 }
0x498c   :  { %v8635_v37 = vmul.f32 %v10667_v55, %v8607_v2 }
0x498e   :  { %v8637_v49 = vmul.f32 %v8635_v37, %v11529_v44 }
0x498f   :  { %v10669_v25 = vpop.eup %10668 }
0x4990   :  { %v8636_v3 = vmul.f32 %v10669_v25, %v8608_v35  ;;  %v8639_v62 = vadd.f32 %v8637_v49, %v11534_v46 }
0x4992   :  { %v8638_v0 = vmul.f32 %v8636_v3, %v11529_v44  ;;  %8641 = vst [vmem:[#allocation10] sm:$0xff] %v8639_v62 }
0x4994   :  { %v8640_v54 = vadd.f32 %v8638_v0, %v11534_v46 }
0x4996   :  { %8642 = vst [vmem:[#allocation10 + $0x8] sm:$0xff] %v8640_v54 }
0x4997   :  { %10776 = shalt.err (!%p10773_p10)
}
0x4998   :  { %s10809_s6 = smov 128   ;;  %s10810_s30 = smov 8  }
0x4999   :  { %8654 = dma.vmem_to_hbm [thread:$0]  %s8649_s28, 256, %s12372_s10, [#allocation4], %s10809_s6, %s10809_s6, %s10810_s30  }
0x499a   :  { %10791 = dma.done.wait [#allocation4], 256  }
0x499b   :  { %10792 = vsyncadd [#allocation4], 4294967040 }
0x499c   :  { %8658 = vsyncpa [#allocation3], 1 }
0x499d   :  { %8659 = vsyncpa [#allocation6], 1 }
0x499e   :  { %8660 = vsyncpa [#allocation9], 1 }
0x499f   :  { %8661 = vsyncpa [#allocation4], 1 }

</bundles_post_ra>
